<compile_context>
chip_gen: v7x
topology: tpu7x:2x2x1
jax: 0.10.0
libtpu: 0.0.40
codegen_flags: <defaults>
</compile_context>

<pallas_src>
import functools

import jax
import jax.numpy as jnp
import numpy as np
from jax.experimental import pallas as pl
from jax.experimental.pallas import tpu as pltpu


def _round_up(a, b):
    return (a + b - 1) // b * b


def _ghostconv_kernel(H, W, Wp, tile_h, chunk_rows,
                      x_ref, w1_ref, b1_ref, w2_ref, b2_ref, o_ref, y_ref):
    # x_ref : (1, S_x, Cin)      zero-padded image, spatial flattened with row pitch Wp
    # w1_ref: (Cin, Cmid)        BN-folded 1x1 conv weight (cv1)        [bf16 or f32]
    # b1_ref: (1, Cmid)          BN-folded cv1 bias                     [f32]
    # w2_ref: (25, Cmid)         BN-folded 5x5 depthwise weight (kh*5+kw row-major) [f32]
    # b2_ref: (1, Cmid)          BN-folded cv2 bias                     [f32]
    # o_ref : (1, tile_h, W, C2) compact NHWC output rows (C2 = 2*Cmid, lane-dense)
    # y_ref : (L_in, Cmid) f32   VMEM scratch holding this step's cv1 output window
    r = pl.program_id(1)
    Cmid = w1_ref.shape[1]
    s_tile = tile_h * Wp
    L_in = (tile_h + 4) * Wp + 8                 # tile rows + 4 halo rows + kw headroom

    start = pl.multiple_of(r * s_tile, 8)        # sublane-aligned window start
    xs = x_ref[0, pl.ds(start, L_in), :]         # (L_in, Cin)

    # ---- cv1: 1x1 conv (+ folded BN) as a single MXU matmul, f32 accumulation ----
    y = jnp.dot(xs, w1_ref[...], preferred_element_type=jnp.float32)
    y = y + b1_ref[...]
    y = y * jax.nn.sigmoid(y)                    # SiLU (EUP), f32

    # cv2 zero-pads y: zero the cv1 values on the padding ring.  Mask is generated
    # in-kernel (no input): column test via one integer remainder on a sublane iota,
    # row test via two scalar bounds derived from the grid row index.
    pos = jax.lax.broadcasted_iota(jnp.int32, (L_in, 1), 0)
    col = pos % Wp
    col_ok = jnp.logical_and(col >= 2, col < W + 2)
    row_lo = (2 - r * tile_h) * Wp               # first interior position in this window
    row_hi = (H + 2 - r * tile_h) * Wp           # one past the last interior position
    row_ok = jnp.logical_and(pos >= row_lo, pos < row_hi)
    keep = jnp.logical_and(col_ok, row_ok).astype(jnp.float32)
    y = y * keep                                 # (L_in, 1) broadcast over Cmid lanes

    y_ref[...] = y                               # stage in VMEM; bounds vreg live ranges

    w2 = w2_ref[...]                             # (25, Cmid) f32
    b2 = b2_ref[...]

    # ---- cv2: 5x5 depthwise conv (+ folded BN), chunked over output rows ----
    c_pos = chunk_rows * Wp                      # output positions per chunk
    win = (chunk_rows + 4) * Wp                  # y positions a chunk's taps touch (per kw)
    for c in range(tile_h // chunk_rows):
        base = c * c_pos                         # static, multiple of 8
        yc = y_ref[pl.ds(base, win + 8), :]      # aligned load of this chunk's y window
        z = jnp.zeros((c_pos, Cmid), jnp.float32)
        for kw in range(5):
            ys = yc[kw:kw + win]                 # ONE shifted copy per column tap
            for kh in range(5):
                off = kh * Wp                    # sublane-aligned (Wp % 8 == 0)
                z = z + ys[off:off + c_pos] * w2[kh * 5 + kw][None, :]
        z = z + b2
        z = z * jax.nn.sigmoid(z)                # SiLU, f32

        # ghost concat [cv1(x), cv2(cv1(x))] -> lane-dense C2-wide rows
        y_int = y_ref[pl.ds(base + 2 * Wp + 2, c_pos), :]      # interior of cv1 output
        out = jnp.concatenate([y_int, z], axis=-1).astype(o_ref.dtype)
        for rr in range(chunk_rows):             # compact W-wide row stores (no post-slice)
            o_ref[0, c * chunk_rows + rr] = out[rr * Wp:rr * Wp + W]


def ghostconv_pallas(x_nhwc, w1, b1, w2, b2, *, tile_h=8, chunk_rows=None,
                     compute_dtype=jnp.bfloat16):
    """GhostConv forward (default k=1, s=1, g=1 configuration).

    x_nhwc: (N, H, W, c1) f32; w1: (c1, c_), b1: (c_,), w2: (25, c_), b2: (c_,) are the
    BN-folded parameters.  Returns (N, H, W, 2*c_) f32.
    """
    N, H, W, Cin = x_nhwc.shape
    Cmid = w1.shape[1]
    C2 = 2 * Cmid
    assert H % tile_h == 0, "H must be divisible by tile_h"
    if chunk_rows is None:
        chunk_rows = min(4, tile_h)
    assert tile_h % chunk_rows == 0

    Wp = _round_up(W + 4, 8)          # padded row pitch, sublane-aligned
    S_x = (H + 5) * Wp                # 2+2 halo rows + 1 slack row (>= 8 tail positions)
    L_in = (tile_h + 4) * Wp + 8

    # Single cast + pad (reshape is free).  Extra right/bottom zero padding beyond the
    # 2-wide conv halo is never read by any stored output position.
    x_flat = jnp.pad(x_nhwc.astype(compute_dtype),
                     ((0, 0), (2, 3), (2, Wp - W - 2), (0, 0))).reshape(N, S_x, Cin)

    w1c = w1.astype(compute_dtype)
    b1c = b1.reshape(1, Cmid).astype(jnp.float32)
    w2c = w2.astype(jnp.float32)
    b2c = b2.reshape(1, Cmid).astype(jnp.float32)

    # Explicit VMEM budget from the (lane/sublane padded) block sizes + scratch.
    def tile_bytes(shape, dtype):
        s = list(shape)
        s[-1] = _round_up(s[-1], 128)
        if len(s) >= 2:
            s[-2] = _round_up(s[-2], 8)
        return int(np.prod(s)) * jnp.dtype(dtype).itemsize

    vmem_est = (2 * (tile_bytes((1, S_x, Cin), compute_dtype)
                     + tile_bytes((1, tile_h, W, C2), jnp.float32)
                     + tile_bytes((Cin, Cmid), compute_dtype)
                     + 2 * tile_bytes((1, Cmid), jnp.float32)
                     + tile_bytes((25, Cmid), jnp.float32))
                + tile_bytes((L_in, Cmid), jnp.float32))
    vmem_limit = int(min(128 << 20, max(32 << 20, 2 * vmem_est + (8 << 20))))

    kernel = functools.partial(_ghostconv_kernel, H, W, Wp, tile_h, chunk_rows)

    return pl.pallas_call(
        kernel,
        out_shape=jax.ShapeDtypeStruct((N, H, W, C2), jnp.float32),
        grid_spec=pltpu.PrefetchScalarGridSpec(
            num_scalar_prefetch=0,
            grid=(N, H // tile_h),
            in_specs=[
                # padded image: resident across the row axis (DMA'd once per batch element)
                pl.BlockSpec((1, S_x, Cin), lambda n, r: (n, 0, 0)),
                pl.BlockSpec((Cin, Cmid), lambda n, r: (0, 0)),
                pl.BlockSpec((1, Cmid), lambda n, r: (0, 0)),
                pl.BlockSpec((25, Cmid), lambda n, r: (0, 0)),
                pl.BlockSpec((1, Cmid), lambda n, r: (0, 0)),
            ],
            out_specs=pl.BlockSpec((1, tile_h, W, C2), lambda n, r: (n, r, 0, 0)),
            scratch_shapes=[pltpu.VMEM((L_in, Cmid), jnp.float32)],
        ),
        compiler_params=pltpu.CompilerParams(
            dimension_semantics=("parallel", "parallel"),
            vmem_limit_bytes=vmem_limit),
    )(x_flat, w1c, b1c, w2c, b2c)


# ----------------------------- parameters / reference -----------------------------

def build_ghostconv_params(key, c1, c2):
    """Deterministic synthetic GhostConv parameters in PyTorch layouts."""
    c_ = c2 // 2
    ks = jax.random.split(key, 10)
    return {
        # cv1 = Conv(c1, c_, k=1): 1x1 conv (no bias) + BN + SiLU
        "w1": 0.1 * jax.random.normal(ks[0], (c_, c1, 1, 1), jnp.float32),  # OIHW
        "g1": 1.0 + 0.1 * jax.random.normal(ks[1], (c_,), jnp.float32),
        "b1": 0.1 * jax.random.normal(ks[2], (c_,), jnp.float32),
        "m1": 0.1 * jax.random.normal(ks[3], (c_,), jnp.float32),
        "v1": jnp.abs(jax.random.normal(ks[4], (c_,), jnp.float32)) + 0.5,
        # cv2 = Conv(c_, c_, k=5, g=c_): 5x5 depthwise conv (no bias) + BN + SiLU
        "w2": 0.1 * jax.random.normal(ks[5], (c_, 1, 5, 5), jnp.float32),   # OIHW
        "g2": 1.0 + 0.1 * jax.random.normal(ks[6], (c_,), jnp.float32),
        "b2": 0.1 * jax.random.normal(ks[7], (c_,), jnp.float32),
        "m2": 0.1 * jax.random.normal(ks[8], (c_,), jnp.float32),
        "v2": jnp.abs(jax.random.normal(ks[9], (c_,), jnp.float32)) + 0.5,
    }


def fuse_ghostconv_params(p, eps=1e-5):
    """Fold eval-mode BatchNorm (running stats) into the conv weights."""
    t1 = p["g1"] / jnp.sqrt(p["v1"] + eps)                          # (c_,)
    w1 = (p["w1"][:, :, 0, 0] * t1[:, None]).T                      # (c1, c_)
    b1 = p["b1"] - p["m1"] * t1                                     # (c_,)
    t2 = p["g2"] / jnp.sqrt(p["v2"] + eps)
    w2 = jnp.transpose(p["w2"][:, 0, :, :] * t2[:, None, None], (1, 2, 0))
    w2 = w2.reshape(25, -1)                                         # (25, c_), kh*5+kw
    b2 = p["b2"] - p["m2"] * t2
    return w1, b1, w2, b2


def ghostconv_reference(x_nhwc, p, eps=1e-5):
    """Pure-JAX NHWC reference with the BatchNorm math left unfused (eval mode)."""
    c_ = p["w1"].shape[0]
    w1_hwio = jnp.transpose(p["w1"], (2, 3, 1, 0))                  # (1,1,c1,c_)
    y = jax.lax.conv_general_dilated(
        x_nhwc, w1_hwio, (1, 1), ((0, 0), (0, 0)),
        dimension_numbers=("NHWC", "HWIO", "NHWC"),
        precision=jax.lax.Precision.HIGHEST)
    y = (y - p["m1"]) / jnp.sqrt(p["v1"] + eps) * p["g1"] + p["b1"]
    y = y * jax.nn.sigmoid(y)
    w2_hwio = jnp.transpose(p["w2"], (2, 3, 1, 0))                  # (5,5,1,c_)
    z = jax.lax.conv_general_dilated(
        y, w2_hwio, (1, 1), ((2, 2), (2, 2)),
        dimension_numbers=("NHWC", "HWIO", "NHWC"),
        feature_group_count=c_,
        precision=jax.lax.Precision.HIGHEST)
    z = (z - p["m2"]) / jnp.sqrt(p["v2"] + eps) * p["g2"] + p["b2"]
    z = z * jax.nn.sigmoid(z)
    return jnp.concatenate([y, z], axis=-1)


if __name__ == "__main__":
    key = jax.random.PRNGKey(0)
    kx, kp, kx2, kp2 = jax.random.split(key, 4)

    # Config 1: lane-friendly GhostConv c1=64 -> c2=128, 16x16 maps, batch 2
    # (grid = (2, 2) parallel steps -> >= 2x num_cores on dual-TC parts).
    N, H, W, C1, C2 = 2, 16, 16, 64, 128
    x = jax.random.normal(kx, (N, H, W, C1), jnp.float32)           # NHWC activations
    params = build_ghostconv_params(kp, C1, C2)
    w1, b1, w2, b2 = fuse_ghostconv_params(params)
    ref = jax.block_until_ready(ghostconv_reference(x, params))

    # f32 MXU path: tight check of the fused conv/BN/SiLU/concat math.
    out_f32 = jax.block_until_ready(
        ghostconv_pallas(x, w1, b1, w2, b2, tile_h=8, compute_dtype=jnp.float32))
    np.testing.assert_allclose(np.asarray(out_f32), np.asarray(ref),
                               rtol=1e-4, atol=1e-4)

    # bf16 MXU path (production configuration): looser tolerance.
    out_bf16 = jax.block_until_ready(
        ghostconv_pallas(x, w1, b1, w2, b2, tile_h=8, compute_dtype=jnp.bfloat16))
    np.testing.assert_allclose(np.asarray(out_bf16), np.asarray(ref),
                               rtol=3e-2, atol=3e-2)

    # Config 2: W not a multiple of 8 (exercises the rounded row pitch and the
    # partial-width row stores that replaced the old pitched-output slice).
    N2, H2, W2, C1b, C2b = 1, 8, 20, 32, 128
    x2 = jax.random.normal(kx2, (N2, H2, W2, C1b), jnp.float32)
    params2 = build_ghostconv_params(kp2, C1b, C2b)
    w1b, b1b, w2b, b2b = fuse_ghostconv_params(params2)
    ref2 = jax.block_until_ready(ghostconv_reference(x2, params2))
    out2 = jax.block_until_ready(
        ghostconv_pallas(x2, w1b, b1b, w2b, b2b, tile_h=4, compute_dtype=jnp.float32))
    np.testing.assert_allclose(np.asarray(out2), np.asarray(ref2),
                               rtol=1e-4, atol=1e-4)

    print("KERNEL_OK")
</pallas_src>

<mosaic_0001>
module attributes {stable_mosaic.version = 11 : i64} {
  func.func @_ghostconv_kernel(%arg0: i32, %arg1: i32, %arg2: memref<1x504x64xf32, #tpu.memory_space<vmem>>, %arg3: memref<64x64xf32, #tpu.memory_space<vmem>>, %arg4: memref<1x64xf32, #tpu.memory_space<vmem>>, %arg5: memref<25x64xf32, #tpu.memory_space<vmem>>, %arg6: memref<1x64xf32, #tpu.memory_space<vmem>>, %arg7: memref<1x8x16x128xf32, #tpu.memory_space<vmem>>, %arg8: memref<296x64xf32, #tpu.memory_space<vmem>>) attributes {dimension_semantics = [#tpu.dimension_semantics<parallel>, #tpu.dimension_semantics<parallel>], iteration_bounds = array<i64: 2, 2>, scalar_prefetch = 0 : i64, scratch_operands = 1 : i64, tpu.core_type = #tpu.core_type<tc>, window_params = [{transform_indices = @transform_0, window_bounds = array<i64: 1, 504, 64>}, {pipeline_mode = #tpu.pipeline_mode<synchronous>, transform_indices = @transform_1, window_bounds = array<i64: 64, 64>}, {pipeline_mode = #tpu.pipeline_mode<synchronous>, transform_indices = @transform_2, window_bounds = array<i64: 1, 64>}, {pipeline_mode = #tpu.pipeline_mode<synchronous>, transform_indices = @transform_3, window_bounds = array<i64: 25, 64>}, {pipeline_mode = #tpu.pipeline_mode<synchronous>, transform_indices = @transform_4, window_bounds = array<i64: 1, 64>}, {transform_indices = @transform_5, window_bounds = array<i64: 1, 8, 16, 128>}]} {
    %c192_i32 = arith.constant 192 : i32
    %0 = arith.muli %arg1, %c192_i32 : i32
    %1 = tpu.assume_multiple %0, 8 : i32
    %c0 = arith.constant 0 : index
    %2 = arith.index_cast %1 : i32 to index
    %c0_0 = arith.constant 0 : index
    %3 = vector.load %arg2[%c0, %2, %c0_0] : memref<1x504x64xf32, #tpu.memory_space<vmem>>, vector<1x296x64xf32>
    %4 = vector.shape_cast %3 : vector<1x296x64xf32> to vector<296x64xf32>
    %c0_1 = arith.constant 0 : index
    %c0_2 = arith.constant 0 : index
    %5 = vector.load %arg3[%c0_1, %c0_2] : memref<64x64xf32, #tpu.memory_space<vmem>>, vector<64x64xf32>
    %cst = arith.constant dense<0.000000e+00> : vector<296x64xf32>
    %6 = tpu.matmul %4, %5, %cst {dimension_numbers = #tpu.dot_dimension_numbers<[1], [0], [0], [1], [0, 0, 1, 1], [], []>} : vector<296x64xf32>, vector<64x64xf32>, vector<296x64xf32> -> vector<296x64xf32>
    %c0_3 = arith.constant 0 : index
    %c0_4 = arith.constant 0 : index
    %7 = vector.load %arg4[%c0_3, %c0_4] : memref<1x64xf32, #tpu.memory_space<vmem>>, vector<1x64xf32>
    %8 = vector.broadcast %7 : vector<1x64xf32> to vector<296x64xf32>
    %9 = arith.addf %6, %8 : vector<296x64xf32>
    %10 = arith.negf %9 : vector<296x64xf32>
    %11 = math.exp %10 : vector<296x64xf32>
    %cst_5 = arith.constant 1.000000e+00 : f32
    %12 = vector.broadcast %cst_5 : f32 to vector<296x64xf32>
    %13 = arith.addf %12, %11 : vector<296x64xf32>
    %14 = arith.divf %12, %13 : vector<296x64xf32>
    %15 = arith.mulf %9, %14 : vector<296x64xf32>
    %16 = tpu.iota {dimensions = array<i32: 0>} : vector<296x1xi32>
    %c24_i32 = arith.constant 24 : i32
    %c0_i32 = arith.constant 0 : i32
    %17 = arith.cmpi eq, %c24_i32, %c0_i32 : i32
    %c1_i32 = arith.constant 1 : i32
    %18 = arith.select %17, %c1_i32, %c24_i32 : i32
    %19 = vector.broadcast %18 : i32 to vector<296x1xi32>
    %20 = arith.remsi %16, %19 : vector<296x1xi32>
    %c0_i32_6 = arith.constant 0 : i32
    %21 = vector.broadcast %c0_i32_6 : i32 to vector<296x1xi32>
    %22 = arith.cmpi ne, %20, %21 : vector<296x1xi32>
    %c0_i32_7 = arith.constant 0 : i32
    %23 = vector.broadcast %c0_i32_7 : i32 to vector<296x1xi32>
    %24 = arith.cmpi slt, %20, %23 : vector<296x1xi32>
    %c0_i32_8 = arith.constant 0 : i32
    %25 = arith.cmpi slt, %18, %c0_i32_8 : i32
    %26 = vector.broadcast %25 : i1 to vector<296x1xi1>
    %27 = vector.broadcast %26 : vector<296x1xi1> to vector<296x1xi1>
    %28 = arith.xori %24, %27 : vector<296x1xi1>
    %29 = arith.andi %28, %22 : vector<296x1xi1>
    %30 = vector.broadcast %18 : i32 to vector<296x1xi32>
    %31 = arith.addi %20, %30 : vector<296x1xi32>
    %32 = arith.select %29, %31, %20 : vector<296x1xi1>, vector<296x1xi32>
    %c2_i32 = arith.constant 2 : i32
    %33 = vector.broadcast %c2_i32 : i32 to vector<296x1xi32>
    %34 = arith.cmpi sge, %32, %33 : vector<296x1xi32>
    %c18_i32 = arith.constant 18 : i32
    %35 = vector.broadcast %c18_i32 : i32 to vector<296x1xi32>
    %36 = arith.cmpi slt, %32, %35 : vector<296x1xi32>
    %37 = arith.andi %34, %36 : vector<296x1xi1>
    %c8_i32 = arith.constant 8 : i32
    %38 = arith.muli %arg1, %c8_i32 : i32
    %c2_i32_9 = arith.constant 2 : i32
    %39 = arith.subi %c2_i32_9, %38 : i32
    %c24_i32_10 = arith.constant 24 : i32
    %40 = arith.muli %39, %c24_i32_10 : i32
    %c8_i32_11 = arith.constant 8 : i32
    %41 = arith.muli %arg1, %c8_i32_11 : i32
    %c18_i32_12 = arith.constant 18 : i32
    %42 = arith.subi %c18_i32_12, %41 : i32
    %c24_i32_13 = arith.constant 24 : i32
    %43 = arith.muli %42, %c24_i32_13 : i32
    %44 = vector.broadcast %40 : i32 to vector<296x1xi32>
    %45 = arith.cmpi sge, %16, %44 : vector<296x1xi32>
    %46 = vector.broadcast %43 : i32 to vector<296x1xi32>
    %47 = arith.cmpi slt, %16, %46 : vector<296x1xi32>
    %48 = arith.andi %45, %47 : vector<296x1xi1>
    %49 = arith.andi %37, %48 : vector<296x1xi1>
    %50 = arith.extui %49 : vector<296x1xi1> to vector<296x1xi32>
    %51 = arith.sitofp %50 : vector<296x1xi32> to vector<296x1xf32>
    %52 = vector.broadcast %51 : vector<296x1xf32> to vector<296x64xf32>
    %53 = arith.mulf %15, %52 : vector<296x64xf32>
    %c0_14 = arith.constant 0 : index
    %c0_15 = arith.constant 0 : index
    %54 = vector.load %arg8[%c0_14, %c0_15] : memref<296x64xf32, #tpu.memory_space<vmem>>, vector<296x64xf32>
    tpu.vector_store %arg8[%c0_14, %c0_15], %53 {strides = array<i32>} : memref<296x64xf32, #tpu.memory_space<vmem>>, vector<296x64xf32>,
    %c0_16 = arith.constant 0 : index
    %c0_17 = arith.constant 0 : index
    %55 = vector.load %arg5[%c0_16, %c0_17] : memref<25x64xf32, #tpu.memory_space<vmem>>, vector<25x64xf32>
    %c0_18 = arith.constant 0 : index
    %c0_19 = arith.constant 0 : index
    %56 = vector.load %arg6[%c0_18, %c0_19] : memref<1x64xf32, #tpu.memory_space<vmem>>, vector<1x64xf32>
    %c0_20 = arith.constant 0 : index
    %c0_21 = arith.constant 0 : index
    %57 = vector.load %arg8[%c0_20, %c0_21] : memref<296x64xf32, #tpu.memory_space<vmem>>, vector<200x64xf32>
    %cst_22 = arith.constant 0.000000e+00 : f32
    %58 = vector.broadcast %cst_22 : f32 to vector<96x64xf32>
    %59 = vector.extract_strided_slice %57 {offsets = [0, 0], sizes = [192, 64], strides = [1, 1]} : vector<200x64xf32> to vector<192x64xf32>
    %60 = vector.extract_strided_slice %59 {offsets = [0, 0], sizes = [96, 64], strides = [1, 1]} : vector<192x64xf32> to vector<96x64xf32>
    %61 = vector.extract_strided_slice %55 {offsets = [0, 0], sizes = [1, 64], strides = [1, 1]} : vector<25x64xf32> to vector<1x64xf32>
    %62 = vector.shape_cast %61 : vector<1x64xf32> to vector<64xf32>
    %63 = vector.shape_cast %62 : vector<64xf32> to vector<1x64xf32>
    %64 = vector.broadcast %63 : vector<1x64xf32> to vector<96x64xf32>
    %65 = arith.mulf %60, %64 : vector<96x64xf32>
    %66 = arith.addf %58, %65 : vector<96x64xf32>
    %67 = vector.extract_strided_slice %59 {offsets = [24, 0], sizes = [96, 64], strides = [1, 1]} : vector<192x64xf32> to vector<96x64xf32>
    %68 = vector.extract_strided_slice %55 {offsets = [5, 0], sizes = [1, 64], strides = [1, 1]} : vector<25x64xf32> to vector<1x64xf32>
    %69 = vector.shape_cast %68 : vector<1x64xf32> to vector<64xf32>
    %70 = vector.shape_cast %69 : vector<64xf32> to vector<1x64xf32>
    %71 = vector.broadcast %70 : vector<1x64xf32> to vector<96x64xf32>
    %72 = arith.mulf %67, %71 : vector<96x64xf32>
    %73 = arith.addf %66, %72 : vector<96x64xf32>
    %74 = vector.extract_strided_slice %59 {offsets = [48, 0], sizes = [96, 64], strides = [1, 1]} : vector<192x64xf32> to vector<96x64xf32>
    %75 = vector.extract_strided_slice %55 {offsets = [10, 0], sizes = [1, 64], strides = [1, 1]} : vector<25x64xf32> to vector<1x64xf32>
    %76 = vector.shape_cast %75 : vector<1x64xf32> to vector<64xf32>
    %77 = vector.shape_cast %76 : vector<64xf32> to vector<1x64xf32>
    %78 = vector.broadcast %77 : vector<1x64xf32> to vector<96x64xf32>
    %79 = arith.mulf %74, %78 : vector<96x64xf32>
    %80 = arith.addf %73, %79 : vector<96x64xf32>
    %81 = vector.extract_strided_slice %59 {offsets = [72, 0], sizes = [96, 64], strides = [1, 1]} : vector<192x64xf32> to vector<96x64xf32>
    %82 = vector.extract_strided_slice %55 {offsets = [15, 0], sizes = [1, 64], strides = [1, 1]} : vector<25x64xf32> to vector<1x64xf32>
    %83 = vector.shape_cast %82 : vector<1x64xf32> to vector<64xf32>
    %84 = vector.shape_cast %83 : vector<64xf32> to vector<1x64xf32>
    %85 = vector.broadcast %84 : vector<1x64xf32> to vector<96x64xf32>
    %86 = arith.mulf %81, %85 : vector<96x64xf32>
    %87 = arith.addf %80, %86 : vector<96x64xf32>
    %88 = vector.extract_strided_slice %59 {offsets = [96, 0], sizes = [96, 64], strides = [1, 1]} : vector<192x64xf32> to vector<96x64xf32>
    %89 = vector.extract_strided_slice %55 {offsets = [20, 0], sizes = [1, 64], strides = [1, 1]} : vector<25x64xf32> to vector<1x64xf32>
    %90 = vector.shape_cast %89 : vector<1x64xf32> to vector<64xf32>
    %91 = vector.shape_cast %90 : vector<64xf32> to vector<1x64xf32>
    %92 = vector.broadcast %91 : vector<1x64xf32> to vector<96x64xf32>
    %93 = arith.mulf %88, %92 : vector<96x64xf32>
    %94 = arith.addf %87, %93 : vector<96x64xf32>
    %95 = vector.extract_strided_slice %57 {offsets = [1, 0], sizes = [192, 64], strides = [1, 1]} : vector<200x64xf32> to vector<192x64xf32>
    %96 = vector.extract_strided_slice %95 {offsets = [0, 0], sizes = [96, 64], strides = [1, 1]} : vector<192x64xf32> to vector<96x64xf32>
    %97 = vector.extract_strided_slice %55 {offsets = [1, 0], sizes = [1, 64], strides = [1, 1]} : vector<25x64xf32> to vector<1x64xf32>
    %98 = vector.shape_cast %97 : vector<1x64xf32> to vector<64xf32>
    %99 = vector.shape_cast %98 : vector<64xf32> to vector<1x64xf32>
    %100 = vector.broadcast %99 : vector<1x64xf32> to vector<96x64xf32>
    %101 = arith.mulf %96, %100 : vector<96x64xf32>
    %102 = arith.addf %94, %101 : vector<96x64xf32>
    %103 = vector.extract_strided_slice %95 {offsets = [24, 0], sizes = [96, 64], strides = [1, 1]} : vector<192x64xf32> to vector<96x64xf32>
    %104 = vector.extract_strided_slice %55 {offsets = [6, 0], sizes = [1, 64], strides = [1, 1]} : vector<25x64xf32> to vector<1x64xf32>
    %105 = vector.shape_cast %104 : vector<1x64xf32> to vector<64xf32>
    %106 = vector.shape_cast %105 : vector<64xf32> to vector<1x64xf32>
    %107 = vector.broadcast %106 : vector<1x64xf32> to vector<96x64xf32>
    %108 = arith.mulf %103, %107 : vector<96x64xf32>
    %109 = arith.addf %102, %108 : vector<96x64xf32>
    %110 = vector.extract_strided_slice %95 {offsets = [48, 0], sizes = [96, 64], strides = [1, 1]} : vector<192x64xf32> to vector<96x64xf32>
    %111 = vector.extract_strided_slice %55 {offsets = [11, 0], sizes = [1, 64], strides = [1, 1]} : vector<25x64xf32> to vector<1x64xf32>
    %112 = vector.shape_cast %111 : vector<1x64xf32> to vector<64xf32>
    %113 = vector.shape_cast %112 : vector<64xf32> to vector<1x64xf32>
    %114 = vector.broadcast %113 : vector<1x64xf32> to vector<96x64xf32>
    %115 = arith.mulf %110, %114 : vector<96x64xf32>
    %116 = arith.addf %109, %115 : vector<96x64xf32>
    %117 = vector.extract_strided_slice %95 {offsets = [72, 0], sizes = [96, 64], strides = [1, 1]} : vector<192x64xf32> to vector<96x64xf32>
    %118 = vector.extract_strided_slice %55 {offsets = [16, 0], sizes = [1, 64], strides = [1, 1]} : vector<25x64xf32> to vector<1x64xf32>
    %119 = vector.shape_cast %118 : vector<1x64xf32> to vector<64xf32>
    %120 = vector.shape_cast %119 : vector<64xf32> to vector<1x64xf32>
    %121 = vector.broadcast %120 : vector<1x64xf32> to vector<96x64xf32>
    %122 = arith.mulf %117, %121 : vector<96x64xf32>
    %123 = arith.addf %116, %122 : vector<96x64xf32>
    %124 = vector.extract_strided_slice %95 {offsets = [96, 0], sizes = [96, 64], strides = [1, 1]} : vector<192x64xf32> to vector<96x64xf32>
    %125 = vector.extract_strided_slice %55 {offsets = [21, 0], sizes = [1, 64], strides = [1, 1]} : vector<25x64xf32> to vector<1x64xf32>
    %126 = vector.shape_cast %125 : vector<1x64xf32> to vector<64xf32>
    %127 = vector.shape_cast %126 : vector<64xf32> to vector<1x64xf32>
    %128 = vector.broadcast %127 : vector<1x64xf32> to vector<96x64xf32>
    %129 = arith.mulf %124, %128 : vector<96x64xf32>
    %130 = arith.addf %123, %129 : vector<96x64xf32>
    %131 = vector.extract_strided_slice %57 {offsets = [2, 0], sizes = [192, 64], strides = [1, 1]} : vector<200x64xf32> to vector<192x64xf32>
    %132 = vector.extract_strided_slice %131 {offsets = [0, 0], sizes = [96, 64], strides = [1, 1]} : vector<192x64xf32> to vector<96x64xf32>
    %133 = vector.extract_strided_slice %55 {offsets = [2, 0], sizes = [1, 64], strides = [1, 1]} : vector<25x64xf32> to vector<1x64xf32>
    %134 = vector.shape_cast %133 : vector<1x64xf32> to vector<64xf32>
    %135 = vector.shape_cast %134 : vector<64xf32> to vector<1x64xf32>
    %136 = vector.broadcast %135 : vector<1x64xf32> to vector<96x64xf32>
    %137 = arith.mulf %132, %136 : vector<96x64xf32>
    %138 = arith.addf %130, %137 : vector<96x64xf32>
    %139 = vector.extract_strided_slice %131 {offsets = [24, 0], sizes = [96, 64], strides = [1, 1]} : vector<192x64xf32> to vector<96x64xf32>
    %140 = vector.extract_strided_slice %55 {offsets = [7, 0], sizes = [1, 64], strides = [1, 1]} : vector<25x64xf32> to vector<1x64xf32>
    %141 = vector.shape_cast %140 : vector<1x64xf32> to vector<64xf32>
    %142 = vector.shape_cast %141 : vector<64xf32> to vector<1x64xf32>
    %143 = vector.broadcast %142 : vector<1x64xf32> to vector<96x64xf32>
    %144 = arith.mulf %139, %143 : vector<96x64xf32>
    %145 = arith.addf %138, %144 : vector<96x64xf32>
    %146 = vector.extract_strided_slice %131 {offsets = [48, 0], sizes = [96, 64], strides = [1, 1]} : vector<192x64xf32> to vector<96x64xf32>
    %147 = vector.extract_strided_slice %55 {offsets = [12, 0], sizes = [1, 64], strides = [1, 1]} : vector<25x64xf32> to vector<1x64xf32>
    %148 = vector.shape_cast %147 : vector<1x64xf32> to vector<64xf32>
    %149 = vector.shape_cast %148 : vector<64xf32> to vector<1x64xf32>
    %150 = vector.broadcast %149 : vector<1x64xf32> to vector<96x64xf32>
    %151 = arith.mulf %146, %150 : vector<96x64xf32>
    %152 = arith.addf %145, %151 : vector<96x64xf32>
    %153 = vector.extract_strided_slice %131 {offsets = [72, 0], sizes = [96, 64], strides = [1, 1]} : vector<192x64xf32> to vector<96x64xf32>
    %154 = vector.extract_strided_slice %55 {offsets = [17, 0], sizes = [1, 64], strides = [1, 1]} : vector<25x64xf32> to vector<1x64xf32>
    %155 = vector.shape_cast %154 : vector<1x64xf32> to vector<64xf32>
    %156 = vector.shape_cast %155 : vector<64xf32> to vector<1x64xf32>
    %157 = vector.broadcast %156 : vector<1x64xf32> to vector<96x64xf32>
    %158 = arith.mulf %153, %157 : vector<96x64xf32>
    %159 = arith.addf %152, %158 : vector<96x64xf32>
    %160 = vector.extract_strided_slice %131 {offsets = [96, 0], sizes = [96, 64], strides = [1, 1]} : vector<192x64xf32> to vector<96x64xf32>
    %161 = vector.extract_strided_slice %55 {offsets = [22, 0], sizes = [1, 64], strides = [1, 1]} : vector<25x64xf32> to vector<1x64xf32>
    %162 = vector.shape_cast %161 : vector<1x64xf32> to vector<64xf32>
    %163 = vector.shape_cast %162 : vector<64xf32> to vector<1x64xf32>
    %164 = vector.broadcast %163 : vector<1x64xf32> to vector<96x64xf32>
    %165 = arith.mulf %160, %164 : vector<96x64xf32>
    %166 = arith.addf %159, %165 : vector<96x64xf32>
    %167 = vector.extract_strided_slice %57 {offsets = [3, 0], sizes = [192, 64], strides = [1, 1]} : vector<200x64xf32> to vector<192x64xf32>
    %168 = vector.extract_strided_slice %167 {offsets = [0, 0], sizes = [96, 64], strides = [1, 1]} : vector<192x64xf32> to vector<96x64xf32>
    %169 = vector.extract_strided_slice %55 {offsets = [3, 0], sizes = [1, 64], strides = [1, 1]} : vector<25x64xf32> to vector<1x64xf32>
    %170 = vector.shape_cast %169 : vector<1x64xf32> to vector<64xf32>
    %171 = vector.shape_cast %170 : vector<64xf32> to vector<1x64xf32>
    %172 = vector.broadcast %171 : vector<1x64xf32> to vector<96x64xf32>
    %173 = arith.mulf %168, %172 : vector<96x64xf32>
    %174 = arith.addf %166, %173 : vector<96x64xf32>
    %175 = vector.extract_strided_slice %167 {offsets = [24, 0], sizes = [96, 64], strides = [1, 1]} : vector<192x64xf32> to vector<96x64xf32>
    %176 = vector.extract_strided_slice %55 {offsets = [8, 0], sizes = [1, 64], strides = [1, 1]} : vector<25x64xf32> to vector<1x64xf32>
    %177 = vector.shape_cast %176 : vector<1x64xf32> to vector<64xf32>
    %178 = vector.shape_cast %177 : vector<64xf32> to vector<1x64xf32>
    %179 = vector.broadcast %178 : vector<1x64xf32> to vector<96x64xf32>
    %180 = arith.mulf %175, %179 : vector<96x64xf32>
    %181 = arith.addf %174, %180 : vector<96x64xf32>
    %182 = vector.extract_strided_slice %167 {offsets = [48, 0], sizes = [96, 64], strides = [1, 1]} : vector<192x64xf32> to vector<96x64xf32>
    %183 = vector.extract_strided_slice %55 {offsets = [13, 0], sizes = [1, 64], strides = [1, 1]} : vector<25x64xf32> to vector<1x64xf32>
    %184 = vector.shape_cast %183 : vector<1x64xf32> to vector<64xf32>
    %185 = vector.shape_cast %184 : vector<64xf32> to vector<1x64xf32>
    %186 = vector.broadcast %185 : vector<1x64xf32> to vector<96x64xf32>
    %187 = arith.mulf %182, %186 : vector<96x64xf32>
    %188 = arith.addf %181, %187 : vector<96x64xf32>
    %189 = vector.extract_strided_slice %167 {offsets = [72, 0], sizes = [96, 64], strides = [1, 1]} : vector<192x64xf32> to vector<96x64xf32>
    %190 = vector.extract_strided_slice %55 {offsets = [18, 0], sizes = [1, 64], strides = [1, 1]} : vector<25x64xf32> to vector<1x64xf32>
    %191 = vector.shape_cast %190 : vector<1x64xf32> to vector<64xf32>
    %192 = vector.shape_cast %191 : vector<64xf32> to vector<1x64xf32>
    %193 = vector.broadcast %192 : vector<1x64xf32> to vector<96x64xf32>
    %194 = arith.mulf %189, %193 : vector<96x64xf32>
    %195 = arith.addf %188, %194 : vector<96x64xf32>
    %196 = vector.extract_strided_slice %167 {offsets = [96, 0], sizes = [96, 64], strides = [1, 1]} : vector<192x64xf32> to vector<96x64xf32>
    %197 = vector.extract_strided_slice %55 {offsets = [23, 0], sizes = [1, 64], strides = [1, 1]} : vector<25x64xf32> to vector<1x64xf32>
    %198 = vector.shape_cast %197 : vector<1x64xf32> to vector<64xf32>
    %199 = vector.shape_cast %198 : vector<64xf32> to vector<1x64xf32>
    %200 = vector.broadcast %199 : vector<1x64xf32> to vector<96x64xf32>
    %201 = arith.mulf %196, %200 : vector<96x64xf32>
    %202 = arith.addf %195, %201 : vector<96x64xf32>
    %203 = vector.extract_strided_slice %57 {offsets = [4, 0], sizes = [192, 64], strides = [1, 1]} : vector<200x64xf32> to vector<192x64xf32>
    %204 = vector.extract_strided_slice %203 {offsets = [0, 0], sizes = [96, 64], strides = [1, 1]} : vector<192x64xf32> to vector<96x64xf32>
    %205 = vector.extract_strided_slice %55 {offsets = [4, 0], sizes = [1, 64], strides = [1, 1]} : vector<25x64xf32> to vector<1x64xf32>
    %206 = vector.shape_cast %205 : vector<1x64xf32> to vector<64xf32>
    %207 = vector.shape_cast %206 : vector<64xf32> to vector<1x64xf32>
    %208 = vector.broadcast %207 : vector<1x64xf32> to vector<96x64xf32>
    %209 = arith.mulf %204, %208 : vector<96x64xf32>
    %210 = arith.addf %202, %209 : vector<96x64xf32>
    %211 = vector.extract_strided_slice %203 {offsets = [24, 0], sizes = [96, 64], strides = [1, 1]} : vector<192x64xf32> to vector<96x64xf32>
    %212 = vector.extract_strided_slice %55 {offsets = [9, 0], sizes = [1, 64], strides = [1, 1]} : vector<25x64xf32> to vector<1x64xf32>
    %213 = vector.shape_cast %212 : vector<1x64xf32> to vector<64xf32>
    %214 = vector.shape_cast %213 : vector<64xf32> to vector<1x64xf32>
    %215 = vector.broadcast %214 : vector<1x64xf32> to vector<96x64xf32>
    %216 = arith.mulf %211, %215 : vector<96x64xf32>
    %217 = arith.addf %210, %216 : vector<96x64xf32>
    %218 = vector.extract_strided_slice %203 {offsets = [48, 0], sizes = [96, 64], strides = [1, 1]} : vector<192x64xf32> to vector<96x64xf32>
    %219 = vector.extract_strided_slice %55 {offsets = [14, 0], sizes = [1, 64], strides = [1, 1]} : vector<25x64xf32> to vector<1x64xf32>
    %220 = vector.shape_cast %219 : vector<1x64xf32> to vector<64xf32>
    %221 = vector.shape_cast %220 : vector<64xf32> to vector<1x64xf32>
    %222 = vector.broadcast %221 : vector<1x64xf32> to vector<96x64xf32>
    %223 = arith.mulf %218, %222 : vector<96x64xf32>
    %224 = arith.addf %217, %223 : vector<96x64xf32>
    %225 = vector.extract_strided_slice %203 {offsets = [72, 0], sizes = [96, 64], strides = [1, 1]} : vector<192x64xf32> to vector<96x64xf32>
    %226 = vector.extract_strided_slice %55 {offsets = [19, 0], sizes = [1, 64], strides = [1, 1]} : vector<25x64xf32> to vector<1x64xf32>
    %227 = vector.shape_cast %226 : vector<1x64xf32> to vector<64xf32>
    %228 = vector.shape_cast %227 : vector<64xf32> to vector<1x64xf32>
    %229 = vector.broadcast %228 : vector<1x64xf32> to vector<96x64xf32>
    %230 = arith.mulf %225, %229 : vector<96x64xf32>
    %231 = arith.addf %224, %230 : vector<96x64xf32>
    %232 = vector.extract_strided_slice %203 {offsets = [96, 0], sizes = [96, 64], strides = [1, 1]} : vector<192x64xf32> to vector<96x64xf32>
    %233 = vector.extract_strided_slice %55 {offsets = [24, 0], sizes = [1, 64], strides = [1, 1]} : vector<25x64xf32> to vector<1x64xf32>
    %234 = vector.shape_cast %233 : vector<1x64xf32> to vector<64xf32>
    %235 = vector.shape_cast %234 : vector<64xf32> to vector<1x64xf32>
    %236 = vector.broadcast %235 : vector<1x64xf32> to vector<96x64xf32>
    %237 = arith.mulf %232, %236 : vector<96x64xf32>
    %238 = arith.addf %231, %237 : vector<96x64xf32>
    %239 = vector.broadcast %56 : vector<1x64xf32> to vector<96x64xf32>
    %240 = arith.addf %238, %239 : vector<96x64xf32>
    %241 = arith.negf %240 : vector<96x64xf32>
    %242 = math.exp %241 : vector<96x64xf32>
    %cst_23 = arith.constant 1.000000e+00 : f32
    %243 = vector.broadcast %cst_23 : f32 to vector<96x64xf32>
    %244 = arith.addf %243, %242 : vector<96x64xf32>
    %245 = arith.divf %243, %244 : vector<96x64xf32>
    %246 = arith.mulf %240, %245 : vector<96x64xf32>
    %c50 = arith.constant 50 : index
    %c0_24 = arith.constant 0 : index
    %247 = vector.load %arg8[%c50, %c0_24] : memref<296x64xf32, #tpu.memory_space<vmem>>, vector<96x64xf32>
    %248 = tpu.concatenate %247, %246 in 1 : vector<96x64xf32>, vector<96x64xf32> -> vector<96x128xf32>
    %249 = vector.extract_strided_slice %248 {offsets = [0, 0], sizes = [16, 128], strides = [1, 1]} : vector<96x128xf32> to vector<16x128xf32>
    %c0_25 = arith.constant 0 : index
    %c0_26 = arith.constant 0 : index
    %c0_27 = arith.constant 0 : index
    %c0_28 = arith.constant 0 : index
    %250 = vector.load %arg7[%c0_25, %c0_26, %c0_27, %c0_28] : memref<1x8x16x128xf32, #tpu.memory_space<vmem>>, vector<1x1x16x128xf32>
    %251 = vector.shape_cast %250 : vector<1x1x16x128xf32> to vector<16x128xf32>
    %252 = vector.shape_cast %249 : vector<16x128xf32> to vector<1x1x16x128xf32>
    tpu.vector_store %arg7[%c0_25, %c0_26, %c0_27, %c0_28], %252 {strides = array<i32>} : memref<1x8x16x128xf32, #tpu.memory_space<vmem>>, vector<1x1x16x128xf32>,
    %253 = vector.extract_strided_slice %248 {offsets = [24, 0], sizes = [16, 128], strides = [1, 1]} : vector<96x128xf32> to vector<16x128xf32>
    %c0_29 = arith.constant 0 : index
    %c1 = arith.constant 1 : index
    %c0_30 = arith.constant 0 : index
    %c0_31 = arith.constant 0 : index
    %254 = vector.load %arg7[%c0_29, %c1, %c0_30, %c0_31] : memref<1x8x16x128xf32, #tpu.memory_space<vmem>>, vector<1x1x16x128xf32>
    %255 = vector.shape_cast %254 : vector<1x1x16x128xf32> to vector<16x128xf32>
    %256 = vector.shape_cast %253 : vector<16x128xf32> to vector<1x1x16x128xf32>
    tpu.vector_store %arg7[%c0_29, %c1, %c0_30, %c0_31], %256 {strides = array<i32>} : memref<1x8x16x128xf32, #tpu.memory_space<vmem>>, vector<1x1x16x128xf32>,
    %257 = vector.extract_strided_slice %248 {offsets = [48, 0], sizes = [16, 128], strides = [1, 1]} : vector<96x128xf32> to vector<16x128xf32>
    %c0_32 = arith.constant 0 : index
    %c2 = arith.constant 2 : index
    %c0_33 = arith.constant 0 : index
    %c0_34 = arith.constant 0 : index
    %258 = vector.load %arg7[%c0_32, %c2, %c0_33, %c0_34] : memref<1x8x16x128xf32, #tpu.memory_space<vmem>>, vector<1x1x16x128xf32>
    %259 = vector.shape_cast %258 : vector<1x1x16x128xf32> to vector<16x128xf32>
    %260 = vector.shape_cast %257 : vector<16x128xf32> to vector<1x1x16x128xf32>
    tpu.vector_store %arg7[%c0_32, %c2, %c0_33, %c0_34], %260 {strides = array<i32>} : memref<1x8x16x128xf32, #tpu.memory_space<vmem>>, vector<1x1x16x128xf32>,
    %261 = vector.extract_strided_slice %248 {offsets = [72, 0], sizes = [16, 128], strides = [1, 1]} : vector<96x128xf32> to vector<16x128xf32>
    %c0_35 = arith.constant 0 : index
    %c3 = arith.constant 3 : index
    %c0_36 = arith.constant 0 : index
    %c0_37 = arith.constant 0 : index
    %262 = vector.load %arg7[%c0_35, %c3, %c0_36, %c0_37] : memref<1x8x16x128xf32, #tpu.memory_space<vmem>>, vector<1x1x16x128xf32>
    %263 = vector.shape_cast %262 : vector<1x1x16x128xf32> to vector<16x128xf32>
    %264 = vector.shape_cast %261 : vector<16x128xf32> to vector<1x1x16x128xf32>
    tpu.vector_store %arg7[%c0_35, %c3, %c0_36, %c0_37], %264 {strides = array<i32>} : memref<1x8x16x128xf32, #tpu.memory_space<vmem>>, vector<1x1x16x128xf32>,
    %c96 = arith.constant 96 : index
    %c0_38 = arith.constant 0 : index
    %265 = vector.load %arg8[%c96, %c0_38] : memref<296x64xf32, #tpu.memory_space<vmem>>, vector<200x64xf32>
    %cst_39 = arith.constant 0.000000e+00 : f32
    %266 = vector.broadcast %cst_39 : f32 to vector<96x64xf32>
    %267 = vector.extract_strided_slice %265 {offsets = [0, 0], sizes = [192, 64], strides = [1, 1]} : vector<200x64xf32> to vector<192x64xf32>
    %268 = vector.extract_strided_slice %267 {offsets = [0, 0], sizes = [96, 64], strides = [1, 1]} : vector<192x64xf32> to vector<96x64xf32>
    %269 = vector.extract_strided_slice %55 {offsets = [0, 0], sizes = [1, 64], strides = [1, 1]} : vector<25x64xf32> to vector<1x64xf32>
    %270 = vector.shape_cast %269 : vector<1x64xf32> to vector<64xf32>
    %271 = vector.shape_cast %270 : vector<64xf32> to vector<1x64xf32>
    %272 = vector.broadcast %271 : vector<1x64xf32> to vector<96x64xf32>
    %273 = arith.mulf %268, %272 : vector<96x64xf32>
    %274 = arith.addf %266, %273 : vector<96x64xf32>
    %275 = vector.extract_strided_slice %267 {offsets = [24, 0], sizes = [96, 64], strides = [1, 1]} : vector<192x64xf32> to vector<96x64xf32>
    %276 = vector.extract_strided_slice %55 {offsets = [5, 0], sizes = [1, 64], strides = [1, 1]} : vector<25x64xf32> to vector<1x64xf32>
    %277 = vector.shape_cast %276 : vector<1x64xf32> to vector<64xf32>
    %278 = vector.shape_cast %277 : vector<64xf32> to vector<1x64xf32>
    %279 = vector.broadcast %278 : vector<1x64xf32> to vector<96x64xf32>
    %280 = arith.mulf %275, %279 : vector<96x64xf32>
    %281 = arith.addf %274, %280 : vector<96x64xf32>
    %282 = vector.extract_strided_slice %267 {offsets = [48, 0], sizes = [96, 64], strides = [1, 1]} : vector<192x64xf32> to vector<96x64xf32>
    %283 = vector.extract_strided_slice %55 {offsets = [10, 0], sizes = [1, 64], strides = [1, 1]} : vector<25x64xf32> to vector<1x64xf32>
    %284 = vector.shape_cast %283 : vector<1x64xf32> to vector<64xf32>
    %285 = vector.shape_cast %284 : vector<64xf32> to vector<1x64xf32>
    %286 = vector.broadcast %285 : vector<1x64xf32> to vector<96x64xf32>
    %287 = arith.mulf %282, %286 : vector<96x64xf32>
    %288 = arith.addf %281, %287 : vector<96x64xf32>
    %289 = vector.extract_strided_slice %267 {offsets = [72, 0], sizes = [96, 64], strides = [1, 1]} : vector<192x64xf32> to vector<96x64xf32>
    %290 = vector.extract_strided_slice %55 {offsets = [15, 0], sizes = [1, 64], strides = [1, 1]} : vector<25x64xf32> to vector<1x64xf32>
    %291 = vector.shape_cast %290 : vector<1x64xf32> to vector<64xf32>
    %292 = vector.shape_cast %291 : vector<64xf32> to vector<1x64xf32>
    %293 = vector.broadcast %292 : vector<1x64xf32> to vector<96x64xf32>
    %294 = arith.mulf %289, %293 : vector<96x64xf32>
    %295 = arith.addf %288, %294 : vector<96x64xf32>
    %296 = vector.extract_strided_slice %267 {offsets = [96, 0], sizes = [96, 64], strides = [1, 1]} : vector<192x64xf32> to vector<96x64xf32>
    %297 = vector.extract_strided_slice %55 {offsets = [20, 0], sizes = [1, 64], strides = [1, 1]} : vector<25x64xf32> to vector<1x64xf32>
    %298 = vector.shape_cast %297 : vector<1x64xf32> to vector<64xf32>
    %299 = vector.shape_cast %298 : vector<64xf32> to vector<1x64xf32>
    %300 = vector.broadcast %299 : vector<1x64xf32> to vector<96x64xf32>
    %301 = arith.mulf %296, %300 : vector<96x64xf32>
    %302 = arith.addf %295, %301 : vector<96x64xf32>
    %303 = vector.extract_strided_slice %265 {offsets = [1, 0], sizes = [192, 64], strides = [1, 1]} : vector<200x64xf32> to vector<192x64xf32>
    %304 = vector.extract_strided_slice %303 {offsets = [0, 0], sizes = [96, 64], strides = [1, 1]} : vector<192x64xf32> to vector<96x64xf32>
    %305 = vector.extract_strided_slice %55 {offsets = [1, 0], sizes = [1, 64], strides = [1, 1]} : vector<25x64xf32> to vector<1x64xf32>
    %306 = vector.shape_cast %305 : vector<1x64xf32> to vector<64xf32>
    %307 = vector.shape_cast %306 : vector<64xf32> to vector<1x64xf32>
    %308 = vector.broadcast %307 : vector<1x64xf32> to vector<96x64xf32>
    %309 = arith.mulf %304, %308 : vector<96x64xf32>
    %310 = arith.addf %302, %309 : vector<96x64xf32>
    %311 = vector.extract_strided_slice %303 {offsets = [24, 0], sizes = [96, 64], strides = [1, 1]} : vector<192x64xf32> to vector<96x64xf32>
    %312 = vector.extract_strided_slice %55 {offsets = [6, 0], sizes = [1, 64], strides = [1, 1]} : vector<25x64xf32> to vector<1x64xf32>
    %313 = vector.shape_cast %312 : vector<1x64xf32> to vector<64xf32>
    %314 = vector.shape_cast %313 : vector<64xf32> to vector<1x64xf32>
    %315 = vector.broadcast %314 : vector<1x64xf32> to vector<96x64xf32>
    %316 = arith.mulf %311, %315 : vector<96x64xf32>
    %317 = arith.addf %310, %316 : vector<96x64xf32>
    %318 = vector.extract_strided_slice %303 {offsets = [48, 0], sizes = [96, 64], strides = [1, 1]} : vector<192x64xf32> to vector<96x64xf32>
    %319 = vector.extract_strided_slice %55 {offsets = [11, 0], sizes = [1, 64], strides = [1, 1]} : vector<25x64xf32> to vector<1x64xf32>
    %320 = vector.shape_cast %319 : vector<1x64xf32> to vector<64xf32>
    %321 = vector.shape_cast %320 : vector<64xf32> to vector<1x64xf32>
    %322 = vector.broadcast %321 : vector<1x64xf32> to vector<96x64xf32>
    %323 = arith.mulf %318, %322 : vector<96x64xf32>
    %324 = arith.addf %317, %323 : vector<96x64xf32>
    %325 = vector.extract_strided_slice %303 {offsets = [72, 0], sizes = [96, 64], strides = [1, 1]} : vector<192x64xf32> to vector<96x64xf32>
    %326 = vector.extract_strided_slice %55 {offsets = [16, 0], sizes = [1, 64], strides = [1, 1]} : vector<25x64xf32> to vector<1x64xf32>
    %327 = vector.shape_cast %326 : vector<1x64xf32> to vector<64xf32>
    %328 = vector.shape_cast %327 : vector<64xf32> to vector<1x64xf32>
    %329 = vector.broadcast %328 : vector<1x64xf32> to vector<96x64xf32>
    %330 = arith.mulf %325, %329 : vector<96x64xf32>
    %331 = arith.addf %324, %330 : vector<96x64xf32>
    %332 = vector.extract_strided_slice %303 {offsets = [96, 0], sizes = [96, 64], strides = [1, 1]} : vector<192x64xf32> to vector<96x64xf32>
    %333 = vector.extract_strided_slice %55 {offsets = [21, 0], sizes = [1, 64], strides = [1, 1]} : vector<25x64xf32> to vector<1x64xf32>
    %334 = vector.shape_cast %333 : vector<1x64xf32> to vector<64xf32>
    %335 = vector.shape_cast %334 : vector<64xf32> to vector<1x64xf32>
    %336 = vector.broadcast %335 : vector<1x64xf32> to vector<96x64xf32>
    %337 = arith.mulf %332, %336 : vector<96x64xf32>
    %338 = arith.addf %331, %337 : vector<96x64xf32>
    %339 = vector.extract_strided_slice %265 {offsets = [2, 0], sizes = [192, 64], strides = [1, 1]} : vector<200x64xf32> to vector<192x64xf32>
    %340 = vector.extract_strided_slice %339 {offsets = [0, 0], sizes = [96, 64], strides = [1, 1]} : vector<192x64xf32> to vector<96x64xf32>
    %341 = vector.extract_strided_slice %55 {offsets = [2, 0], sizes = [1, 64], strides = [1, 1]} : vector<25x64xf32> to vector<1x64xf32>
    %342 = vector.shape_cast %341 : vector<1x64xf32> to vector<64xf32>
    %343 = vector.shape_cast %342 : vector<64xf32> to vector<1x64xf32>
    %344 = vector.broadcast %343 : vector<1x64xf32> to vector<96x64xf32>
    %345 = arith.mulf %340, %344 : vector<96x64xf32>
    %346 = arith.addf %338, %345 : vector<96x64xf32>
    %347 = vector.extract_strided_slice %339 {offsets = [24, 0], sizes = [96, 64], strides = [1, 1]} : vector<192x64xf32> to vector<96x64xf32>
    %348 = vector.extract_strided_slice %55 {offsets = [7, 0], sizes = [1, 64], strides = [1, 1]} : vector<25x64xf32> to vector<1x64xf32>
    %349 = vector.shape_cast %348 : vector<1x64xf32> to vector<64xf32>
    %350 = vector.shape_cast %349 : vector<64xf32> to vector<1x64xf32>
    %351 = vector.broadcast %350 : vector<1x64xf32> to vector<96x64xf32>
    %352 = arith.mulf %347, %351 : vector<96x64xf32>
    %353 = arith.addf %346, %352 : vector<96x64xf32>
    %354 = vector.extract_strided_slice %339 {offsets = [48, 0], sizes = [96, 64], strides = [1, 1]} : vector<192x64xf32> to vector<96x64xf32>
    %355 = vector.extract_strided_slice %55 {offsets = [12, 0], sizes = [1, 64], strides = [1, 1]} : vector<25x64xf32> to vector<1x64xf32>
    %356 = vector.shape_cast %355 : vector<1x64xf32> to vector<64xf32>
    %357 = vector.shape_cast %356 : vector<64xf32> to vector<1x64xf32>
    %358 = vector.broadcast %357 : vector<1x64xf32> to vector<96x64xf32>
    %359 = arith.mulf %354, %358 : vector<96x64xf32>
    %360 = arith.addf %353, %359 : vector<96x64xf32>
    %361 = vector.extract_strided_slice %339 {offsets = [72, 0], sizes = [96, 64], strides = [1, 1]} : vector<192x64xf32> to vector<96x64xf32>
    %362 = vector.extract_strided_slice %55 {offsets = [17, 0], sizes = [1, 64], strides = [1, 1]} : vector<25x64xf32> to vector<1x64xf32>
    %363 = vector.shape_cast %362 : vector<1x64xf32> to vector<64xf32>
    %364 = vector.shape_cast %363 : vector<64xf32> to vector<1x64xf32>
    %365 = vector.broadcast %364 : vector<1x64xf32> to vector<96x64xf32>
    %366 = arith.mulf %361, %365 : vector<96x64xf32>
    %367 = arith.addf %360, %366 : vector<96x64xf32>
    %368 = vector.extract_strided_slice %339 {offsets = [96, 0], sizes = [96, 64], strides = [1, 1]} : vector<192x64xf32> to vector<96x64xf32>
    %369 = vector.extract_strided_slice %55 {offsets = [22, 0], sizes = [1, 64], strides = [1, 1]} : vector<25x64xf32> to vector<1x64xf32>
    %370 = vector.shape_cast %369 : vector<1x64xf32> to vector<64xf32>
    %371 = vector.shape_cast %370 : vector<64xf32> to vector<1x64xf32>
    %372 = vector.broadcast %371 : vector<1x64xf32> to vector<96x64xf32>
    %373 = arith.mulf %368, %372 : vector<96x64xf32>
    %374 = arith.addf %367, %373 : vector<96x64xf32>
    %375 = vector.extract_strided_slice %265 {offsets = [3, 0], sizes = [192, 64], strides = [1, 1]} : vector<200x64xf32> to vector<192x64xf32>
    %376 = vector.extract_strided_slice %375 {offsets = [0, 0], sizes = [96, 64], strides = [1, 1]} : vector<192x64xf32> to vector<96x64xf32>
    %377 = vector.extract_strided_slice %55 {offsets = [3, 0], sizes = [1, 64], strides = [1, 1]} : vector<25x64xf32> to vector<1x64xf32>
    %378 = vector.shape_cast %377 : vector<1x64xf32> to vector<64xf32>
    %379 = vector.shape_cast %378 : vector<64xf32> to vector<1x64xf32>
    %380 = vector.broadcast %379 : vector<1x64xf32> to vector<96x64xf32>
    %381 = arith.mulf %376, %380 : vector<96x64xf32>
    %382 = arith.addf %374, %381 : vector<96x64xf32>
    %383 = vector.extract_strided_slice %375 {offsets = [24, 0], sizes = [96, 64], strides = [1, 1]} : vector<192x64xf32> to vector<96x64xf32>
    %384 = vector.extract_strided_slice %55 {offsets = [8, 0], sizes = [1, 64], strides = [1, 1]} : vector<25x64xf32> to vector<1x64xf32>
    %385 = vector.shape_cast %384 : vector<1x64xf32> to vector<64xf32>
    %386 = vector.shape_cast %385 : vector<64xf32> to vector<1x64xf32>
    %387 = vector.broadcast %386 : vector<1x64xf32> to vector<96x64xf32>
    %388 = arith.mulf %383, %387 : vector<96x64xf32>
    %389 = arith.addf %382, %388 : vector<96x64xf32>
    %390 = vector.extract_strided_slice %375 {offsets = [48, 0], sizes = [96, 64], strides = [1, 1]} : vector<192x64xf32> to vector<96x64xf32>
    %391 = vector.extract_strided_slice %55 {offsets = [13, 0], sizes = [1, 64], strides = [1, 1]} : vector<25x64xf32> to vector<1x64xf32>
    %392 = vector.shape_cast %391 : vector<1x64xf32> to vector<64xf32>
    %393 = vector.shape_cast %392 : vector<64xf32> to vector<1x64xf32>
    %394 = vector.broadcast %393 : vector<1x64xf32> to vector<96x64xf32>
    %395 = arith.mulf %390, %394 : vector<96x64xf32>
    %396 = arith.addf %389, %395 : vector<96x64xf32>
    %397 = vector.extract_strided_slice %375 {offsets = [72, 0], sizes = [96, 64], strides = [1, 1]} : vector<192x64xf32> to vector<96x64xf32>
    %398 = vector.extract_strided_slice %55 {offsets = [18, 0], sizes = [1, 64], strides = [1, 1]} : vector<25x64xf32> to vector<1x64xf32>
    %399 = vector.shape_cast %398 : vector<1x64xf32> to vector<64xf32>
    %400 = vector.shape_cast %399 : vector<64xf32> to vector<1x64xf32>
    %401 = vector.broadcast %400 : vector<1x64xf32> to vector<96x64xf32>
    %402 = arith.mulf %397, %401 : vector<96x64xf32>
    %403 = arith.addf %396, %402 : vector<96x64xf32>
    %404 = vector.extract_strided_slice %375 {offsets = [96, 0], sizes = [96, 64], strides = [1, 1]} : vector<192x64xf32> to vector<96x64xf32>
    %405 = vector.extract_strided_slice %55 {offsets = [23, 0], sizes = [1, 64], strides = [1, 1]} : vector<25x64xf32> to vector<1x64xf32>
    %406 = vector.shape_cast %405 : vector<1x64xf32> to vector<64xf32>
    %407 = vector.shape_cast %406 : vector<64xf32> to vector<1x64xf32>
    %408 = vector.broadcast %407 : vector<1x64xf32> to vector<96x64xf32>
    %409 = arith.mulf %404, %408 : vector<96x64xf32>
    %410 = arith.addf %403, %409 : vector<96x64xf32>
    %411 = vector.extract_strided_slice %265 {offsets = [4, 0], sizes = [192, 64], strides = [1, 1]} : vector<200x64xf32> to vector<192x64xf32>
    %412 = vector.extract_strided_slice %411 {offsets = [0, 0], sizes = [96, 64], strides = [1, 1]} : vector<192x64xf32> to vector<96x64xf32>
    %413 = vector.extract_strided_slice %55 {offsets = [4, 0], sizes = [1, 64], strides = [1, 1]} : vector<25x64xf32> to vector<1x64xf32>
    %414 = vector.shape_cast %413 : vector<1x64xf32> to vector<64xf32>
    %415 = vector.shape_cast %414 : vector<64xf32> to vector<1x64xf32>
    %416 = vector.broadcast %415 : vector<1x64xf32> to vector<96x64xf32>
    %417 = arith.mulf %412, %416 : vector<96x64xf32>
    %418 = arith.addf %410, %417 : vector<96x64xf32>
    %419 = vector.extract_strided_slice %411 {offsets = [24, 0], sizes = [96, 64], strides = [1, 1]} : vector<192x64xf32> to vector<96x64xf32>
    %420 = vector.extract_strided_slice %55 {offsets = [9, 0], sizes = [1, 64], strides = [1, 1]} : vector<25x64xf32> to vector<1x64xf32>
    %421 = vector.shape_cast %420 : vector<1x64xf32> to vector<64xf32>
    %422 = vector.shape_cast %421 : vector<64xf32> to vector<1x64xf32>
    %423 = vector.broadcast %422 : vector<1x64xf32> to vector<96x64xf32>
    %424 = arith.mulf %419, %423 : vector<96x64xf32>
    %425 = arith.addf %418, %424 : vector<96x64xf32>
    %426 = vector.extract_strided_slice %411 {offsets = [48, 0], sizes = [96, 64], strides = [1, 1]} : vector<192x64xf32> to vector<96x64xf32>
    %427 = vector.extract_strided_slice %55 {offsets = [14, 0], sizes = [1, 64], strides = [1, 1]} : vector<25x64xf32> to vector<1x64xf32>
    %428 = vector.shape_cast %427 : vector<1x64xf32> to vector<64xf32>
    %429 = vector.shape_cast %428 : vector<64xf32> to vector<1x64xf32>
    %430 = vector.broadcast %429 : vector<1x64xf32> to vector<96x64xf32>
    %431 = arith.mulf %426, %430 : vector<96x64xf32>
    %432 = arith.addf %425, %431 : vector<96x64xf32>
    %433 = vector.extract_strided_slice %411 {offsets = [72, 0], sizes = [96, 64], strides = [1, 1]} : vector<192x64xf32> to vector<96x64xf32>
    %434 = vector.extract_strided_slice %55 {offsets = [19, 0], sizes = [1, 64], strides = [1, 1]} : vector<25x64xf32> to vector<1x64xf32>
    %435 = vector.shape_cast %434 : vector<1x64xf32> to vector<64xf32>
    %436 = vector.shape_cast %435 : vector<64xf32> to vector<1x64xf32>
    %437 = vector.broadcast %436 : vector<1x64xf32> to vector<96x64xf32>
    %438 = arith.mulf %433, %437 : vector<96x64xf32>
    %439 = arith.addf %432, %438 : vector<96x64xf32>
    %440 = vector.extract_strided_slice %411 {offsets = [96, 0], sizes = [96, 64], strides = [1, 1]} : vector<192x64xf32> to vector<96x64xf32>
    %441 = vector.extract_strided_slice %55 {offsets = [24, 0], sizes = [1, 64], strides = [1, 1]} : vector<25x64xf32> to vector<1x64xf32>
    %442 = vector.shape_cast %441 : vector<1x64xf32> to vector<64xf32>
    %443 = vector.shape_cast %442 : vector<64xf32> to vector<1x64xf32>
    %444 = vector.broadcast %443 : vector<1x64xf32> to vector<96x64xf32>
    %445 = arith.mulf %440, %444 : vector<96x64xf32>
    %446 = arith.addf %439, %445 : vector<96x64xf32>
    %447 = vector.broadcast %56 : vector<1x64xf32> to vector<96x64xf32>
    %448 = arith.addf %446, %447 : vector<96x64xf32>
    %449 = arith.negf %448 : vector<96x64xf32>
    %450 = math.exp %449 : vector<96x64xf32>
    %cst_40 = arith.constant 1.000000e+00 : f32
    %451 = vector.broadcast %cst_40 : f32 to vector<96x64xf32>
    %452 = arith.addf %451, %450 : vector<96x64xf32>
    %453 = arith.divf %451, %452 : vector<96x64xf32>
    %454 = arith.mulf %448, %453 : vector<96x64xf32>
    %c146 = arith.constant 146 : index
    %c0_41 = arith.constant 0 : index
    %455 = vector.load %arg8[%c146, %c0_41] : memref<296x64xf32, #tpu.memory_space<vmem>>, vector<96x64xf32>
    %456 = tpu.concatenate %455, %454 in 1 : vector<96x64xf32>, vector<96x64xf32> -> vector<96x128xf32>
    %457 = vector.extract_strided_slice %456 {offsets = [0, 0], sizes = [16, 128], strides = [1, 1]} : vector<96x128xf32> to vector<16x128xf32>
    %c0_42 = arith.constant 0 : index
    %c4 = arith.constant 4 : index
    %c0_43 = arith.constant 0 : index
    %c0_44 = arith.constant 0 : index
    %458 = vector.load %arg7[%c0_42, %c4, %c0_43, %c0_44] : memref<1x8x16x128xf32, #tpu.memory_space<vmem>>, vector<1x1x16x128xf32>
    %459 = vector.shape_cast %458 : vector<1x1x16x128xf32> to vector<16x128xf32>
    %460 = vector.shape_cast %457 : vector<16x128xf32> to vector<1x1x16x128xf32>
    tpu.vector_store %arg7[%c0_42, %c4, %c0_43, %c0_44], %460 {strides = array<i32>} : memref<1x8x16x128xf32, #tpu.memory_space<vmem>>, vector<1x1x16x128xf32>,
    %461 = vector.extract_strided_slice %456 {offsets = [24, 0], sizes = [16, 128], strides = [1, 1]} : vector<96x128xf32> to vector<16x128xf32>
    %c0_45 = arith.constant 0 : index
    %c5 = arith.constant 5 : index
    %c0_46 = arith.constant 0 : index
    %c0_47 = arith.constant 0 : index
    %462 = vector.load %arg7[%c0_45, %c5, %c0_46, %c0_47] : memref<1x8x16x128xf32, #tpu.memory_space<vmem>>, vector<1x1x16x128xf32>
    %463 = vector.shape_cast %462 : vector<1x1x16x128xf32> to vector<16x128xf32>
    %464 = vector.shape_cast %461 : vector<16x128xf32> to vector<1x1x16x128xf32>
    tpu.vector_store %arg7[%c0_45, %c5, %c0_46, %c0_47], %464 {strides = array<i32>} : memref<1x8x16x128xf32, #tpu.memory_space<vmem>>, vector<1x1x16x128xf32>,
    %465 = vector.extract_strided_slice %456 {offsets = [48, 0], sizes = [16, 128], strides = [1, 1]} : vector<96x128xf32> to vector<16x128xf32>
    %c0_48 = arith.constant 0 : index
    %c6 = arith.constant 6 : index
    %c0_49 = arith.constant 0 : index
    %c0_50 = arith.constant 0 : index
    %466 = vector.load %arg7[%c0_48, %c6, %c0_49, %c0_50] : memref<1x8x16x128xf32, #tpu.memory_space<vmem>>, vector<1x1x16x128xf32>
    %467 = vector.shape_cast %466 : vector<1x1x16x128xf32> to vector<16x128xf32>
    %468 = vector.shape_cast %465 : vector<16x128xf32> to vector<1x1x16x128xf32>
    tpu.vector_store %arg7[%c0_48, %c6, %c0_49, %c0_50], %468 {strides = array<i32>} : memref<1x8x16x128xf32, #tpu.memory_space<vmem>>, vector<1x1x16x128xf32>,
    %469 = vector.extract_strided_slice %456 {offsets = [72, 0], sizes = [16, 128], strides = [1, 1]} : vector<96x128xf32> to vector<16x128xf32>
    %c0_51 = arith.constant 0 : index
    %c7 = arith.constant 7 : index
    %c0_52 = arith.constant 0 : index
    %c0_53 = arith.constant 0 : index
    %470 = vector.load %arg7[%c0_51, %c7, %c0_52, %c0_53] : memref<1x8x16x128xf32, #tpu.memory_space<vmem>>, vector<1x1x16x128xf32>
    %471 = vector.shape_cast %470 : vector<1x1x16x128xf32> to vector<16x128xf32>
    %472 = vector.shape_cast %469 : vector<16x128xf32> to vector<1x1x16x128xf32>
    tpu.vector_store %arg7[%c0_51, %c7, %c0_52, %c0_53], %472 {strides = array<i32>} : memref<1x8x16x128xf32, #tpu.memory_space<vmem>>, vector<1x1x16x128xf32>,
    return
  }
  func.func @transform_0(%arg0: i32, %arg1: i32) -> (i32, i32, i32) {
    %c0_i32 = arith.constant 0 : i32
    %c0_i32_0 = arith.constant 0 : i32
    %c0_i32_1 = arith.constant 0 : i32
    return %arg0, %c0_i32, %c0_i32_0 : i32, i32, i32
  }
  func.func @transform_1(%arg0: i32, %arg1: i32) -> (i32, i32) {
    %c0_i32 = arith.constant 0 : i32
    %c0_i32_0 = arith.constant 0 : i32
    %c0_i32_1 = arith.constant 0 : i32
    return %c0_i32, %c0_i32_0 : i32, i32
  }
  func.func @transform_2(%arg0: i32, %arg1: i32) -> (i32, i32) {
    %c0_i32 = arith.constant 0 : i32
    %c0_i32_0 = arith.constant 0 : i32
    %c0_i32_1 = arith.constant 0 : i32
    return %c0_i32, %c0_i32_0 : i32, i32
  }
  func.func @transform_3(%arg0: i32, %arg1: i32) -> (i32, i32) {
    %c0_i32 = arith.constant 0 : i32
    %c0_i32_0 = arith.constant 0 : i32
    %c0_i32_1 = arith.constant 0 : i32
    return %c0_i32, %c0_i32_0 : i32, i32
  }
  func.func @transform_4(%arg0: i32, %arg1: i32) -> (i32, i32) {
    %c0_i32 = arith.constant 0 : i32
    %c0_i32_0 = arith.constant 0 : i32
    %c0_i32_1 = arith.constant 0 : i32
    return %c0_i32, %c0_i32_0 : i32, i32
  }
  func.func @transform_5(%arg0: i32, %arg1: i32) -> (i32, i32, i32, i32) {
    %c0_i32 = arith.constant 0 : i32
    %c0_i32_0 = arith.constant 0 : i32
    %c0_i32_1 = arith.constant 0 : i32
    return %arg0, %arg1, %c0_i32, %c0_i32_0 : i32, i32, i32, i32
  }
}

</mosaic_0001>

<bundles_post_ra>
// kernel: tpu_custom_call.1
= control target key start
LH: loop header
LB: loop body
LE: loop exit
PB: predicated region body
PF: predicated region fallthrough
CT: control target
= control target key end

     0   :  { %10 = vsyncpa [#allocation4], 0  ;;  %s11199_s0 = inlined_call_operand.vmem [shape: f32[2,504,64], index: 0, kind: input, shape index: {}]   ;;  %s11200_s1 = inlined_call_operand.vmem [shape: f32[64,64], index: 1, kind: input, shape index: {}]   ;;  %s11201_s2 = inlined_call_operand.vmem [shape: f32[1,64], index: 2, kind: input, shape index: {}]   ;;  %s11202_s3 = inlined_call_operand.vmem [shape: f32[25,64], index: 3, kind: input, shape index: {}]   ;;  %s11203_s4 = inlined_call_operand.vmem [shape: f32[1,64], index: 4, kind: input, shape index: {}]   ;;  %s11204_s5 = inlined_call_operand.hbm [shape: f32[2,16,16,128], index: 5, kind: output, shape index: {}]  }
   0x1   :  { %12 = vsyncpa [#allocation4 + $0x1], 0  ;;  %s5907_s18 = smov 0   ;;  %s5909_s19 = smov 0  }
   0x2   :  { %s5911_s20 = smov 0   ;;  %s5913_s21 = smov 0  }
   0x3   :  { %s5915_s22 = smov 0   ;;  %s5917_s23 = smov 0  }
   0x4   :  { %s5919_s24 = smov 0   ;;  %s5921_s25 = smov 0  }
   0x5 LB: > { %s5022_s26 = sadd.s32 4294967295, %s5868_s25   ;;  %s5023_s27 = sadd.s32 4294967294, %s5868_s25   ;;  %s5868_s25 = sphi %s5921_s25, %s18_s25   ;;  %s5864_s24 = sphi %s5919_s24, %s12514_s24   ;;  %s5860_s23 = sphi %s5917_s23, %s12513_s23   ;;  %s5856_s22 = sphi %s5915_s22, %s12512_s22   ;;  %s5852_s21 = sphi %s5913_s21, %s12511_s21   ;;  %s5848_s20 = sphi %s5911_s20, %s12510_s20   ;;  %s5844_s19 = sphi %s5909_s19, %s12509_s19   ;;  %s5840_s18 = sphi %s5907_s18, %s12508_s18  }
   0x6   : > { %s27_s28 = sadd.s32 1, %s5860_s23  ;;  %s30_s29 = sadd.s32 1, %s5864_s24 }
   0x7   : > { %p28_p0 = scmp.ge.s32.totalorder %s27_s28, 2  ;;  %p159_p1 = scmp.ne.s32.totalorder %s5848_s20, %s5844_s19 }
   0x8   : > { %p160_p2 = scmp.eq.s32.totalorder %s5022_s26, 3  ;;  %p165_p5 = scmp.ne.s32.totalorder %s5844_s19, %s5840_s18 }
   0x9   : > { %s12516_s28 = smov (%p28_p0, %s27_s28), 0  ;;  %s12518_s29 = smov (!%p28_p0, %s30_s29), %s5864_s24 }
   0xa   : > { %s145_s30 = ssub.s32 %s5860_s23, %s12516_s28  ;;  %p5958_p3 = por %p160_p2, %p159_p1 }
   0xb   : > { %p32_p4 = scmp.ge.s32.totalorder %s12518_s29, 2  ;;  %p166_p6 = scmp.eq.s32.totalorder %s5023_s27, 3 }
   0xc   : > { %p5026_p7 = scmp.ge.s32.totalorder %s5868_s25, 1  ;;  %p204_p9 = scmp.lt.s32.totalorder %s5868_s25, 5 }
   0xd   : > { %s12520_s29 = smov (%p32_p4, %s12518_s29), 0  ;;  %p5967_p8 = por %p166_p6, %p165_p5 }
   0xe   : > { %s144_s8 = ssub.s32 %s5864_s24, %s12520_s29  ;;  %s149_s9 = sadd.s32 1, %s5848_s20 }
   0xf   : > { %s146_s10 = sor.u32 %s145_s30, %s144_s8  ;;  %p205_p10 = pnand %p5026_p7, %p204_p9 }
  0x10   : > { %p147_p11 = scmp.eq.s32.totalorder %s146_s10, 0 }
  0x11   : > { %208 = sbr.rel (%p205_p10) target bundleno = 1029 (0x405), region = 40 }
  0x12   : > { %s5976_s11 = scalar_select %p147_p11, %s5848_s20, %s149_s9  }
  0x18   : > { %v277_v0 = vld [vmem:[%s11200_s1] sm:$0xff]  ;;  %v278_v1 = vld [vmem:[%s11200_s1 + $0x8] sm:$0xff]  ;;  %v279_v2 = vld [vmem:[%s11200_s1 + $0x10] sm:$0xff]  ;;  %v5870_v3 = vmov 0.0|0.0   ;;  %p232_p12 = scmp.lt.s32.totalorder %s5856_s22, 1  ;;  %vm5871_vm0 = vmmov 0   ;;  %v913_v50 = vlaneseq }
  0x19   : > { %5354 = vmatprep.subr.bf16.mxu0 %v5870_v3  ;;  %5366 = vmatprep.subr.bf16.mxu1 %v5870_v3  ;;  %v5355_v4 = vpack.c.bf16 %v278_v1, %v277_v0  ;;  %v280_v5 = vld [vmem:[%s11200_s1 + $0x18] sm:$0xff]  ;;  %v11223_v6 = vmov 0.0   ;;  %v281_v8 = vld [vmem:[%s11200_s1 + $0x20] sm:$0xff]  ;;  %v282_v9 = vld [vmem:[%s11200_s1 + $0x28] sm:$0xff]  ;;  %s238_s26 = smul.u32 192, %s5852_s21  ;;  %vm11205_vm1 = vcmask 523264  }
  0x1a   : > { %5243 = vmatprep.mubr.msk.f32.mxu0 %vm5871_vm0, %v11223_v6  ;;  %5300 = vmatprep.mubr.msk.f32.mxu1 %vm5871_vm0, %v11223_v6  ;;  %v5358_v7 = vpack.c.bf16 %v280_v5, %v279_v2  ;;  %s233_s30 = scalar_select %p232_p12, %s5856_s22, 1  ;;  %v5361_v10 = vpack.c.bf16 %v282_v9, %v281_v8  ;;  %v283_v11 = vld [vmem:[%s11200_s1 + $0x30] sm:$0xff]  ;;  %v284_v12 = vld [vmem:[%s11200_s1 + $0x38] sm:$0xff]  ;;  %v6156_v51 = vshrl.u32 %v913_v50, 7 }
  0x1b   : > { %5356 = vmatpush3.bf16.msra.mxu0 %v5355_v4  ;;  %5370 = vmatpush3.bf16.msra.mxu1 %v5355_v4  ;;  %v5364_v13 = vpack.c.bf16 %v284_v12, %v283_v11  ;;  %s5104_s10 = sshll.u32 %s5852_s21, 3  ;;  %s5873_s16 = smov 64  }
  0x1c   : > { %5357 = vmatprep.subr.bf16.mxu0 %v5870_v3  ;;  %5367 = vmatprep.subr.bf16.mxu1 %v5870_v3  ;;  %s5374_s13 = smul.u32 504, %s233_s30  ;;  %v6159_v52 = vadd.s32 152, %v6156_v51  ;;  %v6162_v53 = vmul.u32.u64.low 2863311531, %v6156_v51  ;;  %v6163_v54 = vmul.u32.u64.high 2863311531, %v6156_v51, %v6162_v53  ;;  %v6170_v57 = vadd.s32 8, %v6156_v51  ;;  %s1655_s12 = ssub.s32 2, %s5104_s10 }
  0x1d   : > { %v6173_v58 = vadd.s32 160, %v6156_v51  ;;  %s1656_s14 = smul.u32 24, %s1655_s12  ;;  %v6273_v50 = vadd.s32 40, %v6156_v51 }
  0x1e   : > { %s236_s9 = scalar_lea.vmem %s11199_s0, %s5374_s13  ;;  %v6166_v55 = vmul.u32.u64.low 2863311531, %v6159_v52  ;;  %v6167_v56 = vmul.u32.u64.high 2863311531, %v6159_v52, %v6166_v55  ;;  %v957_v59 = vshrl.u32 %v6163_v54, 4  ;;  %s1657_s13 = ssub.s32 18, %s5104_s10 }
  0x1f   : > { %5359 = vmatpush3.bf16.msra.mxu0 %v5358_v7  ;;  %5371 = vmatpush3.bf16.msra.mxu1 %v5358_v7  ;;  %s6012_s30 = scalar_lea.vmem %s236_s9, %s238_s26  ;;  %v6178_v61 = vmul.u32.u64.low 2863311531, %v6170_v57  ;;  %v6179_v62 = vmul.u32.u64.high 2863311531, %v6170_v57, %v6178_v61  ;;  %v6182_v0 = vmul.u32.u64.low 2863311531, %v6173_v58  ;;  %v6183_v1 = vmul.u32.u64.high 2863311531, %v6173_v58, %v6182_v0  ;;  %s1658_s15 = smul.u32 24, %s1657_s13 }
  0x20   : > { %5360 = vmatprep.subr.bf16.mxu0 %v5870_v3  ;;  %5368 = vmatprep.subr.bf16.mxu1 %v5870_v3  ;;  %v240_v14 = vld [vmem:[%s6012_s30] sm:$0xff]  ;;  %v259_v15 = vld [vmem:[%s6012_s30 + $0x98] sm:$0xff]  ;;  %v241_v16 = vld [vmem:[%s6012_s30 + $0x8] sm:$0xff]  ;;  %v1166_v60 = vshrl.u32 %v6167_v56, 4  ;;  %v958_v63 = vmul.u32 24, %v957_v59  ;;  %v6293_v56 = vadd.s32 192, %v6156_v51 }
  0x21   : > { %v260_v17 = vld [vmem:[%s6012_s30 + $0xa0] sm:$0xff]  ;;  %v242_v18 = vld [vmem:[%s6012_s30 + $0x10] sm:$0xff]  ;;  %v261_v19 = vld [vmem:[%s6012_s30 + $0xa8] sm:$0xff]  ;;  %v968_v5 = vshrl.u32 %v6179_v62, 4  ;;  %s229_s13 = sand.u32 1, %s5844_s19   ;;  %s5177_s10 = sshll.u32 %s5856_s22, 5 }
  0x22   : > { %v243_v20 = vld [vmem:[%s6012_s30 + $0x18] sm:$0xff]  ;;  %v262_v21 = vld [vmem:[%s6012_s30 + $0xb0] sm:$0xff]  ;;  %v244_v22 = vld [vmem:[%s6012_s30 + $0x20] sm:$0xff]  ;;  %v1167_v2 = vmul.u32 24, %v1166_v60  ;;  %v959_v4 = vsub.s32 %v6156_v51, %v958_v63  ;;  %s5874_s9 = smov [#allocation3]  }
  0x23   : > { %5362 = vmatpush3.bf16.msra.mxu0 %v5361_v10  ;;  %5372 = vmatpush3.bf16.msra.mxu1 %v5361_v10  ;;  %v263_v23 = vld [vmem:[%s6012_s30 + $0xb8] sm:$0xff]  ;;  %v245_v24 = vld [vmem:[%s6012_s30 + $0x28] sm:$0xff]  ;;  %v264_v25 = vld [vmem:[%s6012_s30 + $0xc0] sm:$0xff]  ;;  %v1177_v10 = vshrl.u32 %v6183_v1, 4  ;;  %v969_v12 = vmul.u32 24, %v968_v5 }
  0x24   : > { %5363 = vmatprep.subr.bf16.mxu0 %v5870_v3  ;;  %5369 = vmatprep.subr.bf16.mxu1 %v5870_v3  ;;  %v246_v26 = vld [vmem:[%s6012_s30 + $0x30] sm:$0xff]  ;;  %v265_v27 = vld [vmem:[%s6012_s30 + $0xc8] sm:$0xff]  ;;  %v247_v28 = vld [vmem:[%s6012_s30 + $0x38] sm:$0xff]  ;;  %v6186_v3 = vadd.s32 16, %v6156_v51  ;;  %vm1358_vm2 = vcmp.ne.s32.totalorder %v959_v4, 0  ;;  %vm1395_vm3 = vcmp.lt.s32.totalorder %v959_v4, 0  ;;  %v1168_v9 = vsub.s32 %v6159_v52, %v1167_v2 }
  0x25   : > { %v266_v29 = vld [vmem:[%s6012_s30 + $0xd0] sm:$0xff]  ;;  %v248_v30 = vld [vmem:[%s6012_s30 + $0x40] sm:$0xff]  ;;  %v267_v31 = vld [vmem:[%s6012_s30 + $0xd8] sm:$0xff]  ;;  %v1469_v11 = vadd.s32 24, %v959_v4  ;;  %v6309_v0 = vmul.u32.u64.low 2863311531, %v6273_v50  ;;  %v6310_v1 = vmul.u32.u64.high 2863311531, %v6273_v50, %v6309_v0 }
  0x26   : > { %v249_v32 = vld [vmem:[%s6012_s30 + $0x48] sm:$0xff]  ;;  %v268_v33 = vld [vmem:[%s6012_s30 + $0xe0] sm:$0xff]  ;;  %v250_v34 = vld [vmem:[%s6012_s30 + $0x50] sm:$0xff]  ;;  %v6192_v7 = vmul.u32.u64.low 2863311531, %v6186_v3  ;;  %v6193_v8 = vmul.u32.u64.high 2863311531, %v6186_v3, %v6192_v7  ;;  %vm1377_vm5 = vcmp.ne.s32.totalorder %v1168_v9, 0 }
  0x27   : > { %5365 = vmatpush3.bf16.msra.mxu0 %v5364_v13  ;;  %5373 = vmatpush3.bf16.msra.mxu1 %v5364_v13  ;;  %v269_v35 = vld [vmem:[%s6012_s30 + $0xe8] sm:$0xff]  ;;  %v251_v36 = vld [vmem:[%s6012_s30 + $0x58] sm:$0xff]  ;;  %v270_v37 = vld [vmem:[%s6012_s30 + $0xf0] sm:$0xff]  ;;  %v6198_v13 = vadd.s32 168, %v6156_v51  ;;  %vm1414_vm6 = vcmp.lt.s32.totalorder %v1168_v9, 0 }
  0x28   : > { %v252_v38 = vld [vmem:[%s6012_s30 + $0x60] sm:$0xff]  ;;  %v271_v39 = vld [vmem:[%s6012_s30 + $0xf8] sm:$0xff]  ;;  %v253_v40 = vld [vmem:[%s6012_s30 + $0x68] sm:$0xff] }
  0x29   : > { %v272_v41 = vld [vmem:[%s6012_s30 + $0x100] sm:$0xff]  ;;  %v254_v42 = vld [vmem:[%s6012_s30 + $0x70] sm:$0xff]  ;;  %v273_v43 = vld [vmem:[%s6012_s30 + $0x108] sm:$0xff] }
  0x2a   : > { %5244 = vmatmul.mubr.msk.f32.vlgmr.msra.gmra.mrb[0].mxu0 %vm11205_vm1, %v240_v14  ;;  %5301 = vmatmul.mubr.msk.f32.vlgmr.msra.gmra.mrb[0].mxu1 %vm11205_vm1, %v259_v15  ;;  %v255_v44 = vld [vmem:[%s6012_s30 + $0x78] sm:$0xff]  ;;  %v274_v45 = vld [vmem:[%s6012_s30 + $0x110] sm:$0xff]  ;;  %v256_v46 = vld [vmem:[%s6012_s30 + $0x80] sm:$0xff]  ;;  %v1178_v14 = vmul.u32 24, %v1177_v10 }
  0x2b   : > { %5246 = vmatprep.mubr.msk.f32.mxu0 %vm5871_vm0, %v11223_v6  ;;  %5303 = vmatprep.mubr.msk.f32.mxu1 %vm5871_vm0, %v11223_v6  ;;  %v275_v47 = vld [vmem:[%s6012_s30 + $0x118] sm:$0xff]  ;;  %v257_v48 = vld [vmem:[%s6012_s30 + $0x88] sm:$0xff]  ;;  %v258_v49 = vld [vmem:[%s6012_s30 + $0x90] sm:$0xff] }
  0x2c   : > { %vm1432_vm4 = vmand %vm1395_vm3, %vm1358_vm2 }
  0x2d   : > { %v1506_v15 = vsel %vm1432_vm4, %v1469_v11, %v959_v4  ;;  %vm1451_vm7 = vmand %vm1414_vm6, %vm1377_vm5 }
  0x2e   : > { %5247 = vmatmul.mubr.msk.f32.gmra.mrb[2].mxu0 %vm11205_vm1, %v241_v16  ;;  %5304 = vmatmul.mubr.msk.f32.gmra.mrb[2].mxu1 %vm11205_vm1, %v260_v17  ;;  %v1488_v16 = vadd.s32 24, %v1168_v9  ;;  %v970_v17 = vsub.s32 %v6170_v57, %v969_v12  ;;  %vm1543_vm8 = vcmp.ge.s32.totalorder %v1506_v15, 2  ;;  %vm1580_vm9 = vcmp.lt.s32.totalorder %v1506_v15, 18 }
  0x2f   : > { %5249 = vmatprep.mubr.msk.f32.mxu0 %vm5871_vm0, %v11223_v6  ;;  %5306 = vmatprep.mubr.msk.f32.mxu1 %vm5871_vm0, %v11223_v6  ;;  %vm6226_vm14 = vmand %vm1543_vm8, %vm1580_vm9  ;;  %v1012_v12 = vshrl.u32 %v6310_v1, 4 }
  0x30   : > { %vm1359_vm10 = vcmp.ne.s32.totalorder %v970_v17, 0  ;;  %vm1396_vm11 = vcmp.lt.s32.totalorder %v970_v17, 0 }
  0x31   : > { %vm1433_vm4 = vmand %vm1396_vm11, %vm1359_vm10 }
  0x32   : > { %5250 = vmatmul.mubr.msk.f32.gmra.mrb[4].mxu0 %vm11205_vm1, %v242_v18  ;;  %5307 = vmatmul.mubr.msk.f32.gmra.mrb[4].mxu1 %vm11205_vm1, %v261_v19  ;;  %v6202_v18 = vmul.u32.u64.low 2863311531, %v6198_v13  ;;  %v6203_v19 = vmul.u32.u64.high 2863311531, %v6198_v13, %v6202_v18 }
  0x33   : > { %5252 = vmatprep.mubr.msk.f32.mxu0 %vm5871_vm0, %v11223_v6  ;;  %5309 = vmatprep.mubr.msk.f32.mxu1 %vm5871_vm0, %v11223_v6 }
  0x36   : > { %5253 = vmatmul.mubr.msk.f32.gmra.mrb[6].mxu0 %vm11205_vm1, %v243_v20  ;;  %5310 = vmatmul.mubr.msk.f32.gmra.mrb[6].mxu1 %vm11205_vm1, %v262_v21  ;;  %v6206_v20 = vadd.s32 24, %v6156_v51  ;;  %v979_v21 = vshrl.u32 %v6193_v8, 4  ;;  %v6333_v7 = vmul.u32.u64.low 2863311531, %v6293_v56  ;;  %v6334_v8 = vmul.u32.u64.high 2863311531, %v6293_v56, %v6333_v7 }
  0x37   : > { %5255 = vmatprep.mubr.msk.f32.mxu0 %vm5871_vm0, %v11223_v6  ;;  %5312 = vmatprep.mubr.msk.f32.mxu1 %vm5871_vm0, %v11223_v6 }
  0x3a   : > { %5256 = vmatmul.mubr.msk.f32.gmra.mrb[8].mxu0 %vm11205_vm1, %v244_v22  ;;  %5313 = vmatmul.mubr.msk.f32.gmra.mrb[8].mxu1 %vm11205_vm1, %v263_v23  ;;  %v6210_v22 = vadd.s32 176, %v6156_v51  ;;  %v1179_v23 = vsub.s32 %v6173_v58, %v1178_v14  ;;  %v6349_v14 = vadd.s32 48, %v6156_v51 }
  0x3b   : > { %5258 = vmatprep.mubr.msk.f32.mxu0 %vm5871_vm0, %v11223_v6  ;;  %5315 = vmatprep.mubr.msk.f32.mxu1 %vm5871_vm0, %v11223_v6 }
  0x3c   : > { %vm1378_vm12 = vcmp.ne.s32.totalorder %v1179_v23, 0  ;;  %vm1415_vm13 = vcmp.lt.s32.totalorder %v1179_v23, 0 }
  0x3e   : > { %5259 = vmatmul.mubr.msk.f32.gmra.mrb[10].mxu0 %vm11205_vm1, %v245_v24  ;;  %5316 = vmatmul.mubr.msk.f32.gmra.mrb[10].mxu1 %vm11205_vm1, %v264_v25  ;;  %v6213_v24 = vstv %s1656_s14  ;;  %v6215_v25 = vstv %s1658_s15  ;;  %s5027_s14 = sshll.u32 %s229_s13, 7 }
  0x3f   : > { %5261 = vmatprep.mubr.msk.f32.mxu0 %vm5871_vm0, %v11223_v6  ;;  %5318 = vmatprep.mubr.msk.f32.mxu1 %vm5871_vm0, %v11223_v6  ;;  %vm1660_vm15 = vcmp.ge.s32.totalorder %v6156_v51, %v6213_v24  ;;  %vm1679_vm5 = vcmp.ge.s32.totalorder %v6159_v52, %v6213_v24  ;;  %vm1717_vm6 = vcmp.lt.s32.totalorder %v6159_v52, %v6215_v25  ;;  %s11047_s26 = scalar_lea.vmem [#allocation3], %s5027_s14 }
  0x40   : > { %vm6248_vm10 = vmand %vm1679_vm5, %vm1717_vm6  ;;  %vm1661_vm11 = vcmp.ge.s32.totalorder %v6170_v57, %v6213_v24  ;;  %s4944_s15 = sshll.u32 %s11047_s26, 4  ;;  %s11141_s15 = int_to_ptr.vmem [resolvable:$true] %s4944_s15 }
  0x41   : > { %s5774_s22 = scalar_lea.vmem %s11141_s15, 2048 }
  0x42   : > { %5262 = vmatmul.mubr.msk.f32.gmra.mrb[12].mxu0 %vm11205_vm1, %v246_v26  ;;  %5319 = vmatmul.mubr.msk.f32.gmra.mrb[12].mxu1 %vm11205_vm1, %v265_v27  ;;  %v1525_v26 = vsel %vm1451_vm7, %v1488_v16, %v1168_v9  ;;  %vm1452_vm7 = vmand %vm1415_vm13, %vm1378_vm12  ;;  %p5775_p13 = scmp.ne.s32.totalorder %s11141_s15, %s5774_s22 }
  0x43   : > { %5264 = vmatprep.mubr.msk.f32.mxu0 %vm5871_vm0, %v11223_v6  ;;  %5321 = vmatprep.mubr.msk.f32.mxu1 %vm5871_vm0, %v11223_v6  ;;  %vm1562_vm2 = vcmp.ge.s32.totalorder %v1525_v26, 2  ;;  %vm1599_vm3 = vcmp.lt.s32.totalorder %v1525_v26, 18 }
  0x44   : > { %vm6244_vm9 = vmand %vm1562_vm2, %vm1599_vm3  ;;  %p5776_p0 = pnand %p5775_p13, %p5958_p3 }
  0x46   : > { %5265 = vmatmul.mubr.msk.f32.gmra.mrb[14].mxu0 %vm11205_vm1, %v247_v28  ;;  %5322 = vmatmul.mubr.msk.f32.gmra.mrb[14].mxu1 %vm11205_vm1, %v266_v29  ;;  %v6218_v27 = vmul.u32.u64.low 2863311531, %v6206_v20  ;;  %v6219_v28 = vmul.u32.u64.high 2863311531, %v6206_v20, %v6218_v27  ;;  %v980_v29 = vmul.u32 24, %v979_v21  ;;  %p5777_p1 = pneg %p5776_p0 }
  0x47   : > { %5267 = vmatprep.mubr.msk.f32.mxu0 %vm5871_vm0, %v11223_v6  ;;  %5324 = vmatprep.mubr.msk.f32.mxu1 %vm5871_vm0, %v11223_v6 }
  0x4a   : > { %5268 = vmatmul.mubr.msk.f32.gmra.mrb[16].mxu0 %vm11205_vm1, %v248_v30  ;;  %5325 = vmatmul.mubr.msk.f32.gmra.mrb[16].mxu1 %vm11205_vm1, %v267_v31  ;;  %v6222_v30 = vmul.u32.u64.low 2863311531, %v6210_v22  ;;  %v6223_v31 = vmul.u32.u64.high 2863311531, %v6210_v22, %v6222_v30 }
  0x4b   : > { %5270 = vmatprep.mubr.msk.f32.mxu0 %vm5871_vm0, %v11223_v6  ;;  %5327 = vmatprep.mubr.msk.f32.mxu1 %vm5871_vm0, %v11223_v6 }
  0x4e   : > { %5271 = vmatmul.mubr.msk.f32.gmra.mrb[18].mxu0 %vm11205_vm1, %v249_v32  ;;  %5328 = vmatmul.mubr.msk.f32.gmra.mrb[18].mxu1 %vm11205_vm1, %v268_v33  ;;  %v1188_v32 = vshrl.u32 %v6203_v19, 4  ;;  %v6409_v33 = vadd.s32 200, %v6156_v51 }
  0x4f   : > { %5273 = vmatprep.mubr.msk.f32.mxu0 %vm5871_vm0, %v11223_v6  ;;  %5330 = vmatprep.mubr.msk.f32.mxu1 %vm5871_vm0, %v11223_v6 }
  0x52   : > { %5274 = vmatmul.mubr.msk.f32.gmra.mrb[20].mxu0 %vm11205_vm1, %v250_v34  ;;  %5331 = vmatmul.mubr.msk.f32.gmra.mrb[20].mxu1 %vm11205_vm1, %v269_v35  ;;  %v1470_v34 = vadd.s32 24, %v970_v17  ;;  %v1489_v35 = vadd.s32 24, %v1179_v23 }
  0x53   : > { %5276 = vmatprep.mubr.msk.f32.mxu0 %vm5871_vm0, %v11223_v6  ;;  %5333 = vmatprep.mubr.msk.f32.mxu1 %vm5871_vm0, %v11223_v6 }
  0x56   : > { %5277 = vmatmul.mubr.msk.f32.gmra.mrb[22].mxu0 %vm11205_vm1, %v251_v36  ;;  %5334 = vmatmul.mubr.msk.f32.gmra.mrb[22].mxu1 %vm11205_vm1, %v270_v37  ;;  %v981_v36 = vsub.s32 %v6186_v3, %v980_v29  ;;  %v1221_v29 = vshrl.u32 %v6334_v8, 4  ;;  %v6524_v8 = vadd.s32 216, %v6156_v51 }
  0x57   : > { %5279 = vmatprep.mubr.msk.f32.mxu0 %vm5871_vm0, %v11223_v6  ;;  %5336 = vmatprep.mubr.msk.f32.mxu1 %vm5871_vm0, %v11223_v6 }
  0x58   : > { %vm1360_vm12 = vcmp.ne.s32.totalorder %v981_v36, 0  ;;  %vm1397_vm13 = vcmp.lt.s32.totalorder %v981_v36, 0 }
  0x5a   : > { %5280 = vmatmul.mubr.msk.f32.gmra.mrb[24].mxu0 %vm11205_vm1, %v252_v38  ;;  %5337 = vmatmul.mubr.msk.f32.gmra.mrb[24].mxu1 %vm11205_vm1, %v271_v39  ;;  %v1189_v38 = vmul.u32 24, %v1188_v32  ;;  %v990_v39 = vshrl.u32 %v6219_v28, 4  ;;  %v1013_v28 = vmul.u32 24, %v1012_v12 }
  0x5b   : > { %5282 = vmatprep.mubr.msk.f32.mxu0 %vm5871_vm0, %v11223_v6  ;;  %5339 = vmatprep.mubr.msk.f32.mxu1 %vm5871_vm0, %v11223_v6 }
  0x5e   : > { %5283 = vmatmul.mubr.msk.f32.gmra.mrb[26].mxu0 %vm11205_vm1, %v253_v40  ;;  %5340 = vmatmul.mubr.msk.f32.gmra.mrb[26].mxu1 %vm11205_vm1, %v272_v41  ;;  %v6441_v40 = vmul.u32.u64.low 2863311531, %v6409_v33  ;;  %v6442_v41 = vmul.u32.u64.high 2863311531, %v6409_v33, %v6441_v40 }
  0x5f   : > { %5285 = vmatprep.mubr.msk.f32.mxu0 %vm5871_vm0, %v11223_v6  ;;  %5342 = vmatprep.mubr.msk.f32.mxu1 %vm5871_vm0, %v11223_v6  ;;  %v11641_v40 = vmov 0 }
  0x60   : > { %v1232_v59 = vshrl.u32 %v6442_v41, 4 }
  0x62   : > { %5286 = vmatmul.mubr.msk.f32.gmra.mrb[28].mxu0 %vm11205_vm1, %v254_v42  ;;  %5343 = vmatmul.mubr.msk.f32.gmra.mrb[28].mxu1 %vm11205_vm1, %v273_v43  ;;  %v1507_v42 = vsel %vm1433_vm4, %v1470_v34, %v970_v17  ;;  %v1526_v43 = vsel %vm1452_vm7, %v1489_v35, %v1179_v23  ;;  %v276_v34 = vld [vmem:[%s6012_s30 + $0x120] sm:$0xff]  ;;  %s5778_s30 = sshll.u32 %s5874_s9, 4  ;;  %s5779_s30 = int_to_ptr.vmem [resolvable:$false] %s5778_s30 }
  0x63   : > { %5288 = vmatprep.mubr.msk.f32.mxu0 %vm5871_vm0, %v11223_v6  ;;  %5345 = vmatprep.mubr.msk.f32.mxu1 %vm5871_vm0, %v11223_v6  ;;  %vm1544_vm3 = vcmp.ge.s32.totalorder %v1507_v42, 2  ;;  %vm1581_vm4 = vcmp.lt.s32.totalorder %v1507_v42, 18  ;;  %vm1563_vm5 = vcmp.ge.s32.totalorder %v1526_v43, 2  ;;  %vm1600_vm6 = vcmp.lt.s32.totalorder %v1526_v43, 18  ;;  %p5781_p2 = scmp.lt.s32.totalorder %s11141_s15, %s5779_s30 }
  0x64   : > { %vm6295_vm7 = vmand %vm1544_vm3, %vm1581_vm4  ;;  %v11651_v43 = vmov 0 }
  0x66   : > { %5289 = vmatmul.mubr.msk.f32.gmra.mrb[30].mxu0 %vm11205_vm1, %v255_v44  ;;  %5346 = vmatmul.mubr.msk.f32.gmra.mrb[30].mxu1 %vm11205_vm1, %v274_v45  ;;  %v1199_v44 = vshrl.u32 %v6223_v31, 4  ;;  %v6256_v45 = vadd.s32 32, %v6156_v51  ;;  %v6404_v30 = vmul.u32.u64.low 2863311531, %v6349_v14  ;;  %v6405_v31 = vmul.u32.u64.high 2863311531, %v6349_v14, %v6404_v30 }
  0x67   : > { %5291 = vmatprep.mubr.msk.f32.mxu0 %vm5871_vm0, %v11223_v6  ;;  %5348 = vmatprep.mubr.msk.f32.mxu1 %vm5871_vm0, %v11223_v6 }
  0x68   : > { %v1200_v53 = vmul.u32 24, %v1199_v44  ;;  %v6289_v54 = vmul.u32.u64.low 2863311531, %v6256_v45  ;;  %v6290_v55 = vmul.u32.u64.high 2863311531, %v6256_v45, %v6289_v54 }
  0x6a   : > { %5292 = vmatmul.mubr.msk.f32.gmra.mrb[32].mxu0 %vm11205_vm1, %v256_v46  ;;  %5349 = vmatmul.mubr.msk.f32.gmra.mrb[32].mxu1 %vm11205_vm1, %v275_v47  ;;  %v1190_v46 = vsub.s32 %v6198_v13, %v1189_v38  ;;  %v991_v47 = vmul.u32 24, %v990_v39  ;;  %v1201_v5 = vsub.s32 %v6210_v22, %v1200_v53  ;;  %v1014_v38 = vsub.s32 %v6273_v50, %v1013_v28 }
  0x6b   : > { %5294 = vmatprep.mubr.msk.f32.mxu0 %vm5871_vm0, %v11223_v6  ;;  %5351 = vmatprep.mubr.msk.f32.mxu1 %vm5871_vm0, %v11223_v6  ;;  %v1222_v39 = vmul.u32 24, %v1221_v29  ;;  %v6462_v53 = vadd.s32 56, %v6156_v51  ;;  %v11627_v29 = vmov 0 }
  0x6c   : > { %v992_v60 = vsub.s32 %v6206_v20, %v991_v47  ;;  %v1490_v4 = vadd.s32 24, %v1190_v46  ;;  %v1491_v37 = vadd.s32 24, %v1201_v5  ;;  %v1474_v1 = vadd.s32 24, %v1014_v38 }
  0x6d   : > { %v1223_v54 = vsub.s32 %v6293_v56, %v1222_v39 }
  0x6e   : > { %5295 = vmatmul.mubr.msk.f32.gmra.mrb[34].mxu0 %vm11205_vm1, %v257_v48  ;;  %v6266_v48 = vadd.s32 184, %v6156_v51  ;;  %v1472_v23 = vadd.s32 24, %v992_v60 }
  0x6f   : > { %5297 = vmatprep.mubr.msk.f32.mxu0 %vm5871_vm0, %v11223_v6  ;;  %vm1698_vm0 = vcmp.lt.s32.totalorder %v6156_v51, %v6215_v25 }
  0x70   : > { %vm6239_vm8 = vmand %vm1660_vm15, %vm1698_vm0  ;;  %vm1699_vm0 = vcmp.lt.s32.totalorder %v6170_v57, %v6215_v25  ;;  %v6301_v57 = vmul.u32.u64.low 2863311531, %v6266_v48  ;;  %v6302_v61 = vmul.u32.u64.high 2863311531, %v6266_v48, %v6301_v57 }
  0x71   : > { %vm1434_vm15 = vmand %vm1397_vm13, %vm1360_vm12  ;;  %vm1379_vm12 = vcmp.ne.s32.totalorder %v1190_v46, 0  ;;  %vm1416_vm13 = vcmp.lt.s32.totalorder %v1190_v46, 0 }
  0x72   : > { %5298 = vmatmul.mubr.msk.f32.gmra.mrb[36].mxu0 %vm11205_vm1, %v258_v49  ;;  %v1471_v49 = vadd.s32 24, %v981_v36  ;;  %vm1718_vm1 = vcmp.lt.s32.totalorder %v6173_v58, %v6215_v25  ;;  %vm6284_vm2 = vmand %vm1661_vm11, %vm1699_vm0  ;;  %vm11581_vm0 = vcmp.ge.s32.totalorder %v6173_v58, %v6213_v24  ;;  %v1001_v58 = vshrl.u32 %v6290_v55, 4 }
  0x73   : > { %vm6304_vm11 = vmand %vm1563_vm5, %vm1600_vm6  ;;  %v1210_v10 = vshrl.u32 %v6302_v61, 4  ;;  %vm11588_vm5 = vcmp.lt.s32.totalorder %v6186_v3, %v6215_v25  ;;  %v11608_v61 = vmov 0 }
  0x74   : > { %v1508_v63 = vsel %vm1434_vm15, %v1471_v49, %v981_v36  ;;  %vm6318_vm3 = vmand %vm11581_vm0, %vm1718_vm1  ;;  %v1002_v11 = vmul.u32 24, %v1001_v58  ;;  %vm11589_vm15 = vcmp.ge.s32.totalorder %v6186_v3, %v6213_v24 }
  0x75   : > { %vm1545_vm1 = vcmp.ge.s32.totalorder %v1508_v63, 2  ;;  %vm1582_vm6 = vcmp.lt.s32.totalorder %v1508_v63, 18  ;;  %vm6338_vm0 = vmand %vm1416_vm13, %vm1379_vm12  ;;  %v1211_v18 = vmul.u32 24, %v1210_v10  ;;  %v11610_v63 = vmov 0 }
  0x76   : > { %vm11586_vm12 = vmand %vm6226_vm14, %vm6239_vm8  ;;  %vm1681_vm14 = vcmp.ge.s32.totalorder %v6198_v13, %v6213_v24  ;;  %v1527_v21 = vsel %vm6338_vm0, %v1490_v4, %v1190_v46  ;;  %v1003_v26 = vsub.s32 %v6256_v45, %v1002_v11  ;;  %v1023_v46 = vshrl.u32 %v6405_v31, 4 }
  0x77   : > { %v6357_v15 = vsel %vm11586_vm12, 1.0, %v11223_v6  ;;  %vm11587_vm13 = vmand %vm6244_vm9, %vm6248_vm10  ;;  %vm11595_vm10 = vcmp.ne.s32.totalorder %v992_v60, 0  ;;  %v1212_v32 = vsub.s32 %v6266_v48, %v1211_v18  ;;  %vm1701_vm12 = vcmp.lt.s32.totalorder %v6206_v20, %v6215_v25 }
  0x78   : > { %v6365_v16 = vsel %vm11587_vm13, 1.0, %v11223_v6  ;;  %vm6373_vm4 = vmand %vm11589_vm15, %vm11588_vm5  ;;  %vm11596_vm15 = vcmp.lt.s32.totalorder %v992_v60, 0  ;;  %vm11600_vm13 = vcmask 523264   ;;  %vm1399_vm0 = vcmp.lt.s32.totalorder %v1003_v26, 0 }
  0x79   : > { %vm11592_vm8 = vmand %vm6295_vm7, %vm6284_vm2  ;;  %vm1380_vm2 = vcmp.ne.s32.totalorder %v1201_v5, 0  ;;  %vm1417_vm7 = vcmp.lt.s32.totalorder %v1201_v5, 0  ;;  %5352 = vmatmul.mubr.msk.f32.gmra.mrb[34].mxu1 %vm11600_vm13, %v276_v34  ;;  %vm1362_vm13 = vcmp.ne.s32.totalorder %v1003_v26, 0  ;;  %v1473_v44 = vadd.s32 24, %v1003_v26 }
  0x7a   : > { %v6385_v19 = vsel %vm11592_vm8, 1.0, %v11223_v6  ;;  %vm6389_vm9 = vmand %vm1545_vm1, %vm1582_vm6  ;;  %vm1719_vm6 = vcmp.lt.s32.totalorder %v6198_v13, %v6215_v25  ;;  %v1492_v52 = vadd.s32 24, %v1212_v32  ;;  %v1024_v62 = vmul.u32 24, %v1023_v46 }
  0x7b   : > { %vm6398_vm5 = vmand %vm11596_vm15, %vm11595_vm10  ;;  %vm1564_vm10 = vcmp.ge.s32.totalorder %v1527_v21, 2  ;;  %vm1720_vm15 = vcmp.lt.s32.totalorder %v6210_v22, %v6215_v25  ;;  %v1233_v4 = vmul.u32 24, %v1232_v59  ;;  %v1493_v10 = vadd.s32 24, %v1223_v54 }
  0x7c   : > { %vm11599_vm1 = vmand %vm6304_vm11, %vm6318_vm3  ;;  %vm1601_vm11 = vcmp.lt.s32.totalorder %v1527_v21, 18  ;;  %v1509_v36 = vsel %vm6398_vm5, %v1472_v23, %v992_v60  ;;  %v6479_v60 = vmul.u32.u64.low 2863311531, %v6462_v53  ;;  %v6480_v57 = vmul.u32.u64.high 2863311531, %v6462_v53, %v6479_v60 }
  0x7d   : > { %v6418_v35 = vsel %vm11599_vm1, 1.0, %v11223_v6  ;;  %vm1774_vm8 = vmand %vm6389_vm9, %vm6373_vm4  ;;  %vm1381_vm4 = vcmp.ne.s32.totalorder %v1212_v32, 0  ;;  %vm1418_vm9 = vcmp.lt.s32.totalorder %v1212_v32, 0  ;;  %v1025_v11 = vsub.s32 %v6349_v14, %v1024_v62 }
  0x7e   : > { %vm1454_vm1 = vmand %vm1417_vm7, %vm1380_vm2  ;;  %v6445_v42 = vsel %vm1774_vm8, 1.0, %v11223_v6  ;;  %vm1363_vm2 = vcmp.ne.s32.totalorder %v1014_v38, 0  ;;  %v1034_v7 = vshrl.u32 %v6480_v57, 4  ;;  %v1234_v3 = vsub.s32 %v6409_v33, %v1233_v4 }
  0x7f   : > { %vm6448_vm5 = vmand %vm1564_vm10, %vm1601_vm11  ;;  %v1528_v47 = vsel %vm1454_vm1, %v1491_v37, %v1201_v5  ;;  %vm1546_vm10 = vcmp.ge.s32.totalorder %v1509_v36, 2  ;;  %vm1583_vm11 = vcmp.lt.s32.totalorder %v1509_v36, 18  ;;  %vm1400_vm1 = vcmp.lt.s32.totalorder %v1014_v38, 0 }
  0x80   : > { %vm6455_vm7 = vmand %vm1399_vm0, %vm1362_vm13  ;;  %vm11607_vm13 = vcmp.ge.s32.totalorder %v6206_v20, %v6213_v24  ;;  %v6501_v20 = vadd.s32 208, %v6156_v51  ;;  %v6514_v5 = vadd.s32 64, %v6156_v51  ;;  %v1035_v21 = vmul.u32 24, %v1034_v7 }
  0x81   : > { %vm1455_vm3 = vmand %vm1418_vm9, %vm1381_vm4  ;;  %v1510_v13 = vsel %vm6455_vm7, %v1473_v44, %v1003_v26  ;;  %v11634_v36 = vmov 0  ;;  %v1475_v37 = vadd.s32 24, %v1025_v11  ;;  %v1494_v41 = vadd.s32 24, %v1234_v3 }
  0x82   : > { %vm6473_vm0 = vmand %vm1681_vm14, %vm1719_vm6  ;;  %vm1565_vm14 = vcmp.ge.s32.totalorder %v1528_v47, 2  ;;  %vm1602_vm6 = vcmp.lt.s32.totalorder %v1528_v47, 18  ;;  %v1529_v0 = vsel %vm1455_vm3, %v1492_v52, %v1212_v32  ;;  %vm1419_vm3 = vcmp.lt.s32.totalorder %v1223_v54, 0 }
  0x83   : > { %vm6488_vm4 = vmand %vm11607_vm13, %vm1701_vm12  ;;  %v6542_v12 = vmul.u32.u64.low 2863311531, %v6501_v20  ;;  %v6543_v17 = vmul.u32.u64.high 2863311531, %v6501_v20, %v6542_v12  ;;  %vm1603_vm8 = vcmp.lt.s32.totalorder %v1529_v0, 18  ;;  %vm11620_vm13 = vcmp.ge.s32.totalorder %v6256_v45, %v6213_v24 }
  0x84   : > { %v11609_v61 = vsel %vm6488_vm4, 4294967295, %v11608_v61  ;;  %vm6494_vm9 = vmand %vm1546_vm10, %vm1583_vm11  ;;  %vm1382_vm10 = vcmp.ne.s32.totalorder %v1223_v54, 0  ;;  %v6563_v23 = vmul.u32.u64.low 2863311531, %v6514_v5  ;;  %v6564_v26 = vmul.u32.u64.high 2863311531, %v6514_v5, %v6563_v23 }
  0x85   : > { %v11611_v63 = vsel %vm6494_vm9, 4294967295, %v11610_v63  ;;  %vm6509_vm7 = vmand %vm1400_vm1, %vm1363_vm2  ;;  %vm11616_vm1 = vcmp.ge.s32.totalorder %v6210_v22, %v6213_v24  ;;  %v11621_v22 = vmov 0  ;;  %vm11624_vm2 = vcmp.ge.s32.totalorder %v1510_v13, 2 }
  0x86   : > { %vm6518_vm11 = vmand %vm1565_vm14, %vm1602_vm6  ;;  %vm1566_vm6 = vcmp.ge.s32.totalorder %v1529_v0, 2  ;;  %v1511_v18 = vsel %vm6509_vm7, %v1474_v1, %v1014_v38  ;;  %vm11623_vm7 = vcmp.lt.s32.totalorder %v1510_v13, 18  ;;  %v1243_v31 = vshrl.u32 %v6543_v17, 4 }
  0x87   : > { %vm6536_vm14 = vmand %vm11616_vm1, %vm1720_vm15  ;;  %vm11619_vm1 = vcmp.lt.s32.totalorder %v6256_v45, %v6215_v25  ;;  %v6577_v45 = vmul.u32.u64.low 2863311531, %v6524_v8  ;;  %v6578_v28 = vmul.u32.u64.high 2863311531, %v6524_v8, %v6577_v45  ;;  %v11631_v32 = vmov 0 }
  0x88   : > { %vm1456_vm15 = vmand %vm1419_vm3, %vm1382_vm10  ;;  %vm11630_vm3 = vcmp.ge.s32.totalorder %v6266_v48, %v6213_v24  ;;  %v1036_v34 = vsub.s32 %v6462_v53, %v1035_v21  ;;  %vm1383_vm4 = vcmp.ne.s32.totalorder %v1234_v3, 0  ;;  %v1244_v39 = vmul.u32 24, %v1243_v31 }
  0x89   : > { %vm6557_vm12 = vmand %vm11620_vm13, %vm11619_vm1  ;;  %vm1703_vm13 = vcmp.lt.s32.totalorder %v6273_v50, %v6215_v25  ;;  %v1530_v30 = vsel %vm1456_vm15, %v1493_v10, %v1223_v54  ;;  %vm11633_vm15 = vcmp.ge.s32.totalorder %v6273_v50, %v6213_v24  ;;  %v1045_v50 = vshrl.u32 %v6564_v26, 4 }
  0x8a   : > { %v11622_v22 = vsel %vm6557_vm12, 4294967295, %v11621_v22  ;;  %vm6568_vm10 = vmand %vm11624_vm2, %vm11623_vm7  ;;  %vm11629_vm7 = vcmp.lt.s32.totalorder %v6266_v48, %v6215_v25  ;;  %v6606_v48 = vadd.s32 72, %v6156_v51  ;;  %v1254_v44 = vshrl.u32 %v6578_v28, 4 }
  0x8b   : > { %vm6580_vm1 = vmand %vm1566_vm6, %vm1603_vm8  ;;  %vm1585_vm8 = vcmp.lt.s32.totalorder %v1511_v18, 18  ;;  %v6624_v46 = vadd.s32 224, %v6156_v51  ;;  %v1046_v52 = vmul.u32 24, %v1045_v50  ;;  %v1245_v55 = vsub.s32 %v6501_v20, %v1244_v39 }
  0x8c   : > { %v11628_v29 = vsel %vm6580_vm1, 4294967295, %v11627_v29  ;;  %vm6591_vm9 = vmand %vm11630_vm3, %vm11629_vm7  ;;  %vm1420_vm3 = vcmp.lt.s32.totalorder %v1234_v3, 0  ;;  %vm11636_vm1 = vcmp.ne.s32.totalorder %v1025_v11, 0  ;;  %v11658_v13 = vmov 0 }
  0x8d   : > { %v11632_v32 = vsel %vm6591_vm9, 4294967295, %v11631_v32  ;;  %vm6601_vm2 = vmand %vm11633_vm15, %vm1703_vm13  ;;  %vm11637_vm9 = vcmp.lt.s32.totalorder %v1025_v11, 0  ;;  %vm11640_vm13 = vcmp.ge.s32.totalorder %v1511_v18, 2  ;;  %v1047_v2 = vsub.s32 %v6514_v5, %v1046_v52 }
  0x8e   : > { %v11635_v36 = vsel %vm6601_vm2, 4294967295, %v11634_v36  ;;  %vm6610_vm6 = vmand %vm11637_vm9, %vm11636_vm1  ;;  %v6660_v59 = vmul.u32.u64.low 2863311531, %v6606_v48  ;;  %v6661_v60 = vmul.u32.u64.high 2863311531, %v6606_v48, %v6660_v59  ;;  %vm1384_vm12 = vcmp.ne.s32.totalorder %v1245_v55, 0 }
  0x8f   : > { %vm6616_vm15 = vmand %vm11640_vm13, %vm1585_vm8  ;;  %v1512_v54 = vsel %vm6610_vm6, %v1475_v37, %v1025_v11  ;;  %vm11657_vm6 = vcmp.ge.s32.totalorder %v6293_v56, %v6213_v24  ;;  %v6694_v0 = vmul.u32.u64.low 2863311531, %v6624_v46  ;;  %v6695_v1 = vmul.u32.u64.high 2863311531, %v6624_v46, %v6694_v0 }
  0x90   : > { %v11642_v40 = vsel %vm6616_vm15, 4294967295, %v11641_v40  ;;  %vm11643_vm9 = vmand %vm6448_vm5, %vm6473_vm0  ;;  %vm1586_vm5 = vcmp.lt.s32.totalorder %v1512_v54, 18  ;;  %vm11665_vm13 = vcmp.lt.s32.totalorder %v6349_v14, %v6215_v25  ;;  %v1056_v10 = vshrl.u32 %v6661_v60, 4 }
  0x91   : > { %v6632_v47 = vsel %vm11643_vm9, 1.0, %v11223_v6  ;;  %vm6634_vm1 = vmand %vm1420_vm3, %vm1383_vm4  ;;  %vm11649_vm3 = vcmp.lt.s32.totalorder %v1530_v30, 18  ;;  %vm11650_vm9 = vcmp.ge.s32.totalorder %v1530_v30, 2  ;;  %vm11654_vm4 = vnez %v11609_v61 }
  0x92   : > { %vm11646_vm7 = vmmov %vm6568_vm10  ;;  %vm11653_vm10 = vnez %v11611_v63  ;;  %v1476_v61 = vadd.s32 24, %v1036_v34  ;;  %v1531_v62 = vsel %vm6634_vm1, %v1494_v41, %v1234_v3  ;;  %vm11666_vm1 = vcmp.ge.s32.totalorder %v6349_v14, %v6213_v24 }
  0x93   : > { %vm6652_vm8 = vmand %vm11650_vm9, %vm11649_vm3  ;;  %vm11656_vm3 = vcmp.lt.s32.totalorder %v6293_v56, %v6215_v25  ;;  %v1255_v56 = vmul.u32 24, %v1254_v44  ;;  %vm1568_vm15 = vcmp.ge.s32.totalorder %v1531_v62, 2  ;;  %vm11669_vm0 = vcmp.ge.s32.totalorder %v1512_v54, 2 }
  0x94   : > { %v11652_v43 = vsel %vm6652_vm8, 4294967295, %v11651_v43  ;;  %vm11655_vm2 = vmand %vm11653_vm10, %vm11654_vm4  ;;  %vm11660_vm10 = vcmp.ne.s32.totalorder %v1036_v34, 0  ;;  %v1495_v14 = vadd.s32 24, %v1245_v55  ;;  %v6734_v17 = vadd.s32 80, %v6156_v51 }
  0x95   : > { %v6669_v57 = vsel %vm11655_vm2, 1.0, %v11223_v6  ;;  %vm6677_vm9 = vmand %vm11657_vm6, %vm11656_vm3  ;;  %vm11661_vm2 = vcmp.lt.s32.totalorder %v1036_v34, 0  ;;  %vm1421_vm6 = vcmp.lt.s32.totalorder %v1245_v55, 0  ;;  %v1256_v12 = vsub.s32 %v6524_v8, %v1255_v56 }
  0x96   : > { %v11659_v13 = vsel %vm6677_vm9, 4294967295, %v11658_v13  ;;  %vm6689_vm4 = vmand %vm11661_vm2, %vm11660_vm10  ;;  %vm1605_vm10 = vcmp.lt.s32.totalorder %v1531_v62, 18  ;;  %vm1705_vm9 = vcmp.lt.s32.totalorder %v6462_v53, %v6215_v25  ;;  %vm1403_vm8 = vcmp.lt.s32.totalorder %v1047_v2, 0 }
  0x97   : > { %vm6718_vm3 = vmand %vm11666_vm1, %vm11665_vm13  ;;  %v1513_v7 = vsel %vm6689_vm4, %v1476_v61, %v1036_v34  ;;  %vm1366_vm1 = vcmp.ne.s32.totalorder %v1047_v2, 0  ;;  %v1477_v18 = vadd.s32 24, %v1047_v2  ;;  %v6737_v3 = vadd.s32 232, %v6156_v51 }
  0x98   : > { %vm6726_vm2 = vmand %vm11669_vm0, %vm1586_vm5  ;;  %v11672_v21 = vmov 0  ;;  %v1265_v23 = vshrl.u32 %v6695_v1, 4  ;;  %v6745_v26 = vmul.u32.u64.low 2863311531, %v6734_v17  ;;  %v6746_v45 = vmul.u32.u64.high 2863311531, %v6734_v17, %v6745_v26 }
  0x99   : > { %vm1458_vm13 = vmand %vm1421_vm6, %vm1384_vm12  ;;  %vm11674_vm12 = vcmp.lt.s32.totalorder %v6409_v33, %v6215_v25  ;;  %vm11675_vm4 = vcmp.ge.s32.totalorder %v6409_v33, %v6213_v24  ;;  %v1057_v30 = vmul.u32 24, %v1056_v10  ;;  %v11679_v37 = vmov 0 }
  0x9a   : > { %vm6739_vm5 = vmand %vm1568_vm15, %vm1605_vm10  ;;  %v6759_v31 = vmul.u32.u64.low 2863311531, %v6737_v3  ;;  %v6760_v34 = vmul.u32.u64.high 2863311531, %v6737_v3, %v6759_v31  ;;  %vm11678_vm10 = vcmp.ge.s32.totalorder %v6462_v53, %v6213_v24  ;;  %v1532_v33 = vsel %vm1458_vm13, %v1495_v14, %v1245_v55 }
  0x9b   : > { %v11673_v21 = vsel %vm6739_vm5, 4294967295, %v11672_v21  ;;  %vm6754_vm6 = vmand %vm11675_vm4, %vm11674_vm12  ;;  %v6773_v38 = vadd.s32 88, %v6156_v51  ;;  %vm11684_vm13 = vnez %v11628_v29  ;;  %vm11685_vm4 = vnez %v11632_v32 }
  0x9c   : > { %vm6768_vm0 = vmand %vm11678_vm10, %vm1705_vm9  ;;  %vm11682_vm9 = vnez %v11622_v22  ;;  %v1496_v27 = vadd.s32 24, %v1256_v12  ;;  %v1266_v29 = vmul.u32 24, %v1265_v23  ;;  %v1058_v32 = vsub.s32 %v6606_v48, %v1057_v30 }
  0x9d   : > { %v11680_v37 = vsel %vm6768_vm0, 4294967295, %v11679_v37  ;;  %vm11681_vm15 = vmand %vm6518_vm11, %vm6536_vm14  ;;  %vm11691_vm0 = vcmp.ge.s32.totalorder %v1513_v7, 2  ;;  %v1276_v50 = vshrl.u32 %v6760_v34, 4  ;;  %v6856_v55 = vadd.s32 240, %v6156_v51 }
  0x9e   : > { %v6781_v39 = vsel %vm11681_vm15, 1.0, %v11223_v6  ;;  %vm11683_vm10 = vmand %vm11646_vm7, %vm11682_vm9  ;;  %vm11687_vm15 = vnez %v11642_v40  ;;  %vm11688_vm7 = vnez %v11635_v36  ;;  %v1067_v36 = vshrl.u32 %v6746_v45, 4 }
  0x9f   : > { %v6789_v53 = vsel %vm11683_vm10, 1.0, %v11223_v6  ;;  %vm11686_vm12 = vmand %vm11684_vm13, %vm11685_vm4  ;;  %vm11690_vm10 = vcmp.lt.s32.totalorder %v1513_v7, 18  ;;  %vm11695_vm4 = vcmp.lt.s32.totalorder %v1256_v12, 0  ;;  %v11701_v59 = vmov 0 }
  0xa0   : > { %v6797_v58 = vsel %vm11686_vm12, 1.0, %v11223_v6  ;;  %vm1440_vm14 = vmand %vm1403_vm8, %vm1366_vm1  ;;  %vm1569_vm8 = vcmp.ge.s32.totalorder %v1532_v33, 2  ;;  %vm11694_vm1 = vcmp.ne.s32.totalorder %v1256_v12, 0  ;;  %v1068_v54 = vmul.u32 24, %v1067_v36 }
  0xa1   : > { %vm11689_vm9 = vmand %vm11687_vm15, %vm11688_vm7  ;;  %vm1606_vm15 = vcmp.lt.s32.totalorder %v1532_v33, 18  ;;  %v1514_v40 = vsel %vm1440_vm14, %v1477_v18, %v1047_v2  ;;  %v6829_v41 = vmul.u32.u64.low 2863311531, %v6773_v38  ;;  %v6830_v44 = vmul.u32.u64.high 2863311531, %v6773_v38, %v6829_v41 }
  0xa2   : > { %v6809_v9 = vsel %vm11689_vm9, 1.0, %v11223_v6  ;;  %vm6813_vm5 = vmand %vm11691_vm0, %vm11690_vm10  ;;  %vm11696_vm7 = vnez %v11652_v43  ;;  %vm11697_vm9 = vnez %v11659_v13  ;;  %v1267_v43 = vsub.s32 %v6624_v46, %v1266_v29 }
  0xa3   : > { %vm1459_vm13 = vmand %vm11695_vm4, %vm11694_vm1  ;;  %vm11699_vm1 = vnez %v11673_v21  ;;  %vm1588_vm4 = vcmp.lt.s32.totalorder %v1514_v40, 18  ;;  %v1277_v60 = vmul.u32 24, %v1276_v50  ;;  %vm11703_vm14 = vcmp.lt.s32.totalorder %v6501_v20, %v6215_v25 }
  0xa4   : > { %vm11698_vm10 = vmand %vm11696_vm7, %vm11697_vm9  ;;  %v1533_v52 = vsel %vm1459_vm13, %v1496_v27, %v1256_v12  ;;  %vm11704_vm13 = vcmp.ge.s32.totalorder %v6501_v20, %v6213_v24  ;;  %v11705_v13 = vmov 0  ;;  %v1078_v61 = vshrl.u32 %v6830_v44, 4 }
  0xa5   : > { %v6838_v49 = vsel %vm11698_vm10, 1.0, %v11223_v6  ;;  %vm6859_vm9 = vmand %vm1569_vm8, %vm1606_vm15  ;;  %vm1551_vm10 = vcmp.ge.s32.totalorder %v1514_v40, 2  ;;  %v6875_v62 = vmul.u32.u64.low 2863311531, %v6856_v55  ;;  %v6876_v63 = vmul.u32.u64.high 2863311531, %v6856_v55, %v6875_v62 }
  0xa6   : > { %v11702_v59 = vsel %vm6859_vm9, 4294967295, %v11701_v59  ;;  %vm6869_vm7 = vmand %vm11704_vm13, %vm11703_vm14  ;;  %vm11707_vm8 = vcmp.lt.s32.totalorder %v6514_v5, %v6215_v25  ;;  %vm11708_vm15 = vcmp.ge.s32.totalorder %v6514_v5, %v6213_v24  ;;  %vm1607_vm13 = vcmp.lt.s32.totalorder %v1533_v52, 18 }
  0xa7   : > { %v11706_v13 = vsel %vm6869_vm7, 4294967295, %v11705_v13  ;;  %vm6884_vm11 = vmand %vm11708_vm15, %vm11707_vm8  ;;  %v6891_v20 = vadd.s32 96, %v6156_v51  ;;  %v1478_v1 = vadd.s32 24, %v1058_v32  ;;  %vm1386_vm7 = vcmp.ne.s32.totalorder %v1267_v43, 0 }
  0xa8   : > { %vm6893_vm9 = vmand %vm1551_vm10, %vm1588_vm4  ;;  %vm1423_vm12 = vcmp.lt.s32.totalorder %v1267_v43, 0  ;;  %v1069_v5 = vsub.s32 %v6734_v17, %v1068_v54  ;;  %vm11714_vm15 = vcmp.ne.s32.totalorder %v1058_v32, 0  ;;  %vm11715_vm0 = vcmp.lt.s32.totalorder %v1058_v32, 0 }
  0xa9   : > { %vm11713_vm8 = vmand %vm6726_vm2, %vm6718_vm3  ;;  %v1278_v10 = vsub.s32 %v6737_v3, %v1277_v60  ;;  %vm11719_vm2 = vcmp.ge.s32.totalorder %v1533_v52, 2  ;;  %v1497_v14 = vadd.s32 24, %v1267_v43  ;;  %v1079_v12 = vmul.u32 24, %v1078_v61 }
  0xaa   : > { %v6904_v2 = vsel %vm11713_vm8, 1.0, %v11223_v6  ;;  %vm6908_vm14 = vmand %vm11715_vm0, %vm11714_vm15  ;;  %v6934_v18 = vadd.s32 248, %v6156_v51  ;;  %v1287_v23 = vshrl.u32 %v6876_v63, 4  ;;  %v6947_v28 = vadd.s32 104, %v6156_v51 }
  0xab   : > { %vm11718_vm3 = vmand %vm11699_vm1, %vm6754_vm6  ;;  %v6943_v26 = vmul.u32.u64.low 2863311531, %v6891_v20  ;;  %v6944_v45 = vmul.u32.u64.high 2863311531, %v6891_v20, %v6943_v26  ;;  %vm11724_vm6 = vnez %v11680_v37  ;;  %v1515_v34 = vsel %vm6908_vm14, %v1478_v1, %v1058_v32 }
  0xac   : > { %v6923_v4 = vsel %vm11718_vm3, 1.0, %v11223_v6  ;;  %vm6927_vm0 = vmand %vm11719_vm2, %vm1607_vm13  ;;  %vm1368_vm2 = vcmp.ne.s32.totalorder %v1069_v5, 0  ;;  %vm1405_vm8 = vcmp.lt.s32.totalorder %v1069_v5, 0  ;;  %v1479_v37 = vadd.s32 24, %v1069_v5 }
  0xad   : > { %vm6937_vm15 = vmand %vm1423_vm12, %vm1386_vm7  ;;  %vm11726_vm12 = vcmp.lt.s32.totalorder %v6524_v8, %v6215_v25  ;;  %vm11727_vm7 = vcmp.ge.s32.totalorder %v6524_v8, %v6213_v24  ;;  %vm1387_vm4 = vcmp.ne.s32.totalorder %v1278_v10, 0  ;;  %v1080_v33 = vsub.s32 %v6773_v38, %v1079_v12  ;;  %v7224_v12 = vld [vmem:[%s11201_s2] ss:$0 sm:$0xff] }
  0xae   : > { %vm11725_vm1 = vmand %vm6813_vm5, %vm11724_vm6  ;;  %vm11730_vm5 = vnez %v11706_v13  ;;  %vm11731_vm6 = vnez %v11702_v59  ;;  %v1534_v8 = vsel %vm6937_vm15, %v1497_v14, %v1267_v43  ;;  %v1288_v29 = vmul.u32 24, %v1287_v23 }
  0xaf   : > { %v6955_v30 = vsel %vm11725_vm1, 1.0, %v11223_v6  ;;  %vm6963_vm13 = vmand %vm11727_vm7, %vm11726_vm12  ;;  %v6983_v22 = vmul.u32.u64.low 2863311531, %v6934_v18  ;;  %v6984_v27 = vmul.u32.u64.high 2863311531, %v6934_v18, %v6983_v22  ;;  %v1089_v32 = vshrl.u32 %v6944_v45, 4 }
  0xb0   : > { %vm1798_vm1 = vmand %vm11731_vm6, %vm11730_vm5  ;;  %v6992_v36 = vmul.u32.u64.low 2863311531, %v6947_v28  ;;  %v6993_v50 = vmul.u32.u64.high 2863311531, %v6947_v28, %v6992_v36  ;;  %v7004_v41 = vadd.s32 256, %v6156_v51  ;;  %vm11734_vm14 = vcmp.lt.s32.totalorder %v6606_v48, %v6215_v25 }
  0xb1   : > { %vm6997_vm3 = vmand %vm1405_vm8, %vm1368_vm2  ;;  %vm11735_vm10 = vcmp.ge.s32.totalorder %v6606_v48, %v6213_v24  ;;  %v1498_v52 = vadd.s32 24, %v1278_v10  ;;  %v7024_v43 = vsel %vm1798_vm1, 1.0, %v11223_v6  ;;  %vm11738_vm12 = vcmp.lt.s32.totalorder %v1278_v10, 0 }
  0xb2   : > { %vm7012_vm7 = vmand %vm11735_vm10, %vm11734_vm14  ;;  %v1090_v54 = vmul.u32 24, %v1089_v32  ;;  %v1298_v60 = vshrl.u32 %v6984_v27, 4  ;;  %vm11741_vm15 = vcmp.lt.s32.totalorder %v1515_v34, 18  ;;  %vm11742_vm8 = vcmp.ge.s32.totalorder %v1515_v34, 2 }
  0xb3   : > { %vm7028_vm10 = vmand %vm11738_vm12, %vm1387_vm4  ;;  %v1516_v13 = vsel %vm6997_vm3, %v1479_v37, %v1069_v5  ;;  %vm1369_vm5 = vcmp.ne.s32.totalorder %v1080_v33, 0  ;;  %vm1406_vm4 = vcmp.lt.s32.totalorder %v1080_v33, 0  ;;  %v1289_v61 = vsub.s32 %v6856_v55, %v1288_v29 }
  0xb4   : > { %vm7037_vm2 = vmand %vm11742_vm8, %vm11741_vm15  ;;  %vm11746_vm1 = vcmp.lt.s32.totalorder %v1534_v8, 18  ;;  %vm11747_vm12 = vcmp.ge.s32.totalorder %v1534_v8, 2  ;;  %v7061_v1 = vmul.u32.u64.low 2863311531, %v7004_v41  ;;  %v7062_v5 = vmul.u32.u64.high 2863311531, %v7004_v41, %v7061_v1 }
  0xb5   : > { %vm11745_vm6 = vmand %vm6893_vm9, %vm6884_vm11  ;;  %vm11750_vm8 = vcmp.lt.s32.totalorder %v6624_v46, %v6215_v25  ;;  %vm11751_vm11 = vcmp.ge.s32.totalorder %v6624_v46, %v6213_v24  ;;  %v11752_v56 = vmov 0  ;;  %v1535_v0 = vsel %vm7028_vm10, %v1498_v52, %v1278_v10 }
  0xb6   : > { %v7050_v62 = vsel %vm11745_vm6, 1.0, %v11223_v6  ;;  %vm7054_vm15 = vmand %vm11747_vm12, %vm11746_vm1  ;;  %v1480_v7 = vadd.s32 24, %v1080_v33  ;;  %v1299_v14 = vmul.u32 24, %v1298_v60  ;;  %vm1590_vm12 = vcmp.lt.s32.totalorder %v1516_v13, 18 }
  0xb7   : > { %vm7070_vm9 = vmand %vm11751_vm11, %vm11750_vm8  ;;  %v1091_v46 = vsub.s32 %v6891_v20, %v1090_v54  ;;  %vm1425_vm6 = vcmp.lt.s32.totalorder %v1289_v61, 0  ;;  %v1100_v10 = vshrl.u32 %v6993_v50, 4  ;;  %v7092_v21 = vadd.s32 112, %v6156_v51 }
  0xb8   : > { %v11753_v56 = vsel %vm7070_vm9, 4294967295, %v11752_v56  ;;  %vm7079_vm14 = vmand %vm1406_vm4, %vm1369_vm5  ;;  %vm11757_vm10 = vcmp.lt.s32.totalorder %v6734_v17, %v6215_v25  ;;  %vm11758_vm8 = vcmp.ge.s32.totalorder %v6734_v17, %v6213_v24  ;;  %v11759_v26 = vmov 0 }
  0xb9   : > { %vm11756_vm5 = vmand %vm6927_vm0, %vm6963_vm13  ;;  %vm1572_vm11 = vcmp.ge.s32.totalorder %v1535_v0, 2  ;;  %vm1609_vm1 = vcmp.lt.s32.totalorder %v1535_v0, 18  ;;  %v7117_v11 = vadd.s32 264, %v6156_v51  ;;  %vm11761_vm0 = vcmp.ge.s32.totalorder %v1516_v13, 2 }
  0xba   : > { %v7100_v23 = vsel %vm11756_vm5, 1.0, %v11223_v6  ;;  %vm7112_vm3 = vmand %vm11758_vm8, %vm11757_vm10  ;;  %v1517_v31 = vsel %vm7079_vm14, %v1480_v7, %v1080_v33  ;;  %v1499_v34 = vadd.s32 24, %v1289_v61  ;;  %v1300_v17 = vsub.s32 %v6934_v18, %v1299_v14 }
  0xbb   : > { %v11760_v26 = vsel %vm7112_vm3, 4294967295, %v11759_v26  ;;  %vm7121_vm13 = vmand %vm11761_vm0, %vm1590_vm12  ;;  %vm11764_vm10 = vcmp.ne.s32.totalorder %v1289_v61, 0  ;;  %vm1370_vm4 = vcmp.ne.s32.totalorder %v1091_v46, 0  ;;  %v1481_v8 = vadd.s32 24, %v1091_v46 }
  0xbc   : > { %vm7131_vm5 = vmand %vm1425_vm6, %vm11764_vm10  ;;  %v1309_v22 = vshrl.u32 %v7062_v5, 4  ;;  %v1101_v33 = vmul.u32 24, %v1100_v10  ;;  %v7141_v29 = vmul.u32.u64.low 2863311531, %v7092_v21  ;;  %v7142_v32 = vmul.u32.u64.high 2863311531, %v7092_v21, %v7141_v29 }
  0xbd   : > { %vm7136_vm12 = vmand %vm1572_vm11, %vm1609_vm1  ;;  %v7145_v36 = vadd.s32 120, %v6156_v51  ;;  %vm11769_vm6 = vcmp.lt.s32.totalorder %v6737_v3, %v6215_v25  ;;  %vm11770_vm1 = vcmp.ge.s32.totalorder %v6737_v3, %v6213_v24  ;;  %vm1591_vm10 = vcmp.lt.s32.totalorder %v1517_v31, 18 }
  0xbe   : > { %vm7157_vm11 = vmand %vm11770_vm1, %vm11769_vm6  ;;  %v7162_v40 = vmul.u32.u64.low 2863311531, %v7117_v11  ;;  %v7163_v52 = vmul.u32.u64.high 2863311531, %v7117_v11, %v7162_v40  ;;  %vm11773_vm8 = vcmp.lt.s32.totalorder %v6773_v38, %v6215_v25  ;;  %vm11774_vm14 = vcmp.ge.s32.totalorder %v6773_v38, %v6213_v24 }
  0xbf   : > { %vm7171_vm9 = vmand %vm11774_vm14, %vm11773_vm8  ;;  %v1536_v3 = vsel %vm7131_vm5, %v1499_v34, %v1289_v61  ;;  %v1310_v54 = vmul.u32 24, %v1309_v22  ;;  %vm1728_vm8 = vcmp.lt.s32.totalorder %v6856_v55, %v6215_v25  ;;  %vm11779_vm14 = vcmp.lt.s32.totalorder %v1091_v46, 0 }
  0xc0   : > { %vm11777_vm0 = vmand %vm7037_vm2, %vm7012_vm7  ;;  %v7192_v38 = vadd.s32 272, %v6156_v51  ;;  %vm11780_vm1 = vcmp.ge.s32.totalorder %v1517_v31, 2  ;;  %vm1710_vm7 = vcmp.lt.s32.totalorder %v6891_v20, %v6215_v25  ;;  %v1500_v44 = vadd.s32 24, %v1300_v17 }
  0xc1   : > { %v7183_v60 = vsel %vm11777_vm0, 1.0, %v11223_v6  ;;  %vm1444_vm3 = vmand %vm11779_vm14, %vm1370_vm4  ;;  %v7202_v13 = vsub.s32 %v6947_v28, %v1101_v33  ;;  %v1111_v61 = vshrl.u32 %v7142_v32, 4  ;;  %vm1573_vm2 = vcmp.ge.s32.totalorder %v1536_v3, 2 }
  0xc2   : > { %11778 = vst [vmem:[#allocation6_spill] sm:$0xff] %v7183_v60  ;;  %vm7195_vm6 = vmand %vm11780_vm1, %vm1591_vm10  ;;  %vm1610_vm4 = vcmp.lt.s32.totalorder %v1536_v3, 18  ;;  %vm11783_vm0 = vcmp.ne.s32.totalorder %v1300_v17, 0  ;;  %vm11784_vm14 = vcmp.lt.s32.totalorder %v1300_v17, 0  ;;  %v1518_v0 = vsel %vm1444_vm3, %v1481_v8, %v1091_v46 }
  0xc3   : > { %vm1463_vm5 = vmand %vm11784_vm14, %vm11783_vm0  ;;  %v7208_v1 = vmul.u32.u64.low 2863311531, %v7145_v36  ;;  %v7209_v5 = vmul.u32.u64.high 2863311531, %v7145_v36, %v7208_v1  ;;  %v7218_v7 = vsub.s32 %v7004_v41, %v1310_v54  ;;  %v1320_v14 = vshrl.u32 %v7163_v52, 4 }
  0xc4   : > { %v1112_v46 = vmul.u32 24, %v1111_v61  ;;  %v7233_v10 = vmul.u32.u64.low 2863311531, %v7192_v38  ;;  %v7234_v31 = vmul.u32.u64.high 2863311531, %v7192_v38, %v7233_v10  ;;  %vm11785_vm14 = vnez %v11753_v56  ;;  %vm7245_vm10 = vmand %vm1573_vm2, %vm1610_vm4 }
  0xc5   : > { %vm11786_vm1 = vmand %vm7054_vm15, %vm11785_vm14  ;;  %v11788_v37 = vmov 0  ;;  %v1537_v8 = vsel %vm1463_vm5, %v1500_v44, %v1300_v17  ;;  %vm1371_vm3 = vcmp.ne.s32.totalorder %v7202_v13, 0  ;;  %vm1408_vm0 = vcmp.lt.s32.totalorder %v7202_v13, 0 }
  0xc6   : > { %v7242_v34 = vsel %vm11786_vm1, 1.0, %v11223_v6  ;;  %v11789_v37 = vsel %vm7245_vm10, 4294967295, %v11788_v37  ;;  %vm11790_vm15 = vcmp.ge.s32.totalorder %v6856_v55, %v6213_v24  ;;  %v1482_v56 = vadd.s32 24, %v7202_v13  ;;  %vm7286_vm10 = vmand %vm1408_vm0, %vm1371_vm3 }
  0xc7   : > { %11787 = vst [vmem:[#allocation7_spill] sm:$0xff] %v7242_v34  ;;  %vm7257_vm1 = vmand %vm11790_vm15, %vm1728_vm8  ;;  %v1321_v17 = vmul.u32 24, %v1320_v14  ;;  %vm11793_vm8 = vcmp.ge.s32.totalorder %v6891_v20, %v6213_v24  ;;  %vm1390_vm15 = vcmp.ne.s32.totalorder %v7218_v7, 0  ;;  %vm1427_vm5 = vcmp.lt.s32.totalorder %v7218_v7, 0 }
  0xc8   : > { %vm7276_vm14 = vmand %vm11793_vm8, %vm1710_vm7  ;;  %v1113_v20 = vsub.s32 %v7092_v21, %v1112_v46  ;;  %vm11798_vm8 = vnez %v11760_v26  ;;  %vm11801_vm0 = vcmp.lt.s32.totalorder %v1518_v0, 18  ;;  %vm11802_vm3 = vcmp.ge.s32.totalorder %v1518_v0, 2 }
  0xc9   : > { %vm11799_vm2 = vmand %vm7121_vm13, %vm11798_vm8  ;;  %v1501_v14 = vadd.s32 24, %v7218_v7  ;;  %v7339_v27 = vsub.s32 %v7117_v11, %v1321_v17  ;;  %v1122_v50 = vshrl.u32 %v7209_v5, 4  ;;  %v1519_v17 = vsel %vm7286_vm10, %v1482_v56, %v7202_v13 }
  0xca   : > { %v7301_v61 = vsel %vm11799_vm2, 1.0, %v11223_v6  ;;  %vm7305_vm4 = vmand %vm11802_vm3, %vm11801_vm0  ;;  %vm1372_vm0 = vcmp.ne.s32.totalorder %v1113_v20, 0  ;;  %vm1409_vm3 = vcmp.lt.s32.totalorder %v1113_v20, 0  ;;  %vm11819_vm10 = vnez %v11789_v37 }
  0xcb   : > { %11800 = vst [vmem:[#allocation8_spill] sm:$0xff] %v7301_v61  ;;  %vm11805_vm7 = vmand %vm7136_vm12, %vm7157_vm11  ;;  %v1483_v13 = vadd.s32 24, %v1113_v20  ;;  %vm1593_vm12 = vcmp.lt.s32.totalorder %v1519_v17, 18 }
  0xcc   : > { %v7316_v26 = vsel %vm11805_vm7, 1.0, %v11223_v6  ;;  %vm11807_vm13 = vmand %vm7195_vm6, %vm7171_vm9  ;;  %vm11811_vm9 = vcmp.lt.s32.totalorder %v1537_v8, 18  ;;  %vm11812_vm6 = vcmp.ge.s32.totalorder %v1537_v8, 2  ;;  %vm11816_vm7 = vcmp.ge.s32.totalorder %v6934_v18, %v6213_v24 }
  0xcd   : > { %11806 = vst [vmem:[#allocation9_spill] sm:$0xff] %v7316_v26  ;;  %v7324_v45 = vsel %vm11807_vm13, 1.0, %v11223_v6  ;;  %vm7330_vm2 = vmand %vm1427_vm5, %vm1390_vm15  ;;  %vm11815_vm15 = vcmp.lt.s32.totalorder %v6934_v18, %v6215_v25  ;;  %v1331_v8 = vshrl.u32 %v7234_v31, 4  ;;  %v1123_v31 = vmul.u32 24, %v1122_v50 }
  0xce   : > { %11808 = vst [vmem:[#allocation10_spill] sm:$0xff] %v7324_v45  ;;  %vm7350_vm5 = vmand %vm11812_vm6, %vm11811_vm9  ;;  %v1538_v18 = vsel %vm7330_vm2, %v1501_v14, %v7218_v7  ;;  %vm11820_vm9 = vcmp.lt.s32.totalorder %v6947_v28, %v6215_v25  ;;  %vm11821_vm13 = vcmp.ge.s32.totalorder %v6947_v28, %v6213_v24 }
  0xcf   : > { %vm7363_vm8 = vmand %vm11816_vm7, %vm11815_vm15  ;;  %vm1428_vm15 = vcmp.lt.s32.totalorder %v7339_v27, 0  ;;  %vm1575_vm11 = vcmp.ge.s32.totalorder %v1538_v18, 2  ;;  %vm1612_vm6 = vcmp.lt.s32.totalorder %v1538_v18, 18 }
  0xd0   : > { %vm1446_vm7 = vmand %vm1409_vm3, %vm1372_vm0 }
  0xd1   : > { %vm7408_vm2 = vmand %vm11821_vm13, %vm11820_vm9  ;;  %vm1712_vm13 = vcmp.lt.s32.totalorder %v7092_v21, %v6215_v25  ;;  %vm11828_vm9 = vcmp.ne.s32.totalorder %v7339_v27, 0 }
  0xd2   : > { %vm11824_vm0 = vmand %vm11819_vm10, %vm7257_vm1  ;;  %vm11843_vm1 = vcmp.ge.s32.totalorder %v7092_v21, %v6213_v24 }
  0xd3   : > { %vm11826_vm3 = vmand %vm7305_vm4, %vm7276_vm14  ;;  %vm11831_vm4 = vcmp.ge.s32.totalorder %v1519_v17, 2 }
  0xd4   : > { %v7427_v28 = vsel %vm11826_vm3, 1.0, %v11223_v6  ;;  %vm7449_vm14 = vmand %vm11831_vm4, %vm1593_vm12  ;;  %vm11836_vm12 = vcmp.lt.s32.totalorder %v7004_v41, %v6215_v25 }
  0xd5   : > { %11827 = vst [vmem:[#allocation12_spill] sm:$0xff] %v7427_v28  ;;  %vm7458_vm10 = vmand %vm1575_vm11, %vm1612_vm6  ;;  %vm1731_vm6 = vcmp.lt.s32.totalorder %v7117_v11, %v6215_v25 }
  0xfd   : > { %v470_v22 = vpop.f32.mrb[0].mxu0  ;;  %v565_v33 = vpop.f32.mrb[0].mxu1 }
  0xfe   : > { %v7265_v29 = vadd.f32 %v7224_v12, %v470_v22  ;;  %v7268_v32 = vadd.f32 %v7224_v12, %v565_v33  ;;  %v5245_v40 = vpop.f32.mrb[1].mxu0  ;;  %v5302_v55 = vpop.f32.mrb[1].mxu1 }
 0x100   : > { %v5067_v54 = vmul.f32 -1.442695, %v7265_v29  ;;  %v5086_v44 = vmul.f32 -1.442695, %v7268_v32 }
 0x101   : > { %v475_v46 = vpop.f32.mrb[2].mxu0  ;;  %v570_v10 = vpop.f32.mrb[2].mxu1 }
 0x102   : > { %5526 = vpow2.f32 %v5067_v54  ;;  %v7343_v48 = vadd.f32 %v7224_v12, %v475_v46  ;;  %v7346_v59 = vadd.f32 %v7224_v12, %v570_v10  ;;  %v5248_v22 = vpop.f32.mrb[3].mxu0  ;;  %v5305_v33 = vpop.f32.mrb[3].mxu1 }
 0x103   : > { %5528 = vpow2.f32 %v5086_v44  ;;  %v7385_v44 = vadd.s32 128, %v6156_v51  ;;  %v1520_v33 = vsel %vm1446_vm7, %v1483_v13, %v1113_v20  ;;  %vm7435_vm7 = vmand %vm1428_vm15, %vm11828_vm9 }
 0x104   : > { %v5068_v55 = vmul.f32 -1.442695, %v7343_v48  ;;  %v5087_v3 = vmul.f32 -1.442695, %v7346_v59  ;;  %vm1557_vm15 = vcmp.ge.s32.totalorder %v1520_v33, 2  ;;  %vm1594_vm11 = vcmp.lt.s32.totalorder %v1520_v33, 18  ;;  %vm1785_vm9 = vmand %vm7449_vm14, %vm7408_vm2 }
 0x105   : > { %v480_v56 = vpop.f32.mrb[4].mxu0  ;;  %v575_v54 = vpop.f32.mrb[4].mxu1 }
 0x106   : > { %5530 = vpow2.f32 %v5068_v55  ;;  %v7388_v7 = vadd.f32 %v7224_v12, %v480_v56  ;;  %v7391_v14 = vadd.f32 %v7224_v12, %v575_v54  ;;  %v5251_v46 = vpop.f32.mrb[5].mxu0  ;;  %v5308_v10 = vpop.f32.mrb[5].mxu1  ;;  %v1502_v55 = vadd.s32 24, %v7339_v27 }
 0x107   : > { %5532 = vpow2.f32 %v5087_v3  ;;  %v7419_v54 = vsel %vm11824_vm0, 1.0, %v11223_v6  ;;  %v7454_v46 = vadd.s32 280, %v6156_v51  ;;  %vm11837_vm0 = vcmp.ge.s32.totalorder %v7004_v41, %v6213_v24 }
 0x108   : > { %v5069_v0 = vmul.f32 -1.442695, %v7388_v7  ;;  %v5088_v50 = vmul.f32 -1.442695, %v7391_v14  ;;  %11825 = vst [vmem:[#allocation11_spill] sm:$0xff] %v7419_v54  ;;  %vm7472_vm3 = vmand %vm11837_vm0, %vm11836_vm12 }
 0x109   : > { %v485_v3 = vpop.f32.mrb[6].mxu0  ;;  %v580_v56 = vpop.f32.mrb[6].mxu1  ;;  %vm1804_vm4 = vmand %vm7458_vm10, %vm7472_vm3 }
 0x10a   : > { %5534 = vpow2.f32 %v5069_v0  ;;  %v7442_v63 = vadd.f32 %v7224_v12, %v485_v3  ;;  %v7445_v52 = vadd.f32 %v7224_v12, %v580_v56  ;;  %v5254_v20 = vpop.f32.mrb[7].mxu0  ;;  %v5311_v1 = vpop.f32.mrb[7].mxu1  ;;  %v7463_v0 = vsub.s32 %v7145_v36, %v1123_v31 }
 0x10b   : > { %5536 = vpow2.f32 %v5088_v50  ;;  %v1332_v3 = vmul.u32 24, %v1331_v8  ;;  %v1539_v50 = vsel %vm7435_vm7, %v1502_v55, %v7339_v27  ;;  %vm11841_vm7 = vmand %vm7350_vm5, %vm7363_vm8 }
 0x10c   : > { %v5527_v17 = vpop.eup %5526  ;;  %v5070_v56 = vmul.f32 -1.442695, %v7442_v63  ;;  %v7480_v31 = vmul.u32.u64.low 2863311531, %v7385_v44  ;;  %v7481_v8 = vmul.u32.u64.high 2863311531, %v7385_v44, %v7480_v31  ;;  %v5089_v6 = vmul.f32 -1.442695, %v7445_v52  ;;  %vm7515_vm5 = vmand %vm11843_vm1, %vm1712_vm13 }
 0x10d   : > { %v5529_v20 = vpop.eup %5528  ;;  %v765_v1 = vadd.f32 1.0, %v5527_v17  ;;  %v490_v28 = vpop.f32.mrb[8].mxu0  ;;  %v11840_v17 = vmov 0.0   ;;  %vm1576_vm12 = vcmp.ge.s32.totalorder %v1539_v50, 2  ;;  %vm1613_vm0 = vcmp.lt.s32.totalorder %v1539_v50, 18 }
 0x10e   : > { %v585_v54 = vpop.f32.mrb[8].mxu1  ;;  %v784_v41 = vadd.f32 1.0, %v5529_v20  ;;  %5538 = vpow2.f32 %v5070_v56  ;;  %v7487_v45 = vadd.f32 %v7224_v12, %v490_v28  ;;  %v5257_v55 = vpop.f32.mrb[9].mxu0  ;;  %v7502_v56 = vsel %vm11841_vm7, 1.0, %v11840_v17  ;;  %vm7526_vm7 = vmand %vm1557_vm15, %vm1594_vm11 }
 0x10f   : > { %v7490_v27 = vadd.f32 %v7224_v12, %v585_v54  ;;  %v5314_v37 = vpop.f32.mrb[9].mxu1  ;;  %5540 = vrcp.f32 %v765_v1  ;;  %11842 = vst [vmem:[#allocation13_spill] sm:$0xff] %v7502_v56  ;;  %vm1373_vm8 = vcmp.ne.s32.totalorder %v7463_v0, 0  ;;  %v7521_v5 = vsub.s32 %v7192_v38, %v1332_v3  ;;  %vm7539_vm1 = vmand %vm1576_vm12, %vm1613_vm0 }
 0x110   : > { %v5531_v54 = vpop.eup %5530  ;;  %5542 = vrcp.f32 %v784_v41  ;;  %v5071_v28 = vmul.f32 -1.442695, %v7487_v45  ;;  %vm1410_vm13 = vcmp.lt.s32.totalorder %v7463_v0, 0  ;;  %v7557_v50 = vsel %vm1804_vm4, 1.0, %v11840_v17  ;;  %vm1786_vm2 = vmand %vm7526_vm7, %vm7515_vm5 }
 0x111   : > { %v5533_v31 = vpop.eup %5532  ;;  %v766_v20 = vadd.f32 1.0, %v5531_v54  ;;  %5544 = vpow2.f32 %v5089_v6  ;;  %v5090_v1 = vmul.f32 -1.442695, %v7490_v27  ;;  %v495_v41 = vpop.f32.mrb[10].mxu0  ;;  %11851 = vst [vmem:[#allocation15_spill] sm:$0xff] %v7557_v50  ;;  %vm11852_vm15 = vcmp.ge.s32.totalorder %v7117_v11, %v6213_v24  ;;  %vm7582_vm3 = vmand %vm1410_vm13, %vm1373_vm8 }
 0x112   : > { %v590_v55 = vpop.f32.mrb[10].mxu1  ;;  %v785_v37 = vadd.f32 1.0, %v5533_v31  ;;  %5546 = vpow2.f32 %v5071_v28  ;;  %v7532_v3 = vadd.f32 %v7224_v12, %v495_v41  ;;  %v5260_v6 = vpop.f32.mrb[11].mxu0  ;;  %v7549_v28 = vsel %vm1785_vm9, 1.0, %v11840_v17  ;;  %vm7565_vm11 = vmand %vm11852_vm15, %vm1731_vm6 }
 0x113   : > { %v7535_v54 = vadd.f32 %v7224_v12, %v590_v55  ;;  %v5317_v56 = vpop.f32.mrb[11].mxu1  ;;  %5548 = vrcp.f32 %v766_v20  ;;  %11850 = vst [vmem:[#allocation14_spill] sm:$0xff] %v7549_v28  ;;  %v1484_v22 = vadd.s32 24, %v7463_v0  ;;  %vm1392_vm14 = vcmp.ne.s32.totalorder %v7521_v5, 0  ;;  %vm1805_vm4 = vmand %vm7539_vm1, %vm7565_vm11 }
 0x114   : > { %v5535_v56 = vpop.eup %5534  ;;  %5550 = vrcp.f32 %v785_v37  ;;  %v5072_v10 = vmul.f32 -1.442695, %v7532_v3  ;;  %vm1429_vm10 = vcmp.lt.s32.totalorder %v7521_v5, 0  ;;  %vm1675_vm6 = vcmp.ge.s32.totalorder %v7145_v36, %v6213_v24 }
 0x115   : > { %v5537_v11 = vpop.eup %5536  ;;  %v767_v18 = vadd.f32 1.0, %v5535_v56  ;;  %5552 = vpow2.f32 %v5090_v1  ;;  %v5091_v31 = vmul.f32 -1.442695, %v7535_v54  ;;  %v500_v20 = vpop.f32.mrb[12].mxu0  ;;  %vm1713_vm9 = vcmp.lt.s32.totalorder %v7145_v36, %v6215_v25  ;;  %vm7636_vm0 = vmand %vm1429_vm10, %vm1392_vm14 }
 0x116   : > { %v595_v41 = vpop.f32.mrb[12].mxu1  ;;  %v1503_v1 = vadd.s32 24, %v7521_v5  ;;  %v786_v37 = vadd.f32 1.0, %v5537_v11  ;;  %5554 = vpow2.f32 %v5072_v10  ;;  %v7592_v6 = vadd.f32 %v7224_v12, %v500_v20  ;;  %v5263_v50 = vpop.f32.mrb[13].mxu0  ;;  %vm7668_vm13 = vmand %vm1675_vm6, %vm1713_vm9 }
 0x117   : > { %v7595_v56 = vadd.f32 %v7224_v12, %v595_v41  ;;  %v5320_v28 = vpop.f32.mrb[13].mxu1  ;;  %5556 = vrcp.f32 %v767_v18  ;;  %v1133_v26 = vshrl.u32 %v7481_v8, 4  ;;  %v7620_v8 = vsel %vm1805_vm4, 1.0, %v11840_v17 }
 0x118   : > { %v7603_v61 = vmul.u32.u64.low 2863311531, %v7454_v46  ;;  %v7604_v11 = vmul.u32.u64.high 2863311531, %v7454_v46, %v7603_v61  ;;  %v5539_v10 = vpop.eup %5538  ;;  %5558 = vrcp.f32 %v786_v37  ;;  %v5073_v20 = vmul.f32 -1.442695, %v7592_v6  ;;  %11858 = vst [vmem:[#allocation17_spill] sm:$0xff] %v7620_v8 }
 0x119   : > { %v5092_v41 = vmul.f32 -1.442695, %v7595_v56  ;;  %v1521_v28 = vsel %vm7582_vm3, %v1484_v22, %v7463_v0  ;;  %v5541_v50 = vpop.eup %5540  ;;  %v768_v33 = vadd.f32 1.0, %v5539_v10  ;;  %5560 = vpow2.f32 %v5091_v31  ;;  %v505_v13 = vpop.f32.mrb[14].mxu0 }
 0x11a   : > { %v600_v18 = vpop.f32.mrb[14].mxu1  ;;  %v7617_v61 = vsel %vm1786_vm2, 1.0, %v11840_v17  ;;  %v5543_v37 = vpop.eup %5542  ;;  %v876_v55 = vmul.f32 %v5541_v50, %v7265_v29  ;;  %5562 = vpow2.f32 %v5073_v20  ;;  %v7624_v0 = vadd.f32 %v7224_v12, %v505_v13 }
 0x11b   : > { %11857 = vst [vmem:[#allocation16_spill] sm:$0xff] %v7617_v61  ;;  %v7627_v22 = vadd.f32 %v7224_v12, %v600_v18  ;;  %v5266_v31 = vpop.f32.mrb[15].mxu0  ;;  %v5323_v21 = vpop.f32.mrb[15].mxu1  ;;  %v895_v40 = vmul.f32 %v5543_v37, %v7268_v32  ;;  %5564 = vrcp.f32 %v768_v33  ;;  %vm1558_vm12 = vcmp.ge.s32.totalorder %v1521_v28, 2 }
 0x11c   : > { %v5545_v10 = vpop.eup %5544  ;;  %v1134_v61 = vmul.u32 24, %v1133_v26  ;;  %v1883_v8 = vmul.f32 %v6357_v15, %v876_v55  ;;  %5566 = vpow2.f32 %v5092_v41  ;;  %v5074_v29 = vmul.f32 -1.442695, %v7624_v0 }
 0x11d   : > { %v5547_v34 = vpop.eup %5546  ;;  %v787_v60 = vadd.f32 1.0, %v5545_v10  ;;  %v1902_v32 = vmul.f32 %v6365_v16, %v895_v40  ;;  %v5093_v26 = vmul.f32 -1.442695, %v7627_v22  ;;  %v510_v13 = vpop.f32.mrb[16].mxu0  ;;  %vm1595_vm5 = vcmp.lt.s32.totalorder %v1521_v28, 18 }
 0x11e   : > { %v5549_v50 = vpop.eup %5548  ;;  %v769_v33 = vadd.f32 1.0, %v5547_v34  ;;  %v605_v15 = vpop.f32.mrb[16].mxu1  ;;  %vm11861_vm8 = vcmask 523264   ;;  %v7645_v37 = vadd.f32 %v7224_v12, %v510_v13  ;;  %vm7676_vm1 = vmand %vm1558_vm12, %vm1595_vm5  ;;  %vm1732_vm5 = vcmp.lt.s32.totalorder %v7192_v38, %v6215_v25 }
 0x11f   : > { %v5551_v41 = vpop.eup %5550  ;;  %1920 = vst.msk [vmem:[#allocation2] sm:$0xff] %vm11861_vm8, %v1883_v8  ;;  %v877_v18 = vmul.f32 %v5549_v50, %v7343_v48  ;;  %5568 = vrcp.f32 %v787_v60  ;;  %v7648_v55 = vadd.f32 %v7224_v12, %v605_v15  ;;  %v5269_v31 = vpop.f32.mrb[17].mxu0  ;;  %vm11862_vm7 = vmmov %vm11861_vm8  ;;  %v7655_v8 = vsel %vm7636_vm0, %v1503_v1, %v7521_v5 }
 0x120   : > { %v5326_v16 = vpop.f32.mrb[17].mxu1  ;;  %v5553_v34 = vpop.eup %5552  ;;  %1939 = vst.msk [vmem:[#allocation2 + $0x98] sm:$0xff] %vm11862_vm7, %v1902_v32  ;;  %v896_v21 = vmul.f32 %v5551_v41, %v7346_v59  ;;  %5570 = vrcp.f32 %v769_v33  ;;  %v7658_v60 = vadd.s32 136, %v6156_v51  ;;  %v5075_v50 = vmul.f32 -1.442695, %v7645_v37  ;;  %vm11867_vm15 = vmmov %vm11862_vm7 }
 0x121   : > { %v5555_v48 = vpop.eup %5554  ;;  %v1884_v10 = vmul.f32 %v6385_v19, %v877_v18  ;;  %v788_v40 = vadd.f32 1.0, %v5553_v34  ;;  %5572 = vpow2.f32 %v5074_v29  ;;  %v5094_v19 = vmul.f32 -1.442695, %v7648_v55  ;;  %v515_v29 = vpop.f32.mrb[18].mxu0  ;;  %vm11868_vm11 = vmmov %vm11862_vm7 }
 0x122   : > { %v5557_v5 = vpop.eup %5556  ;;  %v1903_v1 = vmul.f32 %v6418_v35, %v896_v21  ;;  %v770_v20 = vadd.f32 1.0, %v5555_v48  ;;  %5574 = vpow2.f32 %v5093_v26  ;;  %v610_v32 = vpop.f32.mrb[18].mxu1  ;;  %v7683_v35 = vadd.f32 %v7224_v12, %v515_v29  ;;  %vm1787_vm2 = vmand %vm7676_vm1, %vm7668_vm13 }
 0x123   : > { %v5559_v36 = vpop.eup %5558  ;;  %1921 = vst.msk [vmem:[#allocation2 + $0x8] sm:$0xff] %vm11867_vm15, %v1884_v10  ;;  %v878_v13 = vmul.f32 %v5557_v5, %v7388_v7  ;;  %5576 = vrcp.f32 %v788_v40  ;;  %v7686_v26 = vadd.f32 %v7224_v12, %v610_v32  ;;  %v5272_v15 = vpop.f32.mrb[19].mxu0  ;;  %v7691_v31 = vsub.s32 %v7385_v44, %v1134_v61  ;;  %vm11869_vm14 = vmmov %vm11862_vm7 }
 0x124   : > { %v5329_v41 = vpop.f32.mrb[19].mxu1  ;;  %v5561_v18 = vpop.eup %5560  ;;  %1940 = vst.msk [vmem:[#allocation2 + $0xa0] sm:$0xff] %vm11868_vm11, %v1903_v1  ;;  %v897_v28 = vmul.f32 %v5559_v36, %v7391_v14  ;;  %5578 = vrcp.f32 %v770_v20  ;;  %v1342_v7 = vshrl.u32 %v7604_v11, 4  ;;  %v5076_v48 = vmul.f32 -1.442695, %v7683_v35  ;;  %vm11870_vm10 = vmmov %vm11862_vm7 }
 0x125   : > { %v5563_v16 = vpop.eup %5562  ;;  %v1885_v34 = vmul.f32 %v6445_v42, %v878_v13  ;;  %v789_v21 = vadd.f32 1.0, %v5561_v18  ;;  %5580 = vpow2.f32 %v5075_v50  ;;  %v5095_v61 = vmul.f32 -1.442695, %v7686_v26  ;;  %v520_v11 = vpop.f32.mrb[20].mxu0  ;;  %vm11871_vm9 = vmmov %vm11862_vm7 }
 0x126   : > { %v5565_v10 = vpop.eup %5564  ;;  %v1904_v14 = vmul.f32 %v6632_v47, %v897_v28  ;;  %v771_v40 = vadd.f32 1.0, %v5563_v16  ;;  %5582 = vpow2.f32 %v5094_v19  ;;  %v615_v5 = vpop.f32.mrb[20].mxu1  ;;  %v7705_v50 = vadd.f32 %v7224_v12, %v520_v11  ;;  %vm11874_vm12 = vmmov %vm11862_vm7 }
 0x127   : > { %v5567_v1 = vpop.eup %5566  ;;  %1922 = vst.msk [vmem:[#allocation2 + $0x10] sm:$0xff] %vm11869_vm14, %v1885_v34  ;;  %v879_v42 = vmul.f32 %v5565_v10, %v7442_v63  ;;  %5584 = vrcp.f32 %v789_v21  ;;  %v7708_v20 = vadd.f32 %v7224_v12, %v615_v5  ;;  %v5275_v29 = vpop.f32.mrb[21].mxu0  ;;  %v7717_v63 = vsel %vm1787_vm2, 1.0, %v11840_v17  ;;  %vm11875_vm8 = vmmov %vm11862_vm7 }
 0x128   : > { %v5332_v47 = vpop.f32.mrb[21].mxu1  ;;  %1941 = vst.msk [vmem:[#allocation2 + $0xa8] sm:$0xff] %vm11870_vm10, %v1904_v14  ;;  %5586 = vrcp.f32 %v771_v40  ;;  %v790_v19 = vadd.f32 1.0, %v5567_v1  ;;  %vm1374_vm3 = vcmp.ne.s32.totalorder %v7691_v31, 0  ;;  %v5077_v13 = vmul.f32 -1.442695, %v7705_v50  ;;  %vm11876_vm11 = vmmov %vm11875_vm8 }
 0x129   : > { %v5569_v32 = vpop.eup %5568  ;;  %v1886_v36 = vmul.f32 %v6669_v57, %v879_v42  ;;  %5588 = vpow2.f32 %v5076_v48  ;;  %v5096_v15 = vmul.f32 -1.442695, %v7708_v20  ;;  %v525_v33 = vpop.f32.mrb[22].mxu0  ;;  %vm1411_vm6 = vcmp.lt.s32.totalorder %v7691_v31, 0  ;;  %vm11877_vm14 = vmmov %vm11875_vm8 }
 0x12a   : > { %v5571_v41 = vpop.eup %5570  ;;  %v898_v18 = vmul.f32 %v5569_v32, %v7445_v52  ;;  %5590 = vrcp.f32 %v790_v19  ;;  %v620_v28 = vpop.f32.mrb[22].mxu1  ;;  %v1343_v59 = vmul.u32 24, %v1342_v7  ;;  %v7728_v57 = vadd.f32 %v7224_v12, %v525_v33  ;;  %vm7741_vm4 = vmand %vm1411_vm6, %vm1374_vm3 }
 0x12b   : > { %v5573_v16 = vpop.eup %5572  ;;  %1923 = vst.msk [vmem:[#allocation2 + $0x18] sm:$0xff] %vm11871_vm9, %v1886_v36  ;;  %v880_v34 = vmul.f32 %v5571_v41, %v7487_v45  ;;  %5592 = vpow2.f32 %v5095_v61  ;;  %v7731_v21 = vadd.f32 %v7224_v12, %v620_v28  ;;  %v5278_v48 = vpop.f32.mrb[23].mxu0  ;;  %v1485_v7 = vadd.s32 24, %v7691_v31  ;;  %vm11878_vm3 = vmmov %vm11875_vm8 }
 0x12c   : > { %v5335_v52 = vpop.f32.mrb[23].mxu1  ;;  %v5575_v10 = vpop.eup %5574  ;;  %v1905_v14 = vmul.f32 %v6781_v39, %v898_v18  ;;  %v772_v40 = vadd.f32 1.0, %v5573_v16  ;;  %5594 = vpow2.f32 %v5077_v13  ;;  %v5078_v61 = vmul.f32 -1.442695, %v7728_v57 }
 0x12d   : > { %v5577_v11 = vpop.eup %5576  ;;  %v1887_v5 = vmul.f32 %v6789_v53, %v880_v34  ;;  %v791_v45 = vadd.f32 1.0, %v5575_v10  ;;  %5596 = vpow2.f32 %v5096_v15  ;;  %v5097_v53 = vmul.f32 -1.442695, %v7731_v21  ;;  %v530_v29 = vpop.f32.mrb[24].mxu0 }
 0x12e   : > { %v5579_v39 = vpop.eup %5578  ;;  %1942 = vst.msk [vmem:[#allocation2 + $0xb0] sm:$0xff] %vm11874_vm12, %v1905_v14  ;;  %v899_v42 = vmul.f32 %v5577_v11, %v7490_v27  ;;  %5598 = vrcp.f32 %v772_v40  ;;  %v625_v47 = vpop.f32.mrb[24].mxu1  ;;  %vm1694_vm0 = vcmp.ge.s32.totalorder %v7192_v38, %v6213_v24  ;;  %v7753_v19 = vsub.s32 %v7454_v46, %v1343_v59 }
 0x12f   : > { %v5581_v32 = vpop.eup %5580  ;;  %1924 = vst.msk [vmem:[#allocation2 + $0x20] sm:$0xff] %vm11875_vm8, %v1887_v5  ;;  %v881_v36 = vmul.f32 %v5579_v39, %v7532_v3  ;;  %5600 = vrcp.f32 %v791_v45  ;;  %v7758_v27 = vadd.f32 %v7224_v12, %v530_v29  ;;  %v7761_v13 = vadd.f32 %v7224_v12, %v625_v47  ;;  %v5281_v15 = vpop.f32.mrb[25].mxu0 }
 0x130   : > { %v5338_v41 = vpop.f32.mrb[25].mxu1  ;;  %vm1676_vm7 = vcmp.ge.s32.totalorder %v7385_v44, %v6213_v24  ;;  %vm1714_vm13 = vcmp.lt.s32.totalorder %v7385_v44, %v6215_v25  ;;  %v5583_v18 = vpop.eup %5582  ;;  %v1906_v33 = vmul.f32 %v6797_v58, %v899_v42  ;;  %v773_v28 = vadd.f32 1.0, %v5581_v32 }
 0x131   : > { %5602 = vpow2.f32 %v5078_v61  ;;  %vm1577_vm1 = vcmp.ge.s32.totalorder %v7655_v8, 2  ;;  %vm1614_vm15 = vcmp.lt.s32.totalorder %v7655_v8, 18  ;;  %v7773_v3 = vsel %vm7741_vm4, %v1485_v7, %v7691_v31  ;;  %v5585_v59 = vpop.eup %5584  ;;  %v535_v14 = vpop.f32.mrb[26].mxu0  ;;  %vm11879_vm4 = vmmov %vm11878_vm3  ;;  %v11901_v8 = vld [vmem:[#allocation8_spill] sm:$0xff] }
 0x132   : > { %v1888_v16 = vmul.f32 %v6809_v9, %v881_v36  ;;  %v792_v34 = vadd.f32 1.0, %v5583_v18  ;;  %5604 = vpow2.f32 %v5097_v53  ;;  %v5079_v48 = vmul.f32 -1.442695, %v7758_v27  ;;  %v5587_v52 = vpop.eup %5586  ;;  %1943 = vst.msk [vmem:[#allocation2 + $0xb8] sm:$0xff] %vm11876_vm11, %v1906_v33  ;;  %v630_v40 = vpop.f32.mrb[26].mxu1  ;;  %vm11882_vm11 = vmmov %vm11878_vm3 }
 0x133   : > { %v900_v58 = vmul.f32 %v5585_v59, %v7535_v54  ;;  %5606 = vrcp.f32 %v773_v28  ;;  %v5098_v10 = vmul.f32 -1.442695, %v7761_v13  ;;  %vm1393_vm2 = vcmp.ne.s32.totalorder %v7753_v19, 0  ;;  %v5589_v31 = vpop.eup %5588  ;;  %v5284_v54 = vpop.f32.mrb[27].mxu0 }
 0x134   : > { %1925 = vst.msk [vmem:[#allocation2 + $0x28] sm:$0xff] %vm11877_vm14, %v1888_v16  ;;  %v882_v9 = vmul.f32 %v5587_v52, %v7592_v6  ;;  %5608 = vrcp.f32 %v792_v34  ;;  %v7784_v7 = vadd.f32 %v7224_v12, %v535_v14  ;;  %v7787_v11 = vadd.f32 %v7224_v12, %v630_v40  ;;  %v5341_v5 = vpop.f32.mrb[27].mxu1  ;;  %v5591_v45 = vpop.eup %5590 }
 0x135   : > { %v1907_v61 = vmul.f32 %v6838_v49, %v900_v58  ;;  %v774_v1 = vadd.f32 1.0, %v5589_v31  ;;  %5610 = vpow2.f32 %v5079_v48  ;;  %vm1430_vm10 = vcmp.lt.s32.totalorder %v7753_v19, 0  ;;  %v5593_v39 = vpop.eup %5592  ;;  %v540_v49 = vpop.f32.mrb[28].mxu0 }
 0x136   : > { %v1889_v42 = vmul.f32 %v6904_v2, %v882_v9  ;;  %v901_v6 = vmul.f32 %v5591_v45, %v7595_v56  ;;  %5612 = vpow2.f32 %v5098_v10  ;;  %v5080_v53 = vmul.f32 -1.442695, %v7784_v7  ;;  %v5595_v29 = vpop.eup %5594  ;;  %v635_v36 = vpop.f32.mrb[28].mxu1  ;;  %vm7810_vm12 = vmand %vm1430_vm10, %vm1393_vm2 }
 0x137   : > { %1944 = vst.msk [vmem:[#allocation2 + $0xc0] sm:$0xff] %vm11878_vm3, %v1907_v61  ;;  %5614 = vrcp.f32 %v774_v1  ;;  %v793_v47 = vadd.f32 1.0, %v5593_v39  ;;  %v5099_v32 = vmul.f32 -1.442695, %v7787_v11  ;;  %v1504_v15 = vadd.s32 24, %v7753_v19  ;;  %v5597_v2 = vpop.eup %5596  ;;  %v5287_v33 = vpop.f32.mrb[29].mxu0  ;;  %vm7827_vm2 = vmand %vm1694_vm0, %vm1732_vm5 }
 0x138   : > { %vm1695_vm6 = vcmp.ge.s32.totalorder %v7454_v46, %v6213_v24  ;;  %vm1733_vm9 = vcmp.lt.s32.totalorder %v7454_v46, %v6215_v25  ;;  %1926 = vst.msk [vmem:[#allocation2 + $0x30] sm:$0xff] %vm11879_vm4, %v1889_v42  ;;  %v1908_v56 = vmul.f32 %v6923_v4, %v901_v6  ;;  %v775_v41 = vadd.f32 1.0, %v5595_v29  ;;  %v5344_v28 = vpop.f32.mrb[29].mxu1  ;;  %v5599_v16 = vpop.eup %5598  ;;  %vm7840_vm0 = vmand %vm1676_vm7, %vm1714_vm13  ;;  %v11907_v46 = vld [vmem:[#allocation11_spill] sm:$0xff] }
 0x139   : > { %5616 = vpow2.f32 %v5080_v53  ;;  %v7804_v18 = vadd.f32 %v7224_v12, %v540_v49  ;;  %v794_v34 = vadd.f32 1.0, %v5597_v2  ;;  %v7815_v4 = vadd.f32 %v7224_v12, %v635_v36  ;;  %v5601_v48 = vpop.eup %5600  ;;  %v545_v31 = vpop.f32.mrb[30].mxu0  ;;  %vm7855_vm5 = vmand %vm1577_vm1, %vm1614_vm15 }
 0x13a   : > { %5618 = vrcp.f32 %v793_v47  ;;  %vm1559_vm8 = vcmp.ge.s32.totalorder %v7773_v3, 2  ;;  %1945 = vst.msk [vmem:[#allocation2 + $0xc8] sm:$0xff] %vm11882_vm11, %v1908_v56  ;;  %v883_v52 = vmul.f32 %v5599_v16, %v7624_v0  ;;  %vm1596_vm14 = vcmp.lt.s32.totalorder %v7773_v3, 18  ;;  %v640_v9 = vpop.f32.mrb[30].mxu1  ;;  %v5290_v1 = vpop.f32.mrb[31].mxu0  ;;  %vm11891_vm13 = vmmov %vm11878_vm3 }
 0x13b   : > { %5620 = vrcp.f32 %v775_v41  ;;  %v5081_v58 = vmul.f32 -1.442695, %v7804_v18  ;;  %v5603_v14 = vpop.eup %5602  ;;  %v902_v40 = vmul.f32 %v5601_v48, %v7627_v22  ;;  %v5100_v0 = vmul.f32 -1.442695, %v7815_v4  ;;  %v5347_v39 = vpop.f32.mrb[31].mxu1  ;;  %vm7867_vm7 = vmand %vm1559_vm8, %vm1596_vm14 }
 0x13c   : > { %5622 = vrcp.f32 %v794_v34  ;;  %v1541_v54 = vsel %vm7810_vm12, %v1504_v15, %v7753_v19  ;;  %v5605_v22 = vpop.eup %5604  ;;  %v1890_v5 = vmul.f32 %v6955_v30, %v883_v52  ;;  %v776_v45 = vadd.f32 1.0, %v5603_v14  ;;  %vm11892_vm15 = vmmov %vm11878_vm3 }
 0x13d   : > { %5624 = vpow2.f32 %v5099_v32  ;;  %v7849_v61 = vadd.f32 %v7224_v12, %v545_v31  ;;  %v5607_v42 = vpop.eup %5606  ;;  %v1909_v19 = vmul.f32 %v7024_v43, %v902_v40  ;;  %v795_v6 = vadd.f32 1.0, %v5605_v22  ;;  %vm1806_vm10 = vmand %vm7855_vm5, %vm7827_vm2  ;;  %v550_v49 = vpop.f32.mrb[32].mxu0  ;;  %v11898_v31 = vld [vmem:[#allocation6_spill] sm:$0xff] }
 0x13e   : > { %5626 = vpow2.f32 %v5081_v58  ;;  %v7861_v30 = vadd.f32 %v7224_v12, %v640_v9  ;;  %v5609_v53 = vpop.eup %5608  ;;  %1927 = vst.msk [vmem:[#allocation2 + $0x38] sm:$0xff] %vm11891_vm13, %v1890_v5  ;;  %v884_v29 = vmul.f32 %v5607_v42, %v7645_v37  ;;  %vm1578_vm1 = vcmp.ge.s32.totalorder %v1541_v54, 2  ;;  %v645_v36 = vpop.f32.mrb[32].mxu1  ;;  %vm1788_vm4 = vmand %vm7867_vm7, %vm7840_vm0  ;;  %v11900_v42 = vld [vmem:[#allocation7_spill] sm:$0xff] }
 0x13f   : > { %5628 = vrcp.f32 %v776_v45  ;;  %v5082_v43 = vmul.f32 -1.442695, %v7849_v61  ;;  %v5611_v47 = vpop.eup %5610  ;;  %1946 = vst.msk [vmem:[#allocation2 + $0xd0] sm:$0xff] %vm11892_vm15, %v1909_v19  ;;  %v903_v32 = vmul.f32 %v5609_v53, %v7648_v55  ;;  %vm1615_vm3 = vcmp.lt.s32.totalorder %v1541_v54, 18  ;;  %v5293_v55 = vpop.f32.mrb[33].mxu0  ;;  %vm11893_vm12 = vmmov %vm11882_vm11 }
 0x140   : > { %5630 = vrcp.f32 %v795_v6  ;;  %v5101_v3 = vmul.f32 -1.442695, %v7861_v30  ;;  %v5613_v37 = vpop.eup %5612  ;;  %v1891_v15 = vmul.f32 %v7050_v62, %v884_v29  ;;  %v777_v2 = vadd.f32 1.0, %v5611_v47  ;;  %v5350_v41 = vpop.f32.mrb[33].mxu1  ;;  %vm7910_vm8 = vmand %vm1695_vm6, %vm1733_vm9 }
 0x141   : > { %5632 = vpow2.f32 %v5100_v0  ;;  %v7883_v56 = vadd.f32 %v7224_v12, %v550_v49  ;;  %v5615_v33 = vpop.eup %5614  ;;  %v1910_v28 = vmul.f32 %v7100_v23, %v903_v32  ;;  %v796_v59 = vadd.f32 1.0, %v5613_v37  ;;  %vm7926_vm6 = vmand %vm1578_vm1, %vm1615_vm3  ;;  %v555_v40 = vpop.f32.mrb[34].mxu0 }
 0x142   : > { %5634 = vpow2.f32 %v5082_v43  ;;  %v7891_v16 = vadd.f32 %v7224_v12, %v645_v36  ;;  %1928 = vst.msk [vmem:[#allocation2 + $0x40] sm:$0xff] %vm11893_vm12, %v1891_v15  ;;  %v885_v34 = vmul.f32 %v5615_v33, %v7683_v35  ;;  %v7901_v48 = vsel %vm1806_vm10, 1.0, %v11840_v17  ;;  %v5296_v5 = vpop.f32.mrb[35].mxu0  ;;  %vm11899_vm9 = vmmov %vm11882_vm11 }
 0x143   : > { %v5617_v62 = vpop.eup %5616  ;;  %5636 = vrcp.f32 %v777_v2  ;;  %v5083_v23 = vmul.f32 -1.442695, %v7883_v56  ;;  %1947 = vst.msk [vmem:[#allocation2 + $0xd8] sm:$0xff] %vm11882_vm11, %v1910_v28  ;;  %v7921_v10 = vsel %vm1788_vm4, 1.0, %v11840_v17  ;;  %v7933_v38 = vadd.f32 %v7224_v12, %v555_v40  ;;  %vm1807_vm2 = vmand %vm7926_vm6, %vm7910_vm8 }
 0x144   : > { %v5619_v35 = vpop.eup %5618  ;;  %5638 = vrcp.f32 %v796_v59  ;;  %v778_v58 = vadd.f32 1.0, %v5617_v62  ;;  %v5102_v14 = vmul.f32 -1.442695, %v7891_v16  ;;  %v1892_v9 = vmul.f32 %v11898_v31, %v885_v34  ;;  %vm11902_vm14 = vmmov %vm11899_vm9  ;;  %v11906_v34 = vld [vmem:[#allocation10_spill] sm:$0xff] }
 0x145   : > { %v5621_v0 = vpop.eup %5620  ;;  %v904_v22 = vmul.f32 %v5619_v35, %v7686_v26  ;;  %5640 = vpow2.f32 %v5101_v3  ;;  %v7937_v54 = vmul.u32.u64.low 2863311531, %v7658_v60  ;;  %v7938_v1 = vmul.u32.u64.high 2863311531, %v7658_v60, %v7937_v54  ;;  %v560_v43 = vpop.f32.mrb[36].mxu0  ;;  %vm11904_vm0 = vmmov %vm11899_vm9 }
 0x146   : > { %v5623_v45 = vpop.eup %5622  ;;  %v886_v44 = vmul.f32 %v5621_v0, %v7705_v50  ;;  %5642 = vrcp.f32 %v778_v58  ;;  %1929 = vst.msk [vmem:[#allocation2 + $0x48] sm:$0xff] %vm11899_vm9, %v1892_v9  ;;  %v5084_v50 = vmul.f32 -1.442695, %v7933_v38  ;;  %v7950_v47 = vsub.s32 0, %v6156_v51  ;;  %v5299_v37 = vpop.f32.mrb[37].mxu0  ;;  %vm11905_vm13 = vmmov %vm11904_vm0 }
 0x147   : > { %v5625_v39 = vpop.eup %5624  ;;  %v1911_v19 = vmul.f32 %v11900_v42, %v904_v22  ;;  %v905_v26 = vmul.f32 %v5623_v45, %v7708_v20  ;;  %5644 = vpow2.f32 %v5083_v23  ;;  %v11903_v20 = vld [vmem:[#allocation9_spill] sm:$0xff]  ;;  %v7955_v36 = vadd.f32 %v7224_v12, %v560_v43  ;;  %vm11909_vm1 = vmmov %vm11904_vm0  ;;  %v11911_v42 = vld [vmem:[#allocation12_spill] sm:$0xff] }
 0x148   : > { %v5627_v6 = vpop.eup %5626  ;;  %v1893_v53 = vmul.f32 %v11901_v8, %v886_v44  ;;  %v797_v29 = vadd.f32 1.0, %v5625_v39  ;;  %5646 = vpow2.f32 %v5102_v14  ;;  %v7965_v55 = vsel %vm1807_vm2, 1.0, %v11840_v17  ;;  %v7975_v12 = vld [vmem:[%s11202_s3] sm:$0xff]  ;;  %vm11910_vm15 = vmmov %vm11904_vm0 }
 0x149   : > { %v5629_v32 = vpop.eup %5628  ;;  %1948 = vst.msk [vmem:[#allocation2 + $0xe0] sm:$0xff] %vm11902_vm14, %v1911_v19  ;;  %v1912_v3 = vmul.f32 %v11903_v20, %v905_v26  ;;  %v779_v49 = vadd.f32 1.0, %v5627_v6  ;;  %5648 = vpow2.f32 %v5084_v50  ;;  %v1144_v41 = vshrl.u32 %v7938_v1, 4  ;;  %v11912_v50 = vld [vmem:[#allocation13_spill] sm:$0xff]  ;;  %vm11915_vm12 = vmmov %vm11904_vm0 }
 0x14a   : > { %v5631_v15 = vpop.eup %5630  ;;  %1930 = vst.msk [vmem:[#allocation2 + $0x50] sm:$0xff] %vm11904_vm0, %v1893_v53  ;;  %v887_v2 = vmul.f32 %v5629_v32, %v7728_v57  ;;  %5650 = vrcp.f32 %v797_v29  ;;  %vm1677_vm5 = vcmp.ge.s32.totalorder %v7658_v60, %v6213_v24  ;;  %vm1715_vm7 = vcmp.lt.s32.totalorder %v7658_v60, %v6215_v25  ;;  %vm11916_vm6 = vmmov %vm11904_vm0 }
 0x14b   : > { %v5633_v57 = vpop.eup %5632  ;;  %1949 = vst.msk [vmem:[#allocation2 + $0xe8] sm:$0xff] %vm11905_vm13, %v1912_v3  ;;  %v906_v33 = vmul.f32 %v5631_v15, %v7731_v21  ;;  %5652 = vrcp.f32 %v779_v49  ;;  %v5085_v28 = vmul.f32 -1.442695, %v7955_v36  ;;  %v7981_v59 = vadd.s32 144, %v6156_v51  ;;  %v11917_v49 = vld [vmem:[#allocation14_spill] sm:$0xff]  ;;  %vm11918_vm14 = vmmov %vm11904_vm0 }
 0x14c   : > { %v5635_v62 = vpop.eup %5634  ;;  %v1894_v23 = vmul.f32 %v11906_v34, %v887_v2  ;;  %v798_v52 = vadd.f32 1.0, %v5633_v57  ;;  %v1145_v35 = vmul.u32 24, %v1144_v41  ;;  %v7985_v58 = vsub.s32 5, %v6156_v51  ;;  %v8033_v57 = vld [vmem:[%s11202_s3 + $0x8] sm:$0xff]  ;;  %vm8043_vm0 = vmand %vm1677_vm5, %vm1715_vm7 }
 0x14d   : > { %v5637_v14 = vpop.eup %5636  ;;  %v1913_v40 = vmul.f32 %v11907_v46, %v906_v33  ;;  %v780_v0 = vadd.f32 1.0, %v5635_v62  ;;  %5654 = vpow2.f32 %v5085_v28  ;;  %v7990_v21 = vrot.slane %v7975_v12, %v7950_v47  ;;  %vm11930_vm5 = vmmov %vm11909_vm1 }
 0x14e   : > { %v5639_v31 = vpop.eup %5638  ;;  %1931 = vst.msk [vmem:[#allocation2 + $0x58] sm:$0xff] %vm11909_vm1, %v1894_v23  ;;  %v888_v9 = vmul.f32 %v5637_v14, %v7758_v27  ;;  %5656 = vrcp.f32 %v798_v52  ;;  %v1146_v22 = vsub.s32 %v7658_v60, %v1145_v35  ;;  %v7996_v5 = vsub.s32 2, %v6156_v51  ;;  %v8050_v35 = vld [vmem:[%s11202_s3 + $0x10] sm:$0xff] }
 0x14f   : > { %11908 = vst [vmem:[#allocation6_spill] sm:$0xff] %v7990_v21  ;;  %v5641_v45 = vpop.eup %5640  ;;  %1950 = vst.msk [vmem:[#allocation2 + $0xf0] sm:$0xff] %vm11910_vm15, %v1913_v40  ;;  %v907_v44 = vmul.f32 %v5639_v31, %v7761_v13  ;;  %5658 = vrcp.f32 %v780_v0  ;;  %v8001_v54 = vmul.u32.u64.low 2863311531, %v7981_v59  ;;  %v8002_v1 = vmul.u32.u64.high 2863311531, %v7981_v59, %v8001_v54  ;;  %v11925_v31 = vld [vmem:[#allocation15_spill] sm:$0xff] }
 0x150   : > { %v5643_v39 = vpop.eup %5642  ;;  %v1895_v19 = vmul.f32 %v11911_v42, %v888_v9  ;;  %v799_v27 = vadd.f32 1.0, %v5641_v45  ;;  %vm1375_vm10 = vcmp.ne.s32.totalorder %v1146_v22, 0  ;;  %vm1412_vm3 = vcmp.lt.s32.totalorder %v1146_v22, 0  ;;  %v11927_v54 = vld [vmem:[#allocation16_spill] sm:$0xff] }
 0x151   : > { %v5645_v26 = vpop.eup %5644  ;;  %v1914_v6 = vmul.f32 %v11912_v50, %v907_v44  ;;  %v889_v8 = vmul.f32 %v5643_v39, %v7784_v7  ;;  %vm8007_vm4 = vmand %vm1412_vm3, %vm1375_vm10  ;;  %v1486_v13 = vadd.s32 24, %v1146_v22  ;;  %v8012_v29 = vsub.s32 7, %v6156_v51 }
 0x152   : > { %v5647_v43 = vpop.eup %5646  ;;  %1932 = vst.msk [vmem:[#allocation2 + $0x60] sm:$0xff] %vm11915_vm12, %v1895_v19  ;;  %5660 = vrcp.f32 %v799_v27  ;;  %v781_v32 = vadd.f32 1.0, %v5645_v26  ;;  %vm1678_vm8 = vcmp.ge.s32.totalorder %v7981_v59, %v6213_v24  ;;  %vm1716_vm11 = vcmp.lt.s32.totalorder %v7981_v59, %v6215_v25  ;;  %vm11931_vm10 = vmmov %vm11930_vm5 }
 0x153   : > { %v8020_v7 = vsub.s32 4, %v6156_v51  ;;  %v8023_v20 = vsub.s32 1, %v6156_v51  ;;  %v5649_v3 = vpop.eup %5648  ;;  %1951 = vst.msk [vmem:[#allocation2 + $0xf8] sm:$0xff] %vm11916_vm6, %v1914_v6  ;;  %v1896_v37 = vmul.f32 %v11917_v49, %v889_v8  ;;  %v800_v15 = vadd.f32 1.0, %v5647_v43  ;;  %v11934_v8 = vld [vmem:[#allocation17_spill] sm:$0xff]  ;;  %vm11937_vm6 = vmmov %vm11930_vm5 }
 0x154   : > { %v1523_v2 = vsel %vm8007_vm4, %v1486_v13, %v1146_v22  ;;  %v1155_v41 = vshrl.u32 %v8002_v1, 4  ;;  %v5651_v33 = vpop.eup %5650  ;;  %5662 = vrcp.f32 %v781_v32  ;;  %v782_v28 = vadd.f32 1.0, %v5649_v3 }
 0x155   : > { %vm1560_vm9 = vcmp.ge.s32.totalorder %v1523_v2, 2  ;;  %vm1597_vm2 = vcmp.lt.s32.totalorder %v1523_v2, 18  ;;  %v5653_v62 = vpop.eup %5652  ;;  %1933 = vst.msk [vmem:[#allocation2 + $0x68] sm:$0xff] %vm11918_vm14, %v1896_v37  ;;  %v908_v34 = vmul.f32 %v5651_v33, %v7787_v11  ;;  %5664 = vrcp.f32 %v800_v15  ;;  %v8118_v37 = vld [vmem:[#allocation2 + $0x98] sm:$0xff]  ;;  %v8120_v15 = vld [vmem:[#allocation2 + $0xb0] sm:$0xff]  ;;  %vm11948_vm14 = vmmov %vm11930_vm5 }
 0x156   : > { %v1156_v52 = vmul.u32 24, %v1155_v41  ;;  %v8054_v11 = vrot.slane %v7975_v12, %v7985_v58  ;;  %v890_v14 = vmul.f32 %v5653_v62, %v7804_v18  ;;  %5666 = vrcp.f32 %v782_v28  ;;  %vm8057_vm13 = vmand %vm1560_vm9, %vm1597_vm2  ;;  %v8146_v28 = vld [vmem:[#allocation2 + $0xc8] sm:$0xff] }
 0x157   : > { %v8063_v60 = vrot.slane %v8033_v57, %v7996_v5  ;;  %v8066_v40 = vsub.s32 6, %v6156_v51  ;;  %v5655_v0 = vpop.eup %5654  ;;  %v1915_v9 = vmul.f32 %v11925_v31, %v908_v34  ;;  %v8072_v18 = vrot.slane %v8033_v57, %v8012_v29  ;;  %vm1789_vm7 = vmand %vm8057_vm13, %vm8043_vm0 }
 0x158   : > { %11921 = vst [vmem:[#allocation7_spill] sm:$0xff] %v8054_v11  ;;  %v1157_v22 = vsub.s32 %v7981_v59, %v1156_v52  ;;  %v8075_v45 = vsub.s32 3, %v6156_v51  ;;  %v5657_v44 = vpop.eup %5656  ;;  %v1897_v1 = vmul.f32 %v11927_v54, %v890_v14  ;;  %v783_v39 = vadd.f32 1.0, %v5655_v0  ;;  %vm8130_vm9 = vmand %vm1678_vm8, %vm1716_vm11  ;;  %v8169_v14 = vld [vmem:[#allocation2 + $0xe0] sm:$0xff] }
 0x159   : > { %11924 = vst [vmem:[#allocation8_spill] sm:$0xff] %v8063_v60  ;;  %11926 = vst [vmem:[#allocation9_spill] sm:$0xff] %v8072_v18  ;;  %v8080_v42 = vrot.slane %v8050_v35, %v8020_v7  ;;  %v8084_v19 = vrot.slane %v7975_v12, %v8023_v20  ;;  %v5659_v27 = vpop.eup %5658  ;;  %v909_v26 = vmul.f32 %v5657_v44, %v7815_v4  ;;  %v5122_v49 = vsel %vm1789_vm7, 1.0, %v11840_v17  ;;  %v8181_v44 = vld [vmem:[#allocation2 + $0xa0] sm:$0xff] }
 0x15a   : > { %1952 = vst.msk [vmem:[#allocation2 + $0x100] sm:$0xff] %vm11930_vm5, %v1915_v9  ;;  %vm1376_vm1 = vcmp.ne.s32.totalorder %v1157_v22, 0  ;;  %vm1413_vm15 = vcmp.lt.s32.totalorder %v1157_v22, 0  ;;  %v1487_v51 = vadd.s32 24, %v1157_v22  ;;  %v891_v50 = vmul.f32 %v5659_v27, %v7849_v61  ;;  %vm11941_vm8 = vmmov %vm11930_vm5 }
 0x15b   : > { %11928 = vst [vmem:[#allocation10_spill] sm:$0xff] %v8080_v42  ;;  %11929 = vst [vmem:[#allocation11_spill] sm:$0xff] %v8084_v19  ;;  %5668 = vrcp.f32 %v783_v39  ;;  %v8096_v6 = vrot.slane %v7975_v12, %v8066_v40  ;;  %v8100_v4 = vrot.slane %v8050_v35, %v7950_v47  ;;  %v1916_v53 = vmul.f32 %v11934_v8, %v909_v26 }
 0x15c   : > { %1934 = vst.msk [vmem:[#allocation2 + $0x70] sm:$0xff] %vm11931_vm10, %v1897_v1  ;;  %vm1450_vm3 = vmand %vm1413_vm15, %vm1376_vm1  ;;  %v8105_v43 = vrot.slane %v8033_v57, %v8075_v45  ;;  %v8109_v61 = vrot.slane %v8050_v35, %v7985_v58  ;;  %v5661_v32 = vpop.eup %5660  ;;  %v1898_v3 = vmul.f32 %v7717_v63, %v891_v50  ;;  %vm2114_vm2 = vcmask 1046528   ;;  %v8194_v1 = vld [vmem:[#allocation2 + $0xd0] sm:$0xff] }
 0x15d   : > { %11932 = vst [vmem:[#allocation12_spill] sm:$0xff] %v8096_v6  ;;  %11933 = vst [vmem:[#allocation13_spill] sm:$0xff] %v8100_v4  ;;  %v1524_v13 = vsel %vm1450_vm3, %v1487_v51, %v1157_v22  ;;  %v910_v2 = vmul.f32 %v5661_v32, %v7861_v30  ;;  %v8136_v41 = vrot.slane %v7975_v12, %v7996_v5  ;;  %vm2435_vm1 = vcmask 1045504  }
 0x15e   : > { %11935 = vst [vmem:[#allocation14_spill] sm:$0xff] %v8105_v43  ;;  %11936 = vst [vmem:[#allocation15_spill] sm:$0xff] %v8109_v61  ;;  %vm1561_vm4 = vcmp.ge.s32.totalorder %v1524_v13, 2  ;;  %vm1598_vm12 = vcmp.lt.s32.totalorder %v1524_v13, 18  ;;  %v8140_v33 = vrot.slane %v7975_v12, %v8012_v29  ;;  %v8144_v30 = vrot.slane %v8033_v57, %v8020_v7  ;;  %v5663_v25 = vpop.eup %5662 }
 0x15f   : > { %1953 = vst.msk [vmem:[#allocation2 + $0x108] sm:$0xff] %vm11937_vm6, %v1916_v53  ;;  %11940 = vst [vmem:[#allocation16_spill] sm:$0xff] %v8136_v41  ;;  %v8155_v59 = vrot.slane %v8050_v35, %v8023_v20  ;;  %v8159_v62 = vrot.slane %v8050_v35, %v8066_v40  ;;  %v8163_v34 = vrot.slane %v7975_v12, %v8075_v45  ;;  %v5665_v52 = vpop.eup %5664  ;;  %v8227_v53 = vld [vmem:[#allocation2 + $0xe8] sm:$0xff]  ;;  %vm2756_vm10 = vcmask 1044480  }
 0x160   : > { %1935 = vst.msk [vmem:[#allocation2 + $0x78] sm:$0xff] %vm11941_vm8, %v1898_v3  ;;  %vm8149_vm11 = vmand %vm1561_vm4, %vm1598_vm12  ;;  %v8167_v23 = vrot.slane %v8033_v57, %v7950_v47  ;;  %v1917_v46 = vmul.f32 %v7901_v48, %v910_v2  ;;  %v892_v0 = vmul.f32 %v5663_v25, %v7883_v56  ;;  %v8175_v31 = vrot.slane %v8033_v57, %v7985_v58  ;;  %v5667_v22 = vpop.eup %5666  ;;  %v8183_v47 = vld [vmem:[#allocation2 + $0xb8] sm:$0xff] }
 0x161   : > { %11944 = vst [vmem:[#allocation17_spill] sm:$0xff] %v8163_v34  ;;  %v8179_v9 = vrot.slane %v8050_v35, %v7996_v5  ;;  %v911_v54 = vmul.f32 %v5665_v52, %v7891_v16  ;;  %v8188_v48 = vrot.slane %v8050_v35, %v8012_v29  ;;  %v3528_v56 = vmul.f32 %v7990_v21, %v8118_v37  ;;  %vm1790_vm0 = vmand %vm8149_vm11, %vm8130_vm9  ;;  %v8207_v29 = vld [vmem:[#allocation2 + $0xf8] sm:$0xff]  ;;  %v8250_v24 = vld [vmem:[#allocation2 + $0x100] sm:$0xff] }
 0x162   : > { %11945 = vst [vmem:[#allocation18_spill] sm:$0xff] %v8167_v23  ;;  %v3544_v58 = vmul.f32 %v8120_v15, %v8054_v11  ;;  %1954 = vst.msk [vmem:[#allocation2 + $0x110] sm:$0xff] %vm11948_vm14, %v1917_v46  ;;  %v1899_v5 = vmul.f32 %v7921_v10, %v892_v0  ;;  %v893_v39 = vmul.f32 %v5667_v22, %v7933_v38  ;;  %v5123_v13 = vsel %vm1790_vm0, 1.0, %v11840_v17 }
 0x163   : > { %11946 = vst [vmem:[#allocation19_spill] sm:$0xff] %v8179_v9  ;;  %11947 = vst [vmem:[#allocation20_spill] sm:$0xff] %v8188_v48  ;;  %v8205_v16 = vrot.slane %v7975_v12, %v8020_v7  ;;  %v3560_v27 = vmul.f32 %v8146_v28, %v8063_v60  ;;  %v1918_v26 = vmul.f32 %v7965_v55, %v911_v54  ;;  %vm3077_vm3 = vcmask 1043456  }
 0x164   : > { %v3552_v51 = vadd.f32 %v3544_v58, %v3528_v56  ;;  %v3576_v10 = vmul.f32 %v8169_v14, %v8072_v18  ;;  %v8216_v38 = vmul.f32 %v8084_v19, %v8118_v37  ;;  %vm11950_vm13 = vmmov %vm11930_vm5  ;;  %v1900_v50 = vmul.f32 %v5122_v49, %v893_v39 }
 0x165   : > { %1936 = vst.msk [vmem:[#allocation2 + $0x80] sm:$0xff] %vm11950_vm13, %v1899_v5  ;;  %v3611_v12 = vmul.f32 %v8181_v44, %v8084_v19  ;;  %v8223_v7 = vmul.f32 %v8120_v15, %v8096_v6  ;;  %v3671_v55 = vmul.f32 %v8183_v47, %v8096_v6  ;;  %v5669_v8 = vpop.eup %5668  ;;  %v3592_v3 = vmul.f32 %v8207_v29, %v8080_v42  ;;  %vm11952_vm7 = vmmov %vm11930_vm5 }
 0x166   : > { %11949 = vst [vmem:[#allocation21_spill] sm:$0xff] %v8216_v38  ;;  %1955 = vst.msk [vmem:[#allocation2 + $0x118] sm:$0xff] %vm11930_vm5, %v1918_v26  ;;  %v3568_v32 = vadd.f32 %v3560_v27, %v3552_v51  ;;  %v3731_v49 = vmul.f32 %v8194_v1, %v8105_v43  ;;  %v894_v2 = vmul.f32 %v5669_v8, %v7955_v36  ;;  %v11231_v46 = vrot.slane %v8216_v38, 1 }
 0x167   : > { %11951 = vst [vmem:[#allocation22_spill] sm:$0xff] %v8223_v7  ;;  %1937 = vst.msk [vmem:[#allocation2 + $0x88] sm:$0xff] %vm11952_vm7, %v1900_v50  ;;  %v8244_v25 = vrot.slane %v8033_v57, %v8023_v20  ;;  %v8248_v63 = vrot.slane %v8033_v57, %v8066_v40  ;;  %v3640_v17 = vrot.slane %v3611_v12, 1  ;;  %v11228_v0 = vrot.slane %v8223_v7, 1 }
 0x168   : > { %v3584_v52 = vadd.f32 %v3576_v10, %v3568_v32  ;;  %v8256_v36 = vmul.f32 %v8146_v28, %v8105_v43  ;;  %v1901_v22 = vmul.f32 %v5123_v13, %v894_v2  ;;  %v3700_v54 = vrot.slane %v3671_v55, 1  ;;  %vm11956_vm15 = vmmov %vm11930_vm5 }
 0x169   : > { %v8260_v20 = vmul.f32 %v8169_v14, %v8100_v4  ;;  %v3791_v57 = vmul.f32 %v8227_v53, %v8100_v4  ;;  %v3641_v56 = vsel %vm2114_vm2, %v11231_v46, %v3640_v17  ;;  %v3760_v58 = vrot.slane %v3731_v49, 1  ;;  %vm12472_vm4 = vmmov %vm11930_vm5 }
 0x16a   : > { %11953 = vst [vmem:[#allocation23_spill] sm:$0xff] %v8256_v36  ;;  %v3600_v40 = vadd.f32 %v3592_v3, %v3584_v52  ;;  %v8269_v5 = vmul.f32 %v8207_v29, %v8109_v61  ;;  %1938 = vst.msk [vmem:[#allocation2 + $0x90] sm:$0xff] %vm11956_vm15, %v1901_v22  ;;  %v3851_v27 = vmul.f32 %v8250_v24, %v8109_v61  ;;  %v11227_v12 = vrot.slane %v8256_v36, 1 }
 0x16b   : > { %11954 = vst [vmem:[#allocation24_spill] sm:$0xff] %v8260_v20  ;;  %v3820_v39 = vrot.slane %v3791_v57, 1  ;;  %v8276_v26 = vmul.f32 %v8136_v41, %v8118_v37  ;;  %v3911_v51 = vmul.f32 %v8181_v44, %v8136_v41  ;;  %v8282_v10 = vrot.slane %v8050_v35, %v8075_v45  ;;  %vm12475_vm12 = vmmov %vm12472_vm4 }
 0x16c   : > { %11955 = vst [vmem:[#allocation25_spill] sm:$0xff] %v8269_v5  ;;  %v3660_v50 = vadd.f32 %v3641_v56, %v3600_v40  ;;  %v3971_v55 = vmul.f32 %v8183_v47, %v8140_v33  ;;  %v3701_v8 = vsel %vm2114_vm2, %v11228_v0, %v3700_v54  ;;  %v11226_v13 = vrot.slane %v8260_v20, 1  ;;  %vm12476_vm6 = vmmov %vm12472_vm4 }
 0x16d   : > { %11957 = vst [vmem:[#allocation26_spill] sm:$0xff] %v8276_v26  ;;  %11958 = vst [vmem:[#allocation27_spill] sm:$0xff] %v8282_v10  ;;  %v3880_v32 = vrot.slane %v3851_v27, 1  ;;  %v8293_v3 = vmul.f32 %v8120_v15, %v8140_v33  ;;  %v3761_v45 = vsel %vm2114_vm2, %v11227_v12, %v3760_v58  ;;  %v11225_v49 = vrot.slane %v8269_v5, 1 }
 0x16e   : > { %v3720_v35 = vadd.f32 %v3701_v8, %v3660_v50  ;;  %v3940_v2 = vrot.slane %v3911_v51, 2  ;;  %v3821_v17 = vsel %vm2114_vm2, %v11226_v13, %v3820_v39  ;;  %v11229_v52 = vrot.slane %v8276_v26, 2  ;;  %vm12477_vm9 = vmmov %vm12472_vm4 }
 0x16f   : > { %11959 = vst [vmem:[#allocation28_spill] sm:$0xff] %v8293_v3  ;;  %v4000_v22 = vrot.slane %v3971_v55, 2  ;;  %v4031_v54 = vmul.f32 %v8194_v1, %v8144_v30  ;;  %v8307_v40 = vmul.f32 %v8146_v28, %v8144_v30  ;;  %v8311_v56 = vmul.f32 %v8169_v14, %v8155_v59 }
 0x170   : > { %v3780_v57 = vadd.f32 %v3761_v45, %v3720_v35  ;;  %v4091_v58 = vmul.f32 %v8227_v53, %v8155_v59  ;;  %v3881_v39 = vsel %vm2114_vm2, %v11225_v49, %v3880_v32  ;;  %v11230_v27 = vrot.slane %v8293_v3, 2 }
 0x171   : > { %11960 = vst [vmem:[#allocation29_spill] sm:$0xff] %v8307_v40  ;;  %11961 = vst [vmem:[#allocation30_spill] sm:$0xff] %v8311_v56  ;;  %v8321_v51 = vmul.f32 %v8207_v29, %v8159_v62  ;;  %v4151_v50 = vmul.f32 %v8250_v24, %v8159_v62  ;;  %v3941_v8 = vsel %vm2435_vm1, %v11229_v52, %v3940_v2  ;;  %v4060_v35 = vrot.slane %v4031_v54, 2 }
 0x172   : > { %v3840_v55 = vadd.f32 %v3821_v17, %v3780_v57  ;;  %v4211_v45 = vmul.f32 %v8181_v44, %v8163_v34  ;;  %v4001_v32 = vsel %vm2435_vm1, %v11230_v27, %v4000_v22  ;;  %v4120_v49 = vrot.slane %v4091_v58, 2 }
 0x173   : > { %11962 = vst [vmem:[#allocation31_spill] sm:$0xff] %v8321_v51  ;;  %v4180_v13 = vrot.slane %v4151_v50, 2  ;;  %v8335_v12 = vmul.f32 %v8163_v34, %v8118_v37  ;;  %v11232_v17 = vrot.slane %v8307_v40, 2  ;;  %v11236_v57 = vrot.slane %v8311_v56, 2 }
 0x174   : > { %v3900_v0 = vadd.f32 %v3881_v39, %v3840_v55  ;;  %v11235_v2 = vrot.slane %v8321_v51, 2  ;;  %v4240_v54 = vrot.slane %v4211_v45, 3  ;;  %v8342_v52 = vmul.f32 %v8120_v15, %v8167_v23 }
 0x175   : > { %11963 = vst [vmem:[#allocation32_spill] sm:$0xff] %v8335_v12  ;;  %v4271_v22 = vmul.f32 %v8183_v47, %v8167_v23  ;;  %v8348_v58 = vmul.f32 %v8146_v28, %v8175_v31  ;;  %v4061_v50 = vsel %vm2435_vm1, %v11232_v17, %v4060_v35  ;;  %v4331_v55 = vmul.f32 %v8194_v1, %v8175_v31 }
 0x176   : > { %11964 = vst [vmem:[#allocation33_spill] sm:$0xff] %v8342_v52  ;;  %v3960_v39 = vadd.f32 %v3941_v8, %v3900_v0  ;;  %v8357_v45 = vmul.f32 %v8169_v14, %v8179_v9  ;;  %v4121_v27 = vsel %vm2435_vm1, %v11236_v57, %v4120_v49  ;;  %v4181_v46 = vsel %vm2435_vm1, %v11235_v2, %v4180_v13 }
 0x177   : > { %11965 = vst [vmem:[#allocation34_spill] sm:$0xff] %v8348_v58  ;;  %v11240_v0 = vrot.slane %v8335_v12, 3  ;;  %v4391_v8 = vmul.f32 %v8227_v53, %v8179_v9  ;;  %v4300_v17 = vrot.slane %v4271_v22, 3  ;;  %v8370_v40 = vmul.f32 %v8207_v29, %v8188_v48 }
 0x178   : > { %11966 = vst [vmem:[#allocation35_spill] sm:$0xff] %v8357_v45  ;;  %v4020_v35 = vadd.f32 %v4001_v32, %v3960_v39  ;;  %v4451_v56 = vmul.f32 %v8250_v24, %v8188_v48  ;;  %v11243_v13 = vrot.slane %v8342_v52, 3  ;;  %v11242_v2 = vrot.slane %v8348_v58, 3  ;;  %v8463_v58 = vld [vmem:[#allocation2 + $0x38] sm:$0xff] }
 0x179   : > { %11967 = vst [vmem:[#allocation36_spill] sm:$0xff] %v8370_v40  ;;  %v4241_v49 = vsel %vm2756_vm10, %v11240_v0, %v4240_v54  ;;  %v4360_v57 = vrot.slane %v4331_v55, 3  ;;  %v11241_v32 = vrot.slane %v8357_v45, 3  ;;  %v4420_v22 = vrot.slane %v4391_v8, 3  ;;  %11980 = vst [vmem:[#allocation48_spill] sm:$0xff] %v8463_v58 }
 0x17a   : > { %v4080_v51 = vadd.f32 %v4061_v50, %v4020_v35  ;;  %v4511_v39 = vmul.f32 %v8181_v44, %v8205_v16  ;;  %v4480_v3 = vrot.slane %v4451_v56, 3  ;;  %v8384_v26 = vmul.f32 %v8205_v16, %v8118_v37 }
 0x17b   : > { %v8388_v54 = vmul.f32 %v8120_v15, %v8244_v25  ;;  %v4571_v0 = vmul.f32 %v8183_v47, %v8244_v25  ;;  %v4301_v50 = vsel %vm2756_vm10, %v11243_v13, %v4300_v17  ;;  %v11244_v8 = vrot.slane %v8370_v40, 3 }
 0x17c   : > { %11968 = vst [vmem:[#allocation37_spill] sm:$0xff] %v8384_v26  ;;  %v4140_v55 = vadd.f32 %v4121_v27, %v4080_v51  ;;  %v8398_v44 = vmul.f32 %v8146_v28, %v8248_v63  ;;  %v4361_v37 = vsel %vm2756_vm10, %v11242_v2, %v4360_v57  ;;  %v4540_v15 = vrot.slane %v4511_v39, 4  ;;  %v8405_v27 = vld [vmem:[#allocation2 + $0x18] sm:$0xff]  ;;  %v8416_v57 = vld [vmem:[#allocation2] sm:$0xff]  ;;  %v8428_v39 = vld [vmem:[#allocation2 + $0x30] sm:$0xff] }
 0x17d   : > { %11969 = vst [vmem:[#allocation38_spill] sm:$0xff] %v8388_v54  ;;  %v4600_v56 = vrot.slane %v4571_v0, 4  ;;  %v4631_v47 = vmul.f32 %v8194_v1, %v8248_v63  ;;  %11971 = vst [vmem:[#allocation40_spill] sm:$0xff] %v8405_v27  ;;  %v4421_v17 = vsel %vm2756_vm10, %v11241_v32, %v4420_v22  ;;  %v8412_v28 = vmul.f32 %v8169_v14, %v8282_v10  ;;  %v8421_v1 = vld [vmem:[%s11202_s3 + $0x18] ss:$0 sm:$0xff]  ;;  %v8453_v32 = vld [vmem:[#allocation2 + $0x60] sm:$0xff] }
 0x17e   : > { %11970 = vst [vmem:[#allocation39_spill] sm:$0xff] %v8398_v44  ;;  %v4200_v51 = vadd.f32 %v4181_v46, %v4140_v55  ;;  %v4691_v35 = vmul.f32 %v8227_v53, %v8282_v10  ;;  %11973 = vst [vmem:[#allocation42_spill] sm:$0xff] %v8421_v1  ;;  %v4481_v46 = vsel %vm2756_vm10, %v11244_v8, %v4480_v3  ;;  %v11247_v0 = vrot.slane %v8384_v26, 4  ;;  %v8430_v55 = vld [vmem:[#allocation2 + $0x48] sm:$0xff]  ;;  %v8439_v3 = vld [vmem:[#allocation2 + $0x20] sm:$0xff] }
 0x17f   : > { %11972 = vst [vmem:[#allocation41_spill] sm:$0xff] %v8412_v28  ;;  %v11249_v22 = vrot.slane %v8388_v54, 4  ;;  %v4660_v14 = vrot.slane %v4631_v47, 4  ;;  %11974 = vst [vmem:[#allocation43_spill] sm:$0xff] %v8428_v39  ;;  %v8435_v2 = vmul.f32 %v8421_v1, %v8207_v29  ;;  %v4751_v13 = vmul.f32 %v8421_v1, %v8250_v24 }
 0x180   : > { %11975 = vst [vmem:[#allocation44_spill] sm:$0xff] %v8430_v55  ;;  %v4260_v53 = vadd.f32 %v4241_v49, %v4200_v51  ;;  %11977 = vst [vmem:[#allocation46_spill] sm:$0xff] %v8439_v3  ;;  %v4541_v47 = vsel %vm3077_vm3, %v11247_v0, %v4540_v15  ;;  %v8447_v49 = vld [vmem:[#allocation2 + $0x8] sm:$0xff]  ;;  %v1990_v51 = vmul.f32 %v7990_v21, %v8416_v57  ;;  %v11979_v40 = vrot.slane %v8398_v44, 4 }
 0x181   : > { %11976 = vst [vmem:[#allocation45_spill] sm:$0xff] %v8435_v2  ;;  %v4601_v8 = vsel %vm3077_vm3, %v11249_v22, %v4600_v56  ;;  %v2010_v29 = vmul.f32 %v8054_v11, %v8405_v27  ;;  %11978 = vst [vmem:[#allocation47_spill] sm:$0xff] %v8453_v32  ;;  %v11255_v15 = vrot.slane %v8412_v28, 4  ;;  %v4720_v0 = vrot.slane %v4691_v35, 4 }
 0x182   : > { %v4320_v24 = vadd.f32 %v4301_v50, %v4260_v53  ;;  %v4661_v26 = vsel %vm3077_vm3, %v11979_v40, %v4660_v14  ;;  %v4780_v54 = vrot.slane %v4751_v13, 4  ;;  %v2030_v22 = vmul.f32 %v8063_v60, %v8428_v39 }
 0x183   : > { %v2018_v56 = vadd.f32 %v2010_v29, %v1990_v51  ;;  %v2050_v45 = vmul.f32 %v8072_v18, %v8430_v55  ;;  %v11262_v50 = vrot.slane %v8435_v2, 4  ;;  %v1991_v53 = vmul.f32 %v7990_v21, %v8447_v49 }
 0x184   : > { %v4380_v52 = vadd.f32 %v4361_v37, %v4320_v24  ;;  %v2011_v40 = vmul.f32 %v8054_v11, %v8439_v3  ;;  %v2070_v13 = vmul.f32 %v8080_v42, %v8453_v32  ;;  %v2090_v14 = vmul.f32 %v8084_v19, %v8416_v57 }
 0x185   : > { %v2038_v35 = vadd.f32 %v2030_v22, %v2018_v56  ;;  %v8476_v51 = vmul.f32 %v8084_v19, %v8447_v49  ;;  %v4721_v29 = vsel %vm3077_vm3, %v11255_v15, %v4720_v0  ;;  %v2155_v24 = vmul.f32 %v8096_v6, %v8405_v27  ;;  %v8487_v56 = vld [vmem:[#allocation2 + $0x50] sm:$0xff]  ;;  %v8495_v0 = vld [vmem:[#allocation2 + $0x68] sm:$0xff] }
 0x186   : > { %v4440_v37 = vadd.f32 %v4421_v17, %v4380_v52  ;;  %v8485_v22 = vmul.f32 %v8096_v6, %v8439_v3  ;;  %11981 = vst [vmem:[#allocation49_spill] sm:$0xff] %v8487_v56  ;;  %v4781_v44 = vsel %vm3077_vm3, %v11262_v50, %v4780_v54  ;;  %v2031_v52 = vmul.f32 %v8063_v60, %v8463_v58 }
 0x187   : > { %v2058_v17 = vadd.f32 %v2050_v45, %v2038_v35  ;;  %v11263_v28 = vrot.slane %v8476_v51, 1  ;;  %11982 = vst [vmem:[#allocation50_spill] sm:$0xff] %v8495_v0  ;;  %v2115_v12 = vrot.slane %v2090_v14, 1  ;;  %v2219_v20 = vmul.f32 %v8105_v43, %v8428_v39 }
 0x188   : > { %v4500_v15 = vadd.f32 %v4481_v46, %v4440_v37  ;;  %v11264_v5 = vrot.slane %v8485_v22, 1  ;;  %v2019_v36 = vadd.f32 %v2011_v40, %v1991_v53  ;;  %v2179_v2 = vrot.slane %v2155_v24, 1 }
 0x189   : > { %v2078_v7 = vadd.f32 %v2070_v13, %v2058_v17  ;;  %v8502_v54 = vmul.f32 %v8105_v43, %v8463_v58  ;;  %v2117_v45 = vsel %vm2114_vm2, %v2115_v12, %v11263_v28  ;;  %v2283_v46 = vmul.f32 %v8100_v4, %v8430_v55 }
 0x18a   : > { %v4560_v50 = vadd.f32 %v4541_v47, %v4500_v15  ;;  %v8511_v35 = vmul.f32 %v8100_v4, %v8487_v56  ;;  %v2347_v40 = vmul.f32 %v8109_v61, %v8453_v32  ;;  %v8518_v47 = vmul.f32 %v8109_v61, %v8495_v0 }
 0x18b   : > { %v2143_v14 = vadd.f32 %v2117_v45, %v2078_v7  ;;  %v11265_v53 = vrot.slane %v8502_v54, 1  ;;  %v2181_v12 = vsel %vm2114_vm2, %v2179_v2, %v11264_v5  ;;  %v2243_v13 = vrot.slane %v2219_v20, 1 }
 0x18c   : > { %v4620_v15 = vadd.f32 %v4601_v8, %v4560_v50  ;;  %v11266_v37 = vrot.slane %v8511_v35, 1  ;;  %v2051_v7 = vmul.f32 %v8072_v18, %v8487_v56  ;;  %v2307_v17 = vrot.slane %v2283_v46, 1 }
 0x18d   : > { %v2207_v24 = vadd.f32 %v2181_v12, %v2143_v14  ;;  %v2411_v45 = vmul.f32 %v8136_v41, %v8416_v57  ;;  %v2245_v8 = vsel %vm2114_vm2, %v2243_v13, %v11265_v53  ;;  %v11272_v50 = vrot.slane %v8518_v47, 1 }
 0x18e   : > { %v4680_v28 = vadd.f32 %v4661_v26, %v4620_v15  ;;  %v8534_v20 = vmul.f32 %v8136_v41, %v8447_v49  ;;  %v2371_v5 = vrot.slane %v2347_v40, 1  ;;  %v2476_v14 = vmul.f32 %v8140_v33, %v8405_v27  ;;  %v8553_v40 = vld [vmem:[%s11203_s4] ss:$0 sm:$0xff] }
 0x18f   : > { %v2271_v2 = vadd.f32 %v2245_v8, %v2207_v24  ;;  %v8540_v46 = vmul.f32 %v8140_v33, %v8439_v3  ;;  %v2309_v15 = vsel %vm2114_vm2, %v2307_v17, %v11266_v37  ;;  %v8548_v13 = vmul.f32 %v8144_v30, %v8463_v58 }
 0x190   : > { %v4740_v26 = vadd.f32 %v4721_v29, %v4680_v28  ;;  %v2039_v24 = vadd.f32 %v2031_v52, %v2019_v36  ;;  %v2540_v28 = vmul.f32 %v8144_v30, %v8428_v39  ;;  %v2373_v17 = vsel %vm2114_vm2, %v2371_v5, %v11272_v50 }
 0x191   : > { %v2335_v8 = vadd.f32 %v2309_v15, %v2271_v2  ;;  %v11273_v53 = vrot.slane %v8540_v46, 2  ;;  %v2436_v37 = vrot.slane %v2411_v45, 2  ;;  %v2500_v12 = vrot.slane %v2476_v14, 2 }
 0x192   : > { %v4800_v29 = vadd.f32 %v4781_v44, %v4740_v26  ;;  %v11276_v18 = vrot.slane %v8548_v13, 2  ;;  %v2604_v60 = vmul.f32 %v8155_v59, %v8430_v55  ;;  %v8566_v36 = vmul.f32 %v8155_v59, %v8487_v56 }
 0x193   : > { %v2399_v38 = vadd.f32 %v2373_v17, %v2335_v8  ;;  %v11983_v44 = vrot.slane %v8534_v20, 2  ;;  %v2668_v5 = vmul.f32 %v8159_v62, %v8453_v32  ;;  %v8578_v45 = vmul.f32 %v8159_v62, %v8495_v0 }
 0x194   : > { %v8569_v52 = vadd.f32 %v8553_v40, %v4800_v29  ;;  %v2502_v26 = vsel %vm2435_vm1, %v2500_v12, %v11273_v53  ;;  %v2564_v15 = vrot.slane %v2540_v28, 2  ;;  %v8585_v8 = vmul.f32 %v8163_v34, %v8447_v49 }
 0x195   : > { %v2438_v2 = vsel %vm2435_vm1, %v2436_v37, %v11983_v44  ;;  %11984 = vst [vmem:[#allocation51_spill] sm:$0xff] %v8578_v45  ;;  %v2732_v44 = vmul.f32 %v8163_v34, %v8416_v57  ;;  %v2628_v12 = vrot.slane %v2604_v60, 2  ;;  %v2692_v28 = vrot.slane %v2668_v5, 2 }
 0x196   : > { %v2464_v14 = vadd.f32 %v2438_v2, %v2399_v38  ;;  %11985 = vst [vmem:[#allocation52_spill] sm:$0xff] %v8585_v8  ;;  %v5163_v29 = vmul.f32 -1.442695, %v8569_v52  ;;  %v2566_v38 = vsel %vm2435_vm1, %v2564_v15, %v11276_v18  ;;  %v2797_v53 = vmul.f32 %v8167_v23, %v8405_v27 }
 0x197   : > { %v8600_v37 = vmul.f32 %v8167_v23, %v8439_v3  ;;  %v2059_v17 = vadd.f32 %v2051_v7, %v2039_v24  ;;  %v11986_v60 = vrot.slane %v8566_v36, 2  ;;  %v11987_v15 = vrot.slane %v8578_v45, 2 }
 0x198   : > { %v2528_v50 = vadd.f32 %v2502_v26, %v2464_v14  ;;  %5670 = vpow2.f32 %v5163_v29  ;;  %v2861_v14 = vmul.f32 %v8175_v31, %v8428_v39  ;;  %v8606_v26 = vmul.f32 %v8175_v31, %v8463_v58 }
 0x199   : > { %v2630_v5 = vsel %vm2435_vm1, %v2628_v12, %v11986_v60  ;;  %v2694_v29 = vsel %vm2435_vm1, %v2692_v28, %v11987_v15  ;;  %v2757_v18 = vrot.slane %v2732_v44, 3  ;;  %v8616_v7 = vmul.f32 %v8179_v9, %v8487_v56 }
 0x19a   : > { %v2592_v11 = vadd.f32 %v2566_v38, %v2528_v50  ;;  %v2925_v38 = vmul.f32 %v8179_v9, %v8430_v55  ;;  %v8623_v2 = vmul.f32 %v8188_v48, %v8495_v0  ;;  %v11989_v12 = vrot.slane %v8585_v8, 3 }
 0x19b   : > { %11988 = vst [vmem:[#allocation53_spill] sm:$0xff] %v8616_v7  ;;  %v2821_v28 = vrot.slane %v2797_v53, 3  ;;  %v2885_v44 = vrot.slane %v2861_v14, 3  ;;  %v2989_v15 = vmul.f32 %v8188_v48, %v8453_v32  ;;  %v3053_v24 = vmul.f32 %v8205_v16, %v8416_v57 }
 0x19c   : > { %v2656_v50 = vadd.f32 %v2630_v5, %v2592_v11  ;;  %v2759_v60 = vsel %vm2756_vm10, %v2757_v18, %v11989_v12  ;;  %v8637_v8 = vmul.f32 %v8205_v16, %v8447_v49  ;;  %v3118_v18 = vmul.f32 %v8244_v25, %v8405_v27 }
 0x19d   : > { %v8643_v53 = vmul.f32 %v8244_v25, %v8439_v3  ;;  %v2949_v12 = vrot.slane %v2925_v38, 3  ;;  %v3182_v57 = vmul.f32 %v8248_v63, %v8428_v39  ;;  %v3013_v45 = vrot.slane %v2989_v15, 3 }
 0x19e   : > { %v2720_v21 = vadd.f32 %v2694_v29, %v2656_v50  ;;  %v11991_v29 = vrot.slane %v8600_v37, 3  ;;  %v8654_v11 = vmul.f32 %v8248_v63, %v8463_v58  ;;  %v3078_v27 = vrot.slane %v3053_v24, 4 }
 0x19f   : > { %11990 = vst [vmem:[#allocation54_spill] sm:$0xff] %v8643_v53  ;;  %v3246_v38 = vmul.f32 %v8282_v10, %v8430_v55  ;;  %v11993_v15 = vrot.slane %v8616_v7, 3  ;;  %v11994_v5 = vrot.slane %v8623_v2, 3  ;;  %v3142_v58 = vrot.slane %v3118_v18, 4 }
 0x1a0   : > { %v2785_v14 = vadd.f32 %v2759_v60, %v2720_v21  ;;  %v2823_v50 = vsel %vm2756_vm10, %v2821_v28, %v11991_v29  ;;  %v11992_v21 = vrot.slane %v8606_v26, 3  ;;  %v3206_v39 = vrot.slane %v3182_v57, 4 }
 0x1a1   : > { %v2951_v29 = vsel %vm2756_vm10, %v2949_v12, %v11993_v15  ;;  %v3015_v49 = vsel %vm2756_vm10, %v3013_v45, %v11994_v5  ;;  %v8676_v7 = vmul.f32 %v8282_v10, %v8487_v56  ;;  %v8678_v12 = vld [vmem:[#allocation2 + $0x28] sm:$0xff]  ;;  %v8680_v15 = vld [vmem:[#allocation2 + $0x58] sm:$0xff]  ;;  %v8682_v45 = vld [vmem:[#allocation2 + $0x70] sm:$0xff]  ;;  %v12000_v5 = vrot.slane %v8643_v53, 4 }
 0x1a2   : > { %v2849_v3 = vadd.f32 %v2823_v50, %v2785_v14  ;;  %v2887_v60 = vsel %vm2756_vm10, %v2885_v44, %v11992_v21  ;;  %v5671_v28 = vpop.eup %5670  ;;  %v8667_v14 = vld [vmem:[#allocation2 + $0x10] sm:$0xff]  ;;  %v8669_v50 = vld [vmem:[#allocation2 + $0x40] sm:$0xff]  ;;  %v11996_v21 = vrot.slane %v8637_v8, 4  ;;  %11997 = vst [vmem:[#allocation56_spill] sm:$0xff] %v8678_v12  ;;  %11998 = vst [vmem:[#allocation57_spill] sm:$0xff] %v8680_v15  ;;  %v3310_v57 = vmul.f32 %v8421_v1, %v8453_v32 }
 0x1a3   : > { %11995 = vst [vmem:[#allocation55_spill] sm:$0xff] %v8669_v50  ;;  %v4840_v44 = vadd.f32 1.0, %v5671_v28  ;;  %11999 = vst [vmem:[#allocation58_spill] sm:$0xff] %v8682_v45  ;;  %v3144_v18 = vsel %vm3077_vm3, %v3142_v58, %v12000_v5  ;;  %v3270_v28 = vrot.slane %v3246_v38, 4  ;;  %v8696_v56 = vmul.f32 %v8421_v1, %v8495_v0 }
 0x1a4   : > { %v2913_v24 = vadd.f32 %v2887_v60, %v2849_v3  ;;  %v3080_v55 = vsel %vm3077_vm3, %v3078_v27, %v11996_v21  ;;  %v2071_v27 = vmul.f32 %v8080_v42, %v8495_v0  ;;  %v2092_v21 = vmul.f32 %v8084_v19, %v8667_v14 }
 0x1a5   : > { %5672 = vrcp.f32 %v4840_v44  ;;  %v2157_v58 = vmul.f32 %v8096_v6, %v8678_v12  ;;  %v2221_v5 = vmul.f32 %v8105_v43, %v8669_v50  ;;  %v2349_v38 = vmul.f32 %v8109_v61, %v8682_v45 }
 0x1a6   : > { %v2977_v60 = vadd.f32 %v2951_v29, %v2913_v24  ;;  %v2079_v53 = vadd.f32 %v2071_v27, %v2059_v17  ;;  %v2118_v32 = vrot.slane %v2092_v21, 1  ;;  %v2285_v29 = vmul.f32 %v8100_v4, %v8680_v15 }
 0x1a7   : > { %v2182_v24 = vrot.slane %v2157_v58, 1  ;;  %v2246_v0 = vrot.slane %v2221_v5, 1  ;;  %v2413_v17 = vmul.f32 %v8136_v41, %v8667_v14  ;;  %v12001_v42 = vrot.slane %v8654_v11, 4 }
 0x1a8   : > { %v3041_v3 = vadd.f32 %v3015_v49, %v2977_v60  ;;  %v3334_v49 = vrot.slane %v3310_v57, 4  ;;  %v12002_v60 = vrot.slane %v8476_v51, 1  ;;  %v11311_v4 = vrot.slane %v8696_v56, 4 }
 0x1a9   : > { %v3208_v43 = vsel %vm3077_vm3, %v3206_v39, %v12001_v42  ;;  %v2310_v6 = vrot.slane %v2285_v29, 1  ;;  %v2374_v44 = vrot.slane %v2349_v38, 1  ;;  %v12003_v5 = vrot.slane %v8485_v22, 1 }
 0x1aa   : > { %v3106_v27 = vadd.f32 %v3080_v55, %v3041_v3  ;;  %v2119_v21 = vsel %vm2114_vm2, %v12002_v60, %v2118_v32  ;;  %v2439_v55 = vrot.slane %v2413_v17, 2  ;;  %v2478_v3 = vmul.f32 %v8140_v33, %v8678_v12 }
 0x1ab   : > { %v2144_v61 = vadd.f32 %v2119_v21, %v2079_v53  ;;  %v2183_v41 = vsel %vm2114_vm2, %v12003_v5, %v2182_v24  ;;  %v12004_v39 = vrot.slane %v8502_v54, 1  ;;  %v2542_v32 = vmul.f32 %v8144_v30, %v8669_v50 }
 0x1ac   : > { %v3170_v58 = vadd.f32 %v3144_v18, %v3106_v27  ;;  %v2606_v53 = vmul.f32 %v8155_v59, %v8680_v15  ;;  %v2503_v57 = vrot.slane %v2478_v3, 2  ;;  %v2670_v22 = vmul.f32 %v8159_v62, %v8682_v45 }
 0x1ad   : > { %v2208_v42 = vadd.f32 %v2183_v41, %v2144_v61  ;;  %v2247_v51 = vsel %vm2114_vm2, %v12004_v39, %v2246_v0  ;;  %v2734_v29 = vmul.f32 %v8163_v34, %v8667_v14  ;;  %v12005_v61 = vrot.slane %v8676_v7, 4 }
 0x1ae   : > { %v3234_v18 = vadd.f32 %v3208_v43, %v3170_v58  ;;  %v3336_v0 = vsel %vm3077_vm3, %v3334_v49, %v11311_v4  ;;  %v12006_v38 = vrot.slane %v8511_v35, 1  ;;  %v12007_v27 = vrot.slane %v8518_v47, 1 }
 0x1af   : > { %v3272_v41 = vsel %vm3077_vm3, %v3270_v28, %v12005_v61  ;;  %v2272_v54 = vadd.f32 %v2247_v51, %v2208_v42  ;;  %v5673_v24 = vpop.eup %5672  ;;  %v12008_v21 = vrot.slane %v8534_v20, 2  ;;  %v2799_v28 = vmul.f32 %v8167_v23, %v8678_v12 }
 0x1b0   : > { %v2311_v43 = vsel %vm2114_vm2, %v12006_v38, %v2310_v6  ;;  %v3298_v17 = vadd.f32 %v3272_v41, %v3234_v18  ;;  %v2375_v60 = vsel %vm2114_vm2, %v12007_v27, %v2374_v44  ;;  %v4864_v49 = vmul.f32 %v5673_v24, %v8569_v52 }
 0x1b1   : > { %v2440_v58 = vsel %vm2435_vm1, %v12008_v21, %v2439_v55  ;;  %v2336_v5 = vadd.f32 %v2311_v43, %v2272_v54  ;;  %v2567_v3 = vrot.slane %v2542_v32, 2  ;;  %v2631_v35 = vrot.slane %v2606_v53, 2  ;;  %v12012_v43 = vld [vmem:[#allocation51_spill] sm:$0xff] }
 0x1b2   : > { %v3362_v42 = vadd.f32 %v3336_v0, %v3298_v17  ;;  %v12009_v6 = vrot.slane %v8540_v46, 2  ;;  %v2695_v47 = vrot.slane %v2670_v22, 2  ;;  %v2760_v51 = vrot.slane %v2734_v29, 3  ;;  %4893 = vrot.lane.b32.xlu1 %v4864_v49, %s5873_s16 }
 0x1b3   : > { %v2400_v20 = vadd.f32 %v2375_v60, %v2336_v5  ;;  %v2863_v44 = vmul.f32 %v8175_v31, %v8669_v50  ;;  %v2927_v52 = vmul.f32 %v8179_v9, %v8680_v15  ;;  %v2991_v55 = vmul.f32 %v8188_v48, %v8682_v45  ;;  %v12014_v60 = vld [vmem:[#allocation52_spill] sm:$0xff] }
 0x1b4   : > { %v2504_v39 = vsel %vm2435_vm1, %v12009_v6, %v2503_v57  ;;  %v8761_v32 = vadd.f32 %v8553_v40, %v3362_v42  ;;  %v2824_v46 = vrot.slane %v2799_v28, 3  ;;  %v3055_v53 = vmul.f32 %v8205_v16, %v8667_v14  ;;  %v12018_v6 = vld [vmem:[#allocation53_spill] sm:$0xff] }
 0x1b5   : > { %v3120_v18 = vmul.f32 %v8244_v25, %v8678_v12  ;;  %v2465_v57 = vadd.f32 %v2440_v58, %v2400_v20  ;;  %v12010_v22 = vrot.slane %v8548_v13, 2  ;;  %v2888_v61 = vrot.slane %v2863_v44, 3 }
 0x1b6   : > { %v2952_v41 = vrot.slane %v2927_v52, 3  ;;  %v5144_v0 = vmul.f32 -1.442695, %v8761_v32  ;;  %v12011_v54 = vrot.slane %v8566_v36, 2  ;;  %v12013_v24 = vrot.slane %v12012_v43, 2  ;;  %v12021_v52 = vld [vmem:[#allocation40_spill] sm:$0xff] }
 0x1b7   : > { %v2568_v29 = vsel %vm2435_vm1, %v12010_v22, %v2567_v3  ;;  %v3016_v17 = vrot.slane %v2991_v55, 3  ;;  %v2529_v27 = vadd.f32 %v2504_v39, %v2465_v57  ;;  %v12015_v21 = vrot.slane %v12014_v60, 3  ;;  %v12025_v57 = vld [vmem:[#allocation44_spill] sm:$0xff] }
 0x1b8   : > { %v2632_v38 = vsel %vm2435_vm1, %v12011_v54, %v2631_v35  ;;  %v2696_v14 = vsel %vm2435_vm1, %v12013_v24, %v2695_v47  ;;  %v3081_v58 = vrot.slane %v3055_v53, 4  ;;  %v3184_v28 = vmul.f32 %v8248_v63, %v8669_v50  ;;  %v12024_v53 = vld [vmem:[#allocation7_spill] sm:$0xff]  ;;  %v12026_v22 = vld [vmem:[#allocation8_spill] sm:$0xff]  ;;  %v12029_v24 = vld [vmem:[#allocation9_spill] sm:$0xff] }
 0x1b9   : > { %v2761_v13 = vsel %vm2756_vm10, %v12015_v21, %v2760_v51  ;;  %5674 = vpow2.f32 %v5144_v0  ;;  %v12016_v49 = vrot.slane %v8600_v37, 3  ;;  %v12017_v5 = vrot.slane %v8606_v26, 3  ;;  %v12022_v26 = vld [vmem:[#allocation6_spill] sm:$0xff] }
 0x1ba   : > { %v3145_v35 = vrot.slane %v3120_v18, 4  ;;  %v2593_v42 = vadd.f32 %v2568_v29, %v2529_v27  ;;  %v12019_v39 = vrot.slane %v12018_v6, 3  ;;  %v3248_v51 = vmul.f32 %v8282_v10, %v8680_v15  ;;  %v12030_v21 = vld [vmem:[#allocation46_spill] sm:$0xff] }
 0x1bb   : > { %v2825_v36 = vsel %vm2756_vm10, %v12016_v49, %v2824_v46  ;;  %v2889_v3 = vsel %vm2756_vm10, %v12017_v5, %v2888_v61  ;;  %v3312_v20 = vmul.f32 %v8421_v1, %v8682_v45  ;;  %v12020_v37 = vrot.slane %v8623_v2, 3  ;;  %v12023_v46 = vld [vmem:[#allocation43_spill] sm:$0xff]  ;;  %v8804_v61 = vld [vmem:[#allocation2 + $0x78] sm:$0xff] }
 0x1bc   : > { %v2953_v47 = vsel %vm2756_vm10, %v12019_v39, %v2952_v41  ;;  %v1992_v55 = vmul.f32 %v12022_v26, %v12021_v52  ;;  %v2012_v18 = vmul.f32 %v12024_v53, %v12023_v46  ;;  %v2032_v29 = vmul.f32 %v12026_v22, %v12025_v57  ;;  %v12028_v2 = vld [vmem:[#allocation47_spill] sm:$0xff]  ;;  %v12031_v5 = vld [vmem:[#allocation12_spill] sm:$0xff] }
 0x1bd   : > { %v3017_v44 = vsel %vm2756_vm10, %v12020_v37, %v3016_v17  ;;  %v2657_v41 = vadd.f32 %v2632_v38, %v2593_v42  ;;  %v12027_v0 = vrot.slane %v8637_v8, 4  ;;  %v3209_v43 = vrot.slane %v3184_v28, 4  ;;  %v12032_v39 = vld [vmem:[#allocation48_spill] sm:$0xff]  ;;  %v12033_v28 = vld [vmem:[#allocation54_spill] sm:$0xff] }
 0x1be   : > { %v2052_v17 = vmul.f32 %v12029_v24, %v12028_v2  ;;  %v2020_v27 = vadd.f32 %v2012_v18, %v1992_v55  ;;  %v2093_v60 = vmul.f32 %v8084_v19, %v12021_v52  ;;  %v8815_v49 = vmul.f32 %v8084_v19, %v12030_v21 }
 0x1bf   : > { %v3082_v54 = vsel %vm3077_vm3, %v12027_v0, %v3081_v58  ;;  %v2158_v6 = vmul.f32 %v12031_v5, %v12023_v46  ;;  %v2721_v38 = vadd.f32 %v2696_v14, %v2657_v41  ;;  %v3273_v42 = vrot.slane %v3248_v51, 4  ;;  %v12035_v0 = vld [vmem:[#allocation10_spill] sm:$0xff]  ;;  %v12036_v51 = vld [vmem:[#allocation49_spill] sm:$0xff] }
 0x1c0   : > { %v3337_v8 = vrot.slane %v3312_v20, 4  ;;  %v8821_v58 = vmul.f32 %v12031_v5, %v12032_v39  ;;  %v12034_v37 = vrot.slane %v12033_v28, 4  ;;  %v2040_v18 = vadd.f32 %v2032_v29, %v2020_v27  ;;  %v12037_v20 = vld [vmem:[#allocation14_spill] sm:$0xff]  ;;  %v8834_v5 = vld [vmem:[#allocation2 + $0x80] sm:$0xff] }
 0x1c1   : > { %v2072_v4 = vmul.f32 %v12035_v0, %v8804_v61  ;;  %v2786_v15 = vadd.f32 %v2761_v13, %v2721_v38  ;;  %v2120_v50 = vrot.slane %v2093_v60, 1  ;;  %v8832_v41 = vmul.f32 %v12037_v20, %v12036_v51  ;;  %v12038_v29 = vld [vmem:[#allocation50_spill] sm:$0xff]  ;;  %v12039_v27 = vld [vmem:[#allocation13_spill] sm:$0xff] }
 0x1c2   : > { %v3146_v55 = vsel %vm3077_vm3, %v12034_v37, %v3145_v35  ;;  %v2060_v19 = vadd.f32 %v2052_v17, %v2040_v18  ;;  %v2184_v28 = vrot.slane %v2158_v6, 1  ;;  %v2222_v35 = vmul.f32 %v12037_v20, %v12025_v57 }
 0x1c3   : > { %v8840_v37 = vmul.f32 %v12039_v27, %v12038_v29  ;;  %v2850_v45 = vadd.f32 %v2825_v36, %v2786_v15  ;;  %v12040_v13 = vrot.slane %v8654_v11, 4  ;;  %v12041_v38 = vrot.slane %v8676_v7, 4  ;;  %v5675_v6 = vpop.eup %5674 }
 0x1c4   : > { %v12042_v0 = vrot.slane %v8696_v56, 4  ;;  %v2080_v18 = vadd.f32 %v2072_v4, %v2060_v19  ;;  %v12043_v20 = vrot.slane %v8815_v49, 1  ;;  %v12044_v15 = vrot.slane %v8821_v58, 1 }
 0x1c5   : > { %v3210_v60 = vsel %vm3077_vm3, %v12040_v13, %v3209_v43  ;;  %v3274_v14 = vsel %vm3077_vm3, %v12041_v38, %v3273_v42  ;;  %v2286_v7 = vmul.f32 %v12039_v27, %v12028_v2  ;;  %v3408_v36 = vadd.f32 1.0, %v5675_v6  ;;  %v12045_v42 = vld [vmem:[#allocation15_spill] sm:$0xff] }
 0x1c6   : > { %v8851_v17 = vsel %vm3077_vm3, %v12042_v0, %v3337_v8  ;;  %v2122_v12 = vsel %vm2114_vm2, %v2120_v50, %v12043_v20  ;;  %v2186_v11 = vsel %vm2114_vm2, %v2184_v28, %v12044_v15  ;;  %v2914_v43 = vadd.f32 %v2889_v3, %v2850_v45  ;;  %v12046_v28 = vld [vmem:[#allocation16_spill] sm:$0xff] }
 0x1c7   : > { %v11324_v56 = vrot.slane %v8832_v41, 1  ;;  %v8864_v8 = vmul.f32 %v12045_v42, %v8834_v5  ;;  %v2145_v19 = vadd.f32 %v2122_v12, %v2080_v18  ;;  %v2248_v4 = vrot.slane %v2222_v35, 1 }
 0x1c8   : > { %v11325_v0 = vrot.slane %v8840_v37, 1  ;;  %v2350_v50 = vmul.f32 %v12045_v42, %v8804_v61  ;;  %5676 = vrcp.f32 %v3408_v36  ;;  %v2978_v20 = vadd.f32 %v2953_v47, %v2914_v43 }
 0x1c9   : > { %v2414_v13 = vmul.f32 %v12046_v28, %v12021_v52  ;;  %v8873_v45 = vmul.f32 %v12046_v28, %v12030_v21  ;;  %v2209_v3 = vadd.f32 %v2186_v11, %v2145_v19  ;;  %v2312_v38 = vrot.slane %v2286_v7, 1 }
 0x1ca   : > { %v2479_v12 = vmul.f32 %v8140_v33, %v12023_v46  ;;  %v8879_v35 = vmul.f32 %v8140_v33, %v12032_v39  ;;  %v3042_v6 = vadd.f32 %v3017_v44, %v2978_v20  ;;  %v2250_v47 = vsel %vm2114_vm2, %v2248_v4, %v11324_v56 }
 0x1cb   : > { %v2273_v36 = vadd.f32 %v2250_v47, %v2209_v3  ;;  %v2543_v7 = vmul.f32 %v8144_v30, %v12025_v57  ;;  %v8891_v43 = vmul.f32 %v8144_v30, %v12036_v51  ;;  %v2314_v44 = vsel %vm2114_vm2, %v2312_v38, %v11325_v0 }
 0x1cc   : > { %12047 = vst [vmem:[#allocation51_spill] sm:$0xff] %v8879_v35  ;;  %v3107_v19 = vadd.f32 %v3082_v54, %v3042_v6  ;;  %v2376_v4 = vrot.slane %v2350_v50, 1  ;;  %v2441_v20 = vrot.slane %v2414_v13, 2  ;;  %v2505_v18 = vrot.slane %v2479_v12, 2 }
 0x1cd   : > { %v2337_v56 = vadd.f32 %v2314_v44, %v2273_v36  ;;  %v2607_v3 = vmul.f32 %v8155_v59, %v12028_v2  ;;  %v8900_v47 = vmul.f32 %v8155_v59, %v12038_v29  ;;  %v12048_v15 = vrot.slane %v8864_v8, 1 }
 0x1ce   : > { %v3171_v11 = vadd.f32 %v3146_v55, %v3107_v19  ;;  %v12049_v6 = vrot.slane %v8873_v45, 2  ;;  %v8910_v50 = vmul.f32 %v8159_v62, %v8834_v5  ;;  %v12050_v12 = vrot.slane %v8879_v35, 2 }
 0x1cf   : > { %v2378_v54 = vsel %vm2114_vm2, %v2376_v4, %v12048_v15  ;;  %v2569_v44 = vrot.slane %v2543_v7, 2  ;;  %v2671_v15 = vmul.f32 %v8159_v62, %v8804_v61  ;;  %v2735_v4 = vmul.f32 %v8163_v34, %v12021_v52 }
 0x1d0   : > { %v2443_v38 = vsel %vm2435_vm1, %v2441_v20, %v12049_v6  ;;  %v2401_v13 = vadd.f32 %v2378_v54, %v2337_v56  ;;  %v2507_v36 = vsel %vm2435_vm1, %v2505_v18, %v12050_v12  ;;  %v3235_v19 = vadd.f32 %v3210_v60, %v3171_v11 }
 0x1d1   : > { %v8922_v20 = vmul.f32 %v8163_v34, %v12030_v21  ;;  %v2633_v56 = vrot.slane %v2607_v3, 2  ;;  %v2800_v11 = vmul.f32 %v8167_v23, %v12023_v46  ;;  %v8931_v0 = vmul.f32 %v8167_v23, %v12032_v39 }
 0x1d2   : > { %v2466_v6 = vadd.f32 %v2443_v38, %v2401_v13  ;;  %v5677_v7 = vpop.eup %5676  ;;  %v3299_v12 = vadd.f32 %v3274_v14, %v3235_v19  ;;  %v12052_v3 = vrot.slane %v8891_v43, 2  ;;  %v2864_v13 = vmul.f32 %v8175_v31, %v12025_v57 }
 0x1d3   : > { %12051 = vst [vmem:[#allocation52_spill] sm:$0xff] %v8931_v0  ;;  %v3432_v55 = vmul.f32 %v5677_v7, %v8761_v32  ;;  %v2697_v19 = vrot.slane %v2671_v15, 2  ;;  %v2762_v60 = vrot.slane %v2735_v4, 3  ;;  %v11329_v18 = vrot.slane %v8931_v0, 3 }
 0x1d4   : > { %v2530_v35 = vadd.f32 %v2507_v36, %v2466_v6  ;;  %v2571_v38 = vsel %vm2435_vm1, %v2569_v44, %v12052_v3  ;;  %v3363_v14 = vadd.f32 %v8851_v17, %v3299_v12  ;;  %v12053_v23 = vrot.slane %v8900_v47, 2 }
 0x1d5   : > { %3456 = vrot.lane.b32.xlu0 %v3432_v55, %s5873_s16  ;;  %v8947_v36 = vmul.f32 %v8175_v31, %v12036_v51  ;;  %v8951_v44 = vmul.f32 %v8179_v9, %v12038_v29  ;;  %v12056_v15 = vrot.slane %v8910_v50, 2  ;;  %v2928_v7 = vmul.f32 %v8179_v9, %v12028_v2 }
 0x1d6   : > { %v2594_v54 = vadd.f32 %v2571_v38, %v2530_v35  ;;  %v2635_v32 = vsel %vm2435_vm1, %v2633_v56, %v12053_v23  ;;  %v8954_v17 = vadd.f32 %v8553_v40, %v3363_v14  ;;  %v12057_v35 = vrot.slane %v8922_v20, 3 }
 0x1d7   : > { %12054 = vst [vmem:[#allocation53_spill] sm:$0xff] %v8947_v36  ;;  %12055 = vst [vmem:[#allocation40_spill] sm:$0xff] %v8951_v44  ;;  %v2699_v55 = vsel %vm2435_vm1, %v2697_v19, %v12056_v15  ;;  %v2826_v23 = vrot.slane %v2800_v11, 3  ;;  %v2890_v56 = vrot.slane %v2864_v13, 3  ;;  %v8966_v12 = vmul.f32 %v8188_v48, %v8834_v5 }
 0x1d8   : > { %v2764_v4 = vsel %vm2756_vm10, %v2762_v60, %v12057_v35  ;;  %v2658_v6 = vadd.f32 %v2635_v32, %v2594_v54  ;;  %v5145_v3 = vmul.f32 -1.442695, %v8954_v17  ;;  %v2992_v14 = vmul.f32 %v8188_v48, %v8804_v61 }
 0x1d9   : > { %12058 = vst [vmem:[#allocation6_spill] sm:$0xff] %v8966_v12  ;;  %v2828_v38 = vsel %vm2756_vm10, %v2826_v23, %v11329_v18  ;;  %v3056_v54 = vmul.f32 %v8205_v16, %v12021_v52  ;;  %v8980_v19 = vmul.f32 %v8205_v16, %v12030_v21  ;;  %v3121_v15 = vmul.f32 %v8244_v25, %v12023_v46 }
 0x1da   : > { %v2722_v60 = vadd.f32 %v2699_v55, %v2658_v6  ;;  %5678 = vpow2.f32 %v5145_v3  ;;  %v8987_v35 = vmul.f32 %v8244_v25, %v12032_v39  ;;  %v2954_v55 = vrot.slane %v2928_v7, 3 }
 0x1db   : > { %12059 = vst [vmem:[#allocation43_spill] sm:$0xff] %v8980_v19  ;;  %v11332_v23 = vrot.slane %v8980_v19, 4  ;;  %v3185_v6 = vmul.f32 %v8248_v63, %v12025_v57  ;;  %v3018_v18 = vrot.slane %v2992_v14, 3  ;;  %v3083_v13 = vrot.slane %v3056_v54, 4  ;;  %v12067_v19 = vld [vmem:[#allocation12_spill] sm:$0xff] }
 0x1dc   : > { %12060 = vst [vmem:[#allocation44_spill] sm:$0xff] %v8987_v35  ;;  %v2787_v52 = vadd.f32 %v2764_v4, %v2722_v60  ;;  %v11331_v3 = vrot.slane %v8987_v35, 4  ;;  %v8995_v32 = vmul.f32 %v8248_v63, %v12036_v51  ;;  %v3147_v11 = vrot.slane %v3121_v15, 4  ;;  %v12066_v35 = vld [vmem:[#allocation55_spill] sm:$0xff] }
 0x1dd   : > { %v3249_v0 = vmul.f32 %v8282_v10, %v12028_v2  ;;  %v12061_v4 = vrot.slane %v8947_v36, 3  ;;  %v12062_v60 = vrot.slane %v8951_v44, 3  ;;  %v12063_v14 = vrot.slane %v8966_v12, 3  ;;  %v12070_v44 = vld [vmem:[#allocation58_spill] sm:$0xff] }
 0x1de   : > { %v2851_v46 = vadd.f32 %v2828_v38, %v2787_v52  ;;  %v3085_v38 = vsel %vm3077_vm3, %v3083_v13, %v11332_v23  ;;  %v3149_v2 = vsel %vm3077_vm3, %v3147_v11, %v11331_v3  ;;  %v3211_v52 = vrot.slane %v3185_v6, 4  ;;  %v12064_v3 = vld [vmem:[#allocation56_spill] sm:$0xff]  ;;  %v12065_v23 = vld [vmem:[#allocation11_spill] sm:$0xff] }
 0x1df   : > { %v2892_v7 = vsel %vm2756_vm10, %v2890_v56, %v12061_v4  ;;  %v2956_v57 = vsel %vm2756_vm10, %v2954_v55, %v12062_v60  ;;  %v3020_v54 = vsel %vm2756_vm10, %v3018_v18, %v12063_v14  ;;  %v9016_v56 = vmul.f32 %v8282_v10, %v12038_v29 }
 0x1e0   : > { %v2915_v15 = vadd.f32 %v2892_v7, %v2851_v46  ;;  %v1993_v4 = vmul.f32 %v12022_v26, %v12030_v21  ;;  %v2013_v18 = vmul.f32 %v12024_v53, %v12032_v39  ;;  %v2033_v13 = vmul.f32 %v12026_v22, %v12036_v51  ;;  %v9025_v46 = vld [vmem:[#allocation2 + $0x88] sm:$0xff] }
 0x1e1   : > { %v3275_v11 = vrot.slane %v3249_v0, 4  ;;  %v3313_v6 = vmul.f32 %v8421_v1, %v8804_v61  ;;  %v9031_v60 = vmul.f32 %v8421_v1, %v8834_v5  ;;  %v2053_v21 = vmul.f32 %v12029_v24, %v12038_v29 }
 0x1e2   : > { %v2979_v7 = vadd.f32 %v2956_v57, %v2915_v15  ;;  %v2021_v14 = vadd.f32 %v2013_v18, %v1993_v4  ;;  %v2095_v55 = vmul.f32 %v12065_v23, %v12064_v3  ;;  %v2160_v12 = vmul.f32 %v12067_v19, %v12066_v35  ;;  %v12068_v57 = vld [vmem:[#allocation57_spill] sm:$0xff]  ;;  %v12069_v15 = vld [vmem:[#allocation14_spill] sm:$0xff] }
 0x1e3   : > { %v2224_v61 = vmul.f32 %v12069_v15, %v12068_v57  ;;  %v2288_v1 = vmul.f32 %v12039_v27, %v12070_v44  ;;  %v12071_v18 = vld [vmem:[#allocation10_spill] sm:$0xff]  ;;  %v2352_v23 = vmul.f32 %v12045_v42, %v9025_v46  ;;  %v3339_v0 = vrot.slane %v3313_v6, 4 }
 0x1e4   : > { %v3043_v10 = vadd.f32 %v3020_v54, %v2979_v7  ;;  %v5679_v36 = vpop.eup %5678  ;;  %v2041_v4 = vadd.f32 %v2033_v13, %v2021_v14  ;;  %v2073_v24 = vmul.f32 %v12071_v18, %v8834_v5  ;;  %v2123_v22 = vrot.slane %v2095_v55, 1 }
 0x1e5   : > { %v3409_v29 = vadd.f32 1.0, %v5679_v36  ;;  %v12072_v54 = vrot.slane %v8995_v32, 4  ;;  %v11348_v15 = vrot.slane %v9031_v60, 4  ;;  %v2187_v27 = vrot.slane %v2160_v12, 1 }
 0x1e6   : > { %v3108_v19 = vadd.f32 %v3085_v38, %v3043_v10  ;;  %v2061_v53 = vadd.f32 %v2053_v21, %v2041_v4  ;;  %v2251_v51 = vrot.slane %v2224_v61, 1  ;;  %v12073_v14 = vrot.slane %v8815_v49, 1 }
 0x1e7   : > { %v3213_v7 = vsel %vm3077_vm3, %v3211_v52, %v12072_v54  ;;  %5680 = vrcp.f32 %v3409_v29  ;;  %v2315_v18 = vrot.slane %v2288_v1, 1  ;;  %v2379_v36 = vrot.slane %v2352_v23, 1 }
 0x1e8   : > { %v3172_v13 = vadd.f32 %v3149_v2, %v3108_v19  ;;  %v2124_v55 = vsel %vm2114_vm2, %v12073_v14, %v2123_v22  ;;  %v2081_v42 = vadd.f32 %v2073_v24, %v2061_v53  ;;  %v2416_v10 = vmul.f32 %v12046_v28, %v12064_v3 }
 0x1e9   : > { %v2481_v38 = vmul.f32 %v8140_v33, %v12066_v35  ;;  %v2545_v12 = vmul.f32 %v8144_v30, %v12068_v57  ;;  %v2609_v29 = vmul.f32 %v8155_v59, %v12070_v44  ;;  %v2673_v49 = vmul.f32 %v8159_v62, %v9025_v46 }
 0x1ea   : > { %v3236_v52 = vadd.f32 %v3213_v7, %v3172_v13  ;;  %v12074_v1 = vrot.slane %v9016_v56, 4  ;;  %v3341_v22 = vsel %vm3077_vm3, %v3339_v0, %v11348_v15  ;;  %v2146_v24 = vadd.f32 %v2124_v55, %v2081_v42 }
 0x1eb   : > { %v2444_v19 = vrot.slane %v2416_v10, 2  ;;  %v12075_v2 = vrot.slane %v8821_v58, 1  ;;  %v12076_v21 = vrot.slane %v8832_v41, 1  ;;  %v12077_v4 = vrot.slane %v8840_v37, 1 }
 0x1ec   : > { %v3277_v53 = vsel %vm3077_vm3, %v3275_v11, %v12074_v1  ;;  %v12078_v7 = vrot.slane %v8864_v8, 1  ;;  %v2508_v42 = vrot.slane %v2481_v38, 2  ;;  %v2737_v13 = vmul.f32 %v8163_v34, %v12064_v3 }
 0x1ed   : > { %v3300_v23 = vadd.f32 %v3277_v53, %v3236_v52  ;;  %v2188_v6 = vsel %vm2114_vm2, %v12075_v2, %v2187_v27  ;;  %v2252_v61 = vsel %vm2114_vm2, %v12076_v21, %v2251_v51  ;;  %v2316_v54 = vsel %vm2114_vm2, %v12077_v4, %v2315_v18  ;;  %v12080_v18 = vld [vmem:[#allocation18_spill] sm:$0xff] }
 0x1ee   : > { %v2210_v11 = vadd.f32 %v2188_v6, %v2146_v24  ;;  %v2380_v0 = vsel %vm2114_vm2, %v12078_v7, %v2379_v36  ;;  %v2572_v14 = vrot.slane %v2545_v12, 2  ;;  %v2636_v27 = vrot.slane %v2609_v29, 2 }
 0x1ef   : > { %v3364_v58 = vadd.f32 %v3341_v22, %v3300_v23  ;;  %v2700_v55 = vrot.slane %v2673_v49, 2  ;;  %v12079_v51 = vrot.slane %v8873_v45, 2  ;;  %v2802_v10 = vmul.f32 %v12080_v18, %v12066_v35 }
 0x1f0   : > { %v2274_v41 = vadd.f32 %v2252_v61, %v2210_v11  ;;  %v2866_v8 = vmul.f32 %v8175_v31, %v12068_v57  ;;  %v2930_v38 = vmul.f32 %v8179_v9, %v12070_v44  ;;  %v2994_v52 = vmul.f32 %v8188_v48, %v9025_v46 }
 0x1f1   : > { %v2445_v37 = vsel %vm2435_vm1, %v12079_v51, %v2444_v19  ;;  %v9093_v36 = vadd.f32 %v8553_v40, %v3364_v58  ;;  %v3058_v45 = vmul.f32 %v8205_v16, %v12064_v3  ;;  %v2765_v29 = vrot.slane %v2737_v13, 3  ;;  %v5681_v53 = vpop.eup %5680  ;;  %v12081_v40 = vld [vmem:[#allocation51_spill] sm:$0xff] }
 0x1f2   : > { %v2338_v12 = vadd.f32 %v2316_v54, %v2274_v41  ;;  %v2829_v49 = vrot.slane %v2802_v10, 3  ;;  %v3123_v1 = vmul.f32 %v8244_v25, %v12066_v35  ;;  %v12082_v24 = vrot.slane %v12081_v40, 2  ;;  %v12090_v51 = vld [vmem:[#allocation7_spill] sm:$0xff]  ;;  %v12098_v40 = vld [vmem:[#allocation6_spill] sm:$0xff] }
 0x1f3   : > { %v5146_v22 = vmul.f32 -1.442695, %v9093_v36  ;;  %v12083_v23 = vrot.slane %v8891_v43, 2  ;;  %v12084_v6 = vrot.slane %v8900_v47, 2  ;;  %v3433_v21 = vmul.f32 %v5681_v53, %v8954_v17  ;;  %v12097_v53 = vld [vmem:[#allocation27_spill] sm:$0xff] }
 0x1f4   : > { %v2509_v19 = vsel %vm2435_vm1, %v12082_v24, %v2508_v42  ;;  %v2402_v61 = vadd.f32 %v2380_v0, %v2338_v12  ;;  %v2893_v4 = vrot.slane %v2866_v8, 3  ;;  %v2957_v54 = vrot.slane %v2930_v38, 3  ;;  %v12092_v8 = vld [vmem:[#allocation8_spill] sm:$0xff] }
 0x1f5   : > { %v2573_v2 = vsel %vm2435_vm1, %v12083_v23, %v2572_v14  ;;  %v2637_v3 = vsel %vm2435_vm1, %v12084_v6, %v2636_v27  ;;  %5682 = vpow2.f32 %v5146_v22  ;;  %v12085_v11 = vrot.slane %v8910_v50, 2  ;;  %3458 = vrot.lane.b32.xlu0 %v3433_v21, %s5873_s16  ;;  %v12087_v14 = vld [vmem:[#allocation52_spill] sm:$0xff]  ;;  %v12100_v6 = vld [vmem:[#allocation43_spill] sm:$0xff] }
 0x1f6   : > { %v3021_v13 = vrot.slane %v2994_v52, 3  ;;  %v3086_v42 = vrot.slane %v3058_v45, 4  ;;  %v2467_v43 = vadd.f32 %v2445_v37, %v2402_v61  ;;  %v12086_v58 = vrot.slane %v8922_v20, 3  ;;  %v12091_v37 = vld [vmem:[#allocation50_spill] sm:$0xff]  ;;  %v12093_v52 = vld [vmem:[#allocation53_spill] sm:$0xff] }
 0x1f7   : > { %v2701_v7 = vsel %vm2435_vm1, %v12085_v11, %v2700_v55  ;;  %v12088_v27 = vrot.slane %v12087_v14, 3  ;;  %v3150_v0 = vrot.slane %v3123_v1, 4  ;;  %v9126_v41 = vmul.f32 %v8248_v63, %v12068_v57  ;;  %v12089_v55 = vld [vmem:[#allocation49_spill] sm:$0xff] }
 0x1f8   : > { %v2766_v47 = vsel %vm2756_vm10, %v12086_v58, %v2765_v29  ;;  %v1995_v50 = vmul.f32 %v12022_v26, %v12032_v39  ;;  %v2015_v10 = vmul.f32 %v12090_v51, %v12089_v55  ;;  %v2035_v20 = vmul.f32 %v12092_v8, %v12091_v37  ;;  %v12095_v29 = vld [vmem:[#allocation40_spill] sm:$0xff] }
 0x1f9   : > { %v2830_v17 = vsel %vm2756_vm10, %v12088_v27, %v2829_v49  ;;  %v2531_v38 = vadd.f32 %v2509_v19, %v2467_v43  ;;  %v12094_v45 = vrot.slane %v12093_v52, 3  ;;  %v12096_v49 = vrot.slane %v12095_v29, 3  ;;  %v12105_v27 = vld [vmem:[#allocation42_spill] sm:$0xff] }
 0x1fa   : > { %v9142_v22 = vmul.f32 %v12097_v53, %v12070_v44  ;;  %v12099_v24 = vrot.slane %v12098_v40, 3  ;;  %v12101_v21 = vrot.slane %v12100_v6, 4  ;;  %v2023_v61 = vadd.f32 %v2015_v10, %v1995_v50  ;;  %v12108_v40 = vld [vmem:[#allocation10_spill] sm:$0xff] }
 0x1fb   : > { %v2894_v12 = vsel %vm2756_vm10, %v12094_v45, %v2893_v4  ;;  %v2958_v1 = vsel %vm2756_vm10, %v12096_v49, %v2957_v54  ;;  %v12102_v4 = vld [vmem:[#allocation9_spill] sm:$0xff]  ;;  %v2595_v43 = vadd.f32 %v2573_v2, %v2531_v38  ;;  %v12103_v54 = vld [vmem:[#allocation44_spill] sm:$0xff]  ;;  %v9163_v52 = vmul.f32 %v12105_v27, %v9025_v46 }
 0x1fc   : > { %v9147_v23 = vsel %vm2756_vm10, %v12099_v24, %v3021_v13  ;;  %v9152_v19 = vsel %vm3077_vm3, %v12101_v21, %v3086_v42  ;;  %v2055_v11 = vmul.f32 %v12102_v4, %v8834_v5  ;;  %v12104_v58 = vrot.slane %v12103_v54, 4  ;;  %v12106_v13 = vld [vmem:[#allocation11_spill] sm:$0xff]  ;;  %v12107_v2 = vld [vmem:[#allocation12_spill] sm:$0xff]  ;;  %v9191_v42 = vld [vmem:[#allocation2 + $0xa0] sm:$0xff] }
 0x1fd   : > { %v9167_v45 = vmul.f32 %v12106_v13, %v12032_v39  ;;  %v2043_v50 = vadd.f32 %v2035_v20, %v2023_v61  ;;  %v2098_v10 = vmul.f32 %v12106_v13, %v12066_v35  ;;  %v9174_v38 = vmul.f32 %v12107_v2, %v12089_v55  ;;  %v9177_v49 = vld [vmem:[#allocation2 + $0x98] sm:$0xff]  ;;  %v12109_v61 = vld [vmem:[#allocation14_spill] sm:$0xff]  ;;  %v12111_v4 = vld [vmem:[#allocation15_spill] sm:$0xff] }
 0x1fe   : > { %v9159_v14 = vsel %vm3077_vm3, %v12104_v58, %v3150_v0  ;;  %v2659_v0 = vadd.f32 %v2637_v3, %v2595_v43  ;;  %v3278_v29 = vrot.slane %v9142_v22, 4  ;;  %v2075_v24 = vmul.f32 %v9177_v49, %v12108_v40 }
 0x1ff   : > { %v2163_v6 = vmul.f32 %v12107_v2, %v12068_v57  ;;  %v2063_v21 = vadd.f32 %v2055_v11, %v2043_v50  ;;  %v2128_v20 = vrot.slane %v2098_v10, 1  ;;  %v9185_v54 = vmul.f32 %v12109_v61, %v12091_v37  ;;  %v5683_v15 = vpop.eup %5682  ;;  %v12110_v50 = vld [vmem:[#allocation13_spill] sm:$0xff] }
 0x200   : > { %v2227_v58 = vmul.f32 %v12109_v61, %v12070_v44  ;;  %v2723_v3 = vadd.f32 %v2701_v7, %v2659_v0  ;;  %v11364_v43 = vrot.slane %v9167_v45, 1  ;;  %v11360_v11 = vrot.slane %v9174_v38, 1 }
 0x201   : > { %v2192_v27 = vrot.slane %v2163_v6, 1  ;;  %v2083_v40 = vadd.f32 %v2075_v24, %v2063_v21  ;;  %v9196_v10 = vmul.f32 %v12110_v50, %v8834_v5  ;;  %v2291_v2 = vmul.f32 %v12110_v50, %v9025_v46 }
 0x202   : > { %v3410_v61 = vadd.f32 1.0, %v5683_v15  ;;  %v2788_v7 = vadd.f32 %v2766_v47, %v2723_v3  ;;  %v2129_v0 = vsel %vm2114_vm2, %v11364_v43, %v2128_v20  ;;  %v2256_v6 = vrot.slane %v2227_v58, 1 }
 0x203   : > { %v2148_v22 = vadd.f32 %v2129_v0, %v2083_v40  ;;  %v2193_v24 = vsel %vm2114_vm2, %v11360_v11, %v2192_v27  ;;  %v11355_v21 = vrot.slane %v9185_v54, 1  ;;  %v9209_v13 = vmul.f32 %v9177_v49, %v12111_v4 }
 0x204   : > { %5684 = vrcp.f32 %v3410_v61  ;;  %v2852_v50 = vadd.f32 %v2830_v17, %v2788_v7  ;;  %v2320_v15 = vrot.slane %v2291_v2, 1  ;;  %v2355_v47 = vmul.f32 %v12111_v4, %v9191_v42 }
 0x205   : > { %12112 = vst [vmem:[#allocation47_spill] sm:$0xff] %v9209_v13  ;;  %v2212_v3 = vadd.f32 %v2193_v24, %v2148_v22  ;;  %v11353_v20 = vrot.slane %v9196_v10, 1  ;;  %v9216_v40 = vmul.f32 %v12046_v28, %v12032_v39  ;;  %v2419_v58 = vmul.f32 %v12046_v28, %v12066_v35 }
 0x206   : > { %v2916_v27 = vadd.f32 %v2894_v12, %v2852_v50  ;;  %v2257_v61 = vsel %vm2114_vm2, %v11355_v21, %v2256_v6  ;;  %v2384_v17 = vrot.slane %v2355_v47, 1  ;;  %v9225_v2 = vmul.f32 %v8140_v33, %v12089_v55 }
 0x207   : > { %12113 = vst [vmem:[#allocation46_spill] sm:$0xff] %v9216_v40  ;;  %v2276_v22 = vadd.f32 %v2257_v61, %v2212_v3  ;;  %v11354_v7 = vrot.slane %v9209_v13, 1  ;;  %v2484_v39 = vmul.f32 %v8140_v33, %v12068_v57  ;;  %v9232_v0 = vmul.f32 %v8144_v30, %v12091_v37 }
 0x208   : > { %12114 = vst [vmem:[#allocation48_spill] sm:$0xff] %v9225_v2  ;;  %v2980_v12 = vadd.f32 %v2958_v1, %v2916_v27  ;;  %v2321_v50 = vsel %vm2114_vm2, %v11353_v20, %v2320_v15  ;;  %v2449_v6 = vrot.slane %v2419_v58, 2  ;;  %v2548_v55 = vmul.f32 %v8144_v30, %v12070_v44 }
 0x209   : > { %12115 = vst [vmem:[#allocation54_spill] sm:$0xff] %v9232_v0  ;;  %v2340_v24 = vadd.f32 %v2321_v50, %v2276_v22  ;;  %v2385_v47 = vsel %vm2114_vm2, %v11354_v7, %v2384_v17  ;;  %v11358_v3 = vrot.slane %v9216_v40, 2  ;;  %v2513_v61 = vrot.slane %v2484_v39, 2 }
 0x20a   : > { %v3044_v37 = vadd.f32 %v9147_v23, %v2980_v12  ;;  %v11357_v1 = vrot.slane %v9225_v2, 2  ;;  %v2577_v27 = vrot.slane %v2548_v55, 2  ;;  %v2612_v15 = vmul.f32 %v8155_v59, %v9025_v46 }
 0x20b   : > { %v2404_v58 = vadd.f32 %v2385_v47, %v2340_v24  ;;  %v11356_v20 = vrot.slane %v9232_v0, 2  ;;  %v9250_v22 = vmul.f32 %v8155_v59, %v8834_v5  ;;  %v2676_v17 = vmul.f32 %v8159_v62, %v9191_v42  ;;  %v9429_v0 = vld [vmem:[#allocation2 + $0xb8] sm:$0xff] }
 0x20c   : > { %v3109_v39 = vadd.f32 %v9152_v19, %v3044_v37  ;;  %v12117_v23 = vrot.slane %v9126_v41, 4  ;;  %v12118_v12 = vrot.slane %v8995_v32, 4  ;;  %v12119_v55 = vrot.slane %v9016_v56, 4  ;;  %v5739_v37 = vld [vmem:[#allocation2 + $0x38] sm:$0xff] }
 0x20d   : > { %12116 = vst [vmem:[#allocation16_spill] sm:$0xff] %v9250_v22  ;;  %v2450_v47 = vsel %vm2435_vm1, %v11358_v3, %v2449_v6  ;;  %v2514_v21 = vsel %vm2435_vm1, %v11357_v1, %v2513_v61  ;;  %v2578_v41 = vsel %vm2435_vm1, %v11356_v20, %v2577_v27  ;;  %v9274_v32 = vmul.f32 %v9177_v49, %v8159_v62  ;;  %v9284_v20 = vld [vmem:[#allocation2 + $0x50] sm:$0xff] }
 0x20e   : > { %v3215_v50 = vsel %vm3077_vm3, %v12118_v12, %v12117_v23  ;;  %v3279_v24 = vsel %vm3077_vm3, %v12119_v55, %v3278_v29  ;;  %v2469_v7 = vadd.f32 %v2450_v47, %v2404_v58  ;;  %v5685_v56 = vpop.eup %5684  ;;  %v3173_v19 = vadd.f32 %v9159_v14, %v3109_v39 }
 0x20f   : > { %12120 = vst [vmem:[#allocation56_spill] sm:$0xff] %v9274_v32  ;;  %v2641_v29 = vrot.slane %v2612_v15, 2  ;;  %v9278_v6 = vmul.f32 %v5739_v37, %v8163_v34  ;;  %v2740_v58 = vmul.f32 %v8163_v34, %v12066_v35  ;;  %v3434_v61 = vmul.f32 %v5685_v56, %v9093_v36 }
 0x210   : > { %v2533_v23 = vadd.f32 %v2514_v21, %v2469_v7  ;;  %v11359_v27 = vrot.slane %v9250_v22, 2  ;;  %v2705_v12 = vrot.slane %v2676_v17, 2  ;;  %v3237_v55 = vadd.f32 %v3215_v50, %v3173_v19  ;;  %v9294_v21 = vld [vmem:[#allocation2 + $0x68] sm:$0xff] }
 0x211   : > { %12121 = vst [vmem:[#allocation55_spill] sm:$0xff] %v9278_v6  ;;  %v2770_v47 = vrot.slane %v2740_v58, 3  ;;  %v9288_v14 = vmul.f32 %v9284_v20, %v12080_v18  ;;  %v2805_v15 = vmul.f32 %v12080_v18, %v12068_v57  ;;  %3460 = vrot.lane.b32.xlu1 %v3434_v61, %s5873_s16  ;;  %v11362_v36 = vrot.slane %v9274_v32, 2 }
 0x212   : > { %v2597_v39 = vadd.f32 %v2578_v41, %v2533_v23  ;;  %v9298_v7 = vmul.f32 %v9294_v21, %v8175_v31  ;;  %v2869_v17 = vmul.f32 %v8175_v31, %v12070_v44  ;;  %v3301_v50 = vadd.f32 %v3279_v24, %v3237_v55 }
 0x213   : > { %12122 = vst [vmem:[#allocation57_spill] sm:$0xff] %v9288_v14  ;;  %v2642_v56 = vsel %vm2435_vm1, %v11359_v27, %v2641_v29  ;;  %v11361_v19 = vrot.slane %v9278_v6, 3  ;;  %v9308_v41 = vmul.f32 %v8179_v9, %v8834_v5  ;;  %v12125_v58 = vrot.slane %v9163_v52, 4 }
 0x214   : > { %12123 = vst [vmem:[#allocation58_spill] sm:$0xff] %v9298_v7  ;;  %v12126_v61 = vrot.slane %v9031_v60, 4  ;;  %v2661_v1 = vadd.f32 %v2642_v56, %v2597_v39  ;;  %v2834_v3 = vrot.slane %v2805_v15, 3  ;;  %v2933_v24 = vmul.f32 %v8179_v9, %v9025_v46  ;;  %v9330_v39 = vld [vmem:[%s11203_s4] ss:$0 sm:$0xff] }
 0x215   : > { %12124 = vst [vmem:[#allocation51_spill] sm:$0xff] %v9308_v41  ;;  %v2706_v29 = vsel %vm2435_vm1, %v11362_v36, %v2705_v12  ;;  %v2771_v27 = vsel %vm2756_vm10, %v11361_v19, %v2770_v47  ;;  %v11363_v52 = vrot.slane %v9288_v14, 3  ;;  %v11365_v60 = vrot.slane %v9298_v7, 3  ;;  %12127 = vst [vmem:[#allocation52_spill] sm:$0xff] %v9330_v39 }
 0x216   : > { %v3343_v23 = vsel %vm3077_vm3, %v12126_v61, %v12125_v58  ;;  %v2725_v11 = vadd.f32 %v2706_v29, %v2661_v1  ;;  %v2898_v58 = vrot.slane %v2869_v17, 3  ;;  %v2997_v15 = vmul.f32 %v8188_v48, %v9191_v42 }
 0x217   : > { %v3365_v55 = vadd.f32 %v3343_v23, %v3301_v50  ;;  %v11369_v50 = vrot.slane %v9308_v41, 3  ;;  %v9338_v47 = vmul.f32 %v9177_v49, %v8188_v48  ;;  %v3061_v1 = vmul.f32 %v8205_v16, %v12066_v35  ;;  %v12137_v41 = vld [vmem:[#allocation9_spill] sm:$0xff] }
 0x218   : > { %v2790_v17 = vadd.f32 %v2771_v27, %v2725_v11  ;;  %v2835_v56 = vsel %vm2756_vm10, %v11363_v52, %v2834_v3  ;;  %v2962_v61 = vrot.slane %v2933_v24, 3  ;;  %v9346_v23 = vmul.f32 %v5739_v37, %v8205_v16 }
 0x219   : > { %v9333_v12 = vadd.f32 %v9330_v39, %v3365_v55  ;;  %12128 = vst [vmem:[#allocation49_spill] sm:$0xff] %v9338_v47  ;;  %v3026_v29 = vrot.slane %v2997_v15, 3  ;;  %v9351_v19 = vmul.f32 %v9284_v20, %v8244_v25  ;;  %v3126_v36 = vmul.f32 %v8244_v25, %v12068_v57 }
 0x21a   : > { %12129 = vst [vmem:[#allocation7_spill] sm:$0xff] %v9346_v23  ;;  %v2854_v35 = vadd.f32 %v2835_v56, %v2790_v17  ;;  %v3091_v11 = vrot.slane %v3061_v1, 4  ;;  %v9357_v27 = vmul.f32 %v9294_v21, %v8248_v63  ;;  %v3190_v3 = vmul.f32 %v8248_v63, %v12070_v44 }
 0x21b   : > { %v5147_v55 = vmul.f32 -1.442695, %v9333_v12  ;;  %12130 = vst [vmem:[#allocation50_spill] sm:$0xff] %v9351_v19  ;;  %v2899_v37 = vsel %vm2756_vm10, %v11365_v60, %v2898_v58  ;;  %v11367_v24 = vrot.slane %v9338_v47, 3  ;;  %v3155_v15 = vrot.slane %v3126_v36, 4  ;;  %v9413_v47 = vld [vmem:[#allocation2 + $0xb0] sm:$0xff] }
 0x21c   : > { %12131 = vst [vmem:[#allocation53_spill] sm:$0xff] %v9357_v27  ;;  %v2918_v52 = vadd.f32 %v2899_v37, %v2854_v35  ;;  %v11366_v43 = vrot.slane %v9346_v23, 4  ;;  %v3254_v1 = vmul.f32 %v12097_v53, %v9025_v46  ;;  %v2963_v17 = vsel %vm2756_vm10, %v11369_v50, %v2962_v61 }
 0x21d   : > { %5686 = vpow2.f32 %v5147_v55  ;;  %v3027_v56 = vsel %vm2756_vm10, %v11367_v24, %v3026_v29  ;;  %v11368_v55 = vrot.slane %v9351_v19, 4  ;;  %v3219_v58 = vrot.slane %v3190_v3, 4  ;;  %v12135_v19 = vld [vmem:[#allocation11_spill] sm:$0xff] }
 0x21e   : > { %v2982_v60 = vadd.f32 %v2963_v17, %v2918_v52  ;;  %v3092_v36 = vsel %vm3077_vm3, %v11366_v43, %v3091_v11  ;;  %v11377_v35 = vrot.slane %v9357_v27, 4  ;;  %v9381_v37 = vmul.f32 %v12097_v53, %v8834_v5  ;;  %v9395_v43 = vld [vmem:[%s11202_s3 + $0x18] ss:$0 sm:$0xff] }
 0x21f   : > { %v3156_v61 = vsel %vm3077_vm3, %v11368_v55, %v3155_v15  ;;  %v1997_v29 = vmul.f32 %v9284_v20, %v12022_v26  ;;  %v2017_v52 = vmul.f32 %v9294_v21, %v12090_v51  ;;  %v2037_v3 = vmul.f32 %v12092_v8, %v8834_v5  ;;  %12133 = vst [vmem:[#allocation27_spill] sm:$0xff] %v9395_v43  ;;  %v12138_v27 = vld [vmem:[#allocation12_spill] sm:$0xff] }
 0x220   : > { %12132 = vst [vmem:[#allocation40_spill] sm:$0xff] %v9381_v37  ;;  %v3046_v11 = vadd.f32 %v3027_v56, %v2982_v60  ;;  %v3283_v17 = vrot.slane %v3254_v1, 4  ;;  %v9399_v24 = vmul.f32 %v9395_v43, %v9177_v49  ;;  %v3318_v15 = vmul.f32 %v9395_v43, %v9191_v42 }
 0x221   : > { %v3220_v55 = vsel %vm3077_vm3, %v11377_v35, %v3219_v58  ;;  %v2025_v50 = vadd.f32 %v2017_v52, %v1997_v29  ;;  %v9408_v60 = vmul.f32 %v9284_v20, %v12135_v19  ;;  %v2101_v1 = vmul.f32 %v12135_v19, %v12068_v57  ;;  %v12140_v35 = vld [vmem:[#allocation14_spill] sm:$0xff] }
 0x222   : > { %12134 = vst [vmem:[#allocation6_spill] sm:$0xff] %v9399_v24  ;;  %v3111_v56 = vadd.f32 %v3092_v36, %v3046_v11  ;;  %v11384_v23 = vrot.slane %v9381_v37, 4  ;;  %v2057_v7 = vmul.f32 %v9177_v49, %v12137_v41  ;;  %v2166_v14 = vmul.f32 %v12138_v27, %v12070_v44 }
 0x223   : > { %12136 = vst [vmem:[#allocation43_spill] sm:$0xff] %v9408_v60  ;;  %v2045_v58 = vadd.f32 %v2037_v3, %v2025_v50  ;;  %v2133_v29 = vrot.slane %v2101_v1, 1  ;;  %v9421_v52 = vmul.f32 %v9294_v21, %v12138_v27  ;;  %v2230_v57 = vmul.f32 %v12140_v35, %v9025_v46  ;;  %v12141_v50 = vld [vmem:[#allocation10_spill] sm:$0xff] }
 0x224   : > { %v3175_v36 = vadd.f32 %v3156_v61, %v3111_v56  ;;  %v3284_v11 = vsel %vm3077_vm3, %v11384_v23, %v3283_v17  ;;  %v3347_v32 = vrot.slane %v3318_v15, 4  ;;  %v2077_v3 = vmul.f32 %v12141_v50, %v9413_v47  ;;  %v12143_v17 = vld [vmem:[#allocation13_spill] sm:$0xff] }
 0x225   : > { %12139 = vst [vmem:[#allocation44_spill] sm:$0xff] %v9421_v52  ;;  %v2065_v44 = vadd.f32 %v2057_v7, %v2045_v58  ;;  %v11387_v1 = vrot.slane %v9408_v60, 1  ;;  %v9436_v2 = vmul.f32 %v12140_v35, %v8834_v5  ;;  %v2197_v37 = vrot.slane %v2166_v14, 1 }
 0x226   : > { %v3239_v56 = vadd.f32 %v3220_v55, %v3175_v36  ;;  %v2294_v23 = vmul.f32 %v12143_v17, %v9191_v42  ;;  %v11388_v58 = vrot.slane %v9421_v52, 1  ;;  %v2261_v6 = vrot.slane %v2230_v57, 1 }
 0x227   : > { %v5687_v22 = vpop.eup %5686  ;;  %12142 = vst [vmem:[#allocation42_spill] sm:$0xff] %v9436_v2  ;;  %v2085_v15 = vadd.f32 %v2077_v3, %v2065_v44  ;;  %v2134_v7 = vsel %vm2114_vm2, %v11387_v1, %v2133_v29  ;;  %v9446_v13 = vmul.f32 %v9177_v49, %v12143_v17  ;;  %v12145_v14 = vrot.slane %v9399_v24, 4  ;;  %v9457_v44 = vld [vmem:[#allocation2 + $0x58] sm:$0xff] }
 0x228   : > { %v3411_v61 = vadd.f32 1.0, %v5687_v22  ;;  %v3303_v40 = vadd.f32 %v3284_v11, %v3239_v56  ;;  %v2358_v22 = vmul.f32 %v12111_v4, %v9429_v0  ;;  %v9455_v29 = vmul.f32 %v12111_v4, %v9413_v47 }
 0x229   : > { %12144 = vst [vmem:[#allocation59_spill] sm:$0xff] %v9446_v13  ;;  %v3348_v55 = vsel %vm3077_vm3, %v12145_v14, %v3347_v32  ;;  %v2150_v36 = vadd.f32 %v2134_v7, %v2085_v15  ;;  %v2422_v57 = vmul.f32 %v9457_v44, %v12046_v28  ;;  %v2198_v3 = vsel %vm2114_vm2, %v11388_v58, %v2197_v37 }
 0x22a   : > { %5688 = vrcp.f32 %v3411_v61  ;;  %12146 = vst [vmem:[#allocation60_spill] sm:$0xff] %v9455_v29  ;;  %v3367_v11 = vadd.f32 %v3348_v55, %v3303_v40  ;;  %v11389_v61 = vrot.slane %v9436_v2, 1  ;;  %v2325_v56 = vrot.slane %v2294_v23, 1  ;;  %v5745_v55 = vld [vmem:[#allocation2 + $0x70] sm:$0xff] }
 0x22b   : > { %v2214_v1 = vadd.f32 %v2198_v3, %v2150_v36  ;;  %v2389_v32 = vrot.slane %v2358_v22, 1  ;;  %v9467_v15 = vmul.f32 %v9284_v20, %v12046_v28  ;;  %v11392_v14 = vrot.slane %v9446_v13, 1 }
 0x22c   : > { %v9470_v7 = vadd.f32 %v9330_v39, %v3367_v11  ;;  %v2262_v40 = vsel %vm2114_vm2, %v11389_v61, %v2261_v6  ;;  %v2487_v37 = vmul.f32 %v5745_v55, %v8140_v33  ;;  %v11393_v23 = vrot.slane %v9455_v29, 1 }
 0x22d   : > { %12147 = vst [vmem:[#allocation61_spill] sm:$0xff] %v9467_v15  ;;  %v2278_v58 = vadd.f32 %v2262_v40, %v2214_v1  ;;  %v2454_v22 = vrot.slane %v2422_v57, 2  ;;  %v9480_v36 = vmul.f32 %v9294_v21, %v8140_v33  ;;  %v2326_v3 = vsel %vm2114_vm2, %v11392_v14, %v2325_v56 }
 0x22e   : > { %v5149_v11 = vmul.f32 -1.442695, %v9470_v7  ;;  %v2551_v6 = vmul.f32 %v8144_v30, %v9025_v46  ;;  %v2615_v61 = vmul.f32 %v8155_v59, %v9191_v42  ;;  %v2390_v57 = vsel %vm2114_vm2, %v11393_v23, %v2389_v32 }
 0x22f   : > { %12148 = vst [vmem:[#allocation62_spill] sm:$0xff] %v9480_v36  ;;  %v2342_v1 = vadd.f32 %v2326_v3, %v2278_v58  ;;  %v11397_v40 = vrot.slane %v9467_v15, 2  ;;  %v9496_v2 = vmul.f32 %v8144_v30, %v8834_v5  ;;  %v2518_v13 = vrot.slane %v2487_v37, 2 }
 0x230   : > { %5690 = vpow2.f32 %v5149_v11  ;;  %v9500_v56 = vmul.f32 %v9177_v49, %v8155_v59  ;;  %v2679_v14 = vmul.f32 %v8159_v62, %v9429_v0  ;;  %v11402_v3 = vrot.slane %v9480_v36, 2 }
 0x231   : > { %12149 = vst [vmem:[#allocation63_spill] sm:$0xff] %v9496_v2  ;;  %v2406_v58 = vadd.f32 %v2390_v57, %v2342_v1  ;;  %v2455_v32 = vsel %vm2435_vm1, %v11397_v40, %v2454_v22  ;;  %v9510_v23 = vmul.f32 %v8159_v62, %v9413_v47  ;;  %v2582_v37 = vrot.slane %v2551_v6, 2 }
 0x232   : > { %12150 = vst [vmem:[#allocation64_spill] sm:$0xff] %v9500_v56  ;;  %v2646_v29 = vrot.slane %v2615_v61, 2  ;;  %v9514_v52 = vmul.f32 %v9284_v20, %v8163_v34  ;;  %v2743_v1 = vmul.f32 %v9457_v44, %v8163_v34  ;;  %v2710_v22 = vrot.slane %v2679_v14, 2 }
 0x233   : > { %12151 = vst [vmem:[#allocation65_spill] sm:$0xff] %v9510_v23  ;;  %v2471_v15 = vadd.f32 %v2455_v32, %v2406_v58  ;;  %v9521_v40 = vmul.f32 %v9294_v21, %v12080_v18  ;;  %v2519_v6 = vsel %vm2435_vm1, %v11402_v3, %v2518_v13  ;;  %v11405_v61 = vrot.slane %v9496_v2, 2 }
 0x234   : > { %v5689_v11 = vpop.eup %5688  ;;  %12152 = vst [vmem:[#allocation66_spill] sm:$0xff] %v9514_v52  ;;  %v11404_v60 = vrot.slane %v9500_v56, 2  ;;  %v2808_v24 = vmul.f32 %v5745_v55, %v12080_v18  ;;  %v2775_v14 = vrot.slane %v2743_v1, 3  ;;  %v2872_v32 = vmul.f32 %v8175_v31, %v9025_v46 }
 0x235   : > { %v3435_v57 = vmul.f32 %v5689_v11, %v9333_v12  ;;  %12153 = vst [vmem:[#allocation67_spill] sm:$0xff] %v9521_v40  ;;  %v2535_v39 = vadd.f32 %v2519_v6, %v2471_v15  ;;  %v11403_v12 = vrot.slane %v9510_v23, 2  ;;  %v2583_v58 = vsel %vm2435_vm1, %v11405_v61, %v2582_v37 }
 0x236   : > { %v2647_v13 = vsel %vm2435_vm1, %v11404_v60, %v2646_v29  ;;  %v2936_v11 = vmul.f32 %v8179_v9, %v9191_v42  ;;  %v11409_v1 = vrot.slane %v9514_v52, 3  ;;  %v2839_v37 = vrot.slane %v2808_v24, 3 }
 0x237   : > { %3462 = vrot.lane.b32.xlu1 %v3435_v57, %s5873_s16  ;;  %v2599_v3 = vadd.f32 %v2583_v58, %v2535_v39  ;;  %v2711_v15 = vsel %vm2435_vm1, %v11403_v12, %v2710_v22  ;;  %v9548_v6 = vmul.f32 %v8175_v31, %v8834_v5  ;;  %v9552_v29 = vmul.f32 %v9177_v49, %v8179_v9 }
 0x238   : > { %v3000_v39 = vmul.f32 %v8188_v48, %v9429_v0  ;;  %v2776_v22 = vsel %vm2756_vm10, %v11409_v1, %v2775_v14  ;;  %v9561_v12 = vmul.f32 %v8188_v48, %v9413_v47  ;;  %v3064_v24 = vmul.f32 %v9457_v44, %v8205_v16 }
 0x239   : > { %12154 = vst [vmem:[#allocation68_spill] sm:$0xff] %v9548_v6  ;;  %12155 = vst [vmem:[#allocation69_spill] sm:$0xff] %v9552_v29  ;;  %v2663_v58 = vadd.f32 %v2647_v13, %v2599_v3  ;;  %v2903_v61 = vrot.slane %v2872_v32, 3  ;;  %v2967_v57 = vrot.slane %v2936_v11, 3  ;;  %v9567_v23 = vmul.f32 %v9284_v20, %v8205_v16 }
 0x23a   : > { %12156 = vst [vmem:[#allocation70_spill] sm:$0xff] %v9561_v12  ;;  %v5691_v60 = vpop.eup %5690  ;;  %v3129_v3 = vmul.f32 %v5745_v55, %v8244_v25  ;;  %v3031_v56 = vrot.slane %v3000_v39, 3  ;;  %v9572_v14 = vmul.f32 %v9294_v21, %v8244_v25  ;;  %v12159_v1 = vrot.slane %v9521_v40, 3 }
 0x23b   : > { %12157 = vst [vmem:[#allocation71_spill] sm:$0xff] %v9567_v23  ;;  %v3413_v13 = vadd.f32 1.0, %v5691_v60  ;;  %v2727_v52 = vadd.f32 %v2711_v15, %v2663_v58  ;;  %v11415_v32 = vrot.slane %v9548_v6, 3  ;;  %v11413_v11 = vrot.slane %v9552_v29, 3 }
 0x23c   : > { %12158 = vst [vmem:[#allocation72_spill] sm:$0xff] %v9572_v14  ;;  %v2840_v44 = vsel %vm2756_vm10, %v12159_v1, %v2839_v37  ;;  %v3096_v2 = vrot.slane %v3064_v24, 4  ;;  %v11412_v55 = vrot.slane %v9561_v12, 3  ;;  %v3160_v60 = vrot.slane %v3129_v3, 4  ;;  %v9602_v24 = vld [vmem:[#allocation2 + $0x30] sm:$0xff]  ;;  %v9606_v3 = vld [vmem:[#allocation2 + $0x48] sm:$0xff] }
 0x23d   : > { %5692 = vrcp.f32 %v3413_v13  ;;  %v2792_v20 = vadd.f32 %v2776_v22, %v2727_v52  ;;  %v2904_v15 = vsel %vm2756_vm10, %v11415_v32, %v2903_v61  ;;  %v2968_v21 = vsel %vm2756_vm10, %v11413_v11, %v2967_v57  ;;  %v9610_v13 = vld [vmem:[#allocation2 + $0x90] sm:$0xff] }
 0x23e   : > { %v11411_v1 = vrot.slane %v9567_v23, 4  ;;  %v3193_v37 = vmul.f32 %v8248_v63, %v9025_v46  ;;  %v3032_v52 = vsel %vm2756_vm10, %v11412_v55, %v3031_v56  ;;  %v11414_v58 = vrot.slane %v9572_v14, 4 }
 0x23f   : > { %v2856_v39 = vadd.f32 %v2840_v44, %v2792_v20  ;;  %v3257_v22 = vmul.f32 %v12097_v53, %v9191_v42  ;;  %v9600_v57 = vmul.f32 %v8248_v63, %v8834_v5  ;;  %v1994_v46 = vmul.f32 %v9602_v24, %v12022_v26  ;;  %v9619_v44 = vld [vmem:[#allocation2 + $0x60] sm:$0xff] }
 0x240   : > { %v3097_v61 = vsel %vm3077_vm3, %v11411_v1, %v3096_v2  ;;  %v2014_v56 = vmul.f32 %v9606_v3, %v12090_v51  ;;  %v3161_v2 = vsel %vm3077_vm3, %v11414_v58, %v3160_v60  ;;  %v9617_v5 = vmul.f32 %v9177_v49, %v12097_v53 }
 0x241   : > { %12160 = vst [vmem:[#allocation73_spill] sm:$0xff] %v9600_v57  ;;  %v2920_v42 = vadd.f32 %v2904_v15, %v2856_v39  ;;  %v2034_v20 = vmul.f32 %v9619_v44, %v12092_v8  ;;  %v3224_v1 = vrot.slane %v3193_v37, 4  ;;  %v9625_v55 = vmul.f32 %v9395_v43, %v9413_v47  ;;  %v9627_v15 = vld [vmem:[#allocation2 + $0x78] sm:$0xff] }
 0x242   : > { %12161 = vst [vmem:[#allocation74_spill] sm:$0xff] %v9617_v5  ;;  %v2022_v11 = vadd.f32 %v2014_v56, %v1994_v46  ;;  %12163 = vst [vmem:[#allocation76_spill] sm:$0xff] %v9627_v15  ;;  %v2054_v60 = vmul.f32 %v9627_v15, %v12137_v41  ;;  %v3288_v58 = vrot.slane %v3257_v22, 4  ;;  %v3321_v32 = vmul.f32 %v9395_v43, %v9429_v0 }
 0x243   : > { %12162 = vst [vmem:[#allocation75_spill] sm:$0xff] %v9625_v55  ;;  %v2984_v39 = vadd.f32 %v2968_v21, %v2920_v42  ;;  %v2096_v14 = vmul.f32 %v9602_v24, %v12135_v19  ;;  %v11425_v37 = vrot.slane %v9600_v57, 4  ;;  %v2074_v47 = vmul.f32 %v12141_v50, %v9610_v13 }
 0x244   : > { %v2042_v23 = vadd.f32 %v2034_v20, %v2022_v11  ;;  %v2161_v46 = vmul.f32 %v9606_v3, %v12138_v27  ;;  %v11426_v12 = vrot.slane %v9617_v5, 4  ;;  %v2225_v21 = vmul.f32 %v9619_v44, %v12140_v35 }
 0x245   : > { %v3048_v56 = vadd.f32 %v3032_v52, %v2984_v39  ;;  %v2353_v0 = vmul.f32 %v12111_v4, %v9610_v13  ;;  %v3225_v22 = vsel %vm3077_vm3, %v11425_v37, %v3224_v1  ;;  %v2289_v20 = vmul.f32 %v9627_v15, %v12143_v17 }
 0x246   : > { %v2062_v42 = vadd.f32 %v2054_v60, %v2042_v23  ;;  %v3289_v39 = vsel %vm3077_vm3, %v11426_v12, %v3288_v58  ;;  %v3352_v6 = vrot.slane %v3321_v32, 4  ;;  %v2125_v40 = vrot.slane %v2096_v14, 1  ;;  %v12186_v12 = vld [vmem:[#allocation58_spill] sm:$0xff] }
 0x247   : > { %v5693_v29 = vpop.eup %5692  ;;  %v3113_v52 = vadd.f32 %v3097_v61, %v3048_v56  ;;  %v2189_v57 = vrot.slane %v2161_v46, 1  ;;  %v2417_v1 = vmul.f32 %v9602_v24, %v12046_v28  ;;  %v12164_v23 = vrot.slane %v9167_v45, 1 }
 0x248   : > { %v3437_v36 = vmul.f32 %v5693_v29, %v9470_v7  ;;  %v2082_v4 = vadd.f32 %v2074_v47, %v2062_v42  ;;  %v2253_v11 = vrot.slane %v2225_v21, 1  ;;  %v2381_v61 = vrot.slane %v2353_v0, 1 }
 0x249   : > { %v3177_v37 = vadd.f32 %v3161_v2, %v3113_v52  ;;  %v2127_v60 = vsel %vm2114_vm2, %v2125_v40, %v12164_v23  ;;  %v12165_v32 = vrot.slane %v9174_v38, 1  ;;  %v2317_v7 = vrot.slane %v2289_v20, 1 }
 0x24a   : > { %3466 = vrot.lane.b32.xlu1 %v3437_v36, %s5873_s16  ;;  %v2147_v56 = vadd.f32 %v2127_v60, %v2082_v4  ;;  %v2482_v29 = vmul.f32 %v9606_v3, %v8140_v33  ;;  %v2546_v2 = vmul.f32 %v9619_v44, %v8144_v30  ;;  %v2610_v45 = vmul.f32 %v9627_v15, %v8155_v59 }
 0x24b   : > { %v2191_v14 = vsel %vm2114_vm2, %v2189_v57, %v12165_v32  ;;  %v3241_v58 = vadd.f32 %v3225_v22, %v3177_v37  ;;  %v2674_v40 = vmul.f32 %v8159_v62, %v9610_v13  ;;  %v12166_v4 = vrot.slane %v9625_v55, 4  ;;  %v12169_v22 = vld [vmem:[#allocation47_spill] sm:$0xff] }
 0x24c   : > { %v2211_v36 = vadd.f32 %v2191_v14, %v2147_v56  ;;  %v12167_v57 = vrot.slane %v9185_v54, 1  ;;  %v2446_v46 = vrot.slane %v2417_v1, 2  ;;  %v12168_v21 = vrot.slane %v9196_v10, 1 }
 0x24d   : > { %v3353_v38 = vsel %vm3077_vm3, %v12166_v4, %v3352_v6  ;;  %v3305_v37 = vadd.f32 %v3289_v39, %v3241_v58  ;;  %v12170_v42 = vrot.slane %v12169_v22, 1  ;;  %v2738_v52 = vmul.f32 %v9602_v24, %v8163_v34  ;;  %v12171_v6 = vld [vmem:[#allocation46_spill] sm:$0xff] }
 0x24e   : > { %v2255_v47 = vsel %vm2114_vm2, %v2253_v11, %v12167_v57  ;;  %v2319_v0 = vsel %vm2114_vm2, %v2317_v7, %v12168_v21  ;;  %v12172_v60 = vrot.slane %v12171_v6, 2  ;;  %v2510_v56 = vrot.slane %v2482_v29, 2  ;;  %v12173_v7 = vld [vmem:[#allocation48_spill] sm:$0xff] }
 0x24f   : > { %v2383_v20 = vsel %vm2114_vm2, %v2381_v61, %v12170_v42  ;;  %v2275_v23 = vadd.f32 %v2255_v47, %v2211_v36  ;;  %v2803_v11 = vmul.f32 %v9606_v3, %v12080_v18  ;;  %v3369_v39 = vadd.f32 %v3353_v38, %v3305_v37  ;;  %v12175_v57 = vld [vmem:[#allocation52_spill] sm:$0xff]  ;;  %v12176_v38 = vld [vmem:[#allocation54_spill] sm:$0xff] }
 0x250   : > { %v2448_v54 = vsel %vm2435_vm1, %v2446_v46, %v12172_v60  ;;  %v2574_v10 = vrot.slane %v2546_v2, 2  ;;  %v2638_v1 = vrot.slane %v2610_v45, 2  ;;  %v2702_v32 = vrot.slane %v2674_v40, 2  ;;  %v12178_v21 = vld [vmem:[#allocation16_spill] sm:$0xff] }
 0x251   : > { %v2339_v14 = vadd.f32 %v2319_v0, %v2275_v23  ;;  %v12174_v58 = vrot.slane %v12173_v7, 2  ;;  %v2867_v4 = vmul.f32 %v9619_v44, %v8175_v31  ;;  %v2995_v36 = vmul.f32 %v8188_v48, %v9610_v13 }
 0x252   : > { %v9699_v29 = vadd.f32 %v12175_v57, %v3369_v39  ;;  %v2767_v47 = vrot.slane %v2738_v52, 3  ;;  %v2931_v2 = vmul.f32 %v9627_v15, %v8179_v9  ;;  %v3059_v45 = vmul.f32 %v9602_v24, %v8205_v16  ;;  %v9716_v24 = vld [vmem:[#allocation2 + $0x68] sm:$0xff] }
 0x253   : > { %v2512_v61 = vsel %vm2435_vm1, %v2510_v56, %v12174_v58  ;;  %v2403_v40 = vadd.f32 %v2383_v20, %v2339_v14  ;;  %v12177_v46 = vrot.slane %v12176_v38, 2  ;;  %v12179_v0 = vrot.slane %v12178_v21, 2  ;;  %v12180_v56 = vld [vmem:[#allocation56_spill] sm:$0xff]  ;;  %v12182_v14 = vld [vmem:[#allocation55_spill] sm:$0xff]  ;;  %v12184_v58 = vld [vmem:[#allocation57_spill] sm:$0xff] }
 0x254   : > { %v2831_v42 = vrot.slane %v2803_v11, 3  ;;  %v5151_v23 = vmul.f32 -1.442695, %v9699_v29  ;;  %v3023_v6 = vrot.slane %v2995_v36, 3  ;;  %v3124_v52 = vmul.f32 %v9606_v3, %v8244_v25 }
 0x255   : > { %v2576_v37 = vsel %vm2435_vm1, %v2574_v10, %v12177_v46  ;;  %v2640_v22 = vsel %vm2435_vm1, %v2638_v1, %v12179_v0  ;;  %v3188_v60 = vmul.f32 %v9619_v44, %v8248_v63  ;;  %v2468_v20 = vadd.f32 %v2448_v54, %v2403_v40  ;;  %v9730_v40 = vld [vmem:[#allocation2 + $0x70] sm:$0xff] }
 0x256   : > { %v12181_v39 = vrot.slane %v12180_v56, 2  ;;  %v12183_v7 = vrot.slane %v12182_v14, 3  ;;  %v2895_v1 = vrot.slane %v2867_v4, 3  ;;  %5694 = vpow2.f32 %v5151_v23  ;;  %v9736_v4 = vld [vmem:[#allocation2 + $0x80] sm:$0xff] }
 0x257   : > { %v12185_v36 = vrot.slane %v12184_v58, 3  ;;  %v2959_v46 = vrot.slane %v2931_v2, 3  ;;  %v3088_v21 = vrot.slane %v3059_v45, 4  ;;  %v2532_v0 = vadd.f32 %v2512_v61, %v2468_v20  ;;  %v12190_v45 = vld [vmem:[#allocation49_spill] sm:$0xff]  ;;  %v12193_v58 = vld [vmem:[#allocation7_spill] sm:$0xff] }
 0x258   : > { %v2704_v10 = vsel %vm2435_vm1, %v2702_v32, %v12181_v39  ;;  %v2769_v11 = vsel %vm2756_vm10, %v2767_v47, %v12183_v7  ;;  %v12187_v55 = vrot.slane %v12186_v12, 3  ;;  %v9732_v32 = vld [vmem:[#allocation2 + $0x88] sm:$0xff]  ;;  %v3524_v47 = vmul.f32 %v9716_v24, %v12022_v26 }
 0x259   : > { %v2833_v38 = vsel %vm2756_vm10, %v2831_v42, %v12185_v36  ;;  %v3540_v23 = vmul.f32 %v9736_v4, %v12090_v51  ;;  %v12188_v42 = vld [vmem:[#allocation51_spill] sm:$0xff]  ;;  %v12191_v12 = vrot.slane %v12190_v45, 3  ;;  %v3152_v20 = vrot.slane %v3124_v52, 4  ;;  %v12198_v45 = vld [vmem:[#allocation53_spill] sm:$0xff] }
 0x25a   : > { %v2897_v54 = vsel %vm2756_vm10, %v2895_v1, %v12187_v55  ;;  %v12189_v2 = vrot.slane %v12188_v42, 3  ;;  %v3216_v56 = vrot.slane %v3188_v60, 4  ;;  %v2596_v39 = vadd.f32 %v2576_v37, %v2532_v0  ;;  %v12195_v42 = vld [vmem:[#allocation50_spill] sm:$0xff] }
 0x25b   : > { %v9746_v55 = vsel %vm2756_vm10, %v3023_v6, %v12191_v12  ;;  %v3548_v14 = vadd.f32 %v3540_v23, %v3524_v47  ;;  %v3556_v7 = vmul.f32 %v9177_v49, %v12092_v8  ;;  %v9752_v1 = vmul.f32 %v9716_v24, %v12135_v19  ;;  %v9768_v47 = vld [vmem:[#allocation2 + $0xb0] sm:$0xff] }
 0x25c   : > { %v2961_v61 = vsel %vm2756_vm10, %v2959_v46, %v12189_v2  ;;  %v12194_v36 = vrot.slane %v12193_v58, 4  ;;  %v12196_v2 = vrot.slane %v12195_v42, 4  ;;  %v3605_v37 = vmul.f32 %v9730_v40, %v12135_v19 }
 0x25d   : > { %12192 = vst [vmem:[#allocation47_spill] sm:$0xff] %v9752_v1  ;;  %v3665_v52 = vmul.f32 %v9732_v32, %v12138_v27  ;;  %v2660_v60 = vadd.f32 %v2640_v22, %v2596_v39  ;;  %v3564_v0 = vadd.f32 %v3556_v7, %v3548_v14  ;;  %v3572_v23 = vmul.f32 %v9768_v47, %v12137_v41  ;;  %v9812_v41 = vld [vmem:[#allocation2 + $0xd0] sm:$0xff] }
 0x25e   : > { %v9757_v46 = vsel %vm3077_vm3, %v3088_v21, %v12194_v36  ;;  %v9762_v6 = vsel %vm3077_vm3, %v3152_v20, %v12196_v2  ;;  %v9774_v21 = vmul.f32 %v9736_v4, %v12138_v27  ;;  %v12199_v12 = vrot.slane %v12198_v45, 4  ;;  %v9783_v36 = vld [vmem:[#allocation2 + $0xc8] sm:$0xff]  ;;  %v9788_v2 = vld [vmem:[#allocation2 + $0xa0] sm:$0xff]  ;;  %12202 = vst [vmem:[#allocation54_spill] sm:$0xff] %v9812_v41 }
 0x25f   : > { %v3252_v58 = vmul.f32 %v9627_v15, %v12097_v53  ;;  %v3588_v22 = vmul.f32 %v9783_v36, %v12141_v50  ;;  %v3630_v39 = vrot.slane %v3605_v37, 1  ;;  %v2724_v14 = vadd.f32 %v2704_v10, %v2660_v60  ;;  %v9800_v50 = vld [vmem:[#allocation2 + $0xb8] sm:$0xff]  ;;  %v12203_v15 = vld [vmem:[#allocation15_spill] sm:$0xff] }
 0x260   : > { %12197 = vst [vmem:[#allocation46_spill] sm:$0xff] %v9774_v21  ;;  %v9779_v20 = vsel %vm3077_vm3, %v3216_v56, %v12199_v12  ;;  %v3580_v7 = vadd.f32 %v3572_v23, %v3564_v0  ;;  %v11438_v42 = vrot.slane %v9752_v1, 1  ;;  %v3725_v45 = vmul.f32 %v9788_v2, %v12140_v35  ;;  %v5695_v23 = vpop.eup %5694 }
 0x261   : > { %v3690_v56 = vrot.slane %v3665_v52, 1  ;;  %v9794_v12 = vmul.f32 %v9177_v49, %v12140_v35  ;;  %v9798_v5 = vmul.f32 %v9768_v47, %v12143_v17  ;;  %v3785_v10 = vmul.f32 %v9800_v50, %v12143_v17 }
 0x262   : > { %v2789_v37 = vadd.f32 %v2769_v11, %v2724_v14  ;;  %v9806_v60 = vmul.f32 %v9395_v43, %v9610_v13  ;;  %v3596_v0 = vadd.f32 %v3588_v22, %v3580_v7  ;;  %v11439_v52 = vrot.slane %v9774_v21, 1 }
 0x263   : > { %12200 = vst [vmem:[#allocation48_spill] sm:$0xff] %v9794_v12  ;;  %12201 = vst [vmem:[#allocation52_spill] sm:$0xff] %v9798_v5  ;;  %v3631_v35 = vsel %vm2114_vm2, %v11438_v42, %v3630_v39  ;;  %v3750_v27 = vrot.slane %v3725_v45, 1  ;;  %v3810_v19 = vrot.slane %v3785_v10, 1  ;;  %v3845_v17 = vmul.f32 %v9812_v41, %v12203_v15 }
 0x264   : > { %v3415_v11 = vadd.f32 1.0, %v5695_v23  ;;  %v2853_v14 = vadd.f32 %v2833_v38, %v2789_v37  ;;  %v3656_v8 = vadd.f32 %v3631_v35, %v3596_v0  ;;  %v9818_v22 = vmul.f32 %v9783_v36, %v12203_v15 }
 0x265   : > { %v3691_v7 = vsel %vm2114_vm2, %v11439_v52, %v3690_v56  ;;  %v11442_v39 = vrot.slane %v9794_v12, 1  ;;  %v3905_v10 = vmul.f32 %v9730_v40, %v12046_v28  ;;  %v9829_v35 = vmul.f32 %v9716_v24, %v12046_v28 }
 0x266   : > { %12204 = vst [vmem:[#allocation16_spill] sm:$0xff] %v9818_v22  ;;  %5696 = vrcp.f32 %v3415_v11  ;;  %v2917_v42 = vadd.f32 %v2897_v54, %v2853_v14  ;;  %v3716_v23 = vadd.f32 %v3691_v7, %v3656_v8  ;;  %v3280_v38 = vrot.slane %v3252_v58, 4 }
 0x267   : > { %12205 = vst [vmem:[#allocation56_spill] sm:$0xff] %v9829_v35  ;;  %v3751_v37 = vsel %vm2114_vm2, %v11442_v39, %v3750_v27  ;;  %v3870_v56 = vrot.slane %v3845_v17, 1  ;;  %v3965_v0 = vmul.f32 %v9732_v32, %v8140_v33  ;;  %v12206_v21 = vrot.slane %v9798_v5, 1  ;;  %v12236_v5 = vld [vmem:[#allocation10_spill] sm:$0xff] }
 0x268   : > { %v2981_v52 = vadd.f32 %v2961_v61, %v2917_v42  ;;  %v3776_v45 = vadd.f32 %v3751_v37, %v3716_v23  ;;  %v11441_v8 = vrot.slane %v9818_v22, 1  ;;  %v3930_v11 = vrot.slane %v3905_v10, 2 }
 0x269   : > { %v3811_v54 = vsel %vm2114_vm2, %v12206_v21, %v3810_v19  ;;  %v9842_v58 = vmul.f32 %v9736_v4, %v8140_v33  ;;  %v9846_v27 = vmul.f32 %v9177_v49, %v8144_v30  ;;  %v4025_v17 = vmul.f32 %v9788_v2, %v8144_v30 }
 0x26a   : > { %v3045_v61 = vadd.f32 %v9746_v55, %v2981_v52  ;;  %v3344_v42 = vrot.slane %v9806_v60, 4  ;;  %v3836_v14 = vadd.f32 %v3811_v54, %v3776_v45  ;;  %v11445_v19 = vrot.slane %v9829_v35, 2  ;;  %v12210_v55 = vld [vmem:[#allocation40_spill] sm:$0xff] }
 0x26b   : > { %12207 = vst [vmem:[#allocation55_spill] sm:$0xff] %v9842_v58  ;;  %12208 = vst [vmem:[#allocation57_spill] sm:$0xff] %v9846_v27  ;;  %v3871_v21 = vsel %vm2114_vm2, %v11441_v8, %v3870_v56  ;;  %v3990_v7 = vrot.slane %v3965_v0, 2  ;;  %v9858_v10 = vmul.f32 %v9768_v47, %v8155_v59  ;;  %v4085_v23 = vmul.f32 %v9800_v50, %v8155_v59 }
 0x26c   : > { %v3110_v37 = vadd.f32 %v9757_v46, %v3045_v61  ;;  %v12211_v52 = vrot.slane %v12210_v55, 4  ;;  %v3896_v45 = vadd.f32 %v3871_v21, %v3836_v14  ;;  %v4145_v54 = vmul.f32 %v9812_v41, %v8159_v62 }
 0x26d   : > { %12209 = vst [vmem:[#allocation58_spill] sm:$0xff] %v9858_v10  ;;  %v3931_v56 = vsel %vm2435_vm1, %v11445_v19, %v3930_v11  ;;  %v11444_v0 = vrot.slane %v9842_v58, 2  ;;  %v11447_v8 = vrot.slane %v9846_v27, 2  ;;  %v4050_v39 = vrot.slane %v4025_v17, 2 }
 0x26e   : > { %v3282_v60 = vsel %vm3077_vm3, %v3280_v38, %v12211_v52  ;;  %v3174_v22 = vadd.f32 %v9762_v6, %v3110_v37  ;;  %v3956_v46 = vadd.f32 %v3931_v56, %v3896_v45  ;;  %v4110_v61 = vrot.slane %v4085_v23, 2 }
 0x26f   : > { %v9876_v38 = vmul.f32 %v9783_v36, %v8159_v62  ;;  %v3991_v14 = vsel %vm2435_vm1, %v11444_v0, %v3990_v7  ;;  %v4205_v11 = vmul.f32 %v9730_v40, %v8163_v34  ;;  %v4265_v17 = vmul.f32 %v9732_v32, %v12080_v18  ;;  %v12214_v7 = vld [vmem:[#allocation6_spill] sm:$0xff] }
 0x270   : > { %v5697_v55 = vpop.eup %5696  ;;  %v3238_v6 = vadd.f32 %v9779_v20, %v3174_v22  ;;  %v4016_v23 = vadd.f32 %v3991_v14, %v3956_v46  ;;  %v4170_v37 = vrot.slane %v4145_v54, 2  ;;  %v9889_v52 = vmul.f32 %v9716_v24, %v8163_v34 }
 0x271   : > { %12212 = vst [vmem:[#allocation51_spill] sm:$0xff] %v9876_v38  ;;  %v3439_v45 = vmul.f32 %v5697_v55, %v9699_v29  ;;  %v12215_v56 = vrot.slane %v12214_v7, 4  ;;  %v4051_v19 = vsel %vm2435_vm1, %v11447_v8, %v4050_v39  ;;  %v9900_v21 = vmul.f32 %v9736_v4, %v12080_v18 }
 0x272   : > { %12213 = vst [vmem:[#allocation49_spill] sm:$0xff] %v9889_v52  ;;  %v3302_v20 = vadd.f32 %v3282_v60, %v3238_v6  ;;  %v4076_v22 = vadd.f32 %v4051_v19, %v4016_v23  ;;  %v12217_v54 = vrot.slane %v9858_v10, 2  ;;  %v11446_v29 = vrot.slane %v9876_v38, 2  ;;  %v12230_v38 = vld [vmem:[#allocation11_spill] sm:$0xff] }
 0x273   : > { %v3346_v0 = vsel %vm3077_vm3, %v3344_v42, %v12215_v56  ;;  %12216 = vst [vmem:[#allocation7_spill] sm:$0xff] %v9900_v21  ;;  %3470 = vrot.lane.b32.xlu1 %v3439_v45, %s5873_s16  ;;  %v4230_v14 = vrot.slane %v4205_v11, 3  ;;  %v4290_v42 = vrot.slane %v4265_v17, 3  ;;  %v4325_v55 = vmul.f32 %v9788_v2, %v8175_v31 }
 0x274   : > { %v4111_v46 = vsel %vm2435_vm1, %v12217_v54, %v4110_v61  ;;  %v4385_v39 = vmul.f32 %v9800_v50, %v8179_v9  ;;  %v3366_v7 = vadd.f32 %v3346_v0, %v3302_v20  ;;  %v4171_v19 = vsel %vm2435_vm1, %v11446_v29, %v4170_v37 }
 0x275   : > { %v4136_v56 = vadd.f32 %v4111_v46, %v4076_v22  ;;  %v11452_v60 = vrot.slane %v9889_v52, 3  ;;  %v11448_v61 = vrot.slane %v9900_v21, 3  ;;  %v9918_v11 = vmul.f32 %v9177_v49, %v8175_v31 }
 0x276   : > { %v9922_v17 = vmul.f32 %v9768_v47, %v8179_v9  ;;  %v4445_v0 = vmul.f32 %v9812_v41, %v8188_v48  ;;  %v9927_v6 = vadd.f32 %v12175_v57, %v3366_v7  ;;  %v9931_v37 = vmul.f32 %v9783_v36, %v8188_v48 }
 0x277   : > { %12218 = vst [vmem:[#allocation50_spill] sm:$0xff] %v9918_v11  ;;  %v4196_v23 = vadd.f32 %v4171_v19, %v4136_v56  ;;  %v4505_v45 = vmul.f32 %v9730_v40, %v8205_v16  ;;  %v4231_v20 = vsel %vm2756_vm10, %v11452_v60, %v4230_v14  ;;  %v4291_v22 = vsel %vm2756_vm10, %v11448_v61, %v4290_v42 }
 0x278   : > { %12219 = vst [vmem:[#allocation53_spill] sm:$0xff] %v9922_v17  ;;  %12220 = vst [vmem:[#allocation40_spill] sm:$0xff] %v9931_v37  ;;  %v4350_v54 = vrot.slane %v4325_v55, 3  ;;  %v4410_v46 = vrot.slane %v4385_v39, 3  ;;  %v5148_v7 = vmul.f32 -1.442695, %v9927_v6  ;;  %v9944_v29 = vmul.f32 %v9716_v24, %v8205_v16 }
 0x279   : > { %v4256_v56 = vadd.f32 %v4231_v20, %v4196_v23  ;;  %v4470_v19 = vrot.slane %v4445_v0, 3  ;;  %v11451_v40 = vrot.slane %v9918_v11, 3  ;;  %v11449_v8 = vrot.slane %v9922_v17, 3  ;;  %v9994_v17 = vld [vmem:[#allocation2 + $0xa8] sm:$0xff] }
 0x27a   : > { %12221 = vst [vmem:[#allocation6_spill] sm:$0xff] %v9944_v29  ;;  %v9950_v14 = vmul.f32 %v9736_v4, %v8244_v25  ;;  %v4565_v42 = vmul.f32 %v9732_v32, %v8244_v25  ;;  %5698 = vpow2.f32 %v5148_v7  ;;  %v11450_v39 = vrot.slane %v9931_v37, 3  ;;  %v12227_v37 = vld [vmem:[#allocation76_spill] sm:$0xff] }
 0x27b   : > { %v4316_v55 = vadd.f32 %v4291_v22, %v4256_v56  ;;  %v4530_v0 = vrot.slane %v4505_v45, 4  ;;  %v4351_v24 = vsel %vm2756_vm10, %v11451_v40, %v4350_v54  ;;  %v4411_v23 = vsel %vm2756_vm10, %v11449_v8, %v4410_v46  ;;  %v12226_v56 = vld [vmem:[#allocation8_spill] sm:$0xff] }
 0x27c   : > { %12222 = vst [vmem:[#allocation77_spill] sm:$0xff] %v9950_v14  ;;  %v9963_v20 = vmul.f32 %v9177_v49, %v8248_v63  ;;  %v4625_v61 = vmul.f32 %v9788_v2, %v8248_v63  ;;  %v4471_v45 = vsel %vm2756_vm10, %v11450_v39, %v4470_v19  ;;  %v11456_v22 = vrot.slane %v9944_v29, 4 }
 0x27d   : > { %v4376_v7 = vadd.f32 %v4351_v24, %v4316_v55  ;;  %v4685_v54 = vmul.f32 %v9800_v50, %v12097_v53  ;;  %v4590_v46 = vrot.slane %v4565_v42, 4  ;;  %v9976_v49 = vmul.f32 %v9768_v47, %v12097_v53 }
 0x27e   : > { %12223 = vst [vmem:[#allocation78_spill] sm:$0xff] %v9963_v20  ;;  %v4745_v8 = vmul.f32 %v9812_v41, %v9395_v43  ;;  %v4531_v19 = vsel %vm3077_vm3, %v11456_v22, %v4530_v0  ;;  %v1996_v24 = vmul.f32 %v9606_v3, %v12022_v26  ;;  %v2016_v39 = vmul.f32 %v9619_v44, %v12090_v51  ;;  %v12228_v22 = vld [vmem:[#allocation9_spill] sm:$0xff] }
 0x27f   : > { %12224 = vst [vmem:[#allocation79_spill] sm:$0xff] %v9976_v49  ;;  %v4436_v55 = vadd.f32 %v4411_v23, %v4376_v7  ;;  %v4650_v40 = vrot.slane %v4625_v61, 4  ;;  %v9990_v60 = vmul.f32 %v9783_v36, %v9395_v43  ;;  %v2036_v23 = vmul.f32 %v12227_v37, %v12226_v56 }
 0x280   : > { %v4710_v29 = vrot.slane %v4685_v54, 4  ;;  %v2024_v0 = vadd.f32 %v2016_v39, %v1996_v24  ;;  %v2056_v11 = vmul.f32 %v12228_v22, %v9610_v13  ;;  %v12229_v21 = vrot.slane %v9950_v14, 4 }
 0x281   : > { %12225 = vst [vmem:[#allocation80_spill] sm:$0xff] %v9990_v60  ;;  %v4496_v7 = vadd.f32 %v4471_v45, %v4436_v55  ;;  %v4770_v52 = vrot.slane %v4745_v8, 4  ;;  %v2099_v10 = vmul.f32 %v9606_v3, %v12230_v38  ;;  %v12231_v45 = vld [vmem:[#allocation12_spill] sm:$0xff]  ;;  %v12232_v55 = vld [vmem:[#allocation14_spill] sm:$0xff]  ;;  %v12233_v24 = vrot.slane %v9963_v20, 4 }
 0x282   : > { %v4591_v42 = vsel %vm3077_vm3, %v12229_v21, %v4590_v46  ;;  %v2044_v58 = vadd.f32 %v2036_v23, %v2024_v0  ;;  %v2164_v54 = vmul.f32 %v9619_v44, %v12231_v45  ;;  %v2228_v39 = vmul.f32 %v12227_v37, %v12232_v55  ;;  %v12234_v46 = vld [vmem:[#allocation13_spill] sm:$0xff] }
 0x283   : > { %v4556_v27 = vadd.f32 %v4531_v19, %v4496_v7  ;;  %v4651_v14 = vsel %vm3077_vm3, %v12233_v24, %v4650_v40  ;;  %v11475_v21 = vrot.slane %v9990_v60, 4  ;;  %v2292_v8 = vmul.f32 %v12234_v46, %v9610_v13 }
 0x284   : > { %v2356_v61 = vmul.f32 %v12203_v15, %v9994_v17  ;;  %v5699_v19 = vpop.eup %5698  ;;  %v12235_v7 = vrot.slane %v9976_v49, 4  ;;  %v2064_v35 = vadd.f32 %v2056_v11, %v2044_v58  ;;  %v2076_v20 = vmul.f32 %v12236_v5, %v9994_v17  ;;  %v12237_v49 = vld [vmem:[#allocation43_spill] sm:$0xff] }
 0x285   : > { %v4616_v23 = vadd.f32 %v4591_v42, %v4556_v27  ;;  %v3412_v12 = vadd.f32 1.0, %v5699_v19  ;;  %v4771_v40 = vsel %vm3077_vm3, %v11475_v21, %v4770_v52  ;;  %v2130_v24 = vrot.slane %v2099_v10, 1  ;;  %v12239_v21 = vld [vmem:[#allocation44_spill] sm:$0xff] }
 0x286   : > { %v4711_v0 = vsel %vm3077_vm3, %v12235_v7, %v4710_v29  ;;  %v2420_v1 = vmul.f32 %v9606_v3, %v12046_v28  ;;  %v2084_v43 = vadd.f32 %v2076_v20, %v2064_v35  ;;  %v2194_v27 = vrot.slane %v2164_v54, 1  ;;  %v12241_v54 = vld [vmem:[#allocation42_spill] sm:$0xff] }
 0x287   : > { %v4676_v15 = vadd.f32 %v4651_v14, %v4616_v23  ;;  %v2258_v42 = vrot.slane %v2228_v39, 1  ;;  %5700 = vrcp.f32 %v3412_v12  ;;  %v12238_v29 = vrot.slane %v12237_v49, 1  ;;  %v12243_v23 = vld [vmem:[#allocation59_spill] sm:$0xff] }
 0x288   : > { %v2322_v11 = vrot.slane %v2292_v8, 1  ;;  %v2386_v7 = vrot.slane %v2356_v61, 1  ;;  %v2485_v52 = vmul.f32 %v9619_v44, %v8140_v33  ;;  %v2613_v10 = vmul.f32 %v8155_v59, %v9610_v13 }
 0x289   : > { %v2132_v58 = vsel %vm2114_vm2, %v2130_v24, %v12238_v29  ;;  %v4736_v19 = vadd.f32 %v4711_v0, %v4676_v15  ;;  %v12240_v14 = vrot.slane %v12239_v21, 1  ;;  %v2451_v20 = vrot.slane %v2420_v1, 2  ;;  %v12245_v1 = vld [vmem:[#allocation60_spill] sm:$0xff]  ;;  %v12247_v29 = vld [vmem:[#allocation61_spill] sm:$0xff] }
 0x28a   : > { %v2149_v41 = vadd.f32 %v2132_v58, %v2084_v43  ;;  %v2549_v12 = vmul.f32 %v12227_v37, %v8144_v30  ;;  %v2677_v49 = vmul.f32 %v8159_v62, %v9994_v17  ;;  %v2741_v43 = vmul.f32 %v9606_v3, %v8163_v34 }
 0x28b   : > { %v2196_v35 = vsel %vm2114_vm2, %v2194_v27, %v12240_v14  ;;  %v4796_v61 = vadd.f32 %v4771_v40, %v4736_v19  ;;  %v12242_v39 = vrot.slane %v12241_v54, 1  ;;  %v12244_v21 = vrot.slane %v12243_v23, 1 }
 0x28c   : > { %v2213_v15 = vadd.f32 %v2196_v35, %v2149_v41  ;;  %v12246_v24 = vrot.slane %v12245_v1, 1  ;;  %v12248_v58 = vrot.slane %v12247_v29, 2  ;;  %v2515_v14 = vrot.slane %v2485_v52, 2 }
 0x28d   : > { %v2260_v8 = vsel %vm2114_vm2, %v2258_v42, %v12242_v39  ;;  %v2324_v0 = vsel %vm2114_vm2, %v2322_v11, %v12244_v21  ;;  %v10055_v41 = vadd.f32 %v12175_v57, %v4796_v61  ;;  %v2643_v35 = vrot.slane %v2613_v10, 2  ;;  %v12249_v57 = vld [vmem:[#allocation62_spill] sm:$0xff]  ;;  %v12251_v10 = vld [vmem:[#allocation63_spill] sm:$0xff] }
 0x28e   : > { %v2388_v27 = vsel %vm2114_vm2, %v2386_v7, %v12246_v24  ;;  %v2453_v40 = vsel %vm2435_vm1, %v2451_v20, %v12248_v58  ;;  %v2277_v19 = vadd.f32 %v2260_v8, %v2213_v15  ;;  %v2579_v54 = vrot.slane %v2549_v12, 2 }
 0x28f   : > { %v2707_v42 = vrot.slane %v2677_v49, 2  ;;  %v2806_v39 = vmul.f32 %v9619_v44, %v12080_v18  ;;  %v2934_v11 = vmul.f32 %v8179_v9, %v9610_v13  ;;  %v5159_v7 = vmul.f32 -1.442695, %v10055_v41 }
 0x290   : > { %v2341_v23 = vadd.f32 %v2324_v0, %v2277_v19  ;;  %v2772_v21 = vrot.slane %v2741_v43, 3  ;;  %v2870_v20 = vmul.f32 %v12227_v37, %v8175_v31  ;;  %v12250_v61 = vrot.slane %v12249_v57, 2  ;;  %v12253_v43 = vld [vmem:[#allocation64_spill] sm:$0xff]  ;;  %v12255_v19 = vld [vmem:[#allocation65_spill] sm:$0xff] }
 0x291   : > { %v12252_v12 = vrot.slane %v12251_v10, 2  ;;  %v2998_v15 = vmul.f32 %v8188_v48, %v9994_v17  ;;  %v3062_v8 = vmul.f32 %v9606_v3, %v8205_v16  ;;  %5702 = vpow2.f32 %v5159_v7  ;;  %v5701_v58 = vpop.eup %5700  ;;  %v12257_v7 = vld [vmem:[#allocation66_spill] sm:$0xff] }
 0x292   : > { %v2517_v52 = vsel %vm2435_vm1, %v2515_v14, %v12250_v61  ;;  %v2405_v0 = vadd.f32 %v2388_v27, %v2341_v23  ;;  %v12254_v1 = vrot.slane %v12253_v43, 2  ;;  %v3127_v29 = vmul.f32 %v9619_v44, %v8244_v25  ;;  %v12259_v43 = vld [vmem:[#allocation67_spill] sm:$0xff] }
 0x293   : > { %v2581_v49 = vsel %vm2435_vm1, %v2579_v54, %v12252_v12  ;;  %v12256_v14 = vrot.slane %v12255_v19, 2  ;;  %v2836_v57 = vrot.slane %v2806_v39, 3  ;;  %v2964_v61 = vrot.slane %v2934_v11, 3  ;;  %v12261_v11 = vld [vmem:[#allocation68_spill] sm:$0xff] }
 0x294   : > { %v2645_v24 = vsel %vm2435_vm1, %v2643_v35, %v12254_v1  ;;  %v3191_v10 = vmul.f32 %v12227_v37, %v8248_v63  ;;  %v3436_v3 = vmul.f32 %v5701_v58, %v9927_v6  ;;  %v2470_v27 = vadd.f32 %v2453_v40, %v2405_v0  ;;  %v10097_v58 = vld [vmem:[#allocation2 + $0x98] sm:$0xff] }
 0x295   : > { %v2709_v54 = vsel %vm2435_vm1, %v2707_v42, %v12256_v14  ;;  %v12258_v23 = vrot.slane %v12257_v7, 3  ;;  %v2900_v12 = vrot.slane %v2870_v20, 3  ;;  %v12260_v44 = vrot.slane %v12259_v43, 3  ;;  %v12263_v20 = vld [vmem:[#allocation69_spill] sm:$0xff]  ;;  %v12268_v43 = vld [vmem:[#allocation71_spill] sm:$0xff] }
 0x296   : > { %v3028_v19 = vrot.slane %v2998_v15, 3  ;;  %v3093_v60 = vrot.slane %v3062_v8, 4  ;;  %v3526_v42 = vmul.f32 %v9736_v4, %v12022_v26  ;;  %3464 = vrot.lane.b32.xlu0 %v3436_v3, %s5873_s16  ;;  %v2534_v39 = vadd.f32 %v2517_v52, %v2470_v27  ;;  %v12265_v8 = vld [vmem:[#allocation70_spill] sm:$0xff] }
 0x297   : > { %v2774_v35 = vsel %vm2756_vm10, %v2772_v21, %v12258_v23  ;;  %v2838_v1 = vsel %vm2756_vm10, %v2836_v57, %v12260_v44  ;;  %v12262_v6 = vrot.slane %v12261_v11, 3  ;;  %v3157_v0 = vrot.slane %v3127_v29, 4  ;;  %v12270_v11 = vld [vmem:[#allocation72_spill] sm:$0xff] }
 0x298   : > { %v3542_v21 = vmul.f32 %v10097_v58, %v12090_v51  ;;  %v12264_v14 = vrot.slane %v12263_v20, 3  ;;  %v12266_v57 = vrot.slane %v12265_v8, 3  ;;  %v3221_v3 = vrot.slane %v3191_v10, 4 }
 0x299   : > { %v2902_v40 = vsel %vm2756_vm10, %v2900_v12, %v12262_v6  ;;  %v10109_v52 = vmul.f32 %v9736_v4, %v12230_v38  ;;  %v2598_v27 = vadd.f32 %v2581_v49, %v2534_v39  ;;  %v3558_v23 = vmul.f32 %v9768_v47, %v12226_v56 }
 0x29a   : > { %v2966_v15 = vsel %vm2756_vm10, %v2964_v61, %v12264_v14  ;;  %v3030_v7 = vsel %vm2756_vm10, %v3028_v19, %v12266_v57  ;;  %v3550_v29 = vadd.f32 %v3542_v21, %v3526_v42  ;;  %v3608_v12 = vmul.f32 %v9732_v32, %v12230_v38 }
 0x29b   : > { %12267 = vst [vmem:[#allocation8_spill] sm:$0xff] %v10109_v52  ;;  %v12269_v44 = vrot.slane %v12268_v43, 4  ;;  %v12271_v19 = vrot.slane %v12270_v11, 4  ;;  %v3574_v49 = vmul.f32 %v9783_v36, %v12228_v22  ;;  %v3668_v42 = vmul.f32 %v9788_v2, %v12231_v45 }
 0x29c   : > { %v2662_v39 = vadd.f32 %v2645_v24, %v2598_v27  ;;  %v3566_v6 = vadd.f32 %v3558_v23, %v3550_v29  ;;  %v3635_v21 = vrot.slane %v3608_v12, 1  ;;  %v10131_v20 = vmul.f32 %v10097_v58, %v12231_v45  ;;  %v5703_v27 = vpop.eup %5702  ;;  %v10145_v12 = vld [vmem:[#allocation2 + $0xe0] sm:$0xff] }
 0x29d   : > { %v10118_v61 = vsel %vm3077_vm3, %v3093_v60, %v12269_v44  ;;  %v10123_v10 = vsel %vm3077_vm3, %v3157_v0, %v12271_v19  ;;  %v12273_v60 = vld [vmem:[#allocation73_spill] sm:$0xff]  ;;  %v10140_v0 = vmul.f32 %v12097_v53, %v9610_v13  ;;  %v11477_v57 = vrot.slane %v10109_v52, 1  ;;  %v12279_v52 = vld [vmem:[#allocation15_spill] sm:$0xff] }
 0x29e   : > { %12272 = vst [vmem:[#allocation76_spill] sm:$0xff] %v10131_v20  ;;  %v12274_v14 = vrot.slane %v12273_v60, 4  ;;  %v3728_v24 = vmul.f32 %v9800_v50, %v12232_v55  ;;  %v2726_v29 = vadd.f32 %v2709_v54, %v2662_v39  ;;  %v3582_v23 = vadd.f32 %v3574_v49, %v3566_v6  ;;  %v12276_v60 = vld [vmem:[#allocation54_spill] sm:$0xff] }
 0x29f   : > { %v3590_v43 = vmul.f32 %v10145_v12, %v12236_v5  ;;  %v3695_v44 = vrot.slane %v3668_v42, 1  ;;  %v3636_v11 = vsel %vm2114_vm2, %v11477_v57, %v3635_v21  ;;  %v10154_v19 = vmul.f32 %v9768_v47, %v12232_v55  ;;  %v12278_v42 = vld [vmem:[#allocation27_spill] sm:$0xff]  ;;  %v10165_v57 = vld [vmem:[#allocation2 + $0xe8] sm:$0xff] }
 0x2a0   : > { %v10136_v8 = vsel %vm3077_vm3, %v3221_v3, %v12274_v14  ;;  %v4836_v3 = vadd.f32 1.0, %v5703_v27  ;;  %v3788_v14 = vmul.f32 %v12276_v60, %v12234_v46  ;;  %v2791_v54 = vadd.f32 %v2774_v35, %v2726_v29 }
 0x2a1   : > { %12275 = vst [vmem:[#allocation9_spill] sm:$0xff] %v10154_v19  ;;  %v3598_v49 = vadd.f32 %v3590_v43, %v3582_v23  ;;  %v11483_v39 = vrot.slane %v10131_v20, 1  ;;  %v10161_v6 = vmul.f32 %v9783_v36, %v12234_v46  ;;  %v3319_v27 = vmul.f32 %v12278_v42, %v9994_v17 }
 0x2a2   : > { %5704 = vrcp.f32 %v4836_v3  ;;  %v3755_v21 = vrot.slane %v3728_v24, 1  ;;  %v3848_v5 = vmul.f32 %v10165_v57, %v12279_v52  ;;  %v2855_v55 = vadd.f32 %v2838_v1, %v2791_v54 }
 0x2a3   : > { %12277 = vst [vmem:[#allocation11_spill] sm:$0xff] %v10161_v6  ;;  %v3285_v35 = vrot.slane %v10140_v0, 4  ;;  %v3658_v29 = vadd.f32 %v3636_v11, %v3598_v49  ;;  %v3696_v23 = vsel %vm2114_vm2, %v11483_v39, %v3695_v44  ;;  %v11482_v43 = vrot.slane %v10154_v19, 1 }
 0x2a4   : > { %v3815_v3 = vrot.slane %v3788_v14, 1  ;;  %v10176_v17 = vmul.f32 %v10145_v12, %v12279_v52  ;;  %v3908_v24 = vmul.f32 %v9732_v32, %v12046_v28  ;;  %v2919_v42 = vadd.f32 %v2902_v40, %v2855_v55 }
 0x2a5   : > { %v3718_v46 = vadd.f32 %v3696_v23, %v3658_v29  ;;  %v11484_v1 = vrot.slane %v10161_v6, 1  ;;  %v10183_v0 = vmul.f32 %v9736_v4, %v12046_v28  ;;  %v3756_v44 = vsel %vm2114_vm2, %v11482_v43, %v3755_v21 }
 0x2a6   : > { %12280 = vst [vmem:[#allocation12_spill] sm:$0xff] %v10176_v17  ;;  %v3875_v11 = vrot.slane %v3848_v5, 1  ;;  %v10190_v14 = vmul.f32 %v10097_v58, %v8140_v33  ;;  %v3968_v54 = vmul.f32 %v9788_v2, %v8140_v33  ;;  %v2983_v55 = vadd.f32 %v2966_v15, %v2919_v42 }
 0x2a7   : > { %12281 = vst [vmem:[#allocation43_spill] sm:$0xff] %v10183_v0  ;;  %v3778_v40 = vadd.f32 %v3756_v44, %v3718_v46  ;;  %v3935_v49 = vrot.slane %v3908_v24, 2  ;;  %v4028_v29 = vmul.f32 %v9800_v50, %v8144_v30  ;;  %v3816_v23 = vsel %vm2114_vm2, %v11484_v1, %v3815_v3 }
 0x2a8   : > { %12282 = vst [vmem:[#allocation44_spill] sm:$0xff] %v10190_v14  ;;  %v11487_v21 = vrot.slane %v10176_v17, 1  ;;  %v10202_v5 = vmul.f32 %v9768_v47, %v8144_v30  ;;  %v4088_v43 = vmul.f32 %v12276_v60, %v8155_v59  ;;  %v3047_v39 = vadd.f32 %v3030_v7, %v2983_v55 }
 0x2a9   : > { %v3349_v15 = vrot.slane %v3319_v27, 4  ;;  %v3838_v46 = vadd.f32 %v3816_v23, %v3778_v40  ;;  %v11488_v24 = vrot.slane %v10183_v0, 2  ;;  %v11489_v3 = vrot.slane %v10190_v14, 2 }
 0x2aa   : > { %12283 = vst [vmem:[#allocation42_spill] sm:$0xff] %v10202_v5  ;;  %v3876_v42 = vsel %vm2114_vm2, %v11487_v21, %v3875_v11  ;;  %v3995_v44 = vrot.slane %v3968_v54, 2  ;;  %v10213_v1 = vmul.f32 %v9783_v36, %v8155_v59  ;;  %v3112_v6 = vadd.f32 %v10118_v61, %v3047_v39 }
 0x2ab   : > { %v3898_v19 = vadd.f32 %v3876_v42, %v3838_v46  ;;  %v3936_v7 = vsel %vm2435_vm1, %v11488_v24, %v3935_v49  ;;  %v4055_v27 = vrot.slane %v4028_v29, 2  ;;  %v11493_v40 = vrot.slane %v10202_v5, 2  ;;  %v12286_v49 = vld [vmem:[#allocation74_spill] sm:$0xff] }
 0x2ac   : > { %12284 = vst [vmem:[#allocation59_spill] sm:$0xff] %v10213_v1  ;;  %v5705_v55 = vpop.eup %5704  ;;  %v4115_v23 = vrot.slane %v4088_v43, 2  ;;  %v4148_v11 = vmul.f32 %v10165_v57, %v8159_v62  ;;  %v4208_v54 = vmul.f32 %v9732_v32, %v8163_v34  ;;  %v3176_v61 = vadd.f32 %v10123_v10, %v3112_v6 }
 0x2ad   : > { %v4860_v21 = vmul.f32 %v5705_v55, %v10055_v41  ;;  %v3958_v39 = vadd.f32 %v3936_v7, %v3898_v19  ;;  %v10228_v46 = vmul.f32 %v10145_v12, %v8159_v62  ;;  %v12287_v29 = vrot.slane %v12286_v49, 4  ;;  %v12289_v19 = vld [vmem:[#allocation75_spill] sm:$0xff] }
 0x2ae   : > { %v3996_v43 = vsel %vm2435_vm1, %v11489_v3, %v3995_v44  ;;  %v11492_v24 = vrot.slane %v10213_v1, 2  ;;  %v10239_v41 = vmul.f32 %v9736_v4, %v8163_v34  ;;  %v3240_v10 = vadd.f32 %v10136_v8, %v3176_v61 }
 0x2af   : > { %12285 = vst [vmem:[#allocation60_spill] sm:$0xff] %v10228_v46  ;;  %v3287_v42 = vsel %vm3077_vm3, %v3285_v35, %v12287_v29  ;;  %4885 = vrot.lane.b32.xlu1 %v4860_v21, %s5873_s16  ;;  %v12290_v6 = vrot.slane %v12289_v19, 4  ;;  %v4018_v55 = vadd.f32 %v3996_v43, %v3958_v39  ;;  %v4056_v35 = vsel %vm2435_vm1, %v11493_v40, %v4055_v27 }
 0x2b0   : > { %12288 = vst [vmem:[#allocation61_spill] sm:$0xff] %v10239_v41  ;;  %v4116_v44 = vsel %vm2435_vm1, %v11492_v24, %v4115_v23  ;;  %v4175_v49 = vrot.slane %v4148_v11, 2  ;;  %v4235_v29 = vrot.slane %v4208_v54, 3  ;;  %v4268_v21 = vmul.f32 %v9788_v2, %v12080_v18 }
 0x2b1   : > { %v3351_v7 = vsel %vm3077_vm3, %v3349_v15, %v12290_v6  ;;  %v3304_v3 = vadd.f32 %v3287_v42, %v3240_v10  ;;  %v4078_v8 = vadd.f32 %v4056_v35, %v4018_v55  ;;  %v11491_v61 = vrot.slane %v10228_v46, 2  ;;  %v12303_v46 = vld [vmem:[#allocation14_spill] sm:$0xff] }
 0x2b2   : > { %v10257_v15 = vmul.f32 %v10097_v58, %v12080_v18  ;;  %v11490_v39 = vrot.slane %v10239_v41, 3  ;;  %v10262_v27 = vmul.f32 %v9768_v47, %v8175_v31  ;;  %v4328_v23 = vmul.f32 %v9800_v50, %v8175_v31 }
 0x2b3   : > { %v4388_v11 = vmul.f32 %v12276_v60, %v8179_v9  ;;  %v3368_v54 = vadd.f32 %v3351_v7, %v3304_v3  ;;  %v4138_v42 = vadd.f32 %v4116_v44, %v4078_v8  ;;  %v4448_v43 = vmul.f32 %v10165_v57, %v8188_v48  ;;  %v10283_v3 = vld [vmem:[%s11203_s4] ss:$0 sm:$0xff] }
 0x2b4   : > { %12291 = vst [vmem:[#allocation62_spill] sm:$0xff] %v10257_v15  ;;  %12292 = vst [vmem:[#allocation63_spill] sm:$0xff] %v10262_v27  ;;  %v4176_v10 = vsel %vm2435_vm1, %v11491_v61, %v4175_v49  ;;  %v4236_v19 = vsel %vm2756_vm10, %v11490_v39, %v4235_v29  ;;  %v4295_v6 = vrot.slane %v4268_v21, 3  ;;  %v10278_v55 = vmul.f32 %v9783_v36, %v8179_v9 }
 0x2b5   : > { %12294 = vst [vmem:[#allocation65_spill] sm:$0xff] %v10283_v3  ;;  %v10286_v7 = vadd.f32 %v10283_v3, %v3368_v54  ;;  %v4198_v35 = vadd.f32 %v4176_v10, %v4138_v42  ;;  %v11494_v44 = vrot.slane %v10257_v15, 3  ;;  %v10291_v49 = vmul.f32 %v10145_v12, %v8188_v48 }
 0x2b6   : > { %12293 = vst [vmem:[#allocation64_spill] sm:$0xff] %v10278_v55  ;;  %v11495_v29 = vrot.slane %v10262_v27, 3  ;;  %v4355_v21 = vrot.slane %v4328_v23, 3  ;;  %v4415_v8 = vrot.slane %v4388_v11, 3  ;;  %v4508_v39 = vmul.f32 %v9732_v32, %v8205_v16 }
 0x2b7   : > { %12295 = vst [vmem:[#allocation66_spill] sm:$0xff] %v10291_v49  ;;  %v5150_v61 = vmul.f32 -1.442695, %v10286_v7  ;;  %v4258_v24 = vadd.f32 %v4236_v19, %v4198_v35  ;;  %v4475_v40 = vrot.slane %v4448_v43, 3  ;;  %v10299_v54 = vmul.f32 %v9736_v4, %v8205_v16  ;;  %v10314_v19 = vld [vmem:[#allocation2 + $0x60] sm:$0xff] }
 0x2b8   : > { %v4296_v42 = vsel %vm2756_vm10, %v11494_v44, %v4295_v6  ;;  %v11496_v10 = vrot.slane %v10278_v55, 3  ;;  %v10307_v23 = vmul.f32 %v10097_v58, %v8244_v25  ;;  %v4568_v32 = vmul.f32 %v9788_v2, %v8244_v25 }
 0x2b9   : > { %12296 = vst [vmem:[#allocation67_spill] sm:$0xff] %v10299_v54  ;;  %5706 = vpow2.f32 %v5150_v61  ;;  %v4318_v11 = vadd.f32 %v4296_v42, %v4258_v24  ;;  %v11497_v43 = vrot.slane %v10291_v49, 3  ;;  %v4628_v4 = vmul.f32 %v9800_v50, %v8248_v63  ;;  %v10352_v49 = vld [vmem:[%s11202_s3 + $0x18] ss:$0 sm:$0xff] }
 0x2ba   : > { %12297 = vst [vmem:[#allocation68_spill] sm:$0xff] %v10307_v23  ;;  %v4356_v6 = vsel %vm2756_vm10, %v11495_v29, %v4355_v21  ;;  %v4416_v58 = vsel %vm2756_vm10, %v11496_v10, %v4415_v8  ;;  %v4535_v35 = vrot.slane %v4508_v39, 4  ;;  %v10324_v2 = vmul.f32 %v9768_v47, %v8248_v63  ;;  %v10337_v10 = vld [vmem:[#allocation2 + $0xa8] sm:$0xff] }
 0x2bb   : > { %v4378_v24 = vadd.f32 %v4356_v6, %v4318_v11  ;;  %v4476_v61 = vsel %vm2756_vm10, %v11497_v43, %v4475_v40  ;;  %v11502_v42 = vrot.slane %v10299_v54, 4  ;;  %v4688_v44 = vmul.f32 %v12276_v60, %v12097_v53 }
 0x2bc   : > { %12298 = vst [vmem:[#allocation69_spill] sm:$0xff] %v10324_v2  ;;  %v4595_v29 = vrot.slane %v4568_v32, 4  ;;  %v3523_v39 = vmul.f32 %v10314_v19, %v12022_v26  ;;  %v3539_v8 = vmul.f32 %v12227_v37, %v12090_v51  ;;  %v4655_v6 = vrot.slane %v4628_v4, 4 }
 0x2bd   : > { %v4438_v11 = vadd.f32 %v4416_v58, %v4378_v24  ;;  %v10341_v40 = vmul.f32 %v9783_v36, %v12097_v53  ;;  %v3555_v43 = vmul.f32 %v12226_v56, %v9610_v13  ;;  %v4536_v32 = vsel %vm3077_vm3, %v11502_v42, %v4535_v35  ;;  %v10356_v24 = vld [vmem:[#allocation2 + $0xc0] sm:$0xff] }
 0x2be   : > { %v4748_v4 = vmul.f32 %v10352_v49, %v10165_v57  ;;  %v3547_v58 = vadd.f32 %v3539_v8, %v3523_v39  ;;  %v4715_v27 = vrot.slane %v4688_v44, 4  ;;  %v10360_v54 = vmul.f32 %v10352_v49, %v10145_v12 }
 0x2bf   : > { %12299 = vst [vmem:[#allocation70_spill] sm:$0xff] %v10341_v40  ;;  %v4498_v55 = vadd.f32 %v4476_v61, %v4438_v11  ;;  %v3603_v35 = vmul.f32 %v10314_v19, %v12230_v38  ;;  %v12301_v42 = vrot.slane %v10307_v23, 4  ;;  %v3571_v41 = vmul.f32 %v10337_v10, %v12228_v22 }
 0x2c0   : > { %12300 = vst [vmem:[#allocation71_spill] sm:$0xff] %v10360_v54  ;;  %v3563_v15 = vadd.f32 %v3555_v43, %v3547_v58  ;;  %v3663_v39 = vmul.f32 %v12227_v37, %v12231_v45  ;;  %v12302_v44 = vrot.slane %v10324_v2, 4  ;;  %v11515_v11 = vrot.slane %v10341_v40, 4 }
 0x2c1   : > { %v4596_v21 = vsel %vm3077_vm3, %v12301_v42, %v4595_v29  ;;  %v4558_v61 = vadd.f32 %v4536_v32, %v4498_v55  ;;  %v3723_v1 = vmul.f32 %v12303_v46, %v9610_v13  ;;  %v4775_v23 = vrot.slane %v4748_v4, 4  ;;  %v12304_v29 = vld [vmem:[#allocation10_spill] sm:$0xff]  ;;  %v12305_v42 = vld [vmem:[#allocation13_spill] sm:$0xff]  ;;  %v12306_v4 = vld [vmem:[#allocation47_spill] sm:$0xff] }
 0x2c2   : > { %v4656_v8 = vsel %vm3077_vm3, %v12302_v44, %v4655_v6  ;;  %v3579_v5 = vadd.f32 %v3571_v41, %v3563_v15  ;;  %v3587_v43 = vmul.f32 %v10356_v24, %v12304_v29  ;;  %v3783_v58 = vmul.f32 %v10337_v10, %v12305_v42 }
 0x2c3   : > { %v5707_v14 = vpop.eup %5706  ;;  %v4618_v37 = vadd.f32 %v4596_v21, %v4558_v61  ;;  %v4716_v55 = vsel %vm3077_vm3, %v11515_v11, %v4715_v27  ;;  %v11514_v6 = vrot.slane %v10360_v54, 4  ;;  %v3627_v32 = vrot.slane %v3603_v35, 1  ;;  %v12314_v11 = vld [vmem:[#allocation16_spill] sm:$0xff] }
 0x2c4   : > { %v3414_v44 = vadd.f32 1.0, %v5707_v14  ;;  %v3595_v2 = vadd.f32 %v3587_v43, %v3579_v5  ;;  %v3687_v13 = vrot.slane %v3663_v39, 1  ;;  %v3843_v41 = vmul.f32 %v10356_v24, %v12279_v52  ;;  %v12308_v39 = vld [vmem:[#allocation46_spill] sm:$0xff]  ;;  %v10398_v43 = vld [vmem:[#allocation2 + $0x78] sm:$0xff] }
 0x2c5   : > { %v4678_v15 = vadd.f32 %v4656_v8, %v4618_v37  ;;  %v12307_v0 = vrot.slane %v12306_v4, 1  ;;  %v3747_v20 = vrot.slane %v3723_v1, 1  ;;  %v3903_v21 = vmul.f32 %v10314_v19, %v12046_v28 }
 0x2c6   : > { %5708 = vrcp.f32 %v3414_v44  ;;  %v4776_v27 = vsel %vm3077_vm3, %v11514_v6, %v4775_v23  ;;  %v3807_v5 = vrot.slane %v3783_v58, 1  ;;  %v12309_v61 = vrot.slane %v12308_v39, 1  ;;  %v12310_v58 = vld [vmem:[#allocation48_spill] sm:$0xff] }
 0x2c7   : > { %v3629_v17 = vsel %vm2114_vm2, %v3627_v32, %v12307_v0  ;;  %v4738_v35 = vadd.f32 %v4716_v55, %v4678_v15  ;;  %v3963_v1 = vmul.f32 %v10398_v43, %v8140_v33  ;;  %v10402_v0 = vld [vmem:[#allocation2 + $0x90] sm:$0xff]  ;;  %v3867_v44 = vrot.slane %v3843_v41, 1  ;;  %v12312_v15 = vld [vmem:[#allocation52_spill] sm:$0xff] }
 0x2c8   : > { %v3655_v14 = vadd.f32 %v3629_v17, %v3595_v2  ;;  %v3689_v8 = vsel %vm2114_vm2, %v3687_v13, %v12309_v61  ;;  %v4023_v37 = vmul.f32 %v10402_v0, %v8144_v30  ;;  %v4083_v17 = vmul.f32 %v10337_v10, %v8155_v59 }
 0x2c9   : > { %v4143_v23 = vmul.f32 %v10356_v24, %v8159_v62  ;;  %v4798_v2 = vadd.f32 %v4776_v27, %v4738_v35  ;;  %v12311_v55 = vrot.slane %v12310_v58, 1  ;;  %v12313_v4 = vrot.slane %v12312_v15, 1 }
 0x2ca   : > { %v3715_v32 = vadd.f32 %v3689_v8, %v3655_v14  ;;  %v3927_v61 = vrot.slane %v3903_v21, 2  ;;  %v12315_v14 = vrot.slane %v12314_v11, 1  ;;  %v4203_v8 = vmul.f32 %v10314_v19, %v8163_v34 }
 0x2cb   : > { %v3749_v13 = vsel %vm2114_vm2, %v3747_v20, %v12311_v55  ;;  %v3809_v39 = vsel %vm2114_vm2, %v3807_v5, %v12313_v4  ;;  %v4263_v27 = vmul.f32 %v10398_v43, %v12080_v18  ;;  %v10424_v35 = vadd.f32 %v10283_v3, %v4798_v2  ;;  %v12318_v4 = vld [vmem:[#allocation55_spill] sm:$0xff] }
 0x2cc   : > { %v3775_v6 = vadd.f32 %v3749_v13, %v3715_v32  ;;  %v3869_v41 = vsel %vm2114_vm2, %v3867_v44, %v12315_v14  ;;  %v3987_v20 = vrot.slane %v3963_v1, 2  ;;  %v4047_v58 = vrot.slane %v4023_v37, 2  ;;  %v12316_v32 = vld [vmem:[#allocation56_spill] sm:$0xff] }
 0x2cd   : > { %v4323_v5 = vmul.f32 %v10402_v0, %v8175_v31  ;;  %v12317_v55 = vrot.slane %v12316_v32, 2  ;;  %v4107_v44 = vrot.slane %v4083_v17, 2  ;;  %v4167_v13 = vrot.slane %v4143_v23, 2  ;;  %v12320_v17 = vld [vmem:[#allocation57_spill] sm:$0xff] }
 0x2ce   : > { %v3835_v21 = vadd.f32 %v3809_v39, %v3775_v6  ;;  %v5161_v15 = vmul.f32 -1.442695, %v10424_v35  ;;  %v12319_v14 = vrot.slane %v12318_v4, 2  ;;  %v4383_v1 = vmul.f32 %v10337_v10, %v8179_v9  ;;  %v12324_v9 = vld [vmem:[#allocation51_spill] sm:$0xff] }
 0x2cf   : > { %v3929_v11 = vsel %vm2435_vm1, %v3927_v61, %v12317_v55  ;;  %v4443_v37 = vmul.f32 %v10356_v24, %v8188_v48  ;;  %v4227_v6 = vrot.slane %v4203_v8, 3  ;;  %v4287_v39 = vrot.slane %v4263_v27, 3  ;;  %v12322_v55 = vld [vmem:[#allocation58_spill] sm:$0xff]  ;;  %v12326_v8 = vld [vmem:[#allocation49_spill] sm:$0xff] }
 0x2d0   : > { %v3989_v54 = vsel %vm2435_vm1, %v3987_v20, %v12319_v14  ;;  %v3895_v2 = vadd.f32 %v3869_v41, %v3835_v21  ;;  %v4503_v61 = vmul.f32 %v10314_v19, %v8205_v16  ;;  %5710 = vpow2.f32 %v5161_v15  ;;  %v5709_v40 = vpop.eup %5708  ;;  %v12328_v21 = vld [vmem:[#allocation7_spill] sm:$0xff] }
 0x2d1   : > { %v12321_v23 = vrot.slane %v12320_v17, 2  ;;  %v12323_v4 = vrot.slane %v12322_v55, 2  ;;  %v4347_v14 = vrot.slane %v4323_v5, 3  ;;  %v12325_v48 = vrot.slane %v12324_v9, 2 }
 0x2d2   : > { %v3955_v3 = vadd.f32 %v3929_v11, %v3895_v2  ;;  %v12327_v27 = vrot.slane %v12326_v8, 3  ;;  %v12329_v15 = vrot.slane %v12328_v21, 3  ;;  %v4467_v55 = vrot.slane %v4443_v37, 3 }
 0x2d3   : > { %v4049_v32 = vsel %vm2435_vm1, %v4047_v58, %v12321_v23  ;;  %v4109_v20 = vsel %vm2435_vm1, %v4107_v44, %v12323_v4  ;;  %v4169_v41 = vsel %vm2435_vm1, %v4167_v13, %v12325_v48  ;;  %v3438_v58 = vmul.f32 %v5709_v40, %v10286_v7  ;;  %v12330_v13 = vld [vmem:[#allocation50_spill] sm:$0xff]  ;;  %v12332_v7 = vld [vmem:[#allocation53_spill] sm:$0xff]  ;;  %v10478_v4 = vld [vmem:[#allocation2 + $0xf8] sm:$0xff] }
 0x2d4   : > { %v4229_v19 = vsel %vm2756_vm10, %v4227_v6, %v12327_v27  ;;  %v4289_v17 = vsel %vm2756_vm10, %v4287_v39, %v12329_v15  ;;  %v4407_v23 = vrot.slane %v4383_v1, 3  ;;  %v4563_v5 = vmul.f32 %v10398_v43, %v8244_v25  ;;  %v12334_v27 = vld [vmem:[#allocation40_spill] sm:$0xff] }
 0x2d5   : > { %v4015_v11 = vadd.f32 %v3989_v54, %v3955_v3  ;;  %v4527_v44 = vrot.slane %v4503_v61, 4  ;;  %v3530_v9 = vmul.f32 %v9768_v47, %v12022_v26  ;;  %v3546_v48 = vmul.f32 %v9783_v36, %v12090_v51  ;;  %3468 = vrot.lane.b32.xlu0 %v3438_v58, %s5873_s16  ;;  %v10474_v54 = vld [vmem:[#allocation2 + $0x110] sm:$0xff] }
 0x2d6   : > { %v12331_v2 = vrot.slane %v12330_v13, 3  ;;  %v12333_v40 = vrot.slane %v12332_v7, 3  ;;  %v10472_v3 = vmul.f32 %v10402_v0, %v8248_v63  ;;  %v3562_v37 = vmul.f32 %v10145_v12, %v12226_v56  ;;  %v12336_v13 = vld [vmem:[#allocation6_spill] sm:$0xff] }
 0x2d7   : > { %v4075_v39 = vadd.f32 %v4049_v32, %v4015_v11  ;;  %v3554_v61 = vadd.f32 %v3546_v48, %v3530_v9  ;;  %v10484_v8 = vmul.f32 %v9768_v47, %v12230_v38  ;;  %v12335_v21 = vrot.slane %v12334_v27, 3  ;;  %v12338_v27 = vld [vmem:[#allocation77_spill] sm:$0xff] }
 0x2d8   : > { %v4349_v6 = vsel %vm2756_vm10, %v4347_v14, %v12331_v2  ;;  %v4409_v1 = vsel %vm2756_vm10, %v4407_v23, %v12333_v40  ;;  %v3578_v14 = vmul.f32 %v10478_v4, %v12228_v22  ;;  %v4587_v58 = vrot.slane %v4563_v5, 4 }
 0x2d9   : > { %v4469_v15 = vsel %vm2756_vm10, %v4467_v55, %v12335_v21  ;;  %v3614_v23 = vmul.f32 %v9800_v50, %v12230_v38  ;;  %v10493_v32 = vmul.f32 %v9783_v36, %v12231_v45  ;;  %v4135_v11 = vadd.f32 %v4109_v20, %v4075_v39 }
 0x2da   : > { %v3570_v9 = vadd.f32 %v3562_v37, %v3554_v61  ;;  %v3594_v48 = vmul.f32 %v10474_v54, %v12304_v29  ;;  %v3674_v47 = vmul.f32 %v12276_v60, %v12231_v45  ;;  %v12337_v2 = vrot.slane %v12336_v13, 4  ;;  %v5711_v21 = vpop.eup %5710  ;;  %v10509_v29 = vld [vmem:[#allocation2 + $0x118] sm:$0xff] }
 0x2db   : > { %v4647_v5 = vrot.slane %v10472_v3, 4  ;;  %v3645_v7 = vrot.slane %v3614_v23, 1  ;;  %v3734_v40 = vmul.f32 %v10165_v57, %v12303_v46  ;;  %v4195_v36 = vadd.f32 %v4169_v41, %v4135_v11  ;;  %v10516_v23 = vld [vmem:[#allocation2 + $0x100] sm:$0xff] }
 0x2dc   : > { %v4529_v55 = vsel %vm3077_vm3, %v4527_v44, %v12337_v2  ;;  %v12339_v20 = vrot.slane %v12338_v27, 4  ;;  %v3586_v39 = vadd.f32 %v3578_v14, %v3570_v9  ;;  %v11529_v61 = vrot.slane %v10484_v8, 1 }
 0x2dd   : > { %v3705_v44 = vrot.slane %v3674_v47, 1  ;;  %v10514_v3 = vmul.f32 %v10145_v12, %v12303_v46  ;;  %v3794_v41 = vmul.f32 %v10516_v23, %v12305_v42  ;;  %v4838_v11 = vadd.f32 1.0, %v5711_v21 }
 0x2de   : > { %v4589_v37 = vsel %vm3077_vm3, %v4587_v58, %v12339_v20  ;;  %v4255_v58 = vadd.f32 %v4229_v19, %v4195_v36  ;;  %v3602_v14 = vadd.f32 %v3594_v48, %v3586_v39  ;;  %v10522_v9 = vmul.f32 %v10478_v4, %v12305_v42 }
 0x2df   : > { %12340 = vst [vmem:[#allocation72_spill] sm:$0xff] %v10514_v3  ;;  %v3646_v47 = vsel %vm2114_vm2, %v11529_v61, %v3645_v7  ;;  %v3765_v2 = vrot.slane %v3734_v40, 1  ;;  %v3825_v27 = vrot.slane %v3794_v41, 1  ;;  %v10529_v20 = vmul.f32 %v10474_v54, %v12279_v52 }
 0x2e0   : > { %12341 = vst [vmem:[#allocation73_spill] sm:$0xff] %v10522_v9  ;;  %5712 = vrcp.f32 %v4838_v11  ;;  %v4315_v13 = vadd.f32 %v4289_v17, %v4255_v58  ;;  %v3662_v46 = vadd.f32 %v3646_v47, %v3602_v14  ;;  %v3854_v19 = vmul.f32 %v10509_v29, %v12279_v52  ;;  %v10546_v47 = vld [vmem:[#allocation2 + $0xb0] sm:$0xff] }
 0x2e1   : > { %12342 = vst [vmem:[#allocation54_spill] sm:$0xff] %v10529_v20  ;;  %v4683_v48 = vmul.f32 %v10337_v10, %v12097_v53  ;;  %v12343_v36 = vrot.slane %v10493_v32, 1  ;;  %v11526_v7 = vrot.slane %v10514_v3, 1  ;;  %v3914_v40 = vmul.f32 %v9800_v50, %v12046_v28 }
 0x2e2   : > { %v4375_v21 = vadd.f32 %v4349_v6, %v4315_v13  ;;  %v11527_v17 = vrot.slane %v10522_v9, 1  ;;  %v3885_v11 = vrot.slane %v3854_v19, 1  ;;  %v11528_v14 = vrot.slane %v10529_v20, 1 }
 0x2e3   : > { %v3706_v39 = vsel %vm2114_vm2, %v12343_v36, %v3705_v44  ;;  %v3766_v58 = vsel %vm2114_vm2, %v11526_v7, %v3765_v2  ;;  %v10550_v44 = vmul.f32 %v10546_v47, %v12046_v28  ;;  %v3974_v50 = vmul.f32 %v12276_v60, %v8140_v33 }
 0x2e4   : > { %v3722_v41 = vadd.f32 %v3706_v39, %v3662_v46  ;;  %v4435_v6 = vadd.f32 %v4409_v1, %v4375_v21  ;;  %v4743_v46 = vmul.f32 %v10352_v49, %v10356_v24  ;;  %v3826_v2 = vsel %vm2114_vm2, %v11527_v17, %v3825_v27  ;;  %v10562_v39 = vld [vmem:[#allocation2 + $0xc8] sm:$0xff] }
 0x2e5   : > { %12344 = vst [vmem:[#allocation27_spill] sm:$0xff] %v10550_v44  ;;  %v3886_v19 = vsel %vm2114_vm2, %v11528_v14, %v3885_v11  ;;  %v3945_v36 = vrot.slane %v3914_v40, 2  ;;  %v10566_v7 = vmul.f32 %v10562_v39, %v8140_v33  ;;  %v4034_v60 = vmul.f32 %v10165_v57, %v8144_v30  ;;  %v12346_v21 = vld [vmem:[#allocation78_spill] sm:$0xff] }
 0x2e6   : > { %v3782_v13 = vadd.f32 %v3766_v58, %v3722_v41  ;;  %v4495_v1 = vadd.f32 %v4469_v15, %v4435_v6  ;;  %v12347_v41 = vrot.slane %v12346_v21, 4  ;;  %v10575_v17 = vmul.f32 %v10145_v12, %v8144_v30 }
 0x2e7   : > { %12345 = vst [vmem:[#allocation15_spill] sm:$0xff] %v10566_v7  ;;  %v4707_v40 = vrot.slane %v4683_v48, 4  ;;  %v11533_v11 = vrot.slane %v10550_v44, 2  ;;  %v4005_v14 = vrot.slane %v3974_v50, 2  ;;  %v4094_v61 = vmul.f32 %v10516_v23, %v8155_v59 }
 0x2e8   : > { %v4649_v58 = vsel %vm3077_vm3, %v4647_v5, %v12347_v41  ;;  %v3842_v27 = vadd.f32 %v3826_v2, %v3782_v13  ;;  %12348 = vst [vmem:[#allocation74_spill] sm:$0xff] %v10575_v17  ;;  %v4555_v20 = vadd.f32 %v4529_v55, %v4495_v1  ;;  %v4767_v9 = vrot.slane %v4743_v46, 4 }
 0x2e9   : > { %v10582_v15 = vmul.f32 %v10478_v4, %v8155_v59  ;;  %v3946_v5 = vsel %vm2435_vm1, %v11533_v11, %v3945_v36  ;;  %v11536_v6 = vrot.slane %v10566_v7, 2  ;;  %v4065_v48 = vrot.slane %v4034_v60, 2  ;;  %v5767_v60 = vld [vmem:[#allocation2 + $0xb8] sm:$0xff]  ;;  %v12351_v11 = vld [vmem:[#allocation79_spill] sm:$0xff] }
 0x2ea   : > { %v3902_v3 = vadd.f32 %v3886_v19, %v3842_v27  ;;  %v4154_v50 = vmul.f32 %v10509_v29, %v8159_v62  ;;  %v5713_v13 = vpop.eup %5712  ;;  %v4615_v2 = vadd.f32 %v4589_v37, %v4555_v20  ;;  %v11534_v55 = vrot.slane %v10575_v17, 2 }
 0x2eb   : > { %12349 = vst [vmem:[#allocation75_spill] sm:$0xff] %v10582_v15  ;;  %v10593_v46 = vmul.f32 %v10474_v54, %v8159_v62  ;;  %v4862_v19 = vmul.f32 %v5713_v13, %v10424_v35  ;;  %v4006_v36 = vsel %vm2435_vm1, %v11536_v6, %v4005_v14  ;;  %v4125_v1 = vrot.slane %v4094_v61, 2  ;;  %v5768_v14 = vld [vmem:[#allocation2 + $0xd0] sm:$0xff]  ;;  %v12360_v6 = vld [vmem:[#allocation65_spill] sm:$0xff] }
 0x2ec   : > { %v3962_v21 = vadd.f32 %v3946_v5, %v3902_v3  ;;  %v4214_v41 = vmul.f32 %v5767_v60, %v8163_v34  ;;  %v4675_v27 = vadd.f32 %v4649_v58, %v4615_v2  ;;  %v12352_v37 = vrot.slane %v12351_v11, 4  ;;  %v12354_v2 = vld [vmem:[#allocation80_spill] sm:$0xff] }
 0x2ed   : > { %12350 = vst [vmem:[#allocation13_spill] sm:$0xff] %v10593_v46  ;;  %v11535_v5 = vrot.slane %v10582_v15, 2  ;;  %4889 = vrot.lane.b32.xlu1 %v4862_v19, %s5873_s16  ;;  %v4066_v35 = vsel %vm2435_vm1, %v11534_v55, %v4065_v48  ;;  %v4185_v13 = vrot.slane %v4154_v50, 2  ;;  %v10610_v61 = vmul.f32 %v10546_v47, %v8163_v34 }
 0x2ee   : > { %v4709_v3 = vsel %vm3077_vm3, %v4707_v40, %v12352_v37  ;;  %v4022_v20 = vadd.f32 %v4006_v36, %v3962_v21  ;;  %v4274_v58 = vmul.f32 %v5768_v14, %v12080_v18  ;;  %v12355_v40 = vrot.slane %v12354_v2, 4 }
 0x2ef   : > { %12353 = vst [vmem:[#allocation47_spill] sm:$0xff] %v10610_v61  ;;  %v4735_v11 = vadd.f32 %v4709_v3, %v4675_v27  ;;  %v11537_v19 = vrot.slane %v10593_v46, 2  ;;  %v4126_v48 = vsel %vm2435_vm1, %v11535_v5, %v4125_v1  ;;  %v4245_v50 = vrot.slane %v4214_v41, 3 }
 0x2f0   : > { %v4769_v21 = vsel %vm3077_vm3, %v4767_v9, %v12355_v40  ;;  %v4082_v36 = vadd.f32 %v4066_v35, %v4022_v20  ;;  %v10622_v37 = vmul.f32 %v10562_v39, %v12080_v18  ;;  %v4334_v55 = vmul.f32 %v10165_v57, %v8175_v31  ;;  %v12358_v20 = vld [vmem:[#allocation19_spill] sm:$0xff]  ;;  %v12359_v40 = vld [vmem:[#allocation20_spill] sm:$0xff] }
 0x2f1   : > { %v4795_v27 = vadd.f32 %v4769_v21, %v4735_v11  ;;  %v10628_v9 = vmul.f32 %v10145_v12, %v8175_v31  ;;  %v4394_v35 = vmul.f32 %v10516_v23, %v12358_v20  ;;  %v4186_v1 = vsel %vm2435_vm1, %v11537_v19, %v4185_v13 }
 0x2f2   : > { %12356 = vst [vmem:[#allocation46_spill] sm:$0xff] %v10622_v37  ;;  %v4142_v3 = vadd.f32 %v4126_v48, %v4082_v36  ;;  %v11541_v41 = vrot.slane %v10610_v61, 3  ;;  %v4305_v2 = vrot.slane %v4274_v58, 3  ;;  %v4454_v5 = vmul.f32 %v10509_v29, %v12359_v40 }
 0x2f3   : > { %12357 = vst [vmem:[#allocation48_spill] sm:$0xff] %v10628_v9  ;;  %v10639_v11 = vadd.f32 %v12360_v6, %v4795_v27  ;;  %v10643_v36 = vmul.f32 %v10478_v4, %v12358_v20  ;;  %v11547_v13 = vrot.slane %v10622_v37, 3  ;;  %v4365_v19 = vrot.slane %v4334_v55, 3  ;;  %v12397_v37 = vld [vmem:[#allocation64_spill] sm:$0xff] }
 0x2f4   : > { %v4202_v21 = vadd.f32 %v4186_v1, %v4142_v3  ;;  %v4246_v48 = vsel %vm2756_vm10, %v11541_v41, %v4245_v50  ;;  %v10651_v58 = vmul.f32 %v10474_v54, %v12359_v40  ;;  %v11543_v3 = vrot.slane %v10628_v9, 3 }
 0x2f5   : > { %12361 = vst [vmem:[#allocation52_spill] sm:$0xff] %v10643_v36  ;;  %v5158_v46 = vmul.f32 -1.442695, %v10639_v11  ;;  %v4425_v1 = vrot.slane %v4394_v35, 3  ;;  %v4306_v15 = vsel %vm2756_vm10, %v11547_v13, %v4305_v2  ;;  %v4485_v61 = vrot.slane %v4454_v5, 3 }
 0x2f6   : > { %12362 = vst [vmem:[#allocation16_spill] sm:$0xff] %v10651_v58  ;;  %v4262_v27 = vadd.f32 %v4246_v48, %v4202_v21  ;;  %v10660_v50 = vmul.f32 %v10546_v47, %v8205_v16  ;;  %v4514_v55 = vmul.f32 %v5767_v60, %v8205_v16  ;;  %v11545_v17 = vrot.slane %v10643_v36, 3  ;;  %v10675_v60 = vpop.f32.mrb[34].mxu1 }
 0x2f7   : > { %5714 = vpow2.f32 %v5158_v46  ;;  %v10666_v21 = vmul.f32 %v10562_v39, %v8244_v25  ;;  %v4366_v35 = vsel %vm2756_vm10, %v11543_v3, %v4365_v19  ;;  %v11544_v5 = vrot.slane %v10651_v58, 3  ;;  %12365 = vst [vmem:[#allocation57_spill] sm:$0xff] %v10675_v60  ;;  %v5353_v39 = vpop.f32.mrb[35].mxu1  ;;  %v12369_v58 = vld [vmem:[#allocation10_spill] sm:$0xff] }
 0x2f8   : > { %12363 = vst [vmem:[#allocation56_spill] sm:$0xff] %v10660_v50  ;;  %v4322_v41 = vadd.f32 %v4306_v15, %v4262_v27  ;;  %v4574_v2 = vmul.f32 %v5768_v14, %v8244_v25  ;;  %v4634_v47 = vmul.f32 %v10165_v57, %v8248_v63  ;;  %v4426_v46 = vsel %vm2756_vm10, %v11545_v17, %v4425_v1  ;;  %v10703_v17 = vld [vmem:[#allocation2 + $0xd8] sm:$0xff] }
 0x2f9   : > { %12364 = vst [vmem:[#allocation55_spill] sm:$0xff] %v10666_v21  ;;  %v4486_v48 = vsel %vm2756_vm10, %v11544_v5, %v4485_v61  ;;  %v11546_v19 = vrot.slane %v10660_v50, 4  ;;  %v4545_v27 = vrot.slane %v4514_v55, 4  ;;  %v10686_v14 = vmul.f32 %v10145_v12, %v8248_v63 }
 0x2fa   : > { %v4382_v15 = vadd.f32 %v4366_v35, %v4322_v41  ;;  %v11553_v3 = vrot.slane %v10666_v21, 4  ;;  %v3525_v41 = vmul.f32 %v10398_v43, %v12022_v26  ;;  %v3541_v1 = vmul.f32 %v10402_v0, %v12090_v51  ;;  %v12370_v21 = vld [vmem:[#allocation14_spill] sm:$0xff] }
 0x2fb   : > { %12366 = vst [vmem:[#allocation58_spill] sm:$0xff] %v10686_v14  ;;  %v4605_v35 = vrot.slane %v4574_v2, 4  ;;  %v4665_v39 = vrot.slane %v4634_v47, 4  ;;  %v10695_v61 = vmul.f32 %v10478_v4, %v12097_v53  ;;  %v4694_v55 = vmul.f32 %v10516_v23, %v12097_v53 }
 0x2fc   : > { %v4442_v57 = vadd.f32 %v4426_v46, %v4382_v15  ;;  %v4754_v15 = vmul.f32 %v10352_v49, %v10509_v29  ;;  %v3549_v46 = vadd.f32 %v3541_v1, %v3525_v41  ;;  %v3557_v5 = vmul.f32 %v10337_v10, %v12226_v56 }
 0x2fd   : > { %12367 = vst [vmem:[#allocation51_spill] sm:$0xff] %v10695_v61  ;;  %v4546_v2 = vsel %vm3077_vm3, %v11546_v19, %v4545_v27  ;;  %v11557_v4 = vrot.slane %v10686_v14, 4  ;;  %v3606_v47 = vmul.f32 %v10398_v43, %v12230_v38  ;;  %v3666_v23 = vmul.f32 %v10402_v0, %v12231_v45 }
 0x2fe   : > { %v4502_v12 = vadd.f32 %v4486_v48, %v4442_v57  ;;  %v10715_v29 = vmul.f32 %v10352_v49, %v10474_v54  ;;  %v3565_v57 = vadd.f32 %v3557_v5, %v3549_v46  ;;  %v3573_v41 = vmul.f32 %v10356_v24, %v12228_v22 }
 0x2ff   : > { %v4606_v27 = vsel %vm3077_vm3, %v11553_v3, %v4605_v35  ;;  %v4666_v1 = vsel %vm3077_vm3, %v11557_v4, %v4665_v39  ;;  %v11556_v19 = vrot.slane %v10695_v61, 4  ;;  %v4725_v13 = vrot.slane %v4694_v55, 4 }
 0x300   : > { %v4562_v48 = vadd.f32 %v4546_v2, %v4502_v12  ;;  %12368 = vst [vmem:[#allocation49_spill] sm:$0xff] %v10715_v29  ;;  %v4785_v50 = vrot.slane %v4754_v15, 4  ;;  %v3581_v54 = vadd.f32 %v3573_v41, %v3565_v57  ;;  %v3589_v5 = vmul.f32 %v10703_v17, %v12369_v58  ;;  %v12371_v15 = vld [vmem:[#allocation8_spill] sm:$0xff] }
 0x301   : > { %v5715_v12 = vpop.eup %5714  ;;  %v3632_v36 = vrot.slane %v3606_v47, 1  ;;  %v3692_v9 = vrot.slane %v3666_v23, 1  ;;  %v3726_v35 = vmul.f32 %v10337_v10, %v12370_v21  ;;  %v11555_v14 = vrot.slane %v10715_v29, 4 }
 0x302   : > { %v4622_v2 = vadd.f32 %v4606_v27, %v4562_v48  ;;  %v4835_v46 = vadd.f32 1.0, %v5715_v12  ;;  %v3597_v39 = vadd.f32 %v3589_v5, %v3581_v54  ;;  %v4726_v55 = vsel %vm3077_vm3, %v11556_v19, %v4725_v13 }
 0x303   : > { %v12372_v48 = vrot.slane %v12371_v15, 1  ;;  %v3786_v47 = vmul.f32 %v10356_v24, %v12305_v42  ;;  %v4786_v27 = vsel %vm3077_vm3, %v11555_v14, %v4785_v50  ;;  %v3752_v54 = vrot.slane %v3726_v35, 1  ;;  %v12377_v35 = vld [vmem:[#allocation11_spill] sm:$0xff] }
 0x304   : > { %v4682_v3 = vadd.f32 %v4666_v1, %v4622_v2  ;;  %5716 = vrcp.f32 %v4835_v46  ;;  %v12373_v1 = vld [vmem:[#allocation76_spill] sm:$0xff]  ;;  %v3846_v13 = vmul.f32 %v10703_v17, %v12279_v52  ;;  %v3966_v50 = vmul.f32 %v10402_v0, %v8140_v33 }
 0x305   : > { %v3634_v57 = vsel %vm2114_vm2, %v3632_v36, %v12372_v48  ;;  %v12374_v12 = vrot.slane %v12373_v1, 1  ;;  %v12375_v36 = vld [vmem:[#allocation9_spill] sm:$0xff]  ;;  %v12398_v60 = vrot.slane %v12397_v37, 3  ;;  %v4686_v37 = vmul.f32 %v10356_v24, %v12097_v53 }
 0x306   : > { %v4742_v23 = vadd.f32 %v4726_v55, %v4682_v3  ;;  %v3657_v41 = vadd.f32 %v3634_v57, %v3597_v39  ;;  %v12376_v15 = vrot.slane %v12375_v36, 1  ;;  %v3812_v3 = vrot.slane %v3786_v47, 1 }
 0x307   : > { %v3694_v2 = vsel %vm2114_vm2, %v3692_v9, %v12374_v12  ;;  %v3906_v39 = vmul.f32 %v10398_v43, %v12046_v28  ;;  %v12378_v57 = vrot.slane %v12377_v35, 1  ;;  %v4086_v47 = vmul.f32 %v10356_v24, %v8155_v59 }
 0x308   : > { %v4802_v5 = vadd.f32 %v4786_v27, %v4742_v23  ;;  %v3717_v46 = vadd.f32 %v3694_v2, %v3657_v41  ;;  %v3754_v48 = vsel %vm2114_vm2, %v3752_v54, %v12376_v15  ;;  %v3872_v41 = vrot.slane %v3846_v13, 1 }
 0x309   : > { %v3814_v23 = vsel %vm2114_vm2, %v3812_v3, %v12378_v57  ;;  %v4026_v27 = vmul.f32 %v10337_v10, %v8144_v30  ;;  %v4146_v2 = vmul.f32 %v10703_v17, %v8159_v62  ;;  %v4206_v54 = vmul.f32 %v10398_v43, %v8163_v34  ;;  %v12381_v57 = vld [vmem:[#allocation43_spill] sm:$0xff] }
 0x30a   : > { %v10755_v55 = vadd.f32 %v12360_v6, %v4802_v5  ;;  %v3777_v9 = vadd.f32 %v3754_v48, %v3717_v46  ;;  %v12379_v5 = vld [vmem:[#allocation12_spill] sm:$0xff]  ;;  %v3932_v13 = vrot.slane %v3906_v39, 2  ;;  %v3992_v15 = vrot.slane %v3966_v50, 2 }
 0x30b   : > { %v12380_v46 = vrot.slane %v12379_v5, 1  ;;  %v4266_v48 = vmul.f32 %v10402_v0, %v12080_v18  ;;  %v4052_v14 = vrot.slane %v4026_v27, 2  ;;  %v4112_v19 = vrot.slane %v4086_v47, 2  ;;  %v12385_v47 = vld [vmem:[#allocation42_spill] sm:$0xff] }
 0x30c   : > { %v5165_v1 = vmul.f32 -1.442695, %v10755_v55  ;;  %v3837_v12 = vadd.f32 %v3814_v23, %v3777_v9  ;;  %v12382_v9 = vrot.slane %v12381_v57, 2  ;;  %v4172_v5 = vrot.slane %v4146_v2, 2 }
 0x30d   : > { %v3874_v36 = vsel %vm2114_vm2, %v3872_v41, %v12380_v46  ;;  %v4232_v61 = vrot.slane %v4206_v54, 3  ;;  %v12383_v41 = vld [vmem:[#allocation44_spill] sm:$0xff]  ;;  %v4292_v46 = vrot.slane %v4266_v48, 3  ;;  %v4386_v2 = vmul.f32 %v10356_v24, %v12358_v20 }
 0x30e   : > { %5718 = vpow2.f32 %v5165_v1  ;;  %v3897_v3 = vadd.f32 %v3874_v36, %v3837_v12  ;;  %v5717_v35 = vpop.eup %5716  ;;  %v3934_v23 = vsel %vm2435_vm1, %v3932_v13, %v12382_v9  ;;  %v12384_v39 = vrot.slane %v12383_v41, 2  ;;  %v12387_v13 = vld [vmem:[#allocation59_spill] sm:$0xff] }
 0x30f   : > { %v4859_v4 = vmul.f32 %v5717_v35, %v10639_v11  ;;  %v4326_v1 = vmul.f32 %v10337_v10, %v8175_v31  ;;  %v3527_v12 = vmul.f32 %v10402_v0, %v12022_v26  ;;  %v12386_v36 = vrot.slane %v12385_v47, 2  ;;  %v12393_v47 = vld [vmem:[#allocation62_spill] sm:$0xff] }
 0x310   : > { %v3957_v29 = vadd.f32 %v3934_v23, %v3897_v3  ;;  %v3994_v50 = vsel %vm2435_vm1, %v3992_v15, %v12384_v39  ;;  %v3543_v54 = vmul.f32 %v10337_v10, %v12090_v51  ;;  %v12388_v15 = vrot.slane %v12387_v13, 2  ;;  %v12389_v3 = vld [vmem:[#allocation60_spill] sm:$0xff]  ;;  %v10807_v39 = vld [vmem:[#allocation2 + $0xf0] sm:$0xff] }
 0x311   : > { %4883 = vrot.lane.b32.xlu0 %v4859_v4, %s5873_s16  ;;  %v4054_v11 = vsel %vm2435_vm1, %v4052_v14, %v12386_v36  ;;  %v12390_v35 = vrot.slane %v12389_v3, 2  ;;  %v4446_v4 = vmul.f32 %v10703_v17, %v12359_v40  ;;  %v3609_v14 = vmul.f32 %v10402_v0, %v12230_v38 }
 0x312   : > { %v4017_v27 = vadd.f32 %v3994_v50, %v3957_v29  ;;  %v4114_v48 = vsel %vm2435_vm1, %v4112_v19, %v12388_v15  ;;  %v4506_v9 = vmul.f32 %v10398_v43, %v8205_v16  ;;  %v3551_v23 = vadd.f32 %v3543_v54, %v3527_v12  ;;  %v12391_v19 = vld [vmem:[#allocation61_spill] sm:$0xff] }
 0x313   : > { %v4174_v57 = vsel %vm2435_vm1, %v4172_v5, %v12390_v35  ;;  %v3559_v41 = vmul.f32 %v10356_v24, %v12226_v56  ;;  %v12392_v50 = vrot.slane %v12391_v19, 3  ;;  %v12394_v36 = vrot.slane %v12393_v47, 3 }
 0x314   : > { %v4077_v29 = vadd.f32 %v4054_v11, %v4017_v27  ;;  %v4352_v15 = vrot.slane %v4326_v1, 3  ;;  %v4566_v27 = vmul.f32 %v10402_v0, %v8244_v25  ;;  %v4412_v43 = vrot.slane %v4386_v2, 3 }
 0x315   : > { %v4234_v5 = vsel %vm2756_vm10, %v4232_v61, %v12392_v50  ;;  %v4294_v13 = vsel %vm2756_vm10, %v4292_v46, %v12394_v36  ;;  %v3567_v12 = vadd.f32 %v3559_v41, %v3551_v23  ;;  %v3575_v54 = vmul.f32 %v10703_v17, %v12228_v22 }
 0x316   : > { %v4137_v11 = vadd.f32 %v4114_v48, %v4077_v29  ;;  %v4472_v3 = vrot.slane %v4446_v4, 3  ;;  %v4626_v35 = vmul.f32 %v10337_v10, %v8248_v63  ;;  %v3637_v19 = vrot.slane %v3609_v14, 1  ;;  %v12395_v29 = vld [vmem:[#allocation63_spill] sm:$0xff] }
 0x317   : > { %v3669_v61 = vmul.f32 %v10337_v10, %v12231_v45  ;;  %v4532_v1 = vrot.slane %v4506_v9, 4  ;;  %v3583_v47 = vadd.f32 %v3575_v54, %v3567_v12  ;;  %v3591_v48 = vmul.f32 %v10807_v39, %v12369_v58 }
 0x318   : > { %v5719_v50 = vpop.eup %5718  ;;  %v4197_v46 = vadd.f32 %v4174_v57, %v4137_v11  ;;  %v12396_v23 = vrot.slane %v12395_v29, 3  ;;  %v4592_v4 = vrot.slane %v4566_v27, 4  ;;  %v3729_v36 = vmul.f32 %v10356_v24, %v12370_v21  ;;  %v12399_v11 = vld [vmem:[#allocation66_spill] sm:$0xff] }
 0x319   : > { %v4842_v2 = vadd.f32 1.0, %v5719_v50  ;;  %v4414_v7 = vsel %vm2756_vm10, %v4412_v43, %v12398_v60  ;;  %v3599_v57 = vadd.f32 %v3591_v48, %v3583_v47  ;;  %v3789_v9 = vmul.f32 %v10703_v17, %v12305_v42  ;;  %v12401_v50 = vld [vmem:[#allocation21_spill] sm:$0xff]  ;;  %v12403_v43 = vld [vmem:[#allocation22_spill] sm:$0xff] }
 0x31a   : > { %v4354_v41 = vsel %vm2756_vm10, %v4352_v15, %v12396_v23  ;;  %v4257_v14 = vadd.f32 %v4234_v5, %v4197_v46  ;;  %v12400_v12 = vrot.slane %v12399_v11, 3  ;;  %v12402_v15 = vrot.slane %v12401_v50, 1 }
 0x31b   : > { %5720 = vrcp.f32 %v4842_v2  ;;  %v3697_v29 = vrot.slane %v3669_v61, 1  ;;  %v4652_v5 = vrot.slane %v4626_v35, 4  ;;  %v12404_v46 = vrot.slane %v12403_v43, 1  ;;  %v12405_v61 = vld [vmem:[#allocation67_spill] sm:$0xff] }
 0x31c   : > { %v4474_v54 = vsel %vm2756_vm10, %v4472_v3, %v12400_v12  ;;  %v3639_v27 = vsel %vm2114_vm2, %v3637_v19, %v12402_v15  ;;  %v4317_v23 = vadd.f32 %v4294_v13, %v4257_v14  ;;  %v3757_v48 = vrot.slane %v3729_v36, 1  ;;  %v12407_v12 = vld [vmem:[#allocation68_spill] sm:$0xff]  ;;  %v12409_v15 = vld [vmem:[#allocation69_spill] sm:$0xff]  ;;  %v12411_v43 = vld [vmem:[#allocation23_spill] sm:$0xff] }
 0x31d   : > { %v3659_v60 = vadd.f32 %v3639_v27, %v3599_v57  ;;  %v3699_v47 = vsel %vm2114_vm2, %v3697_v29, %v12404_v46  ;;  %v3849_v2 = vmul.f32 %v10807_v39, %v12279_v52  ;;  %v3909_v3 = vmul.f32 %v10402_v0, %v12046_v28 }
 0x31e   : > { %v4377_v11 = vadd.f32 %v4354_v41, %v4317_v23  ;;  %v4746_v13 = vmul.f32 %v10352_v49, %v10703_v17  ;;  %v3817_v19 = vrot.slane %v3789_v9, 1  ;;  %v12406_v14 = vrot.slane %v12405_v61, 4 }
 0x31f   : > { %v3719_v35 = vadd.f32 %v3699_v47, %v3659_v60  ;;  %v12408_v50 = vrot.slane %v12407_v12, 4  ;;  %v12410_v27 = vrot.slane %v12409_v15, 4  ;;  %v12412_v46 = vrot.slane %v12411_v43, 1  ;;  %v12413_v60 = vld [vmem:[#allocation24_spill] sm:$0xff]  ;;  %v12417_v43 = vld [vmem:[#allocation70_spill] sm:$0xff] }
 0x320   : > { %v4534_v57 = vsel %vm3077_vm3, %v4532_v1, %v12406_v14  ;;  %v4437_v23 = vadd.f32 %v4414_v7, %v4377_v11  ;;  %v12414_v9 = vrot.slane %v12413_v60, 1  ;;  %v3969_v1 = vmul.f32 %v10337_v10, %v8140_v33  ;;  %v12415_v11 = vld [vmem:[#allocation25_spill] sm:$0xff] }
 0x321   : > { %v4594_v36 = vsel %vm3077_vm3, %v4592_v4, %v12408_v50  ;;  %v4654_v29 = vsel %vm3077_vm3, %v4652_v5, %v12410_v27  ;;  %v3759_v41 = vsel %vm2114_vm2, %v3757_v48, %v12412_v46  ;;  %v3877_v61 = vrot.slane %v3849_v2, 1 }
 0x322   : > { %v3779_v44 = vadd.f32 %v3759_v41, %v3719_v35  ;;  %v3819_v47 = vsel %vm2114_vm2, %v3817_v19, %v12414_v9  ;;  %v3937_v14 = vrot.slane %v3909_v3, 2  ;;  %v4029_v4 = vmul.f32 %v10356_v24, %v8144_v30  ;;  %v12419_v41 = vld [vmem:[#allocation71_spill] sm:$0xff]  ;;  %v12421_v9 = vld [vmem:[#allocation26_spill] sm:$0xff] }
 0x323   : > { %v4089_v5 = vmul.f32 %v10703_v17, %v8155_v59  ;;  %v4497_v12 = vadd.f32 %v4474_v54, %v4437_v23  ;;  %v4712_v50 = vrot.slane %v4686_v37, 4  ;;  %v4772_v48 = vrot.slane %v4746_v13, 4 }
 0x324   : > { %v3839_v7 = vadd.f32 %v3819_v47, %v3779_v44  ;;  %v12416_v35 = vrot.slane %v12415_v11, 1  ;;  %v4149_v19 = vmul.f32 %v10807_v39, %v8159_v62  ;;  %v4209_v2 = vmul.f32 %v10402_v0, %v8163_v34 }
 0x325   : > { %v4269_v3 = vmul.f32 %v10337_v10, %v12080_v18  ;;  %v4557_v27 = vadd.f32 %v4534_v57, %v4497_v12  ;;  %v12418_v46 = vrot.slane %v12417_v43, 4  ;;  %v3997_v44 = vrot.slane %v3969_v1, 2  ;;  %v5721_v13 = vpop.eup %5720  ;;  %v12423_v43 = vld [vmem:[#allocation28_spill] sm:$0xff]  ;;  %v12425_v1 = vld [vmem:[#allocation29_spill] sm:$0xff] }
 0x326   : > { %v3879_v15 = vsel %vm2114_vm2, %v3877_v61, %v12416_v35  ;;  %v12420_v23 = vrot.slane %v12419_v41, 4  ;;  %v12422_v47 = vrot.slane %v12421_v9, 2  ;;  %v4057_v11 = vrot.slane %v4029_v4, 2 }
 0x327   : > { %v4714_v54 = vsel %vm3077_vm3, %v4712_v50, %v12418_v46  ;;  %v3899_v37 = vadd.f32 %v3879_v15, %v3839_v7  ;;  %v4117_v35 = vrot.slane %v4089_v5, 2  ;;  %v4866_v18 = vmul.f32 %v5721_v13, %v10755_v55 }
 0x328   : > { %v4774_v60 = vsel %vm3077_vm3, %v4772_v48, %v12420_v23  ;;  %v3939_v61 = vsel %vm2435_vm1, %v3937_v14, %v12422_v47  ;;  %v4617_v57 = vadd.f32 %v4594_v36, %v4557_v27  ;;  %v12424_v34 = vrot.slane %v12423_v43, 2  ;;  %v10898_v23 = vpop.permute.xlu1 %4893  ;;  %v10919_v47 = vld [vmem:[#allocation2 + $0x108] sm:$0xff] }
 0x329   : > { %v3959_v12 = vadd.f32 %v3939_v61, %v3899_v37  ;;  %v12426_v7 = vrot.slane %v12425_v1, 2  ;;  %v4177_v46 = vrot.slane %v4149_v19, 2  ;;  %v4237_v48 = vrot.slane %v4209_v2, 3  ;;  %4897 = vrot.lane.b32.xlu1 %v4866_v18, %s5873_s16  ;;  %v12431_v61 = vld [vmem:[#allocation32_spill] sm:$0xff] }
 0x32a   : > { %v3999_v50 = vsel %vm2435_vm1, %v3997_v44, %v12424_v34  ;;  %v4297_v41 = vrot.slane %v4269_v3, 3  ;;  %v4677_v14 = vadd.f32 %v4654_v29, %v4617_v57  ;;  %v4329_v55 = vmul.f32 %v10356_v24, %v8175_v31  ;;  %v12427_v3 = vld [vmem:[#allocation30_spill] sm:$0xff]  ;;  %v12429_v44 = vld [vmem:[#allocation31_spill] sm:$0xff] }
 0x32b   : > { %v4059_v15 = vsel %vm2435_vm1, %v4057_v11, %v12426_v7  ;;  %v4019_v4 = vadd.f32 %v3999_v50, %v3959_v12  ;;  %v4389_v36 = vmul.f32 %v10703_v17, %v12358_v20  ;;  %v4449_v34 = vmul.f32 %v10807_v39, %v12359_v40 }
 0x32c   : > { %v3529_v5 = vmul.f32 %v10337_v10, %v12022_v26  ;;  %v3545_v19 = vmul.f32 %v10356_v24, %v12090_v51  ;;  %v3561_v18 = vmul.f32 %v10703_v17, %v12226_v56  ;;  %v4737_v29 = vadd.f32 %v4714_v54, %v4677_v14  ;;  %v12433_v51 = vld [vmem:[#allocation33_spill] sm:$0xff]  ;;  %v10929_v43 = vpop.permute.xlu1 %3460 }
 0x32d   : > { %v4079_v2 = vadd.f32 %v4059_v15, %v4019_v4  ;;  %v12428_v27 = vrot.slane %v12427_v3, 2  ;;  %v12430_v13 = vrot.slane %v12429_v44, 2  ;;  %v12432_v26 = vrot.slane %v12431_v61, 3  ;;  %v12440_v61 = vld [vmem:[#allocation36_spill] sm:$0xff] }
 0x32e   : > { %v12434_v57 = vrot.slane %v12433_v51, 3  ;;  %v3553_v54 = vadd.f32 %v3545_v19, %v3529_v5  ;;  %v3577_v12 = vmul.f32 %v10807_v39, %v12228_v22  ;;  %v4357_v1 = vrot.slane %v4329_v55, 3  ;;  %v12435_v19 = vld [vmem:[#allocation34_spill] sm:$0xff] }
 0x32f   : > { %v4119_v37 = vsel %vm2435_vm1, %v4117_v35, %v12428_v27  ;;  %v4179_v9 = vsel %vm2435_vm1, %v4177_v46, %v12430_v13  ;;  %v4239_v11 = vsel %vm2756_vm10, %v4237_v48, %v12432_v26  ;;  %v4797_v35 = vadd.f32 %v4774_v60, %v4737_v29  ;;  %v12437_v29 = vld [vmem:[#allocation35_spill] sm:$0xff] }
 0x330   : > { %v4299_v56 = vsel %vm2756_vm10, %v4297_v41, %v12434_v57  ;;  %v4139_v50 = vadd.f32 %v4119_v37, %v4079_v2  ;;  %v3612_v7 = vmul.f32 %v10337_v10, %v12230_v38  ;;  %v4417_v15 = vrot.slane %v4389_v36, 3 }
 0x331   : > { %v4477_v46 = vrot.slane %v4449_v34, 3  ;;  %v3569_v14 = vadd.f32 %v3561_v18, %v3553_v54  ;;  %v3593_v48 = vmul.f32 %v10919_v47, %v12369_v58  ;;  %v10936_v41 = vadd.f32 %v12360_v6, %v4797_v35 }
 0x332   : > { %v4199_v4 = vadd.f32 %v4179_v9, %v4139_v50  ;;  %v4509_v22 = vmul.f32 %v10402_v0, %v8205_v16  ;;  %v3672_v60 = vmul.f32 %v10356_v24, %v12231_v45  ;;  %v4569_v55 = vmul.f32 %v10337_v10, %v8244_v25 }
 0x333   : > { %v4629_v38 = vmul.f32 %v10356_v24, %v8248_v63  ;;  %v3585_v36 = vadd.f32 %v3577_v12, %v3569_v14  ;;  %v3732_v58 = vmul.f32 %v10703_v17, %v12370_v21  ;;  %v5160_v6 = vmul.f32 -1.442695, %v10936_v41  ;;  %v10959_v21 = vpop.permute.xlu1 %3462 }
 0x334   : > { %v4259_v34 = vadd.f32 %v4239_v11, %v4199_v4  ;;  %v3642_v5 = vrot.slane %v3612_v7, 1  ;;  %v3852_v0 = vmul.f32 %v10919_v47, %v12279_v52  ;;  %v12436_v18 = vrot.slane %v12435_v19, 3 }
 0x335   : > { %v12438_v2 = vrot.slane %v12437_v29, 3  ;;  %v3601_v27 = vadd.f32 %v3593_v48, %v3585_v36  ;;  %v3792_v37 = vmul.f32 %v10807_v39, %v12305_v42  ;;  %5722 = vpow2.f32 %v5160_v6  ;;  %v12443_v48 = vld [vmem:[#allocation72_spill] sm:$0xff] }
 0x336   : > { %v4359_v45 = vsel %vm2756_vm10, %v4357_v1, %v12436_v18  ;;  %v4319_v44 = vadd.f32 %v4299_v56, %v4259_v34  ;;  %v12439_v13 = vrot.slane %v10484_v8, 1  ;;  %v3702_v9 = vrot.slane %v3672_v60, 1 }
 0x337   : > { %v4419_v3 = vsel %vm2756_vm10, %v4417_v15, %v12438_v2  ;;  %v12441_v26 = vrot.slane %v12440_v61, 3  ;;  %v4537_v51 = vrot.slane %v4509_v22, 4  ;;  %v4597_v57 = vrot.slane %v4569_v55, 4  ;;  %v12445_v55 = vld [vmem:[#allocation73_spill] sm:$0xff]  ;;  %v12451_v2 = vld [vmem:[#allocation38_spill] sm:$0xff] }
 0x338   : > { %v3644_v52 = vsel %vm2114_vm2, %v3642_v5, %v12439_v13  ;;  %v4379_v12 = vadd.f32 %v4359_v45, %v4319_v44  ;;  %v12442_v35 = vrot.slane %v10493_v32, 1  ;;  %v3762_v50 = vrot.slane %v3732_v58, 1  ;;  %v12447_v5 = vld [vmem:[#allocation54_spill] sm:$0xff]  ;;  %v12449_v45 = vld [vmem:[#allocation37_spill] sm:$0xff] }
 0x339   : > { %v4479_v11 = vsel %vm2756_vm10, %v4477_v46, %v12441_v26  ;;  %v3661_v54 = vadd.f32 %v3644_v52, %v3601_v27  ;;  %v3882_v1 = vrot.slane %v3852_v0, 1  ;;  %v4657_v56 = vrot.slane %v4629_v38, 4  ;;  %v12453_v27 = vld [vmem:[#allocation39_spill] sm:$0xff]  ;;  %v3457_v52 = vpop.permute.xlu0 %3456 }
 0x33a   : > { %v3704_v42 = vsel %vm2114_vm2, %v3702_v9, %v12442_v35  ;;  %v4689_v8 = vmul.f32 %v10703_v17, %v12097_v53  ;;  %v3822_v15 = vrot.slane %v3792_v37, 1  ;;  %v4439_v14 = vadd.f32 %v4419_v3, %v4379_v12 }
 0x33b   : > { %v3721_v7 = vadd.f32 %v3704_v42, %v3661_v54  ;;  %v4749_v46 = vmul.f32 %v10352_v49, %v10807_v39  ;;  %v12444_v4 = vrot.slane %v12443_v48, 1  ;;  %v3912_v32 = vmul.f32 %v10337_v10, %v12046_v28  ;;  %v10986_v49 = vpop.permute.xlu1 %3466  ;;  %v12456_v42 = vld [vmem:[#allocation27_spill] sm:$0xff]  ;;  %v12460_v48 = vld [vmem:[#allocation45_spill] sm:$0xff] }
 0x33c   : > { %v12446_v38 = vrot.slane %v12445_v55, 1  ;;  %v3972_v58 = vmul.f32 %v10356_v24, %v8140_v33  ;;  %v4032_v6 = vmul.f32 %v10703_v17, %v8144_v30  ;;  %v4499_v34 = vadd.f32 %v4479_v11, %v4439_v14  ;;  %v12462_v55 = vld [vmem:[#allocation15_spill] sm:$0xff] }
 0x33d   : > { %v3764_v22 = vsel %vm2114_vm2, %v3762_v50, %v12444_v4  ;;  %v12448_v0 = vrot.slane %v12447_v5, 1  ;;  %v4092_v28 = vmul.f32 %v10807_v39, %v8155_v59  ;;  %v4152_v18 = vmul.f32 %v10919_v47, %v8159_v62  ;;  %v12466_v5 = vld [vmem:[#allocation75_spill] sm:$0xff] }
 0x33e   : > { %v3781_v60 = vadd.f32 %v3764_v22, %v3721_v7  ;;  %v3824_v36 = vsel %vm2114_vm2, %v3822_v15, %v12446_v38  ;;  %v12450_v29 = vrot.slane %v12449_v45, 4  ;;  %v12452_v3 = vrot.slane %v12451_v2, 4  ;;  %v5769_v45 = vld [vmem:[%s11201_s2] ss:$0 sm:$0xff]  ;;  %v3459_v2 = vpop.permute.xlu0 %3458 }
 0x33f   : > { %v3884_v19 = vsel %vm2114_vm2, %v3882_v1, %v12448_v0  ;;  %v12454_v37 = vrot.slane %v12453_v27, 4  ;;  %v4717_v9 = vrot.slane %v4689_v8, 4  ;;  %v4777_v61 = vrot.slane %v4749_v46, 4  ;;  %v5723_v35 = vpop.eup %5722  ;;  %v12458_v8 = vld [vmem:[#allocation41_spill] sm:$0xff]  ;;  %vm12478_vm2 = vmmov %vm12472_vm4 }
 0x340   : > { %v4539_v33 = vsel %vm3077_vm3, %v4537_v51, %v12450_v29  ;;  %v4599_v30 = vsel %vm3077_vm3, %v4597_v57, %v12452_v3  ;;  %v3841_v13 = vadd.f32 %v3824_v36, %v3781_v60  ;;  %v3942_v62 = vrot.slane %v3912_v32, 2  ;;  %v12455_v51 = vld [vmem:[#allocation17_spill] sm:$0xff]  ;;  %v3471_v32 = vpop.permute.xlu1 %3470  ;;  %vm12479_vm8 = vmmov %vm12478_vm2 }
 0x341   : > { %v4659_v44 = vsel %vm3077_vm3, %v4657_v56, %v12454_v37  ;;  %v4559_v59 = vadd.f32 %v4539_v33, %v4499_v34  ;;  %v4002_v11 = vrot.slane %v3972_v58, 2  ;;  %v4062_v54 = vrot.slane %v4032_v6, 2  ;;  %v12464_v58 = vld [vmem:[#allocation74_spill] sm:$0xff]  ;;  %v12468_v29 = vld [vmem:[#allocation57_spill] sm:$0xff]  ;;  %vm12480_vm11 = vmmov %vm12478_vm2 }
 0x342   : > { %v3901_v26 = vadd.f32 %v3884_v19, %v3841_v13  ;;  %v4212_v12 = vmul.f32 %v10337_v10, %v12455_v51  ;;  %v12457_v50 = vrot.slane %v12456_v42, 2  ;;  %v4122_v56 = vrot.slane %v4092_v28, 2  ;;  %v3465_v42 = vpop.permute.xlu0 %3464  ;;  %vm12481_vm14 = vmmov %vm12478_vm2 }
 0x343   : > { %v4619_v57 = vadd.f32 %v4599_v30, %v4559_v59  ;;  %v4182_v7 = vrot.slane %v4152_v18, 2  ;;  %v4837_v15 = vadd.f32 1.0, %v5723_v35  ;;  %v12459_v14 = vrot.slane %v12458_v8, 4  ;;  %v12469_v30 = vld [vmem:[#allocation13_spill] sm:$0xff]  ;;  %v4872_v59 = vld [vmem:[#allocation2 + $0xca] sm:$0xff]  ;;  %v3443_v8 = vld [vmem:[#allocation2 + $0x52] sm:$0xff] }
 0x344   : > { %v3944_v1 = vsel %vm2435_vm1, %v3942_v62, %v12457_v50  ;;  %v12461_v4 = vrot.slane %v12460_v48, 4  ;;  %v12463_v38 = vrot.slane %v12462_v55, 2  ;;  %v12465_v6 = vrot.slane %v12464_v58, 2  ;;  %v4886_v50 = vpop.permute.xlu1 %4885  ;;  %vm12482_vm0 = vmmov %vm12478_vm2 }
 0x345   : > { %v4719_v46 = vsel %vm3077_vm3, %v4717_v9, %v12459_v14  ;;  %v3961_v10 = vadd.f32 %v3944_v1, %v3901_v26  ;;  %v4679_v60 = vadd.f32 %v4659_v44, %v4619_v57  ;;  %v12467_v0 = vrot.slane %v12466_v5, 2  ;;  %v12471_v44 = vld [vmem:[#allocation18_spill] sm:$0xff]  ;;  %v3441_v57 = vld [vmem:[#allocation2 + $0x3a] sm:$0xff]  ;;  %vm12489_vm13 = vmmov %vm12482_vm0 }
 0x346   : > { %v4779_v22 = vsel %vm3077_vm3, %v4777_v61, %v12461_v4  ;;  %v4004_v36 = vsel %vm2435_vm1, %v4002_v11, %v12463_v38  ;;  %v4064_v34 = vsel %vm2435_vm1, %v4062_v54, %v12465_v6  ;;  %5724 = vrcp.f32 %v4837_v15  ;;  %v12473_v54 = vld [vmem:[#allocation47_spill] sm:$0xff]  ;;  %v11053_v1 = vld [vmem:[%s11203_s4] ss:$0 sm:$0xff]  ;;  %v5771_v5 = vld [vmem:[#allocation2 + $0xa8] sm:$0xff] }
 0x347   : > { %v4124_v19 = vsel %vm2435_vm1, %v4122_v56, %v12467_v0  ;;  %v4021_v28 = vadd.f32 %v4004_v36, %v3961_v10  ;;  %v4242_v18 = vrot.slane %v4212_v12, 3  ;;  %v651_v33 = vadd.f32 %v5769_v45, %v12468_v29  ;;  %v3442_v15 = vld [vmem:[#allocation2 + $0x4a] sm:$0xff]  ;;  %v3444_v10 = vld [vmem:[#allocation2 + $0x62] sm:$0xff]  ;;  %v12485_v45 = vld [vmem:[#allocation48_spill] sm:$0xff] }
 0x348   : > { %v4739_v3 = vadd.f32 %v4719_v46, %v4679_v60  ;;  %v12470_v27 = vrot.slane %v12469_v30, 2  ;;  %v4272_v13 = vmul.f32 %v10356_v24, %v12471_v44  ;;  %v4332_v61 = vmul.f32 %v10703_v17, %v8175_v31  ;;  %v3445_v14 = vld [vmem:[#allocation2 + $0x6a] sm:$0xff]  ;;  %v4868_v60 = vld [vmem:[#allocation2 + $0x9a] sm:$0xff]  ;;  %v3469_v44 = vpop.permute.xlu0 %3468  ;;  %vm12502_vm5 = vmmov %vm12482_vm0 }
 0x349   : > { %v4081_v9 = vadd.f32 %v4064_v34, %v4021_v28  ;;  %v5103_v62 = vmul.f32 -1.442695, %v651_v33  ;;  %v4912_v26 = vsel %vm12472_vm4, %v4872_v59, %v10898_v23  ;;  %v12474_v51 = vrot.slane %v12473_v54, 3  ;;  %v3440_v23 = vld [vmem:[#allocation2 + $0x32] sm:$0xff]  ;;  %vm12503_vm7 = vmmov %vm12482_vm0 }
 0x34a   : > { %v4184_v37 = vsel %vm2435_vm1, %v4182_v7, %v12470_v27  ;;  %v4799_v11 = vadd.f32 %v4779_v22, %v4739_v3  ;;  %v4392_v35 = vmul.f32 %v10807_v39, %v12358_v20  ;;  %v4452_v24 = vmul.f32 %v10919_v47, %v12359_v40  ;;  %5171 = vst [vmem:[%s11047_s26 + $0x68] sm:$0xff] %v4912_v26  ;;  %v3447_v22 = vld [vmem:[#allocation2 + $0x82] sm:$0xff]  ;;  %v12490_v26 = vld [vmem:[#allocation16_spill] sm:$0xff]  ;;  %vm12504_vm1 = vmmov %vm12482_vm0 }
 0x34b   : > { %v4244_v12 = vsel %vm2756_vm10, %v4242_v18, %v12474_v51  ;;  %v4141_v31 = vadd.f32 %v4124_v19, %v4081_v9  ;;  %5726 = vpow2.f32 %v5103_v62  ;;  %v4302_v40 = vrot.slane %v4272_v13, 3  ;;  %v5772_v3 = vld [vmem:[#allocation2 + $0xc0] sm:$0xff]  ;;  %vm12505_vm15 = vmmov %vm12482_vm0 }
 0x34c   : > { %v11056_v20 = vadd.f32 %v11053_v1, %v4799_v11  ;;  %v3480_v56 = vsel %vm12475_vm12, %v3440_v23, %v3457_v52  ;;  %v3481_v7 = vsel %vm12476_vm6, %v3441_v57, %v3459_v2  ;;  %v3482_v48 = vsel %vm12477_vm9, %v3442_v15, %v10929_v43 }
 0x34d   : > { %v4201_v46 = vadd.f32 %v4184_v37, %v4141_v31  ;;  %3488 = vst [vmem:[%s11047_s26] sm:$0xff] %v3480_v56  ;;  %3489 = vst [vmem:[%s11047_s26 + $0x8] sm:$0xff] %v3481_v7  ;;  %v3483_v4 = vsel %vm12478_vm2, %v3443_v8, %v10959_v21  ;;  %v3485_v52 = vsel %vm12479_vm8, %v3445_v14, %v10986_v49  ;;  %v12483_v21 = vld [vmem:[#allocation46_spill] sm:$0xff]  ;;  %v4362_v34 = vrot.slane %v4332_v61, 3  ;;  %v3446_v37 = vld [vmem:[#allocation2 + $0x7a] sm:$0xff] }
 0x34e   : > { %v5162_v55 = vmul.f32 -1.442695, %v11056_v20  ;;  %5152 = vst [vmem:[%s11047_s26 + $0x10] sm:$0xff] %v3482_v48  ;;  %5153 = vst [vmem:[%s11047_s26 + $0x18] sm:$0xff] %v3483_v4  ;;  %v3487_v38 = vsel %vm12480_vm11, %v3447_v22, %v3471_v32  ;;  %v3484_v36 = vsel %vm12481_vm14, %v3444_v10, %v3465_v42  ;;  %v4908_v43 = vsel %vm12482_vm0, %v4868_v60, %v4886_v50  ;;  %v5773_v42 = vld [vmem:[%s11202_s3 + $0x18] ss:$0 sm:$0xff] }
 0x34f   : > { %5155 = vst [vmem:[%s11047_s26 + $0x28] sm:$0xff] %v3485_v52  ;;  %v4261_v58 = vadd.f32 %v4244_v12, %v4201_v46  ;;  %5157 = vst [vmem:[%s11047_s26 + $0x38] sm:$0xff] %v3487_v38  ;;  %v12484_v49 = vrot.slane %v12483_v21, 3  ;;  %v4512_v0 = vmul.f32 %v5771_v5, %v8205_v16  ;;  %v4422_v32 = vrot.slane %v4392_v35, 3  ;;  %v12487_v16 = vld [vmem:[#allocation52_spill] sm:$0xff]  ;;  %v12494_v7 = vld [vmem:[#allocation55_spill] sm:$0xff] }
 0x350   : > { %5154 = vst [vmem:[%s11047_s26 + $0x20] sm:$0xff] %v3484_v36  ;;  %5167 = vst [vmem:[%s11047_s26 + $0x48] sm:$0xff] %v4908_v43  ;;  %5728 = vpow2.f32 %v5162_v55  ;;  %v5725_v19 = vpop.eup %5724  ;;  %v12486_v29 = vrot.slane %v12485_v45, 3  ;;  %v4482_v2 = vrot.slane %v4452_v24, 3  ;;  %v4572_v30 = vmul.f32 %v5772_v3, %v8244_v25  ;;  %v12492_v24 = vld [vmem:[#allocation56_spill] sm:$0xff]  ;;  %v12496_v46 = vld [vmem:[#allocation58_spill] sm:$0xff] }
 0x351   : > { %v4304_v6 = vsel %vm2756_vm10, %v4302_v40, %v12484_v49  ;;  %v4861_v18 = vmul.f32 %v5725_v19, %v10936_v41  ;;  %v12488_v13 = vrot.slane %v12487_v16, 3  ;;  %v4542_v9 = vrot.slane %v4512_v0, 4  ;;  %v12500_v55 = vld [vmem:[#allocation49_spill] sm:$0xff]  ;;  %v4870_v5 = vld [vmem:[#allocation2 + $0xb2] sm:$0xff] }
 0x352   : > { %v4321_v28 = vadd.f32 %v4304_v6, %v4261_v58  ;;  %v4364_v33 = vsel %vm2756_vm10, %v4362_v34, %v12486_v29  ;;  %v3486_v41 = vsel %vm12489_vm13, %v3446_v37, %v3469_v44  ;;  %v12491_v11 = vrot.slane %v12490_v26, 3  ;;  %v4867_v45 = vld [vmem:[#allocation2 + $0x92] sm:$0xff]  ;;  %v4871_v44 = vld [vmem:[#allocation2 + $0xc2] sm:$0xff] }
 0x353   : > { %4887 = vrot.lane.b32.xlu0 %v4861_v18, %s5873_s16  ;;  %v4424_v59 = vsel %vm2756_vm10, %v4422_v32, %v12488_v13  ;;  %5156 = vst [vmem:[%s11047_s26 + $0x30] sm:$0xff] %v3486_v41  ;;  %v4602_v25 = vrot.slane %v4572_v30, 4  ;;  %v4632_v51 = vmul.f32 %v10703_v17, %v8248_v63  ;;  %v12493_v31 = vrot.slane %v12492_v24, 4  ;;  %v4869_v30 = vld [vmem:[#allocation2 + $0xaa] sm:$0xff] }
 0x354   : > { %v4381_v27 = vadd.f32 %v4364_v33, %v4321_v28  ;;  %v4484_v54 = vsel %vm2756_vm10, %v4482_v2, %v12491_v11  ;;  %v4692_v57 = vmul.f32 %v10807_v39, %v12097_v53  ;;  %v4752_v50 = vmul.f32 %v5773_v42, %v10919_v47  ;;  %v12498_v47 = vld [vmem:[#allocation51_spill] sm:$0xff]  ;;  %v4874_v33 = vld [vmem:[#allocation2 + $0xe2] sm:$0xff]  ;;  %vm12506_vm10 = vmmov %vm12482_vm0 }
 0x355   : > { %v5727_v61 = vpop.eup %5726  ;;  %v4544_v23 = vsel %vm3077_vm3, %v4542_v9, %v12493_v31  ;;  %v12495_v63 = vrot.slane %v12494_v7, 4  ;;  %v4662_v15 = vrot.slane %v4632_v51, 4  ;;  %v12497_v48 = vrot.slane %v12496_v46, 4 }
 0x356   : > { %v4441_v62 = vadd.f32 %v4424_v59, %v4381_v27  ;;  %v801_v12 = vadd.f32 1.0, %v5727_v61  ;;  %v4722_v39 = vrot.slane %v4692_v57, 4  ;;  %v4782_v4 = vrot.slane %v4752_v50, 4  ;;  %v4873_v59 = vld [vmem:[#allocation2 + $0xda] sm:$0xff] }
 0x357   : > { %v4604_v17 = vsel %vm3077_vm3, %v4602_v25, %v12495_v63  ;;  %v4664_v53 = vsel %vm3077_vm3, %v4662_v15, %v12497_v48  ;;  %v12499_v22 = vrot.slane %v12498_v47, 4  ;;  %v12501_v38 = vrot.slane %v12500_v55, 4 }
 0x358   : > { %v4501_v35 = vadd.f32 %v4484_v54, %v4441_v62  ;;  %5730 = vrcp.f32 %v801_v12 }
 0x359   : > { %v4724_v10 = vsel %vm3077_vm3, %v4722_v39, %v12499_v22  ;;  %v4784_v36 = vsel %vm3077_vm3, %v4782_v4, %v12501_v38  ;;  %vm12507_vm3 = vmmov %vm12482_vm0 }
 0x35a   : > { %v4561_v40 = vadd.f32 %v4544_v23, %v4501_v35  ;;  %v5729_v56 = vpop.eup %5728 }
 0x35b   : > { %v4839_v8 = vadd.f32 1.0, %v5729_v56 }
 0x35c   : > { %v4621_v14 = vadd.f32 %v4604_v17, %v4561_v40 }
 0x35d   : > { %5732 = vrcp.f32 %v4839_v8 }
 0x35e   : > { %v4681_v52 = vadd.f32 %v4664_v53, %v4621_v14 }
 0x35f   : > { %v4890_v0 = vpop.permute.xlu1 %4889 }
 0x360   : > { %v4741_v60 = vadd.f32 %v4724_v10, %v4681_v52  ;;  %v4910_v19 = vsel %vm12502_vm5, %v4870_v5, %v4890_v0 }
 0x361   : > { %5169 = vst [vmem:[%s11047_s26 + $0x58] sm:$0xff] %v4910_v19 }
 0x362   : > { %v4801_v43 = vadd.f32 %v4784_v36, %v4741_v60  ;;  %v5731_v58 = vpop.eup %5730 }
 0x364   : > { %v4809_v21 = vadd.f32 %v11053_v1, %v4801_v43 }
 0x366   : > { %v5164_v49 = vmul.f32 -1.442695, %v4809_v21 }
 0x367   : > { %v5733_v6 = vpop.eup %5732 }
 0x368   : > { %5734 = vpow2.f32 %v5164_v49  ;;  %v4863_v34 = vmul.f32 %v5733_v6, %v11056_v20 }
 0x36a   : > { %4891 = vrot.lane.b32.xlu0 %v4863_v34, %s5873_s16 }
 0x372   : > { %v5735_v28 = vpop.eup %5734 }
 0x373   : > { %v4841_v32 = vadd.f32 1.0, %v5735_v28 }
 0x375   : > { %5736 = vrcp.f32 %v4841_v32 }
 0x37f   : > { %v5737_v18 = vpop.eup %5736 }
 0x380   : > { %v4865_v1 = vmul.f32 %v5737_v18, %v4809_v21 }
 0x382   : > { %4895 = vrot.lane.b32.xlu0 %v4865_v1, %s5873_s16  ;;  %s5181_s16 = sshll.u32 %s5852_s21, 4  ;;  %s11147_s21 = scalar_lea.sflag [#allocation4], %s229_s13 }
 0x383   : > { %v4884_v20 = vpop.permute.xlu0 %4883  ;;  %s4941_s12 = sadd.s32 %s5181_s16, %s5177_s10  ;;  %s5780_s16 = scalar_lea.vmem %s5779_s30, 4096 }
 0x384   : > { %v4907_v29 = vsel %vm12503_vm7, %v4867_v45, %v4884_v20  ;;  %s5178_s14 = sshll.u32 %s4941_s12, 7  ;;  %p5782_p4 = scmp.lt.s32.totalorder %s5780_s16, %s5774_s22 }
 0x385   : > { %5166 = vst [vmem:[%s11047_s26 + $0x40] sm:$0xff] %v4907_v29  ;;  %s11139_s8 = scalar_lea.hbm %s11204_s5, %s5178_s14 }
 0x386   : > { %p5783_p5 = por %p5782_p4, %p5781_p2 }
 0x388   : > { %p5784_p6 = pnand %p5783_p5, %p5777_p1 }
 0x39b   : > { %v4898_v2 = vpop.permute.xlu1 %4897 }
 0x39c   : > { %v4914_v3 = vsel %vm12504_vm1, %v4874_v33, %v4898_v2 }
 0x39d   : > { %5173 = vst [vmem:[%s11047_s26 + $0x78] sm:$0xff] %v4914_v3 }
 0x3c5   : > { %v4888_v27 = vpop.permute.xlu0 %4887 }
 0x3c6   : > { %v4909_v37 = vsel %vm12505_vm15, %v4869_v30, %v4888_v27 }
 0x3c7   : > { %5168 = vst [vmem:[%s11047_s26 + $0x50] sm:$0xff] %v4909_v37 }
 0x3dc   : > { %v4892_v16 = vpop.permute.xlu0 %4891 }
 0x3dd   : > { %v4911_v13 = vsel %vm12506_vm10, %v4871_v44, %v4892_v16 }
 0x3de   : > { %5170 = vst [vmem:[%s11047_s26 + $0x60] sm:$0xff] %v4911_v13 }
 0x3f4   : > { %v4896_v9 = vpop.permute.xlu0 %4895 }
 0x3f5   : > { %v4913_v41 = vsel %vm12507_vm3, %v4873_v59, %v4896_v9 }
 0x3f6   : > { %5172 = vst [vmem:[%s11047_s26 + $0x70] sm:$0xff] %v4913_v41 }
 0x3f7   : > { %5787 = shalt.err (!%p5784_p6)
}
 0x3f8   : > { %s5788_s13 = scalar_lea.hbm %s11139_s8, 2048  ;;  %s5792_s12 = scalar_lea.hbm %s11204_s5, 8192 }
 0x3f9   : > { %p5789_p7 = scmp.ne.s32.totalorder %s11139_s8, %s5788_s13  ;;  %p5793_p11 = scmp.lt.u32.totalorder %s11139_s8, %s11204_s5 }
 0x3fa   : > { %p5794_p12 = scmp.lt.u32.totalorder %s5792_s12, %s5788_s13  ;;  %p5796_p0 = scmp.lt.u32.totalorder %s5788_s13, %s11139_s8 }
 0x3fb   : > { %p5790_p9 = pnand %p5789_p7, %p5958_p3 }
 0x3fc   : > { %p5795_p13 = por %p5794_p12, %p5793_p11 }
 0x3fd   : > { %p5791_p10 = pneg %p5790_p9 }
 0x3fe   : > { %p5797_p1 = por %p5796_p0, %p5795_p13 }
 0x400   : > { %p5798_p2 = pnand %p5797_p1, %p5791_p10 }
 0x402   : > { %5801 = shalt.err (!%p5798_p2)
}
 0x403   : > { %s5875_s27 = smov 128   ;;  %s5876_s22 = smov 8  }
 0x404   : > { %5449 = dma.vmem_to_hbm [thread:$0]  (%p5958_p3), %s11141_s15, 2048, %s11139_s8, %s11147_s21, %s5875_s27, %s5875_s27, %s5876_s22  }
 0x405 PF: > { %p5455_p4 = scmp.ge.s32.totalorder %s5868_s25, 2  ;;  %s4959_s9 = sand.u32 1, %s5840_s18  }
 0x406   : > { %s4960_s30 = scalar_lea.sflag [#allocation4], %s4959_s9 }
 0x407   : > { %p5452_p5 = pnand %p5455_p4, %p5967_p8 }
 0x409   : > { %5835 = dma.done.wait (!%p5452_p5), %s4960_s30, 2048  }
 0x40a   : > { %5837 = vsyncadd (!%p5452_p5), %s4960_s30, 4294965248  ;;  %s18_s25 = sadd.s32 1, %s5868_s25   ;;  %s12508_s18 = smov %s5844_s19 }
 0x40b   : > { %p15_p6 = scmp.ge.s32.totalorder %s18_s25, 6   ;;  %s12509_s19 = smov %s5848_s20 }
 0x40c   : > { %s12510_s20 = smov %s5976_s11  ;;  %s12511_s21 = smov %s5860_s23 }
 0x40d   : > { %s12512_s22 = smov %s5864_s24  ;;  %s12513_s23 = smov %s12516_s28 }
 0x40e   : > { %s12514_s24 = smov %s12520_s29  ;;  %17 = sbr.rel (!%p15_p6) target bundleno = 5 (0x5), region = 83 }
 0x415   :  { %4965 = vsyncpa [#allocation4], 1 }
 0x416   :  { %4967 = vsyncpa [#allocation4 + $0x1], 1 }

</bundles_post_ra>
